<compile_context>
chip_gen: v7x
topology: tpu7x:2x2x1
jax: 0.10.0
libtpu: 0.0.40
codegen_flags: <defaults>
</compile_context>

<pallas_src>
import functools

import numpy as np
import jax
import jax.numpy as jnp
from jax.experimental import pallas as pl
from jax.experimental.pallas import tpu as pltpu


# --------------------------- fused Pallas kernel ----------------------------

def _fused_option_net_kernel(p1_ref, g2_ref, local3_ref,
                             w1_ref, b1_ref, w2f_ref, b2_ref,
                             wg_ref, wl_ref, bc_ref,
                             wav_ref, bav_ref, wout_ref, bout_ref,
                             q_ref, p2_ref, fcin_ref, *, n_taps, n_pos):
    f32, bf16 = jnp.float32, jnp.bfloat16

    # ---- hexconv_1: pre-gathered im2col patches (rows (b,i1,j1), cols (tap,cin)) ----
    c1 = jnp.dot(p1_ref[...], w1_ref[...], preferred_element_type=f32)       # (416, 16)
    c1 = jnp.maximum(c1 + b1_ref[...], 0.0).astype(bf16)

    # ---- hexconv_2: ONE stacked 0/1-gather matmul (exact row gather on the MXU) ----
    # g2 rows are tap-major blocks: row = t*M2p + m, m = (i2*oC2 + j2)*B + b; all-zero
    # rows implement the zero-padding taps (zero contribution before bias, as in conv).
    x = jnp.dot(g2_ref[...], c1, preferred_element_type=f32)                 # (T2*M2p, 16)
    c1w = c1.shape[1]                                                        # 16
    m2p = p2_ref.shape[0]                                                    # 64 (padded 60)
    for t in range(n_taps):            # 37 static slice-copies: sublane blocks -> lane blocks
        p2_ref[:, t * c1w:(t + 1) * c1w] = x[t * m2p:(t + 1) * m2p, :]
    h2 = jnp.dot(p2_ref[...].astype(bf16), w2f_ref[...],
                 preferred_element_type=f32)                                 # (64, 64), K=592
    h2 = jnp.maximum(h2 + b2_ref[...], 0.0)

    # ---- NHWC flatten (pos, channel) into lanes: (B, 1920) scratch, then ONE matmul ----
    cout = h2.shape[1]
    B = fcin_ref.shape[0]
    for p in range(n_pos):             # 30 static slice-copies (batch-minor row ordering)
        fcin_ref[:, p * cout:(p + 1) * cout] = h2[p * B:(p + 1) * B, :]

    # ---- cat_fc: relu(flatten @ Wg + local3 @ Wl + b), local branch on the VPU ----
    l = local3_ref[...]
    fc = jnp.dot(fcin_ref[...].astype(bf16), wg_ref[...],
                 preferred_element_type=f32)                                 # (B,256), K=1920
    fc = fc + (l[:, 0:1] * wl_ref[0:1, :]
               + l[:, 1:2] * wl_ref[1:2, :]
               + l[:, 2:3] * wl_ref[2:3, :])
    fc = jnp.maximum(fc + bc_ref[...], 0.0).astype(bf16)

    # ---- fc_adv | fc_v packed; output_adv / output_v packed block-diagonally ----
    hid = jnp.maximum(jnp.dot(fc, wav_ref[...], preferred_element_type=f32)
                      + bav_ref[...], 0.0).astype(bf16)                      # (B, 128)
    out = jnp.dot(hid, wout_ref[...], preferred_element_type=f32) + bout_ref[...]
    nA = q_ref.shape[1]
    adv, v = out[:, :nA], out[:, nA:nA + 1]
    q_ref[...] = v + adv - jnp.mean(adv, axis=1, keepdims=True)


_VMEM = pl.BlockSpec(memory_space=pltpu.MemorySpace.VMEM)   # whole-array VMEM block


# --------------------------- hexagonal index tables (host, static) ----------

def _hex_kernel_offsets(k):
    """Hexagonal neighbourhood of radius k in offset ("columns shifted") coords.

    Returns (dc, dr_even, dr_odd): column deltas plus row deltas for kernel centres in
    even / odd columns.  Count = 1 + 3k(k+1)."""
    dc, dr_even, dr_odd = [], [], []
    for dx in range(-k, k + 1):
        for dz in range(max(-k, -dx - k), min(k, -dx + k) + 1):
            dc.append(dx)
            for p, lst in ((0, dr_even), (1, dr_odd)):
                pn = (p + dx) % 2
                lst.append(dz + (dx + p - pn) // 2)
    return np.asarray(dc), np.asarray(dr_even), np.asarray(dr_odd)


def _hex_im2col_nhwc(x, k, stride):
    """x: (B,H,W,C) NHWC -> (patches (B*oR*oC, T*C), (oR, oC)); no transpose needed.

    # TODO(synk): hexagdly re-aligns strided kernel centres onto the exact hexagonal
    # sub-lattice; here centres are taken on the plain offset grid (rows/cols 0,s,2s,...).
    """
    B, H, W, C = x.shape
    oR = (H - 1) // stride + 1
    oC = (W - 1) // stride + 1
    dc, dr_even, dr_odd = _hex_kernel_offsets(k)
    T = dc.shape[0]
    xpad = jnp.pad(x, ((0, 0), (k, k), (k, k), (0, 0)))
    rows = np.zeros((oR, oC, T), dtype=np.int32)
    cols = np.zeros((oR, oC, T), dtype=np.int32)
    for j in range(oC):
        cctr = j * stride
        dr = dr_even if (cctr % 2 == 0) else dr_odd
        for i in range(oR):
            rows[i, j] = i * stride + k + dr
            cols[i, j] = cctr + k + dc
    patches = xpad[:, jnp.asarray(rows), jnp.asarray(cols), :]        # (B,oR,oC,T,C)
    return patches.reshape(B * oR * oC, T * C), (oR, oC)


@functools.lru_cache(maxsize=None)
def _conv2_gather_matrix(B, oR1, oC1, k, stride):
    """0/1 gather matrix G (T2*M2p, B*oR1*oC1): row t*M2p + m selects the conv1-output
    row feeding tap t of conv2 position m = (i2*oC2 + j2)*B + b; all-zero rows encode
    the zero padding (M2 is padded up to a multiple of 8 sublanes)."""
    dc, dr_even, dr_odd = _hex_kernel_offsets(k)
    T = dc.shape[0]
    oR2 = (oR1 - 1) // stride + 1
    oC2 = (oC1 - 1) // stride + 1
    M2 = oR2 * oC2 * B
    M2p = ((M2 + 7) // 8) * 8
    R1 = B * oR1 * oC1
    G = np.zeros((T * M2p, R1), dtype=np.float32)
    for i2 in range(oR2):
        for j2 in range(oC2):
            rctr, cctr = i2 * stride, j2 * stride
            dr = dr_even if (cctr % 2 == 0) else dr_odd
            for b in range(B):
                m = (i2 * oC2 + j2) * B + b
                for t in range(T):
                    r, c = rctr + int(dr[t]), cctr + int(dc[t])
                    if 0 <= r < oR1 and 0 <= c < oC1:
                        G[t * M2p + m, b * oR1 * oC1 + r * oC1 + c] = 1.0
    return G, (oR2, oC2, M2, M2p, T)


# --------------------------- parameters & forward ---------------------------

def init_params(key, output_dim):
    """Packed layouts the fused kernel expects (matmul weights in bf16).

      * w1 rows are (tap, in_channel); w2 is (tap, in_channel, out_channel).
      * w_cat_g rows follow the NHWC flatten order (i2, j2, channel) of conv2's output
        (a permutation of PyTorch's NCHW torch.flatten order).
      * w_av = [fc_adv | fc_v] column-packed; w_out is block-diagonal
        [[output_adv, 0], [0, output_v]] so adv/v remain independent as in the module.
    The unused local_fc / global_fc layers of the original module are omitted.
    """
    T1 = 1 + 3 * 5 * 6     # 91 taps  (kernel_size=5)
    T2 = 1 + 3 * 3 * 4     # 37 taps  (kernel_size=3)
    FLAT = 64 * 5 * 6      # 1920
    keys = jax.random.split(key, 12)
    rnd = lambda kk, shp: (0.05 * jax.random.normal(kk, shp)).astype(jnp.float32)
    w_out = jnp.zeros((128, output_dim + 1), jnp.float32)
    w_out = w_out.at[:64, :output_dim].set(rnd(keys[10], (64, output_dim)))
    w_out = w_out.at[64:, output_dim:].set(rnd(keys[11], (64, 1)))
    return {
        "w1": rnd(keys[0], (T1 * 4, 16)).astype(jnp.bfloat16),
        "b1": rnd(keys[1], (1, 16)),
        "w2": rnd(keys[2], (T2, 16, 64)).astype(jnp.bfloat16),
        "b2": rnd(keys[3], (1, 64)),
        "w_cat_g": rnd(keys[4], (FLAT, 256)).astype(jnp.bfloat16),
        "w_cat_l": rnd(keys[5], (3, 256)),                      # f32, applied on the VPU
        "b_cat": rnd(keys[6], (1, 256)),
        "w_av": rnd(keys[7], (256, 128)).astype(jnp.bfloat16),  # [fc_adv | fc_v]
        "b_av": rnd(keys[8], (1, 128)),
        "w_out": w_out.astype(jnp.bfloat16),                    # block-diag adv / v head
        "b_out": rnd(keys[9], (1, output_dim + 1)),
    }


@functools.partial(jax.jit, static_argnames=("output_dim",))
def target_option_network_forward(local_state, global_state, params, output_dim):
    B = global_state.shape[0]
    # NCHW -> NHWC once on the small raw input, emitted directly in bf16.
    x = jnp.transpose(global_state, (0, 2, 3, 1)).astype(jnp.bfloat16)

    # hexconv_1 im2col: (B*13*16, 91*4) bf16 patches, no transpose needed.
    p1, (oR1, oC1) = _hex_im2col_nhwc(x, k=5, stride=3)

    # hexconv_2 stacked gather matrix (trace-time static, baked as a bf16 constant).
    Gnp, (oR2, oC2, M2, M2p, T2) = _conv2_gather_matrix(B, oR1, oC1, 3, 3)
    g2 = jnp.asarray(Gnp, dtype=jnp.bfloat16)

    n_pos = oR2 * oC2
    nflat = n_pos * params["w2"].shape[2]
    assert params["w_cat_g"].shape[0] == nflat

    w2f = params["w2"].reshape(T2 * params["w2"].shape[1], params["w2"].shape[2])
    local3 = local_state[:, 1:].astype(jnp.float32)             # (B, 3)

    args = (p1, g2, local3,
            params["w1"], params["b1"], w2f, params["b2"],
            params["w_cat_g"], params["w_cat_l"], params["b_cat"],
            params["w_av"], params["b_av"], params["w_out"], params["b_out"])

    mats = [(p1.shape[0], p1.shape[1], 16),
            (g2.shape[0], g2.shape[1], 16),
            (M2p, w2f.shape[0], w2f.shape[1]),
            (B, nflat, 256), (B, 256, 128), (B, 128, output_dim + 1)]
    flops = 2 * sum(m * k * n for m, k, n in mats)
    bytes_accessed = sum(int(np.prod(a.shape)) * a.dtype.itemsize for a in args) \
        + B * output_dim * 4

    return pl.pallas_call(
        functools.partial(_fused_option_net_kernel, n_taps=T2, n_pos=n_pos),
        out_shape=jax.ShapeDtypeStruct((B, output_dim), jnp.float32),
        in_specs=[_VMEM] * len(args),
        out_specs=_VMEM,
        scratch_shapes=[pltpu.VMEM((M2p, T2 * params["w2"].shape[1]), jnp.float32),
                        pltpu.VMEM((B, nflat), jnp.float32)],
        compiler_params=pltpu.CompilerParams(vmem_limit_bytes=32 * 1024 * 1024),
        cost_estimate=pl.CostEstimate(flops=flops, transcendentals=0,
                                      bytes_accessed=bytes_accessed),
    )(*args)


if __name__ == "__main__":
    key = jax.random.PRNGKey(0)
    k_par, k_loc, k_glob = jax.random.split(key, 3)
    OUTPUT_DIM = 8
    B = 2
    # Spatial dims chosen so two stride-3 hex convs give a 5 x 6 map, matching the
    # hard-coded 64*5*6 flatten in the module: 37x46 -> 13x16 -> 5x6.
    global_state = jax.random.normal(k_glob, (B, 4, 37, 46), dtype=jnp.float32)
    local_state = jax.random.normal(k_loc, (B, 4), dtype=jnp.float32)

    params = init_params(k_par, OUTPUT_DIM)
    q = target_option_network_forward(local_state, global_state, params,
                                      output_dim=OUTPUT_DIM)
    q = jax.block_until_ready(q)
    assert q.shape == (B, OUTPUT_DIM) and q.dtype == jnp.float32
    assert bool(jnp.all(jnp.isfinite(q)))
    print("KERNEL_OK")
</pallas_src>

<mosaic_0001>
module attributes {stable_mosaic.version = 11 : i64} {
  func.func @_fused_option_net_kernel(%arg0: memref<416x364xbf16, #tpu.memory_space<vmem>>, %arg1: memref<2368x416xbf16, #tpu.memory_space<vmem>>, %arg2: memref<2x3xf32, #tpu.memory_space<vmem>>, %arg3: memref<364x16xbf16, #tpu.memory_space<vmem>>, %arg4: memref<1x16xf32, #tpu.memory_space<vmem>>, %arg5: memref<592x64xbf16, #tpu.memory_space<vmem>>, %arg6: memref<1x64xf32, #tpu.memory_space<vmem>>, %arg7: memref<1920x256xbf16, #tpu.memory_space<vmem>>, %arg8: memref<3x256xf32, #tpu.memory_space<vmem>>, %arg9: memref<1x256xf32, #tpu.memory_space<vmem>>, %arg10: memref<256x128xbf16, #tpu.memory_space<vmem>>, %arg11: memref<1x128xf32, #tpu.memory_space<vmem>>, %arg12: memref<128x9xbf16, #tpu.memory_space<vmem>>, %arg13: memref<1x9xf32, #tpu.memory_space<vmem>>, %arg14: memref<2x8xf32, #tpu.memory_space<vmem>>, %arg15: memref<64x592xf32, #tpu.memory_space<vmem>>, %arg16: memref<2x1920xf32, #tpu.memory_space<vmem>>) attributes {dimension_semantics = [], scalar_prefetch = 0 : i64, scratch_operands = 2 : i64, tpu.core_type = #tpu.core_type<tc>} {
    %c0 = arith.constant 0 : index
    %c0_0 = arith.constant 0 : index
    %0 = vector.load %arg0[%c0, %c0_0] : memref<416x364xbf16, #tpu.memory_space<vmem>>, vector<416x364xbf16>
    %c0_1 = arith.constant 0 : index
    %c0_2 = arith.constant 0 : index
    %1 = vector.load %arg3[%c0_1, %c0_2] : memref<364x16xbf16, #tpu.memory_space<vmem>>, vector<364x16xbf16>
    %cst = arith.constant dense<0.000000e+00> : vector<416x16xf32>
    %2 = tpu.matmul %0, %1, %cst {dimension_numbers = #tpu.dot_dimension_numbers<[1], [0], [0], [1], [0, 0, 1, 1], [], []>} : vector<416x364xbf16>, vector<364x16xbf16>, vector<416x16xf32> -> vector<416x16xf32>
    %c0_3 = arith.constant 0 : index
    %c0_4 = arith.constant 0 : index
    %3 = vector.load %arg4[%c0_3, %c0_4] : memref<1x16xf32, #tpu.memory_space<vmem>>, vector<1x16xf32>
    %4 = vector.broadcast %3 : vector<1x16xf32> to vector<416x16xf32>
    %5 = arith.addf %2, %4 : vector<416x16xf32>
    %cst_5 = arith.constant 0.000000e+00 : f32
    %6 = vector.broadcast %cst_5 : f32 to vector<416x16xf32>
    %7 = arith.maximumf %5, %6 : vector<416x16xf32>
    %8 = arith.truncf %7 : vector<416x16xf32> to vector<416x16xbf16>
    %c0_6 = arith.constant 0 : index
    %c0_7 = arith.constant 0 : index
    %9 = vector.load %arg1[%c0_6, %c0_7] : memref<2368x416xbf16, #tpu.memory_space<vmem>>, vector<2368x416xbf16>
    %cst_8 = arith.constant dense<0.000000e+00> : vector<2368x16xf32>
    %10 = tpu.matmul %9, %8, %cst_8 {dimension_numbers = #tpu.dot_dimension_numbers<[1], [0], [0], [1], [0, 0, 1, 1], [], []>} : vector<2368x416xbf16>, vector<416x16xbf16>, vector<2368x16xf32> -> vector<2368x16xf32>
    %11 = vector.extract_strided_slice %10 {offsets = [0, 0], sizes = [64, 16], strides = [1, 1]} : vector<2368x16xf32> to vector<64x16xf32>
    %c0_9 = arith.constant 0 : index
    %c0_10 = arith.constant 0 : index
    %12 = vector.load %arg15[%c0_9, %c0_10] : memref<64x592xf32, #tpu.memory_space<vmem>>, vector<64x16xf32>
    tpu.vector_store %arg15[%c0_9, %c0_10], %11 {strides = array<i32>} : memref<64x592xf32, #tpu.memory_space<vmem>>, vector<64x16xf32>,
    %13 = vector.extract_strided_slice %10 {offsets = [64, 0], sizes = [64, 16], strides = [1, 1]} : vector<2368x16xf32> to vector<64x16xf32>
    %c0_11 = arith.constant 0 : index
    %c16 = arith.constant 16 : index
    %14 = vector.load %arg15[%c0_11, %c16] : memref<64x592xf32, #tpu.memory_space<vmem>>, vector<64x16xf32>
    tpu.vector_store %arg15[%c0_11, %c16], %13 {strides = array<i32>} : memref<64x592xf32, #tpu.memory_space<vmem>>, vector<64x16xf32>,
    %15 = vector.extract_strided_slice %10 {offsets = [128, 0], sizes = [64, 16], strides = [1, 1]} : vector<2368x16xf32> to vector<64x16xf32>
    %c0_12 = arith.constant 0 : index
    %c32 = arith.constant 32 : index
    %16 = vector.load %arg15[%c0_12, %c32] : memref<64x592xf32, #tpu.memory_space<vmem>>, vector<64x16xf32>
    tpu.vector_store %arg15[%c0_12, %c32], %15 {strides = array<i32>} : memref<64x592xf32, #tpu.memory_space<vmem>>, vector<64x16xf32>,
    %17 = vector.extract_strided_slice %10 {offsets = [192, 0], sizes = [64, 16], strides = [1, 1]} : vector<2368x16xf32> to vector<64x16xf32>
    %c0_13 = arith.constant 0 : index
    %c48 = arith.constant 48 : index
    %18 = vector.load %arg15[%c0_13, %c48] : memref<64x592xf32, #tpu.memory_space<vmem>>, vector<64x16xf32>
    tpu.vector_store %arg15[%c0_13, %c48], %17 {strides = array<i32>} : memref<64x592xf32, #tpu.memory_space<vmem>>, vector<64x16xf32>,
    %19 = vector.extract_strided_slice %10 {offsets = [256, 0], sizes = [64, 16], strides = [1, 1]} : vector<2368x16xf32> to vector<64x16xf32>
    %c0_14 = arith.constant 0 : index
    %c64 = arith.constant 64 : index
    %20 = vector.load %arg15[%c0_14, %c64] : memref<64x592xf32, #tpu.memory_space<vmem>>, vector<64x16xf32>
    tpu.vector_store %arg15[%c0_14, %c64], %19 {strides = array<i32>} : memref<64x592xf32, #tpu.memory_space<vmem>>, vector<64x16xf32>,
    %21 = vector.extract_strided_slice %10 {offsets = [320, 0], sizes = [64, 16], strides = [1, 1]} : vector<2368x16xf32> to vector<64x16xf32>
    %c0_15 = arith.constant 0 : index
    %c80 = arith.constant 80 : index
    %22 = vector.load %arg15[%c0_15, %c80] : memref<64x592xf32, #tpu.memory_space<vmem>>, vector<64x16xf32>
    tpu.vector_store %arg15[%c0_15, %c80], %21 {strides = array<i32>} : memref<64x592xf32, #tpu.memory_space<vmem>>, vector<64x16xf32>,
    %23 = vector.extract_strided_slice %10 {offsets = [384, 0], sizes = [64, 16], strides = [1, 1]} : vector<2368x16xf32> to vector<64x16xf32>
    %c0_16 = arith.constant 0 : index
    %c96 = arith.constant 96 : index
    %24 = vector.load %arg15[%c0_16, %c96] : memref<64x592xf32, #tpu.memory_space<vmem>>, vector<64x16xf32>
    tpu.vector_store %arg15[%c0_16, %c96], %23 {strides = array<i32>} : memref<64x592xf32, #tpu.memory_space<vmem>>, vector<64x16xf32>,
    %25 = vector.extract_strided_slice %10 {offsets = [448, 0], sizes = [64, 16], strides = [1, 1]} : vector<2368x16xf32> to vector<64x16xf32>
    %c0_17 = arith.constant 0 : index
    %c112 = arith.constant 112 : index
    %26 = vector.load %arg15[%c0_17, %c112] : memref<64x592xf32, #tpu.memory_space<vmem>>, vector<64x16xf32>
    tpu.vector_store %arg15[%c0_17, %c112], %25 {strides = array<i32>} : memref<64x592xf32, #tpu.memory_space<vmem>>, vector<64x16xf32>,
    %27 = vector.extract_strided_slice %10 {offsets = [512, 0], sizes = [64, 16], strides = [1, 1]} : vector<2368x16xf32> to vector<64x16xf32>
    %c0_18 = arith.constant 0 : index
    %c128 = arith.constant 128 : index
    %28 = vector.load %arg15[%c0_18, %c128] : memref<64x592xf32, #tpu.memory_space<vmem>>, vector<64x16xf32>
    tpu.vector_store %arg15[%c0_18, %c128], %27 {strides = array<i32>} : memref<64x592xf32, #tpu.memory_space<vmem>>, vector<64x16xf32>,
    %29 = vector.extract_strided_slice %10 {offsets = [576, 0], sizes = [64, 16], strides = [1, 1]} : vector<2368x16xf32> to vector<64x16xf32>
    %c0_19 = arith.constant 0 : index
    %c144 = arith.constant 144 : index
    %30 = vector.load %arg15[%c0_19, %c144] : memref<64x592xf32, #tpu.memory_space<vmem>>, vector<64x16xf32>
    tpu.vector_store %arg15[%c0_19, %c144], %29 {strides = array<i32>} : memref<64x592xf32, #tpu.memory_space<vmem>>, vector<64x16xf32>,
    %31 = vector.extract_strided_slice %10 {offsets = [640, 0], sizes = [64, 16], strides = [1, 1]} : vector<2368x16xf32> to vector<64x16xf32>
    %c0_20 = arith.constant 0 : index
    %c160 = arith.constant 160 : index
    %32 = vector.load %arg15[%c0_20, %c160] : memref<64x592xf32, #tpu.memory_space<vmem>>, vector<64x16xf32>
    tpu.vector_store %arg15[%c0_20, %c160], %31 {strides = array<i32>} : memref<64x592xf32, #tpu.memory_space<vmem>>, vector<64x16xf32>,
    %33 = vector.extract_strided_slice %10 {offsets = [704, 0], sizes = [64, 16], strides = [1, 1]} : vector<2368x16xf32> to vector<64x16xf32>
    %c0_21 = arith.constant 0 : index
    %c176 = arith.constant 176 : index
    %34 = vector.load %arg15[%c0_21, %c176] : memref<64x592xf32, #tpu.memory_space<vmem>>, vector<64x16xf32>
    tpu.vector_store %arg15[%c0_21, %c176], %33 {strides = array<i32>} : memref<64x592xf32, #tpu.memory_space<vmem>>, vector<64x16xf32>,
    %35 = vector.extract_strided_slice %10 {offsets = [768, 0], sizes = [64, 16], strides = [1, 1]} : vector<2368x16xf32> to vector<64x16xf32>
    %c0_22 = arith.constant 0 : index
    %c192 = arith.constant 192 : index
    %36 = vector.load %arg15[%c0_22, %c192] : memref<64x592xf32, #tpu.memory_space<vmem>>, vector<64x16xf32>
    tpu.vector_store %arg15[%c0_22, %c192], %35 {strides = array<i32>} : memref<64x592xf32, #tpu.memory_space<vmem>>, vector<64x16xf32>,
    %37 = vector.extract_strided_slice %10 {offsets = [832, 0], sizes = [64, 16], strides = [1, 1]} : vector<2368x16xf32> to vector<64x16xf32>
    %c0_23 = arith.constant 0 : index
    %c208 = arith.constant 208 : index
    %38 = vector.load %arg15[%c0_23, %c208] : memref<64x592xf32, #tpu.memory_space<vmem>>, vector<64x16xf32>
    tpu.vector_store %arg15[%c0_23, %c208], %37 {strides = array<i32>} : memref<64x592xf32, #tpu.memory_space<vmem>>, vector<64x16xf32>,
    %39 = vector.extract_strided_slice %10 {offsets = [896, 0], sizes = [64, 16], strides = [1, 1]} : vector<2368x16xf32> to vector<64x16xf32>
    %c0_24 = arith.constant 0 : index
    %c224 = arith.constant 224 : index
    %40 = vector.load %arg15[%c0_24, %c224] : memref<64x592xf32, #tpu.memory_space<vmem>>, vector<64x16xf32>
    tpu.vector_store %arg15[%c0_24, %c224], %39 {strides = array<i32>} : memref<64x592xf32, #tpu.memory_space<vmem>>, vector<64x16xf32>,
    %41 = vector.extract_strided_slice %10 {offsets = [960, 0], sizes = [64, 16], strides = [1, 1]} : vector<2368x16xf32> to vector<64x16xf32>
    %c0_25 = arith.constant 0 : index
    %c240 = arith.constant 240 : index
    %42 = vector.load %arg15[%c0_25, %c240] : memref<64x592xf32, #tpu.memory_space<vmem>>, vector<64x16xf32>
    tpu.vector_store %arg15[%c0_25, %c240], %41 {strides = array<i32>} : memref<64x592xf32, #tpu.memory_space<vmem>>, vector<64x16xf32>,
    %43 = vector.extract_strided_slice %10 {offsets = [1024, 0], sizes = [64, 16], strides = [1, 1]} : vector<2368x16xf32> to vector<64x16xf32>
    %c0_26 = arith.constant 0 : index
    %c256 = arith.constant 256 : index
    %44 = vector.load %arg15[%c0_26, %c256] : memref<64x592xf32, #tpu.memory_space<vmem>>, vector<64x16xf32>
    tpu.vector_store %arg15[%c0_26, %c256], %43 {strides = array<i32>} : memref<64x592xf32, #tpu.memory_space<vmem>>, vector<64x16xf32>,
    %45 = vector.extract_strided_slice %10 {offsets = [1088, 0], sizes = [64, 16], strides = [1, 1]} : vector<2368x16xf32> to vector<64x16xf32>
    %c0_27 = arith.constant 0 : index
    %c272 = arith.constant 272 : index
    %46 = vector.load %arg15[%c0_27, %c272] : memref<64x592xf32, #tpu.memory_space<vmem>>, vector<64x16xf32>
    tpu.vector_store %arg15[%c0_27, %c272], %45 {strides = array<i32>} : memref<64x592xf32, #tpu.memory_space<vmem>>, vector<64x16xf32>,
    %47 = vector.extract_strided_slice %10 {offsets = [1152, 0], sizes = [64, 16], strides = [1, 1]} : vector<2368x16xf32> to vector<64x16xf32>
    %c0_28 = arith.constant 0 : index
    %c288 = arith.constant 288 : index
    %48 = vector.load %arg15[%c0_28, %c288] : memref<64x592xf32, #tpu.memory_space<vmem>>, vector<64x16xf32>
    tpu.vector_store %arg15[%c0_28, %c288], %47 {strides = array<i32>} : memref<64x592xf32, #tpu.memory_space<vmem>>, vector<64x16xf32>,
    %49 = vector.extract_strided_slice %10 {offsets = [1216, 0], sizes = [64, 16], strides = [1, 1]} : vector<2368x16xf32> to vector<64x16xf32>
    %c0_29 = arith.constant 0 : index
    %c304 = arith.constant 304 : index
    %50 = vector.load %arg15[%c0_29, %c304] : memref<64x592xf32, #tpu.memory_space<vmem>>, vector<64x16xf32>
    tpu.vector_store %arg15[%c0_29, %c304], %49 {strides = array<i32>} : memref<64x592xf32, #tpu.memory_space<vmem>>, vector<64x16xf32>,
    %51 = vector.extract_strided_slice %10 {offsets = [1280, 0], sizes = [64, 16], strides = [1, 1]} : vector<2368x16xf32> to vector<64x16xf32>
    %c0_30 = arith.constant 0 : index
    %c320 = arith.constant 320 : index
    %52 = vector.load %arg15[%c0_30, %c320] : memref<64x592xf32, #tpu.memory_space<vmem>>, vector<64x16xf32>
    tpu.vector_store %arg15[%c0_30, %c320], %51 {strides = array<i32>} : memref<64x592xf32, #tpu.memory_space<vmem>>, vector<64x16xf32>,
    %53 = vector.extract_strided_slice %10 {offsets = [1344, 0], sizes = [64, 16], strides = [1, 1]} : vector<2368x16xf32> to vector<64x16xf32>
    %c0_31 = arith.constant 0 : index
    %c336 = arith.constant 336 : index
    %54 = vector.load %arg15[%c0_31, %c336] : memref<64x592xf32, #tpu.memory_space<vmem>>, vector<64x16xf32>
    tpu.vector_store %arg15[%c0_31, %c336], %53 {strides = array<i32>} : memref<64x592xf32, #tpu.memory_space<vmem>>, vector<64x16xf32>,
    %55 = vector.extract_strided_slice %10 {offsets = [1408, 0], sizes = [64, 16], strides = [1, 1]} : vector<2368x16xf32> to vector<64x16xf32>
    %c0_32 = arith.constant 0 : index
    %c352 = arith.constant 352 : index
    %56 = vector.load %arg15[%c0_32, %c352] : memref<64x592xf32, #tpu.memory_space<vmem>>, vector<64x16xf32>
    tpu.vector_store %arg15[%c0_32, %c352], %55 {strides = array<i32>} : memref<64x592xf32, #tpu.memory_space<vmem>>, vector<64x16xf32>,
    %57 = vector.extract_strided_slice %10 {offsets = [1472, 0], sizes = [64, 16], strides = [1, 1]} : vector<2368x16xf32> to vector<64x16xf32>
    %c0_33 = arith.constant 0 : index
    %c368 = arith.constant 368 : index
    %58 = vector.load %arg15[%c0_33, %c368] : memref<64x592xf32, #tpu.memory_space<vmem>>, vector<64x16xf32>
    tpu.vector_store %arg15[%c0_33, %c368], %57 {strides = array<i32>} : memref<64x592xf32, #tpu.memory_space<vmem>>, vector<64x16xf32>,
    %59 = vector.extract_strided_slice %10 {offsets = [1536, 0], sizes = [64, 16], strides = [1, 1]} : vector<2368x16xf32> to vector<64x16xf32>
    %c0_34 = arith.constant 0 : index
    %c384 = arith.constant 384 : index
    %60 = vector.load %arg15[%c0_34, %c384] : memref<64x592xf32, #tpu.memory_space<vmem>>, vector<64x16xf32>
    tpu.vector_store %arg15[%c0_34, %c384], %59 {strides = array<i32>} : memref<64x592xf32, #tpu.memory_space<vmem>>, vector<64x16xf32>,
    %61 = vector.extract_strided_slice %10 {offsets = [1600, 0], sizes = [64, 16], strides = [1, 1]} : vector<2368x16xf32> to vector<64x16xf32>
    %c0_35 = arith.constant 0 : index
    %c400 = arith.constant 400 : index
    %62 = vector.load %arg15[%c0_35, %c400] : memref<64x592xf32, #tpu.memory_space<vmem>>, vector<64x16xf32>
    tpu.vector_store %arg15[%c0_35, %c400], %61 {strides = array<i32>} : memref<64x592xf32, #tpu.memory_space<vmem>>, vector<64x16xf32>,
    %63 = vector.extract_strided_slice %10 {offsets = [1664, 0], sizes = [64, 16], strides = [1, 1]} : vector<2368x16xf32> to vector<64x16xf32>
    %c0_36 = arith.constant 0 : index
    %c416 = arith.constant 416 : index
    %64 = vector.load %arg15[%c0_36, %c416] : memref<64x592xf32, #tpu.memory_space<vmem>>, vector<64x16xf32>
    tpu.vector_store %arg15[%c0_36, %c416], %63 {strides = array<i32>} : memref<64x592xf32, #tpu.memory_space<vmem>>, vector<64x16xf32>,
    %65 = vector.extract_strided_slice %10 {offsets = [1728, 0], sizes = [64, 16], strides = [1, 1]} : vector<2368x16xf32> to vector<64x16xf32>
    %c0_37 = arith.constant 0 : index
    %c432 = arith.constant 432 : index
    %66 = vector.load %arg15[%c0_37, %c432] : memref<64x592xf32, #tpu.memory_space<vmem>>, vector<64x16xf32>
    tpu.vector_store %arg15[%c0_37, %c432], %65 {strides = array<i32>} : memref<64x592xf32, #tpu.memory_space<vmem>>, vector<64x16xf32>,
    %67 = vector.extract_strided_slice %10 {offsets = [1792, 0], sizes = [64, 16], strides = [1, 1]} : vector<2368x16xf32> to vector<64x16xf32>
    %c0_38 = arith.constant 0 : index
    %c448 = arith.constant 448 : index
    %68 = vector.load %arg15[%c0_38, %c448] : memref<64x592xf32, #tpu.memory_space<vmem>>, vector<64x16xf32>
    tpu.vector_store %arg15[%c0_38, %c448], %67 {strides = array<i32>} : memref<64x592xf32, #tpu.memory_space<vmem>>, vector<64x16xf32>,
    %69 = vector.extract_strided_slice %10 {offsets = [1856, 0], sizes = [64, 16], strides = [1, 1]} : vector<2368x16xf32> to vector<64x16xf32>
    %c0_39 = arith.constant 0 : index
    %c464 = arith.constant 464 : index
    %70 = vector.load %arg15[%c0_39, %c464] : memref<64x592xf32, #tpu.memory_space<vmem>>, vector<64x16xf32>
    tpu.vector_store %arg15[%c0_39, %c464], %69 {strides = array<i32>} : memref<64x592xf32, #tpu.memory_space<vmem>>, vector<64x16xf32>,
    %71 = vector.extract_strided_slice %10 {offsets = [1920, 0], sizes = [64, 16], strides = [1, 1]} : vector<2368x16xf32> to vector<64x16xf32>
    %c0_40 = arith.constant 0 : index
    %c480 = arith.constant 480 : index
    %72 = vector.load %arg15[%c0_40, %c480] : memref<64x592xf32, #tpu.memory_space<vmem>>, vector<64x16xf32>
    tpu.vector_store %arg15[%c0_40, %c480], %71 {strides = array<i32>} : memref<64x592xf32, #tpu.memory_space<vmem>>, vector<64x16xf32>,
    %73 = vector.extract_strided_slice %10 {offsets = [1984, 0], sizes = [64, 16], strides = [1, 1]} : vector<2368x16xf32> to vector<64x16xf32>
    %c0_41 = arith.constant 0 : index
    %c496 = arith.constant 496 : index
    %74 = vector.load %arg15[%c0_41, %c496] : memref<64x592xf32, #tpu.memory_space<vmem>>, vector<64x16xf32>
    tpu.vector_store %arg15[%c0_41, %c496], %73 {strides = array<i32>} : memref<64x592xf32, #tpu.memory_space<vmem>>, vector<64x16xf32>,
    %75 = vector.extract_strided_slice %10 {offsets = [2048, 0], sizes = [64, 16], strides = [1, 1]} : vector<2368x16xf32> to vector<64x16xf32>
    %c0_42 = arith.constant 0 : index
    %c512 = arith.constant 512 : index
    %76 = vector.load %arg15[%c0_42, %c512] : memref<64x592xf32, #tpu.memory_space<vmem>>, vector<64x16xf32>
    tpu.vector_store %arg15[%c0_42, %c512], %75 {strides = array<i32>} : memref<64x592xf32, #tpu.memory_space<vmem>>, vector<64x16xf32>,
    %77 = vector.extract_strided_slice %10 {offsets = [2112, 0], sizes = [64, 16], strides = [1, 1]} : vector<2368x16xf32> to vector<64x16xf32>
    %c0_43 = arith.constant 0 : index
    %c528 = arith.constant 528 : index
    %78 = vector.load %arg15[%c0_43, %c528] : memref<64x592xf32, #tpu.memory_space<vmem>>, vector<64x16xf32>
    tpu.vector_store %arg15[%c0_43, %c528], %77 {strides = array<i32>} : memref<64x592xf32, #tpu.memory_space<vmem>>, vector<64x16xf32>,
    %79 = vector.extract_strided_slice %10 {offsets = [2176, 0], sizes = [64, 16], strides = [1, 1]} : vector<2368x16xf32> to vector<64x16xf32>
    %c0_44 = arith.constant 0 : index
    %c544 = arith.constant 544 : index
    %80 = vector.load %arg15[%c0_44, %c544] : memref<64x592xf32, #tpu.memory_space<vmem>>, vector<64x16xf32>
    tpu.vector_store %arg15[%c0_44, %c544], %79 {strides = array<i32>} : memref<64x592xf32, #tpu.memory_space<vmem>>, vector<64x16xf32>,
    %81 = vector.extract_strided_slice %10 {offsets = [2240, 0], sizes = [64, 16], strides = [1, 1]} : vector<2368x16xf32> to vector<64x16xf32>
    %c0_45 = arith.constant 0 : index
    %c560 = arith.constant 560 : index
    %82 = vector.load %arg15[%c0_45, %c560] : memref<64x592xf32, #tpu.memory_space<vmem>>, vector<64x16xf32>
    tpu.vector_store %arg15[%c0_45, %c560], %81 {strides = array<i32>} : memref<64x592xf32, #tpu.memory_space<vmem>>, vector<64x16xf32>,
    %83 = vector.extract_strided_slice %10 {offsets = [2304, 0], sizes = [64, 16], strides = [1, 1]} : vector<2368x16xf32> to vector<64x16xf32>
    %c0_46 = arith.constant 0 : index
    %c576 = arith.constant 576 : index
    %84 = vector.load %arg15[%c0_46, %c576] : memref<64x592xf32, #tpu.memory_space<vmem>>, vector<64x16xf32>
    tpu.vector_store %arg15[%c0_46, %c576], %83 {strides = array<i32>} : memref<64x592xf32, #tpu.memory_space<vmem>>, vector<64x16xf32>,
    %c0_47 = arith.constant 0 : index
    %c0_48 = arith.constant 0 : index
    %85 = vector.load %arg15[%c0_47, %c0_48] : memref<64x592xf32, #tpu.memory_space<vmem>>, vector<64x592xf32>
    %86 = arith.truncf %85 : vector<64x592xf32> to vector<64x592xbf16>
    %c0_49 = arith.constant 0 : index
    %c0_50 = arith.constant 0 : index
    %87 = vector.load %arg5[%c0_49, %c0_50] : memref<592x64xbf16, #tpu.memory_space<vmem>>, vector<592x64xbf16>
    %cst_51 = arith.constant dense<0.000000e+00> : vector<64x64xf32>
    %88 = tpu.matmul %86, %87, %cst_51 {dimension_numbers = #tpu.dot_dimension_numbers<[1], [0], [0], [1], [0, 0, 1, 1], [], []>} : vector<64x592xbf16>, vector<592x64xbf16>, vector<64x64xf32> -> vector<64x64xf32>
    %c0_52 = arith.constant 0 : index
    %c0_53 = arith.constant 0 : index
    %89 = vector.load %arg6[%c0_52, %c0_53] : memref<1x64xf32, #tpu.memory_space<vmem>>, vector<1x64xf32>
    %90 = vector.broadcast %89 : vector<1x64xf32> to vector<64x64xf32>
    %91 = arith.addf %88, %90 : vector<64x64xf32>
    %cst_54 = arith.constant 0.000000e+00 : f32
    %92 = vector.broadcast %cst_54 : f32 to vector<64x64xf32>
    %93 = arith.maximumf %91, %92 : vector<64x64xf32>
    %94 = vector.extract_strided_slice %93 {offsets = [0, 0], sizes = [2, 64], strides = [1, 1]} : vector<64x64xf32> to vector<2x64xf32>
    %c0_55 = arith.constant 0 : index
    %c0_56 = arith.constant 0 : index
    %95 = vector.load %arg16[%c0_55, %c0_56] : memref<2x1920xf32, #tpu.memory_space<vmem>>, vector<2x64xf32>
    tpu.vector_store %arg16[%c0_55, %c0_56], %94 {strides = array<i32>} : memref<2x1920xf32, #tpu.memory_space<vmem>>, vector<2x64xf32>,
    %96 = vector.extract_strided_slice %93 {offsets = [2, 0], sizes = [2, 64], strides = [1, 1]} : vector<64x64xf32> to vector<2x64xf32>
    %c0_57 = arith.constant 0 : index
    %c64_58 = arith.constant 64 : index
    %97 = vector.load %arg16[%c0_57, %c64_58] : memref<2x1920xf32, #tpu.memory_space<vmem>>, vector<2x64xf32>
    tpu.vector_store %arg16[%c0_57, %c64_58], %96 {strides = array<i32>} : memref<2x1920xf32, #tpu.memory_space<vmem>>, vector<2x64xf32>,
    %98 = vector.extract_strided_slice %93 {offsets = [4, 0], sizes = [2, 64], strides = [1, 1]} : vector<64x64xf32> to vector<2x64xf32>
    %c0_59 = arith.constant 0 : index
    %c128_60 = arith.constant 128 : index
    %99 = vector.load %arg16[%c0_59, %c128_60] : memref<2x1920xf32, #tpu.memory_space<vmem>>, vector<2x64xf32>
    tpu.vector_store %arg16[%c0_59, %c128_60], %98 {strides = array<i32>} : memref<2x1920xf32, #tpu.memory_space<vmem>>, vector<2x64xf32>,
    %100 = vector.extract_strided_slice %93 {offsets = [6, 0], sizes = [2, 64], strides = [1, 1]} : vector<64x64xf32> to vector<2x64xf32>
    %c0_61 = arith.constant 0 : index
    %c192_62 = arith.constant 192 : index
    %101 = vector.load %arg16[%c0_61, %c192_62] : memref<2x1920xf32, #tpu.memory_space<vmem>>, vector<2x64xf32>
    tpu.vector_store %arg16[%c0_61, %c192_62], %100 {strides = array<i32>} : memref<2x1920xf32, #tpu.memory_space<vmem>>, vector<2x64xf32>,
    %102 = vector.extract_strided_slice %93 {offsets = [8, 0], sizes = [2, 64], strides = [1, 1]} : vector<64x64xf32> to vector<2x64xf32>
    %c0_63 = arith.constant 0 : index
    %c256_64 = arith.constant 256 : index
    %103 = vector.load %arg16[%c0_63, %c256_64] : memref<2x1920xf32, #tpu.memory_space<vmem>>, vector<2x64xf32>
    tpu.vector_store %arg16[%c0_63, %c256_64], %102 {strides = array<i32>} : memref<2x1920xf32, #tpu.memory_space<vmem>>, vector<2x64xf32>,
    %104 = vector.extract_strided_slice %93 {offsets = [10, 0], sizes = [2, 64], strides = [1, 1]} : vector<64x64xf32> to vector<2x64xf32>
    %c0_65 = arith.constant 0 : index
    %c320_66 = arith.constant 320 : index
    %105 = vector.load %arg16[%c0_65, %c320_66] : memref<2x1920xf32, #tpu.memory_space<vmem>>, vector<2x64xf32>
    tpu.vector_store %arg16[%c0_65, %c320_66], %104 {strides = array<i32>} : memref<2x1920xf32, #tpu.memory_space<vmem>>, vector<2x64xf32>,
    %106 = vector.extract_strided_slice %93 {offsets = [12, 0], sizes = [2, 64], strides = [1, 1]} : vector<64x64xf32> to vector<2x64xf32>
    %c0_67 = arith.constant 0 : index
    %c384_68 = arith.constant 384 : index
    %107 = vector.load %arg16[%c0_67, %c384_68] : memref<2x1920xf32, #tpu.memory_space<vmem>>, vector<2x64xf32>
    tpu.vector_store %arg16[%c0_67, %c384_68], %106 {strides = array<i32>} : memref<2x1920xf32, #tpu.memory_space<vmem>>, vector<2x64xf32>,
    %108 = vector.extract_strided_slice %93 {offsets = [14, 0], sizes = [2, 64], strides = [1, 1]} : vector<64x64xf32> to vector<2x64xf32>
    %c0_69 = arith.constant 0 : index
    %c448_70 = arith.constant 448 : index
    %109 = vector.load %arg16[%c0_69, %c448_70] : memref<2x1920xf32, #tpu.memory_space<vmem>>, vector<2x64xf32>
    tpu.vector_store %arg16[%c0_69, %c448_70], %108 {strides = array<i32>} : memref<2x1920xf32, #tpu.memory_space<vmem>>, vector<2x64xf32>,
    %110 = vector.extract_strided_slice %93 {offsets = [16, 0], sizes = [2, 64], strides = [1, 1]} : vector<64x64xf32> to vector<2x64xf32>
    %c0_71 = arith.constant 0 : index
    %c512_72 = arith.constant 512 : index
    %111 = vector.load %arg16[%c0_71, %c512_72] : memref<2x1920xf32, #tpu.memory_space<vmem>>, vector<2x64xf32>
    tpu.vector_store %arg16[%c0_71, %c512_72], %110 {strides = array<i32>} : memref<2x1920xf32, #tpu.memory_space<vmem>>, vector<2x64xf32>,
    %112 = vector.extract_strided_slice %93 {offsets = [18, 0], sizes = [2, 64], strides = [1, 1]} : vector<64x64xf32> to vector<2x64xf32>
    %c0_73 = arith.constant 0 : index
    %c576_74 = arith.constant 576 : index
    %113 = vector.load %arg16[%c0_73, %c576_74] : memref<2x1920xf32, #tpu.memory_space<vmem>>, vector<2x64xf32>
    tpu.vector_store %arg16[%c0_73, %c576_74], %112 {strides = array<i32>} : memref<2x1920xf32, #tpu.memory_space<vmem>>, vector<2x64xf32>,
    %114 = vector.extract_strided_slice %93 {offsets = [20, 0], sizes = [2, 64], strides = [1, 1]} : vector<64x64xf32> to vector<2x64xf32>
    %c0_75 = arith.constant 0 : index
    %c640 = arith.constant 640 : index
    %115 = vector.load %arg16[%c0_75, %c640] : memref<2x1920xf32, #tpu.memory_space<vmem>>, vector<2x64xf32>
    tpu.vector_store %arg16[%c0_75, %c640], %114 {strides = array<i32>} : memref<2x1920xf32, #tpu.memory_space<vmem>>, vector<2x64xf32>,
    %116 = vector.extract_strided_slice %93 {offsets = [22, 0], sizes = [2, 64], strides = [1, 1]} : vector<64x64xf32> to vector<2x64xf32>
    %c0_76 = arith.constant 0 : index
    %c704 = arith.constant 704 : index
    %117 = vector.load %arg16[%c0_76, %c704] : memref<2x1920xf32, #tpu.memory_space<vmem>>, vector<2x64xf32>
    tpu.vector_store %arg16[%c0_76, %c704], %116 {strides = array<i32>} : memref<2x1920xf32, #tpu.memory_space<vmem>>, vector<2x64xf32>,
    %118 = vector.extract_strided_slice %93 {offsets = [24, 0], sizes = [2, 64], strides = [1, 1]} : vector<64x64xf32> to vector<2x64xf32>
    %c0_77 = arith.constant 0 : index
    %c768 = arith.constant 768 : index
    %119 = vector.load %arg16[%c0_77, %c768] : memref<2x1920xf32, #tpu.memory_space<vmem>>, vector<2x64xf32>
    tpu.vector_store %arg16[%c0_77, %c768], %118 {strides = array<i32>} : memref<2x1920xf32, #tpu.memory_space<vmem>>, vector<2x64xf32>,
    %120 = vector.extract_strided_slice %93 {offsets = [26, 0], sizes = [2, 64], strides = [1, 1]} : vector<64x64xf32> to vector<2x64xf32>
    %c0_78 = arith.constant 0 : index
    %c832 = arith.constant 832 : index
    %121 = vector.load %arg16[%c0_78, %c832] : memref<2x1920xf32, #tpu.memory_space<vmem>>, vector<2x64xf32>
    tpu.vector_store %arg16[%c0_78, %c832], %120 {strides = array<i32>} : memref<2x1920xf32, #tpu.memory_space<vmem>>, vector<2x64xf32>,
    %122 = vector.extract_strided_slice %93 {offsets = [28, 0], sizes = [2, 64], strides = [1, 1]} : vector<64x64xf32> to vector<2x64xf32>
    %c0_79 = arith.constant 0 : index
    %c896 = arith.constant 896 : index
    %123 = vector.load %arg16[%c0_79, %c896] : memref<2x1920xf32, #tpu.memory_space<vmem>>, vector<2x64xf32>
    tpu.vector_store %arg16[%c0_79, %c896], %122 {strides = array<i32>} : memref<2x1920xf32, #tpu.memory_space<vmem>>, vector<2x64xf32>,
    %124 = vector.extract_strided_slice %93 {offsets = [30, 0], sizes = [2, 64], strides = [1, 1]} : vector<64x64xf32> to vector<2x64xf32>
    %c0_80 = arith.constant 0 : index
    %c960 = arith.constant 960 : index
    %125 = vector.load %arg16[%c0_80, %c960] : memref<2x1920xf32, #tpu.memory_space<vmem>>, vector<2x64xf32>
    tpu.vector_store %arg16[%c0_80, %c960], %124 {strides = array<i32>} : memref<2x1920xf32, #tpu.memory_space<vmem>>, vector<2x64xf32>,
    %126 = vector.extract_strided_slice %93 {offsets = [32, 0], sizes = [2, 64], strides = [1, 1]} : vector<64x64xf32> to vector<2x64xf32>
    %c0_81 = arith.constant 0 : index
    %c1024 = arith.constant 1024 : index
    %127 = vector.load %arg16[%c0_81, %c1024] : memref<2x1920xf32, #tpu.memory_space<vmem>>, vector<2x64xf32>
    tpu.vector_store %arg16[%c0_81, %c1024], %126 {strides = array<i32>} : memref<2x1920xf32, #tpu.memory_space<vmem>>, vector<2x64xf32>,
    %128 = vector.extract_strided_slice %93 {offsets = [34, 0], sizes = [2, 64], strides = [1, 1]} : vector<64x64xf32> to vector<2x64xf32>
    %c0_82 = arith.constant 0 : index
    %c1088 = arith.constant 1088 : index
    %129 = vector.load %arg16[%c0_82, %c1088] : memref<2x1920xf32, #tpu.memory_space<vmem>>, vector<2x64xf32>
    tpu.vector_store %arg16[%c0_82, %c1088], %128 {strides = array<i32>} : memref<2x1920xf32, #tpu.memory_space<vmem>>, vector<2x64xf32>,
    %130 = vector.extract_strided_slice %93 {offsets = [36, 0], sizes = [2, 64], strides = [1, 1]} : vector<64x64xf32> to vector<2x64xf32>
    %c0_83 = arith.constant 0 : index
    %c1152 = arith.constant 1152 : index
    %131 = vector.load %arg16[%c0_83, %c1152] : memref<2x1920xf32, #tpu.memory_space<vmem>>, vector<2x64xf32>
    tpu.vector_store %arg16[%c0_83, %c1152], %130 {strides = array<i32>} : memref<2x1920xf32, #tpu.memory_space<vmem>>, vector<2x64xf32>,
    %132 = vector.extract_strided_slice %93 {offsets = [38, 0], sizes = [2, 64], strides = [1, 1]} : vector<64x64xf32> to vector<2x64xf32>
    %c0_84 = arith.constant 0 : index
    %c1216 = arith.constant 1216 : index
    %133 = vector.load %arg16[%c0_84, %c1216] : memref<2x1920xf32, #tpu.memory_space<vmem>>, vector<2x64xf32>
    tpu.vector_store %arg16[%c0_84, %c1216], %132 {strides = array<i32>} : memref<2x1920xf32, #tpu.memory_space<vmem>>, vector<2x64xf32>,
    %134 = vector.extract_strided_slice %93 {offsets = [40, 0], sizes = [2, 64], strides = [1, 1]} : vector<64x64xf32> to vector<2x64xf32>
    %c0_85 = arith.constant 0 : index
    %c1280 = arith.constant 1280 : index
    %135 = vector.load %arg16[%c0_85, %c1280] : memref<2x1920xf32, #tpu.memory_space<vmem>>, vector<2x64xf32>
    tpu.vector_store %arg16[%c0_85, %c1280], %134 {strides = array<i32>} : memref<2x1920xf32, #tpu.memory_space<vmem>>, vector<2x64xf32>,
    %136 = vector.extract_strided_slice %93 {offsets = [42, 0], sizes = [2, 64], strides = [1, 1]} : vector<64x64xf32> to vector<2x64xf32>
    %c0_86 = arith.constant 0 : index
    %c1344 = arith.constant 1344 : index
    %137 = vector.load %arg16[%c0_86, %c1344] : memref<2x1920xf32, #tpu.memory_space<vmem>>, vector<2x64xf32>
    tpu.vector_store %arg16[%c0_86, %c1344], %136 {strides = array<i32>} : memref<2x1920xf32, #tpu.memory_space<vmem>>, vector<2x64xf32>,
    %138 = vector.extract_strided_slice %93 {offsets = [44, 0], sizes = [2, 64], strides = [1, 1]} : vector<64x64xf32> to vector<2x64xf32>
    %c0_87 = arith.constant 0 : index
    %c1408 = arith.constant 1408 : index
    %139 = vector.load %arg16[%c0_87, %c1408] : memref<2x1920xf32, #tpu.memory_space<vmem>>, vector<2x64xf32>
    tpu.vector_store %arg16[%c0_87, %c1408], %138 {strides = array<i32>} : memref<2x1920xf32, #tpu.memory_space<vmem>>, vector<2x64xf32>,
    %140 = vector.extract_strided_slice %93 {offsets = [46, 0], sizes = [2, 64], strides = [1, 1]} : vector<64x64xf32> to vector<2x64xf32>
    %c0_88 = arith.constant 0 : index
    %c1472 = arith.constant 1472 : index
    %141 = vector.load %arg16[%c0_88, %c1472] : memref<2x1920xf32, #tpu.memory_space<vmem>>, vector<2x64xf32>
    tpu.vector_store %arg16[%c0_88, %c1472], %140 {strides = array<i32>} : memref<2x1920xf32, #tpu.memory_space<vmem>>, vector<2x64xf32>,
    %142 = vector.extract_strided_slice %93 {offsets = [48, 0], sizes = [2, 64], strides = [1, 1]} : vector<64x64xf32> to vector<2x64xf32>
    %c0_89 = arith.constant 0 : index
    %c1536 = arith.constant 1536 : index
    %143 = vector.load %arg16[%c0_89, %c1536] : memref<2x1920xf32, #tpu.memory_space<vmem>>, vector<2x64xf32>
    tpu.vector_store %arg16[%c0_89, %c1536], %142 {strides = array<i32>} : memref<2x1920xf32, #tpu.memory_space<vmem>>, vector<2x64xf32>,
    %144 = vector.extract_strided_slice %93 {offsets = [50, 0], sizes = [2, 64], strides = [1, 1]} : vector<64x64xf32> to vector<2x64xf32>
    %c0_90 = arith.constant 0 : index
    %c1600 = arith.constant 1600 : index
    %145 = vector.load %arg16[%c0_90, %c1600] : memref<2x1920xf32, #tpu.memory_space<vmem>>, vector<2x64xf32>
    tpu.vector_store %arg16[%c0_90, %c1600], %144 {strides = array<i32>} : memref<2x1920xf32, #tpu.memory_space<vmem>>, vector<2x64xf32>,
    %146 = vector.extract_strided_slice %93 {offsets = [52, 0], sizes = [2, 64], strides = [1, 1]} : vector<64x64xf32> to vector<2x64xf32>
    %c0_91 = arith.constant 0 : index
    %c1664 = arith.constant 1664 : index
    %147 = vector.load %arg16[%c0_91, %c1664] : memref<2x1920xf32, #tpu.memory_space<vmem>>, vector<2x64xf32>
    tpu.vector_store %arg16[%c0_91, %c1664], %146 {strides = array<i32>} : memref<2x1920xf32, #tpu.memory_space<vmem>>, vector<2x64xf32>,
    %148 = vector.extract_strided_slice %93 {offsets = [54, 0], sizes = [2, 64], strides = [1, 1]} : vector<64x64xf32> to vector<2x64xf32>
    %c0_92 = arith.constant 0 : index
    %c1728 = arith.constant 1728 : index
    %149 = vector.load %arg16[%c0_92, %c1728] : memref<2x1920xf32, #tpu.memory_space<vmem>>, vector<2x64xf32>
    tpu.vector_store %arg16[%c0_92, %c1728], %148 {strides = array<i32>} : memref<2x1920xf32, #tpu.memory_space<vmem>>, vector<2x64xf32>,
    %150 = vector.extract_strided_slice %93 {offsets = [56, 0], sizes = [2, 64], strides = [1, 1]} : vector<64x64xf32> to vector<2x64xf32>
    %c0_93 = arith.constant 0 : index
    %c1792 = arith.constant 1792 : index
    %151 = vector.load %arg16[%c0_93, %c1792] : memref<2x1920xf32, #tpu.memory_space<vmem>>, vector<2x64xf32>
    tpu.vector_store %arg16[%c0_93, %c1792], %150 {strides = array<i32>} : memref<2x1920xf32, #tpu.memory_space<vmem>>, vector<2x64xf32>,
    %152 = vector.extract_strided_slice %93 {offsets = [58, 0], sizes = [2, 64], strides = [1, 1]} : vector<64x64xf32> to vector<2x64xf32>
    %c0_94 = arith.constant 0 : index
    %c1856 = arith.constant 1856 : index
    %153 = vector.load %arg16[%c0_94, %c1856] : memref<2x1920xf32, #tpu.memory_space<vmem>>, vector<2x64xf32>
    tpu.vector_store %arg16[%c0_94, %c1856], %152 {strides = array<i32>} : memref<2x1920xf32, #tpu.memory_space<vmem>>, vector<2x64xf32>,
    %c0_95 = arith.constant 0 : index
    %c0_96 = arith.constant 0 : index
    %154 = vector.load %arg2[%c0_95, %c0_96] : memref<2x3xf32, #tpu.memory_space<vmem>>, vector<2x3xf32>
    %c0_97 = arith.constant 0 : index
    %c0_98 = arith.constant 0 : index
    %155 = vector.load %arg16[%c0_97, %c0_98] : memref<2x1920xf32, #tpu.memory_space<vmem>>, vector<2x1920xf32>
    %156 = arith.truncf %155 : vector<2x1920xf32> to vector<2x1920xbf16>
    %c0_99 = arith.constant 0 : index
    %c0_100 = arith.constant 0 : index
    %157 = vector.load %arg7[%c0_99, %c0_100] : memref<1920x256xbf16, #tpu.memory_space<vmem>>, vector<1920x256xbf16>
    %cst_101 = arith.constant dense<0.000000e+00> : vector<2x256xf32>
    %158 = tpu.matmul %156, %157, %cst_101 {dimension_numbers = #tpu.dot_dimension_numbers<[1], [0], [0], [1], [0, 0, 1, 1], [], []>} : vector<2x1920xbf16>, vector<1920x256xbf16>, vector<2x256xf32> -> vector<2x256xf32>
    %159 = vector.extract_strided_slice %154 {offsets = [0, 0], sizes = [2, 1], strides = [1, 1]} : vector<2x3xf32> to vector<2x1xf32>
    %c0_102 = arith.constant 0 : index
    %c0_103 = arith.constant 0 : index
    %160 = vector.load %arg8[%c0_102, %c0_103] : memref<3x256xf32, #tpu.memory_space<vmem>>, vector<1x256xf32>
    %161 = vector.broadcast %159 : vector<2x1xf32> to vector<2x256xf32>
    %162 = vector.broadcast %160 : vector<1x256xf32> to vector<2x256xf32>
    %163 = arith.mulf %161, %162 : vector<2x256xf32>
    %164 = vector.extract_strided_slice %154 {offsets = [0, 1], sizes = [2, 1], strides = [1, 1]} : vector<2x3xf32> to vector<2x1xf32>
    %c1 = arith.constant 1 : index
    %c0_104 = arith.constant 0 : index
    %165 = vector.load %arg8[%c1, %c0_104] : memref<3x256xf32, #tpu.memory_space<vmem>>, vector<1x256xf32>
    %166 = vector.broadcast %164 : vector<2x1xf32> to vector<2x256xf32>
    %167 = vector.broadcast %165 : vector<1x256xf32> to vector<2x256xf32>
    %168 = arith.mulf %166, %167 : vector<2x256xf32>
    %169 = arith.addf %163, %168 : vector<2x256xf32>
    %170 = vector.extract_strided_slice %154 {offsets = [0, 2], sizes = [2, 1], strides = [1, 1]} : vector<2x3xf32> to vector<2x1xf32>
    %c2 = arith.constant 2 : index
    %c0_105 = arith.constant 0 : index
    %171 = vector.load %arg8[%c2, %c0_105] : memref<3x256xf32, #tpu.memory_space<vmem>>, vector<1x256xf32>
    %172 = vector.broadcast %170 : vector<2x1xf32> to vector<2x256xf32>
    %173 = vector.broadcast %171 : vector<1x256xf32> to vector<2x256xf32>
    %174 = arith.mulf %172, %173 : vector<2x256xf32>
    %175 = arith.addf %169, %174 : vector<2x256xf32>
    %176 = arith.addf %158, %175 : vector<2x256xf32>
    %c0_106 = arith.constant 0 : index
    %c0_107 = arith.constant 0 : index
    %177 = vector.load %arg9[%c0_106, %c0_107] : memref<1x256xf32, #tpu.memory_space<vmem>>, vector<1x256xf32>
    %178 = vector.broadcast %177 : vector<1x256xf32> to vector<2x256xf32>
    %179 = arith.addf %176, %178 : vector<2x256xf32>
    %cst_108 = arith.constant 0.000000e+00 : f32
    %180 = vector.broadcast %cst_108 : f32 to vector<2x256xf32>
    %181 = arith.maximumf %179, %180 : vector<2x256xf32>
    %182 = arith.truncf %181 : vector<2x256xf32> to vector<2x256xbf16>
    %c0_109 = arith.constant 0 : index
    %c0_110 = arith.constant 0 : index
    %183 = vector.load %arg10[%c0_109, %c0_110] : memref<256x128xbf16, #tpu.memory_space<vmem>>, vector<256x128xbf16>
    %cst_111 = arith.constant dense<0.000000e+00> : vector<2x128xf32>
    %184 = tpu.matmul %182, %183, %cst_111 {dimension_numbers = #tpu.dot_dimension_numbers<[1], [0], [0], [1], [0, 0, 1, 1], [], []>} : vector<2x256xbf16>, vector<256x128xbf16>, vector<2x128xf32> -> vector<2x128xf32>
    %c0_112 = arith.constant 0 : index
    %c0_113 = arith.constant 0 : index
    %185 = vector.load %arg11[%c0_112, %c0_113] : memref<1x128xf32, #tpu.memory_space<vmem>>, vector<1x128xf32>
    %186 = vector.broadcast %185 : vector<1x128xf32> to vector<2x128xf32>
    %187 = arith.addf %184, %186 : vector<2x128xf32>
    %cst_114 = arith.constant 0.000000e+00 : f32
    %188 = vector.broadcast %cst_114 : f32 to vector<2x128xf32>
    %189 = arith.maximumf %187, %188 : vector<2x128xf32>
    %190 = arith.truncf %189 : vector<2x128xf32> to vector<2x128xbf16>
    %c0_115 = arith.constant 0 : index
    %c0_116 = arith.constant 0 : index
    %191 = vector.load %arg12[%c0_115, %c0_116] : memref<128x9xbf16, #tpu.memory_space<vmem>>, vector<128x9xbf16>
    %cst_117 = arith.constant dense<0.000000e+00> : vector<2x9xf32>
    %192 = tpu.matmul %190, %191, %cst_117 {dimension_numbers = #tpu.dot_dimension_numbers<[1], [0], [0], [1], [0, 0, 1, 1], [], []>} : vector<2x128xbf16>, vector<128x9xbf16>, vector<2x9xf32> -> vector<2x9xf32>
    %c0_118 = arith.constant 0 : index
    %c0_119 = arith.constant 0 : index
    %193 = vector.load %arg13[%c0_118, %c0_119] : memref<1x9xf32, #tpu.memory_space<vmem>>, vector<1x9xf32>
    %194 = vector.broadcast %193 : vector<1x9xf32> to vector<2x9xf32>
    %195 = arith.addf %192, %194 : vector<2x9xf32>
    %196 = vector.extract_strided_slice %195 {offsets = [0, 0], sizes = [2, 8], strides = [1, 1]} : vector<2x9xf32> to vector<2x8xf32>
    %197 = vector.extract_strided_slice %195 {offsets = [0, 8], sizes = [2, 1], strides = [1, 1]} : vector<2x9xf32> to vector<2x1xf32>
    %198 = vector.broadcast %197 : vector<2x1xf32> to vector<2x8xf32>
    %199 = arith.addf %198, %196 : vector<2x8xf32>
    %cst_120 = arith.constant dense<0.000000e+00> : vector<2xf32>
    %200 = vector.multi_reduction <add>, %196, %cst_120 [1] : vector<2x8xf32> to vector<2xf32>
    %201 = vector.shape_cast %200 : vector<2xf32> to vector<2x1xf32>
    %cst_121 = arith.constant 8.000000e+00 : f32
    %202 = vector.broadcast %cst_121 : f32 to vector<2x1xf32>
    %203 = arith.divf %201, %202 : vector<2x1xf32>
    %204 = vector.broadcast %203 : vector<2x1xf32> to vector<2x8xf32>
    %205 = arith.subf %199, %204 : vector<2x8xf32>
    %c0_122 = arith.constant 0 : index
    %c0_123 = arith.constant 0 : index
    %206 = vector.load %arg14[%c0_122, %c0_123] : memref<2x8xf32, #tpu.memory_space<vmem>>, vector<2x8xf32>
    tpu.vector_store %arg14[%c0_122, %c0_123], %205 {strides = array<i32>} : memref<2x8xf32, #tpu.memory_space<vmem>>, vector<2x8xf32>,
    return
  }
}

</mosaic_0001>

<bundles_post_ra>
// kernel: target_option_network_forward.1
= control target key start
LH: loop header
LB: loop body
LE: loop exit
PB: predicated region body
PF: predicated region fallthrough
CT: control target
= control target key end

     0   :  { %v20369_v1 = vmov 0   ;;  %vm733_vm0 = vcmask 883712   ;;  %vm812_vm1 = vcmask 1045504   ;;  %s20354_s0 = inlined_call_operand.vmem [shape: bf16[416,364], index: 0, kind: input, shape index: {}]   ;;  %s20355_s1 = inlined_call_operand.vmem [shape: bf16[2368,416], index: 1, kind: input, shape index: {}]   ;;  %s20356_s2 = inlined_call_operand.vmem [shape: f32[2,3], index: 2, kind: input, shape index: {}]   ;;  %s20357_s3 = inlined_call_operand.vmem [shape: bf16[364,16], index: 3, kind: input, shape index: {}]   ;;  %s20358_s4 = inlined_call_operand.vmem [shape: f32[1,16], index: 4, kind: input, shape index: {}]   ;;  %s20359_s5 = inlined_call_operand.vmem [shape: bf16[592,64], index: 5, kind: input, shape index: {}]   ;;  %s20360_s6 = inlined_call_operand.vmem [shape: f32[1,64], index: 6, kind: input, shape index: {}]   ;;  %s20361_s7 = inlined_call_operand.vmem [shape: bf16[1920,256], index: 7, kind: input, shape index: {}]   ;;  %s20362_s8 = inlined_call_operand.vmem [shape: f32[3,256], index: 8, kind: input, shape index: {}]   ;;  %s20363_s9 = inlined_call_operand.vmem [shape: f32[1,256], index: 9, kind: input, shape index: {}]   ;;  %s20364_s10 = inlined_call_operand.vmem [shape: bf16[256,128], index: 10, kind: input, shape index: {}]   ;;  %s20365_s11 = inlined_call_operand.vmem [shape: f32[1,128], index: 11, kind: input, shape index: {}]   ;;  %s20366_s12 = inlined_call_operand.vmem [shape: bf16[128,9], index: 12, kind: input, shape index: {}]   ;;  %s20367_s13 = inlined_call_operand.vmem [shape: f32[1,9], index: 13, kind: input, shape index: {}]   ;;  %s20368_s14 = inlined_call_operand.hbm [shape: f32[2,8], index: 14, kind: output, shape index: {}]  }
   0x1   :  { %v13911_v0 = vld [vmem:[%s20357_s3] sm:$0xff]   ;;  %816 = vmatprep.subr.bf16.mxu0 %v20369_v1  ;;  %13907 = vset.pattern.permute.xlu1 %v20369_v1  ;;  %v13912_v2 = vld [vmem:[%s20357_s3 + $0x8] sm:$0xff]   ;;  %v13913_v3 = vld [vmem:[%s20357_s3 + $0x10] sm:$0xff]  }
   0x2   :  { %817 = vmatpush1.bf16.msra.mxu0 %v13911_v0  ;;  %v13914_v4 = vld [vmem:[%s20357_s3 + $0x18] sm:$0xff]   ;;  %v13921_v5 = vld [vmem:[%s20357_s3 + $0x80] sm:$0xff]   ;;  %v13923_v6 = vld [vmem:[%s20357_s3 + $0x88] sm:$0xff]  }
   0x3   :  { %818 = vmatprep.subr.bf16.mxu0 %v20369_v1  ;;  %13385 = vmatprep.subr.bf16.mxu1 %v13921_v5  ;;  %v13915_v7 = vld [vmem:[%s20357_s3 + $0x20] sm:$0xff]   ;;  %v13925_v8 = vld [vmem:[%s20357_s3 + $0x90] sm:$0xff]   ;;  %v13916_v9 = vld [vmem:[%s20357_s3 + $0x28] sm:$0xff]  }
   0x4   :  { %13386 = vmatpush3.bf16.msra.mxu1 %v13921_v5  ;;  %v13927_v10 = vld [vmem:[%s20357_s3 + $0x98] sm:$0xff]   ;;  %v13917_v11 = vld [vmem:[%s20357_s3 + $0x30] sm:$0xff]   ;;  %v13929_v12 = vld [vmem:[%s20357_s3 + $0xa0] sm:$0xff]  }
   0x5   :  { %13387 = vmatprep.subr.bf16.mxu1 %v13923_v6  ;;  %v13918_v13 = vld [vmem:[%s20357_s3 + $0x38] sm:$0xff]   ;;  %v13936_v14 = vld [vmem:[%s20354_s0 + $0x4] ss:$12 sps:$4 sm:$0xff]   ;;  %v13937_v15 = vld [vmem:[%s20354_s0 + $0x8] ss:$12 sps:$4 sm:$0xff]  }
   0x6   :  { %819 = vmatpush1.bf16.msra.mxu0 %v13912_v2  ;;  %v13931_v16 = vld [vmem:[%s20357_s3 + $0xa8] sm:$0xff]   ;;  %848 = vmatprep.mubr.bf16.mxu0 %v13936_v14  ;;  %v13919_v17 = vld [vmem:[%s20357_s3 + $0x40] sm:$0xff]   ;;  %v13933_v18 = vld [vmem:[%s20357_s3 + $0xb0] sm:$0x3f]  }
   0x7   :  { %820 = vmatprep.subr.bf16.mxu0 %v20369_v1  ;;  %13399 = vmatprep.mubr.msk.bf16.mxu1 %vm733_vm0, %v13937_v15  ;;  %v13920_v19 = vld [vmem:[%s20357_s3 + $0x48] sm:$0xff]   ;;  %v814_v20 = vsel %vm812_vm1, %v13933_v18, 0  ;;  %v13945_v22 = vld [vmem:[%s20354_s0 + $0x38] ss:$12 sps:$4 sm:$0xff]   ;;  %v13922_v23 = vld [vmem:[%s20357_s3 + $0x50] sm:$0xff]  }
   0x8   :  { %13388 = vmatpush3.bf16.msra.mxu1 %v13923_v6  ;;  %v13938_v21 = vld [vmem:[%s20354_s0 + $0x20] ss:$12 sps:$4 sm:$0xff]   ;;  %v13924_v24 = vld [vmem:[%s20357_s3 + $0x58] sm:$0xff]   ;;  %v13953_v26 = vld [vmem:[%s20354_s0 + $0x68] ss:$12 sps:$4 sm:$0xff]  }
   0x9   :  { %13389 = vmatprep.subr.bf16.mxu1 %v13925_v8  ;;  %v13946_v25 = vld [vmem:[%s20354_s0 + $0x50] ss:$12 sps:$4 sm:$0xff]   ;;  %v13926_v27 = vld [vmem:[%s20357_s3 + $0x60] sm:$0xff]   ;;  %v13928_v28 = vld [vmem:[%s20357_s3 + $0x68] sm:$0xff]  }
   0xa   :  { %821 = vmatpush1.bf16.msra.mxu0 %v13913_v3  ;;  %v13954_v29 = vld [vmem:[%s20354_s0 + $0x80] ss:$12 sps:$4 sm:$0xff]   ;;  %v13961_v30 = vld [vmem:[%s20354_s0 + $0x98] ss:$12 sps:$4 sm:$0xff]   ;;  %v13930_v31 = vld [vmem:[%s20357_s3 + $0x70] sm:$0xff]  }
   0xb   :  { %822 = vmatprep.subr.bf16.mxu0 %v20369_v1  ;;  %v13932_v32 = vld [vmem:[%s20357_s3 + $0x78] sm:$0xff]   ;;  %v13934_v33 = vld [vmem:[%s20354_s0] ss:$12 sps:$4 sm:$0xff]   ;;  %v13969_v35 = vld [vmem:[%s20354_s0 + $0xc8] ss:$12 sps:$4 sm:$0xff]  }
   0xc   :  { %13390 = vmatpush3.bf16.msra.mxu1 %v13925_v8  ;;  %v13962_v34 = vld [vmem:[%s20354_s0 + $0xb0] ss:$12 sps:$4 sm:$0xff]   ;;  %v13970_v37 = vld [vmem:[%s20354_s0 + $0xe0] ss:$12 sps:$4 sm:$0xff]   ;;  %v13941_v38 = vld [vmem:[%s20354_s0 + $0x18] ss:$12 sps:$4 sm:$0xff]  }
   0xd   :  { %13391 = vmatprep.subr.bf16.mxu1 %v13927_v10  ;;  %v13939_v36 = vld [vmem:[%s20354_s0 + $0x1c] ss:$12 sps:$4 sm:$0xff]   ;;  %v13977_v39 = vld [vmem:[%s20354_s0 + $0xf8] ss:$12 sps:$4 sm:$0xff]   ;;  %v13942_v40 = vld [vmem:[%s20354_s0 + $0x34] ss:$12 sps:$4 sm:$0xff]  }
   0xe   :  { %823 = vmatpush1.bf16.msra.mxu0 %v13914_v4  ;;  %v13978_v41 = vld [vmem:[%s20354_s0 + $0x110] ss:$12 sps:$4 sm:$0xff]   ;;  %v13985_v43 = vld [vmem:[%s20354_s0 + $0x128] ss:$12 sps:$4 sm:$0xff]   ;;  %v13947_v44 = vld [vmem:[%s20354_s0 + $0x4c] ss:$12 sps:$4 sm:$0xff]  }
   0xf   :  { %824 = vmatprep.subr.bf16.mxu0 %v20369_v1  ;;  %v13944_v42 = vld [vmem:[%s20354_s0 + $0x30] ss:$12 sps:$4 sm:$0xff]   ;;  %v13986_v45 = vld [vmem:[%s20354_s0 + $0x140] ss:$12 sps:$4 sm:$0xff]   ;;  %v13949_v46 = vld [vmem:[%s20354_s0 + $0x48] ss:$12 sps:$4 sm:$0xff]  }
  0x10   :  { %13392 = vmatpush3.bf16.msra.mxu1 %v13927_v10  ;;  %v13993_v47 = vld [vmem:[%s20354_s0 + $0x158] ss:$12 sps:$4 sm:$0xff]   ;;  %v13994_v49 = vld [vmem:[%s20354_s0 + $0x170] ss:$12 sps:$4 sm:$0xff]   ;;  %v13952_v50 = vld [vmem:[%s20354_s0 + $0x60] ss:$12 sps:$4 sm:$0xff]  }
  0x11   :  { %13393 = vmatprep.subr.bf16.mxu1 %v13929_v12  ;;  %v13950_v48 = vld [vmem:[%s20354_s0 + $0x64] ss:$12 sps:$4 sm:$0xff]   ;;  %v13998_v51 = vld [vmem:[%s20354_s0 + $0x188] ss:$12 sps:$4 sm:$0xff]   ;;  %v13999_v53 = vld [vmem:[%s20354_s0 + $0x1a0] ss:$12 sps:$4 sm:$0xff]  }
  0x12   :  { %825 = vmatpush1.bf16.msra.mxu0 %v13915_v7  ;;  %v13955_v52 = vld [vmem:[%s20354_s0 + $0x7c] ss:$12 sps:$4 sm:$0xff]   ;;  %v13957_v54 = vld [vmem:[%s20354_s0 + $0x78] ss:$12 sps:$4 sm:$0xff]   ;;  %v13958_v56 = vld [vmem:[%s20354_s0 + $0x94] ss:$12 sps:$4 sm:$0xff]  }
  0x13   :  { %826 = vmatprep.subr.bf16.mxu0 %v20369_v1  ;;  %v14009_v55 = vld [vmem:[%s20354_s0 + $0x1b8] ss:$12 sps:$4 sm:$0xff]   ;;  %v14010_v57 = vld [vmem:[%s20354_s0 + $0x1d0] ss:$12 sps:$4 sm:$0xff]   ;;  %v13965_v60 = vld [vmem:[%s20354_s0 + $0xa8] ss:$12 sps:$4 sm:$0xff]  }
  0x14   :  { %13394 = vmatpush3.bf16.msra.mxu1 %v13929_v12  ;;  %v13960_v58 = vld [vmem:[%s20354_s0 + $0x90] ss:$12 sps:$4 sm:$0xff]   ;;  %v13963_v59 = vld [vmem:[%s20354_s0 + $0xac] ss:$12 sps:$4 sm:$0xff]   ;;  %v13974_v2 = vld [vmem:[%s20354_s0 + $0xf4] ss:$12 sps:$4 sm:$0xff]  }
  0x15   :  { %13395 = vmatprep.subr.bf16.mxu1 %v13931_v16  ;;  %v13966_v61 = vld [vmem:[%s20354_s0 + $0xc4] ss:$12 sps:$4 sm:$0xff]   ;;  %v13968_v62 = vld [vmem:[%s20354_s0 + $0xc0] ss:$12 sps:$4 sm:$0xff]   ;;  %v13971_v63 = vld [vmem:[%s20354_s0 + $0xdc] ss:$12 sps:$4 sm:$0xff]  }
  0x16   :  { %827 = vmatpush1.bf16.msra.mxu0 %v13916_v9  ;;  %v13973_v0 = vld [vmem:[%s20354_s0 + $0xd8] ss:$12 sps:$4 sm:$0xff]   ;;  %v13976_v3 = vld [vmem:[%s20354_s0 + $0xf0] ss:$12 sps:$4 sm:$0xff]   ;;  %v13981_v5 = vld [vmem:[%s20354_s0 + $0x108] ss:$12 sps:$4 sm:$0xff]  }
  0x17   :  { %828 = vmatprep.subr.bf16.mxu0 %v20369_v1  ;;  %v13979_v4 = vld [vmem:[%s20354_s0 + $0x10c] ss:$12 sps:$4 sm:$0xff]   ;;  %v13982_v6 = vld [vmem:[%s20354_s0 + $0x124] ss:$12 sps:$4 sm:$0xff]   ;;  %v13987_v8 = vld [vmem:[%s20354_s0 + $0x13c] ss:$12 sps:$4 sm:$0xff]  }
  0x18   :  { %13396 = vmatpush3.bf16.msra.mxu1 %v13931_v16  ;;  %v13984_v7 = vld [vmem:[%s20354_s0 + $0x120] ss:$12 sps:$4 sm:$0xff]   ;;  %v13989_v9 = vld [vmem:[%s20354_s0 + $0x138] ss:$12 sps:$4 sm:$0xff]   ;;  %v14003_v16 = vld [vmem:[%s20354_s0 + $0x19c] ss:$12 sps:$4 sm:$0xff]  }
  0x19   :  { %13891 = vmatprep.subr.msk.bf16.mxu1 %vm812_vm1, %v13933_v18  ;;  %v13990_v10 = vld [vmem:[%s20354_s0 + $0x154] ss:$12 sps:$4 sm:$0xff]   ;;  %v13995_v12 = vld [vmem:[%s20354_s0 + $0x16c] ss:$12 sps:$4 sm:$0xff]   ;;  %v14000_v14 = vld [vmem:[%s20354_s0 + $0x184] ss:$12 sps:$4 sm:$0xff]  }
  0x1a   :  { %829 = vmatpush1.bf16.msra.mxu0 %v13917_v11  ;;  %v13992_v11 = vld [vmem:[%s20354_s0 + $0x150] ss:$12 sps:$4 sm:$0xff]   ;;  %v14002_v15 = vld [vmem:[%s20354_s0 + $0x180] ss:$12 sps:$4 sm:$0xff]  }
  0x1b   :  { %830 = vmatprep.subr.bf16.mxu0 %v20369_v1  ;;  %v14006_v18 = vld [vmem:[%s20354_s0 + $0x1b4] ss:$12 sps:$4 sm:$0xff]  }
  0x1c   :  { %13398 = vmatpush3.bf16.msra.mxu1 %v814_v20  ;;  %v14011_v20 = vld [vmem:[%s20354_s0 + $0x1cc] ss:$12 sps:$4 sm:$0xff]  }
  0x1d   :  { %13489 = vmatprep.subr.bf16.mxu1 %v20369_v1 }
  0x1e   :  { %831 = vmatpush1.bf16.msra.mxu0 %v13918_v13  ;;  %v13997_v13 = vld [vmem:[%s20354_s0 + $0x168] ss:$12 sps:$4 sm:$0xff]  }
  0x1f   :  { %832 = vmatprep.subr.bf16.mxu0 %v20369_v1  ;;  %13400 = vmatmul.mubr.msk.bf16.vlgmr.msra.gmra.mrb[0].mxu1 %vm733_vm0, %v13938_v21  ;;  %v14013_v21 = vld [vmem:[%s20354_s0 + $0x1c8] ss:$12 sps:$4 sm:$0xff]  }
  0x20   :  { %13403 = vmatprep.mubr.msk.bf16.mxu1 %vm733_vm0, %v13945_v22  ;;  %v14014_v22 = vld [vmem:[%s20354_s0 + $0x1e4] ss:$12 sps:$4 sm:$0xff]  }
  0x22   :  { %833 = vmatpush1.bf16.msra.mxu0 %v13919_v17  ;;  %v14005_v17 = vld [vmem:[%s20354_s0 + $0x198] ss:$12 sps:$4 sm:$0xff]  }
  0x23   :  { %834 = vmatprep.subr.bf16.mxu0 %v20369_v1 }
  0x26   :  { %835 = vmatpush1.bf16.msra.mxu0 %v13920_v19  ;;  %v14008_v19 = vld [vmem:[%s20354_s0 + $0x1b0] ss:$12 sps:$4 sm:$0xff]  }
  0x27   :  { %836 = vmatprep.subr.bf16.mxu0 %v20369_v1  ;;  %13404 = vmatmul.mubr.msk.bf16.gmra.mrb[4].mxu1 %vm733_vm0, %v13946_v25  ;;  %v14016_v25 = vld [vmem:[%s20354_s0 + $0x1e0] ss:$12 sps:$4 sm:$0xff]  }
  0x28   :  { %13407 = vmatprep.mubr.msk.bf16.mxu1 %vm733_vm0, %v13953_v26  ;;  %v14019_v26 = vld [vmem:[%s20354_s0 + $0x1fc] ss:$12 sps:$4 sm:$0xff]  }
  0x2a   :  { %837 = vmatpush1.bf16.msra.mxu0 %v13922_v23  ;;  %v14017_v23 = vld [vmem:[%s20354_s0 + $0x1e8] ss:$12 sps:$4 sm:$0xff]  }
  0x2b   :  { %838 = vmatprep.subr.bf16.mxu0 %v20369_v1 }
  0x2e   :  { %839 = vmatpush1.bf16.msra.mxu0 %v13924_v24  ;;  %v14018_v24 = vld [vmem:[%s20354_s0 + $0x200] ss:$12 sps:$4 sm:$0xff]  }
  0x2f   :  { %840 = vmatprep.subr.bf16.mxu0 %v20369_v1  ;;  %13408 = vmatmul.mubr.msk.bf16.gmra.mrb[8].mxu1 %vm733_vm0, %v13954_v29  ;;  %v14024_v29 = vld [vmem:[%s20354_s0 + $0x210] ss:$12 sps:$4 sm:$0xff]  }
  0x30   :  { %13411 = vmatprep.mubr.msk.bf16.mxu1 %vm733_vm0, %v13961_v30 }
  0x32   :  { %841 = vmatpush1.bf16.msra.mxu0 %v13926_v27  ;;  %v14021_v27 = vld [vmem:[%s20354_s0 + $0x1f8] ss:$12 sps:$4 sm:$0xff]  }
  0x33   :  { %842 = vmatprep.subr.bf16.mxu0 %v20369_v1 }
  0x36   :  { %843 = vmatpush1.bf16.msra.mxu0 %v13928_v28  ;;  %v14022_v28 = vld [vmem:[%s20354_s0 + $0x214] ss:$12 sps:$4 sm:$0xff]  }
  0x37   :  { %844 = vmatprep.subr.bf16.mxu0 %v20369_v1  ;;  %13412 = vmatmul.mubr.msk.bf16.gmra.mrb[12].mxu1 %vm733_vm0, %v13962_v34 }
  0x38   :  { %13415 = vmatprep.mubr.msk.bf16.mxu1 %vm733_vm0, %v13969_v35 }
  0x3a   :  { %845 = vmatpush1.bf16.msra.mxu0 %v13930_v31  ;;  %v14025_v31 = vld [vmem:[%s20354_s0 + $0x22c] ss:$12 sps:$4 sm:$0xff]  }
  0x3b   :  { %846 = vmatprep.subr.bf16.mxu0 %v20369_v1 }
  0x3e   :  { %847 = vmatpush1.bf16.msra.mxu0 %v13932_v32 }
  0x3f   :  { %5225 = vmatprep.subr.bf16.mxu0 %v20369_v1  ;;  %13416 = vmatmul.mubr.msk.bf16.gmra.mrb[16].mxu1 %vm733_vm0, %v13970_v37  ;;  %v14029_v37 = vld [vmem:[%s20354_s0 + $0x230] ss:$12 sps:$4 sm:$0xff]  }
  0x40   :  { %13419 = vmatprep.mubr.msk.bf16.mxu1 %vm733_vm0, %v13977_v39  ;;  %v14030_v39 = vld [vmem:[%s20354_s0 + $0x244] ss:$12 sps:$4 sm:$0xff]  }
  0x41   :  { %849 = vmatmul.mubr.bf16.vlgmr.msra.gmra.mrb[0].mxu0 %v13934_v33  ;;  %v14027_v33 = vld [vmem:[%s20354_s0 + $0x228] ss:$12 sps:$4 sm:$0xff]  }
  0x42   :  { %856 = vmatprep.mubr.bf16.mxu0 %v13939_v36  ;;  %v14028_v36 = vld [vmem:[%s20354_s0 + $0x218] ss:$12 sps:$4 sm:$0xff]  }
  0x47   :  { %13420 = vmatmul.mubr.msk.bf16.gmra.mrb[20].mxu1 %vm733_vm0, %v13978_v41  ;;  %v14032_v41 = vld [vmem:[%s20354_s0 + $0x240] ss:$12 sps:$4 sm:$0xff]  }
  0x48   :  { %13423 = vmatprep.mubr.msk.bf16.mxu1 %vm733_vm0, %v13985_v43 }
  0x49   :  { %857 = vmatmul.mubr.bf16.gmra.mrb[4].mxu0 %v13941_v38 }
  0x4a   :  { %864 = vmatprep.mubr.bf16.mxu0 %v13942_v40 }
  0x4f   :  { %13424 = vmatmul.mubr.msk.bf16.gmra.mrb[24].mxu1 %vm733_vm0, %v13986_v45  ;;  %v14034_v45 = vld [vmem:[%s20354_s0 + $0x260] ss:$12 sps:$4 sm:$0xff]  }
  0x50   :  { %13427 = vmatprep.mubr.msk.bf16.mxu1 %vm733_vm0, %v13993_v47  ;;  %v14035_v47 = vld [vmem:[%s20354_s0 + $0x25c] ss:$12 sps:$4 sm:$0xff]  }
  0x51   :  { %865 = vmatmul.mubr.bf16.gmra.mrb[8].mxu0 %v13944_v42 }
  0x52   :  { %872 = vmatprep.mubr.bf16.mxu0 %v13947_v44  ;;  %v14033_v44 = vld [vmem:[%s20354_s0 + $0x248] ss:$12 sps:$4 sm:$0xff]  }
  0x57   :  { %13428 = vmatmul.mubr.msk.bf16.gmra.mrb[28].mxu1 %vm733_vm0, %v13994_v49  ;;  %v14037_v49 = vld [vmem:[%s20354_s0 + $0x258] ss:$12 sps:$4 sm:$0xff]  }
  0x58   :  { %13431 = vmatprep.mubr.msk.bf16.mxu1 %vm733_vm0, %v13998_v51 }
  0x59   :  { %873 = vmatmul.mubr.bf16.gmra.mrb[12].mxu0 %v13949_v46 }
  0x5a   :  { %880 = vmatprep.mubr.bf16.mxu0 %v13950_v48 }
  0x5f   :  { %13432 = vmatmul.mubr.msk.bf16.gmra.mrb[32].mxu1 %vm733_vm0, %v13999_v53 }
  0x60   :  { %13435 = vmatprep.mubr.msk.bf16.mxu1 %vm733_vm0, %v14009_v55 }
  0x61   :  { %881 = vmatmul.mubr.bf16.gmra.mrb[16].mxu0 %v13952_v50 }
  0x62   :  { %888 = vmatprep.mubr.bf16.mxu0 %v13955_v52  ;;  %v15829_v52 = vld [vmem:[%s20358_s4] ss:$0 sm:$0xff] }
  0x67   :  { %13436 = vmatmul.mubr.msk.bf16.gmra.mrb[36].mxu1 %vm733_vm0, %v14010_v57 }
  0x68   :  { %13439 = vmatprep.mubr.msk.bf16.mxu1 %vm733_vm0, %v14017_v23 }
  0x69   :  { %889 = vmatmul.mubr.bf16.gmra.mrb[20].mxu0 %v13957_v54 }
  0x6a   :  { %896 = vmatprep.mubr.bf16.mxu0 %v13958_v56 }
  0x6f   :  { %13440 = vmatmul.mubr.msk.bf16.gmra.mrb[40].mxu1 %vm733_vm0, %v14018_v24 }
  0x70   :  { %13443 = vmatprep.mubr.msk.bf16.mxu1 %vm733_vm0, %v14028_v36 }
  0x71   :  { %897 = vmatmul.mubr.bf16.gmra.mrb[24].mxu0 %v13960_v58 }
  0x72   :  { %904 = vmatprep.mubr.bf16.mxu0 %v13963_v59 }
  0x77   :  { %13444 = vmatmul.mubr.msk.bf16.gmra.mrb[44].mxu1 %vm733_vm0, %v14029_v37 }
  0x78   :  { %13447 = vmatprep.mubr.msk.bf16.mxu1 %vm733_vm0, %v14033_v44 }
  0x79   :  { %905 = vmatmul.mubr.bf16.gmra.mrb[28].mxu0 %v13965_v60 }
  0x7a   :  { %912 = vmatprep.mubr.bf16.mxu0 %v13966_v61 }
  0x7f   :  { %13448 = vmatmul.mubr.msk.bf16.gmra.mrb[48].mxu1 %vm733_vm0, %v14034_v45 }
  0x81   :  { %913 = vmatmul.mubr.bf16.gmra.mrb[32].mxu0 %v13968_v62 }
  0x82   :  { %920 = vmatprep.mubr.bf16.mxu0 %v13971_v63 }
  0x89   :  { %921 = vmatmul.mubr.bf16.gmra.mrb[36].mxu0 %v13973_v0  ;;  %v14040_v0 = vld [vmem:[%s20355_s1 + $0xc84] ss:$16 sps:$4 sm:$0xff]  }
  0x8a   :  { %928 = vmatprep.mubr.bf16.mxu0 %v13974_v2  ;;  %6057 = vmatprep.mubr.bf16.mxu1 %v14040_v0 }
  0x91   :  { %929 = vmatmul.mubr.bf16.gmra.mrb[40].mxu0 %v13976_v3 }
  0x92   :  { %936 = vmatprep.mubr.bf16.mxu0 %v13979_v4 }
  0x99   :  { %937 = vmatmul.mubr.bf16.gmra.mrb[44].mxu0 %v13981_v5 }
  0x9a   :  { %944 = vmatprep.mubr.bf16.mxu0 %v13982_v6 }
  0xa1   :  { %945 = vmatmul.mubr.bf16.gmra.mrb[48].mxu0 %v13984_v7 }
  0xa2   :  { %952 = vmatprep.mubr.bf16.mxu0 %v13987_v8 }
  0xa9   :  { %953 = vmatmul.mubr.bf16.gmra.mrb[52].mxu0 %v13989_v9 }
  0xaa   :  { %960 = vmatprep.mubr.bf16.mxu0 %v13990_v10 }
  0xb1   :  { %961 = vmatmul.mubr.bf16.gmra.mrb[56].mxu0 %v13992_v11 }
  0xb2   :  { %968 = vmatprep.mubr.bf16.mxu0 %v13995_v12 }
  0xb9   :  { %969 = vmatmul.mubr.bf16.gmra.mrb[60].mxu0 %v13997_v13 }
  0xba   :  { %976 = vmatprep.mubr.bf16.mxu0 %v14000_v14 }
  0xc1   :  { %977 = vmatmul.mubr.bf16.gmra.mrb[64].mxu0 %v14002_v15 }
  0xc2   :  { %984 = vmatprep.mubr.bf16.mxu0 %v14003_v16 }
  0xc9   :  { %985 = vmatmul.mubr.bf16.gmra.mrb[68].mxu0 %v14005_v17 }
  0xca   :  { %992 = vmatprep.mubr.bf16.mxu0 %v14006_v18 }
  0xd1   :  { %993 = vmatmul.mubr.bf16.gmra.mrb[72].mxu0 %v14008_v19 }
  0xd2   :  { %1000 = vmatprep.mubr.bf16.mxu0 %v14011_v20 }
  0xd9   :  { %1001 = vmatmul.mubr.bf16.gmra.mrb[76].mxu0 %v14013_v21 }
  0xda   :  { %1008 = vmatprep.mubr.bf16.mxu0 %v14014_v22 }
  0xe1   :  { %1009 = vmatmul.mubr.bf16.gmra.mrb[80].mxu0 %v14016_v25 }
  0xe2   :  { %1016 = vmatprep.mubr.bf16.mxu0 %v14019_v26 }
  0xe9   :  { %1017 = vmatmul.mubr.bf16.gmra.mrb[84].mxu0 %v14021_v27 }
  0xea   :  { %1024 = vmatprep.mubr.bf16.mxu0 %v14022_v28 }
  0xf1   :  { %1025 = vmatmul.mubr.bf16.gmra.mrb[88].mxu0 %v14024_v29 }
  0xf2   :  { %v13401_v30 = vpop.f32.mrb[0].mxu1  ;;  %1032 = vmatprep.mubr.bf16.mxu0 %v14025_v31 }
  0xf3   :  { %v1091_v32 = vpop.f32.mrb[1].mxu1 }
  0xf4   :  { %v13402_v34 = vpop.f32.mrb[2].mxu1 }
  0xf5   :  { %v1094_v35 = vpop.f32.mrb[3].mxu1 }
  0xf9   :  { %1033 = vmatmul.mubr.bf16.gmra.mrb[92].mxu0 %v14027_v33 }
  0xfa   :  { %v15789_v38 = vpop.f32.mrb[4].mxu1  ;;  %1040 = vmatprep.mubr.bf16.mxu0 %v14030_v39 }
  0xfb   :  { %v15795_v40 = vpop.f32.mrb[5].mxu1 }
  0xfc   :  { %v15800_v42 = vpop.f32.mrb[6].mxu1 }
  0xfd   :  { %v15802_v43 = vpop.f32.mrb[7].mxu1 }
 0x101   :  { %1041 = vmatmul.mubr.bf16.gmra.mrb[96].mxu0 %v14032_v41 }
 0x102   :  { %v15811_v46 = vpop.f32.mrb[8].mxu1  ;;  %1048 = vmatprep.mubr.bf16.mxu0 %v14035_v47 }
 0x103   :  { %v15817_v48 = vpop.f32.mrb[9].mxu1 }
 0x104   :  { %v15822_v50 = vpop.f32.mrb[10].mxu1 }
 0x105   :  { %v15824_v51 = vpop.f32.mrb[11].mxu1 }
 0x109   :  { %1049 = vmatmul.mubr.bf16.gmra.mrb[100].mxu0 %v14037_v49 }
 0x10a   :  { %v15831_v53 = vpop.f32.mrb[12].mxu1 }
 0x10b   :  { %v15833_v55 = vpop.f32.mrb[13].mxu1 }
 0x10c   :  { %v15836_v58 = vpop.f32.mrb[14].mxu1 }
 0x10d   :  { %v15838_v60 = vpop.f32.mrb[15].mxu1 }
 0x112   :  { %v15844_v5 = vpop.f32.mrb[16].mxu1 }
 0x113   :  { %v15846_v7 = vpop.f32.mrb[17].mxu1 }
 0x114   :  { %v850_v54 = vpop.f32.mrb[0].mxu0  ;;  %v15849_v11 = vpop.f32.mrb[18].mxu1 }
 0x115   :  { %v851_v56 = vadd.f32 %v15829_v52, %v850_v54  ;;  %v852_v57 = vpop.f32.mrb[1].mxu0  ;;  %v15851_v13 = vpop.f32.mrb[19].mxu1 }
 0x116   :  { %v853_v59 = vpop.f32.mrb[2].mxu0 }
 0x117   :  { %v854_v61 = vadd.f32 %v15829_v52, %v853_v59  ;;  %v1092_v62 = vadd.f32 %v1091_v32, %v851_v56  ;;  %v855_v63 = vpop.f32.mrb[3].mxu0 }
 0x119   :  { %v1095_v2 = vadd.f32 %v1094_v35, %v854_v61  ;;  %v1298_v3 = vmax.f32 %v1092_v62, 0.0 }
 0x11a   :  { %v15856_v20 = vpop.f32.mrb[20].mxu1 }
 0x11b   :  { %v1299_v4 = vmax.f32 %v1095_v2, 0.0  ;;  %v15858_v22 = vpop.f32.mrb[21].mxu1 }
 0x11c   :  { %v858_v6 = vpop.f32.mrb[4].mxu0  ;;  %v15861_v26 = vpop.f32.mrb[22].mxu1 }
 0x11d   :  { %v1350_v8 = vpack.c.bf16 %v1299_v4, %v1298_v3  ;;  %v859_v9 = vadd.f32 %v15829_v52, %v858_v6  ;;  %v860_v10 = vpop.f32.mrb[5].mxu0  ;;  %v15863_v28 = vpop.f32.mrb[23].mxu1 }
 0x11e   :  { %v861_v12 = vpop.f32.mrb[6].mxu0 }
 0x11f   :  { %v1100_v14 = vadd.f32 %v13401_v30, %v859_v9  ;;  %v862_v15 = vadd.f32 %v15829_v52, %v861_v12  ;;  %v863_v16 = vpop.f32.mrb[7].mxu0  ;;  %5226 = vmatpush1.bf16.msra.mxu0 %v1350_v8  ;;  %13505 = vmatpush1.bf16.msra.mxu1 %v1350_v8 }
 0x120   :  { %5227 = vmatprep.subr.bf16.mxu0 %v20369_v1  ;;  %13490 = vmatprep.subr.bf16.mxu1 %v20369_v1 }
 0x121   :  { %v1103_v17 = vadd.f32 %v13402_v34, %v862_v15  ;;  %v1300_v18 = vmax.f32 %v1100_v14, 0.0 }
 0x122   :  { %v15870_v35 = vpop.f32.mrb[24].mxu1 }
 0x123   :  { %v1301_v19 = vmax.f32 %v1103_v17, 0.0  ;;  %v15872_v37 = vpop.f32.mrb[25].mxu1 }
 0x124   :  { %v866_v21 = vpop.f32.mrb[8].mxu0  ;;  %v15875_v44 = vpop.f32.mrb[26].mxu1 }
 0x125   :  { %v867_v23 = vadd.f32 %v15829_v52, %v866_v21  ;;  %v868_v24 = vpop.f32.mrb[9].mxu0  ;;  %v1351_v25 = vpack.c.bf16 %v1301_v19, %v1300_v18  ;;  %v15877_v47 = vpop.f32.mrb[27].mxu1 }
 0x126   :  { %v869_v27 = vpop.f32.mrb[10].mxu0 }
 0x127   :  { %v870_v29 = vadd.f32 %v15829_v52, %v869_v27  ;;  %v1108_v30 = vadd.f32 %v15795_v40, %v867_v23  ;;  %v871_v31 = vpop.f32.mrb[11].mxu0  ;;  %5228 = vmatpush1.bf16.msra.mxu0 %v1351_v25  ;;  %13506 = vmatpush1.bf16.msra.mxu1 %v1351_v25 }
 0x128   :  { %5229 = vmatprep.subr.bf16.mxu0 %v20369_v1  ;;  %13491 = vmatprep.subr.bf16.mxu1 %v20369_v1 }
 0x129   :  { %v1111_v32 = vadd.f32 %v15802_v43, %v870_v29  ;;  %v1302_v33 = vmax.f32 %v1108_v30, 0.0 }
 0x12a   :  { %v15884_v61 = vpop.f32.mrb[28].mxu1 }
 0x12b   :  { %v1303_v34 = vmax.f32 %v1111_v32, 0.0  ;;  %v15886_v63 = vpop.f32.mrb[29].mxu1 }
 0x12c   :  { %v874_v36 = vpop.f32.mrb[12].mxu0  ;;  %v15889_v3 = vpop.f32.mrb[30].mxu1 }
 0x12d   :  { %v1352_v39 = vpack.c.bf16 %v1303_v34, %v1302_v33  ;;  %v875_v41 = vadd.f32 %v15829_v52, %v874_v36  ;;  %v876_v40 = vpop.f32.mrb[13].mxu0  ;;  %v15891_v6 = vpop.f32.mrb[31].mxu1 }
 0x12e   :  { %v877_v45 = vpop.f32.mrb[14].mxu0 }
 0x12f   :  { %v1116_v49 = vadd.f32 %v15789_v38, %v875_v41  ;;  %v878_v43 = vadd.f32 %v15829_v52, %v877_v45  ;;  %v879_v54 = vpop.f32.mrb[15].mxu0  ;;  %5230 = vmatpush1.bf16.msra.mxu0 %v1352_v39  ;;  %13507 = vmatpush1.bf16.msra.mxu1 %v1352_v39 }
 0x130   :  { %5231 = vmatprep.subr.bf16.mxu0 %v20369_v1  ;;  %13492 = vmatprep.subr.bf16.mxu1 %v20369_v1 }
 0x131   :  { %v1119_v56 = vadd.f32 %v15800_v42, %v878_v43  ;;  %v1304_v57 = vmax.f32 %v1116_v49, 0.0 }
 0x132   :  { %v15898_v15 = vpop.f32.mrb[32].mxu1 }
 0x133   :  { %v1305_v59 = vmax.f32 %v1119_v56, 0.0  ;;  %v15900_v17 = vpop.f32.mrb[33].mxu1 }
 0x134   :  { %v882_v62 = vpop.f32.mrb[16].mxu0  ;;  %v15903_v21 = vpop.f32.mrb[34].mxu1 }
 0x135   :  { %v883_v38 = vadd.f32 %v15829_v52, %v882_v62  ;;  %v884_v0 = vpop.f32.mrb[17].mxu0  ;;  %v1353_v2 = vpack.c.bf16 %v1305_v59, %v1304_v57  ;;  %v15905_v24 = vpop.f32.mrb[35].mxu1 }
 0x136   :  { %v885_v4 = vpop.f32.mrb[18].mxu0 }
 0x137   :  { %v886_v8 = vadd.f32 %v15829_v52, %v885_v4  ;;  %v1124_v42 = vadd.f32 %v15817_v48, %v883_v38  ;;  %v887_v9 = vpop.f32.mrb[19].mxu0  ;;  %5232 = vmatpush1.bf16.msra.mxu0 %v1353_v2  ;;  %13508 = vmatpush1.bf16.msra.mxu1 %v1353_v2 }
 0x138   :  { %5233 = vmatprep.subr.bf16.mxu0 %v20369_v1  ;;  %13493 = vmatprep.subr.bf16.mxu1 %v20369_v1 }
 0x139   :  { %v1127_v10 = vadd.f32 %v15824_v51, %v886_v8  ;;  %v1306_v12 = vmax.f32 %v1124_v42, 0.0 }
 0x13b   :  { %v1307_v14 = vmax.f32 %v1127_v10, 0.0 }
 0x13c   :  { %v890_v16 = vpop.f32.mrb[20].mxu0 }
 0x13d   :  { %v1354_v18 = vpack.c.bf16 %v1307_v14, %v1306_v12  ;;  %v891_v19 = vadd.f32 %v15829_v52, %v890_v16  ;;  %v892_v48 = vpop.f32.mrb[21].mxu0  ;;  %v15930_v16 = vpop.f32.mrb[36].mxu1 }
 0x13e   :  { %v893_v23 = vpop.f32.mrb[22].mxu0  ;;  %v15932_v48 = vpop.f32.mrb[37].mxu1 }
 0x13f   :  { %v1132_v25 = vadd.f32 %v15811_v46, %v891_v19  ;;  %v894_v51 = vadd.f32 %v15829_v52, %v893_v23  ;;  %v895_v27 = vpop.f32.mrb[23].mxu0  ;;  %5234 = vmatpush1.bf16.msra.mxu0 %v1354_v18  ;;  %13509 = vmatpush1.bf16.msra.mxu1 %v1354_v18 }
 0x140   :  { %5235 = vmatprep.subr.bf16.mxu0 %v20369_v1  ;;  %13494 = vmatprep.subr.bf16.mxu1 %v20369_v1 }
 0x141   :  { %v1135_v29 = vadd.f32 %v15822_v50, %v894_v51  ;;  %v1308_v30 = vmax.f32 %v1132_v25, 0.0  ;;  %v15934_v25 = vpop.f32.mrb[38].mxu1 }
 0x143   :  { %v1309_v31 = vmax.f32 %v1135_v29, 0.0  ;;  %v15937_v29 = vpop.f32.mrb[39].mxu1 }
 0x144   :  { %v898_v32 = vpop.f32.mrb[24].mxu0 }
 0x145   :  { %v899_v33 = vadd.f32 %v15829_v52, %v898_v32  ;;  %v900_v34 = vpop.f32.mrb[25].mxu0  ;;  %v1355_v36 = vpack.c.bf16 %v1309_v31, %v1308_v30 }
 0x146   :  { %v901_v39 = vpop.f32.mrb[26].mxu0 }
 0x147   :  { %v902_v46 = vadd.f32 %v15829_v52, %v901_v39  ;;  %v1140_v41 = vadd.f32 %v15833_v55, %v899_v33  ;;  %v903_v40 = vpop.f32.mrb[27].mxu0  ;;  %5236 = vmatpush1.bf16.msra.mxu0 %v1355_v36  ;;  %13510 = vmatpush1.bf16.msra.mxu1 %v1355_v36 }
 0x148   :  { %5237 = vmatprep.subr.bf16.mxu0 %v20369_v1  ;;  %13495 = vmatprep.subr.bf16.mxu1 %v20369_v1 }
 0x149   :  { %v1143_v50 = vadd.f32 %v15838_v60, %v902_v46  ;;  %v1310_v45 = vmax.f32 %v1140_v41, 0.0 }
 0x14b   :  { %v1311_v49 = vmax.f32 %v1143_v50, 0.0 }
 0x14c   :  { %v906_v43 = vpop.f32.mrb[28].mxu0 }
 0x14d   :  { %v1356_v54 = vpack.c.bf16 %v1311_v49, %v1310_v45  ;;  %v907_v56 = vadd.f32 %v15829_v52, %v906_v43  ;;  %v908_v57 = vpop.f32.mrb[29].mxu0 }
 0x14e   :  { %v909_v59 = vpop.f32.mrb[30].mxu0 }
 0x14f   :  { %v1148_v62 = vadd.f32 %v15831_v53, %v907_v56  ;;  %v910_v55 = vadd.f32 %v15829_v52, %v909_v59  ;;  %v911_v38 = vpop.f32.mrb[31].mxu0  ;;  %5238 = vmatpush1.bf16.msra.mxu0 %v1356_v54  ;;  %13511 = vmatpush1.bf16.msra.mxu1 %v1356_v54 }
 0x150   :  { %5239 = vmatprep.subr.bf16.mxu0 %v20369_v1  ;;  %13496 = vmatprep.subr.bf16.mxu1 %v20369_v1 }
 0x151   :  { %v1151_v60 = vadd.f32 %v15836_v58, %v910_v55  ;;  %v1312_v0 = vmax.f32 %v1148_v62, 0.0 }
 0x153   :  { %v1313_v2 = vmax.f32 %v1151_v60, 0.0 }
 0x154   :  { %v914_v4 = vpop.f32.mrb[32].mxu0 }
 0x155   :  { %v915_v8 = vadd.f32 %v15829_v52, %v914_v4  ;;  %v916_v42 = vpop.f32.mrb[33].mxu0  ;;  %v1357_v9 = vpack.c.bf16 %v1313_v2, %v1312_v0 }
 0x156   :  { %v917_v10 = vpop.f32.mrb[34].mxu0 }
 0x157   :  { %v918_v53 = vadd.f32 %v15829_v52, %v917_v10  ;;  %v1156_v12 = vadd.f32 %v15846_v7, %v915_v8  ;;  %v919_v14 = vpop.f32.mrb[35].mxu0  ;;  %5240 = vmatpush1.bf16.msra.mxu0 %v1357_v9  ;;  %13512 = vmatpush1.bf16.msra.mxu1 %v1357_v9 }
 0x158   :  { %5241 = vmatprep.subr.bf16.mxu0 %v20369_v1  ;;  %13497 = vmatprep.subr.bf16.mxu1 %v20369_v1 }
 0x159   :  { %v1159_v58 = vadd.f32 %v15851_v13, %v918_v53  ;;  %v1314_v18 = vmax.f32 %v1156_v12, 0.0 }
 0x15b   :  { %v1315_v19 = vmax.f32 %v1159_v58, 0.0 }
 0x15c   :  { %v922_v23 = vpop.f32.mrb[36].mxu0 }
 0x15d   :  { %v1358_v51 = vpack.c.bf16 %v1315_v19, %v1314_v18  ;;  %v923_v7 = vadd.f32 %v15829_v52, %v922_v23  ;;  %v924_v27 = vpop.f32.mrb[37].mxu0 }
 0x15e   :  { %v925_v30 = vpop.f32.mrb[38].mxu0 }
 0x15f   :  { %v1164_v31 = vadd.f32 %v15844_v5, %v923_v7  ;;  %v926_v13 = vadd.f32 %v15829_v52, %v925_v30  ;;  %v927_v32 = vpop.f32.mrb[39].mxu0  ;;  %5242 = vmatpush1.bf16.msra.mxu0 %v1358_v51  ;;  %13513 = vmatpush1.bf16.msra.mxu1 %v1358_v51 }
 0x160   :  { %5243 = vmatprep.subr.bf16.mxu0 %v20369_v1  ;;  %13498 = vmatprep.subr.bf16.mxu1 %v20369_v1 }
 0x161   :  { %v1167_v33 = vadd.f32 %v15849_v11, %v926_v13  ;;  %v1316_v34 = vmax.f32 %v1164_v31, 0.0 }
 0x163   :  { %v1317_v36 = vmax.f32 %v1167_v33, 0.0 }
 0x164   :  { %v930_v39 = vpop.f32.mrb[40].mxu0 }
 0x165   :  { %v931_v46 = vadd.f32 %v15829_v52, %v930_v39  ;;  %v932_v41 = vpop.f32.mrb[41].mxu0  ;;  %v1359_v40 = vpack.c.bf16 %v1317_v36, %v1316_v34 }
 0x166   :  { %v933_v50 = vpop.f32.mrb[42].mxu0 }
 0x167   :  { %v934_v5 = vadd.f32 %v15829_v52, %v933_v50  ;;  %v1172_v45 = vadd.f32 %v15858_v22, %v931_v46  ;;  %v935_v49 = vpop.f32.mrb[43].mxu0  ;;  %5244 = vmatpush1.bf16.msra.mxu0 %v1359_v40  ;;  %13514 = vmatpush1.bf16.msra.mxu1 %v1359_v40 }
 0x168   :  { %5245 = vmatprep.subr.bf16.mxu0 %v20369_v1  ;;  %13499 = vmatprep.subr.bf16.mxu1 %v20369_v1 }
 0x169   :  { %v1175_v11 = vadd.f32 %v15863_v28, %v934_v5  ;;  %v1318_v43 = vmax.f32 %v1172_v45, 0.0 }
 0x16b   :  { %v1319_v54 = vmax.f32 %v1175_v11, 0.0 }
 0x16c   :  { %v938_v56 = vpop.f32.mrb[44].mxu0 }
 0x16d   :  { %v1360_v57 = vpack.c.bf16 %v1319_v54, %v1318_v43  ;;  %v939_v59 = vadd.f32 %v15829_v52, %v938_v56  ;;  %v940_v62 = vpop.f32.mrb[45].mxu0 }
 0x16e   :  { %v941_v55 = vpop.f32.mrb[46].mxu0 }
 0x16f   :  { %v1180_v38 = vadd.f32 %v15856_v20, %v939_v59  ;;  %v942_v22 = vadd.f32 %v15829_v52, %v941_v55  ;;  %v943_v60 = vpop.f32.mrb[47].mxu0  ;;  %5246 = vmatpush1.bf16.msra.mxu0 %v1360_v57  ;;  %13515 = vmatpush1.bf16.msra.mxu1 %v1360_v57  ;;  %v14038_v55 = vld [vmem:[%s20355_s1 + $0xc80] ss:$16 sps:$4 sm:$0xff]  }
 0x170   :  { %5247 = vmatprep.subr.bf16.mxu0 %v20369_v1  ;;  %13500 = vmatprep.subr.bf16.mxu1 %v20369_v1  ;;  %v14041_v60 = vld [vmem:[%s20355_s1 + $0xca4] ss:$16 sps:$4 sm:$0xff]  }
 0x171   :  { %v1183_v28 = vadd.f32 %v15861_v26, %v942_v22  ;;  %v1320_v0 = vmax.f32 %v1180_v38, 0.0 }
 0x173   :  { %v1321_v2 = vmax.f32 %v1183_v28, 0.0 }
 0x174   :  { %v946_v4 = vpop.f32.mrb[48].mxu0 }
 0x175   :  { %v947_v8 = vadd.f32 %v15829_v52, %v946_v4  ;;  %v948_v42 = vpop.f32.mrb[49].mxu0  ;;  %v1361_v9 = vpack.c.bf16 %v1321_v2, %v1320_v0 }
 0x176   :  { %v949_v10 = vpop.f32.mrb[50].mxu0 }
 0x177   :  { %v950_v20 = vadd.f32 %v15829_v52, %v949_v10  ;;  %v1188_v53 = vadd.f32 %v15872_v37, %v947_v8  ;;  %v951_v12 = vpop.f32.mrb[51].mxu0  ;;  %5248 = vmatpush1.bf16.msra.mxu0 %v1361_v9  ;;  %13516 = vmatpush1.bf16.msra.mxu1 %v1361_v9  ;;  %v15967_v37 = vld [vmem:[%s20358_s4] ss:$0 sm:$0xff] }
 0x178   :  { %5249 = vmatprep.subr.bf16.mxu0 %v20369_v1  ;;  %13501 = vmatprep.subr.bf16.mxu1 %v20369_v1  ;;  %v14043_v10 = vld [vmem:[%s20355_s1 + $0xca0] ss:$16 sps:$4 sm:$0xff]   ;;  %v14044_v12 = vld [vmem:[%s20355_s1 + $0xcc4] ss:$16 sps:$4 sm:$0xff]  }
 0x179   :  { %v1191_v26 = vadd.f32 %v15877_v47, %v950_v20  ;;  %v1322_v14 = vmax.f32 %v1188_v53, 0.0 }
 0x17b   :  { %v1323_v58 = vmax.f32 %v1191_v26, 0.0 }
 0x17c   :  { %v954_v18 = vpop.f32.mrb[52].mxu0 }
 0x17d   :  { %v1362_v19 = vpack.c.bf16 %v1323_v58, %v1322_v14  ;;  %v955_v23 = vadd.f32 %v15829_v52, %v954_v18  ;;  %v956_v51 = vpop.f32.mrb[53].mxu0 }
 0x17e   :  { %v957_v7 = vpop.f32.mrb[54].mxu0 }
 0x17f   :  { %v1196_v27 = vadd.f32 %v15870_v35, %v955_v23  ;;  %v958_v30 = vadd.f32 %v15967_v37, %v957_v7  ;;  %v959_v31 = vpop.f32.mrb[55].mxu0  ;;  %5250 = vmatpush1.bf16.msra.mxu0 %v1362_v19  ;;  %13517 = vmatpush1.bf16.msra.mxu1 %v1362_v19 }
 0x180   :  { %5251 = vmatprep.subr.bf16.mxu0 %v20369_v1  ;;  %13502 = vmatprep.subr.bf16.mxu1 %v20369_v1 }
 0x181   :  { %v1199_v52 = vadd.f32 %v15875_v44, %v958_v30  ;;  %v1324_v47 = vmax.f32 %v1196_v27, 0.0 }
 0x183   :  { %v1325_v13 = vmax.f32 %v1199_v52, 0.0 }
 0x184   :  { %v962_v32 = vpop.f32.mrb[56].mxu0 }
 0x185   :  { %v963_v35 = vadd.f32 %v15967_v37, %v962_v32  ;;  %v964_v33 = vpop.f32.mrb[57].mxu0  ;;  %v1363_v34 = vpack.c.bf16 %v1325_v13, %v1324_v47 }
 0x186   :  { %v965_v36 = vpop.f32.mrb[58].mxu0 }
 0x187   :  { %v966_v39 = vadd.f32 %v15967_v37, %v965_v36  ;;  %v1204_v46 = vadd.f32 %v15886_v63, %v963_v35  ;;  %v967_v41 = vpop.f32.mrb[59].mxu0  ;;  %5252 = vmatpush1.bf16.msra.mxu0 %v1363_v34  ;;  %13518 = vmatpush1.bf16.msra.mxu1 %v1363_v34 }
 0x188   :  { %5253 = vmatprep.subr.bf16.mxu0 %v20369_v1  ;;  %13503 = vmatprep.subr.bf16.mxu1 %v20369_v1 }
 0x189   :  { %v1207_v44 = vadd.f32 %v15891_v6, %v966_v39  ;;  %v1326_v40 = vmax.f32 %v1204_v46, 0.0 }
 0x18b   :  { %v1327_v50 = vmax.f32 %v1207_v44, 0.0 }
 0x18c   :  { %v970_v5 = vpop.f32.mrb[60].mxu0 }
 0x18d   :  { %v1364_v45 = vpack.c.bf16 %v1327_v50, %v1326_v40  ;;  %v971_v49 = vadd.f32 %v15967_v37, %v970_v5  ;;  %v972_v11 = vpop.f32.mrb[61].mxu0 }
 0x18e   :  { %v973_v43 = vpop.f32.mrb[62].mxu0 }
 0x18f   :  { %v1212_v54 = vadd.f32 %v15884_v61, %v971_v49  ;;  %v974_v63 = vadd.f32 %v15967_v37, %v973_v43  ;;  %v975_v56 = vpop.f32.mrb[63].mxu0  ;;  %5254 = vmatpush1.bf16.msra.mxu0 %v1364_v45  ;;  %13519 = vmatpush1.bf16.msra.mxu1 %v1364_v45 }
 0x190   :  { %5255 = vmatprep.subr.bf16.mxu0 %v20369_v1  ;;  %13504 = vmatprep.subr.bf16.mxu1 %v20369_v1 }
 0x191   :  { %v1215_v6 = vadd.f32 %v15889_v3, %v974_v63  ;;  %v1328_v57 = vmax.f32 %v1212_v54, 0.0 }
 0x193   :  { %v1329_v59 = vmax.f32 %v1215_v6, 0.0 }
 0x194   :  { %v978_v62 = vpop.f32.mrb[64].mxu0 }
 0x195   :  { %v979_v61 = vadd.f32 %v15967_v37, %v978_v62  ;;  %v980_v38 = vpop.f32.mrb[65].mxu0  ;;  %v1365_v22 = vpack.c.bf16 %v1329_v59, %v1328_v57 }
 0x196   :  { %v981_v28 = vpop.f32.mrb[66].mxu0 }
 0x197   :  { %v1220_v0 = vadd.f32 %v15900_v17, %v979_v61  ;;  %v982_v3 = vadd.f32 %v15967_v37, %v981_v28  ;;  %v983_v2 = vpop.f32.mrb[67].mxu0  ;;  %5256 = vmatpush1.bf16.msra.mxu0 %v1365_v22  ;;  %13520 = vmatpush1.bf16.msra.mxu1 %v1365_v22 }
 0x198   :  { %6442 = vmatprep.subr.bf16.mxu1 %v20369_v1 }
 0x199   :  { %v1330_v4 = vmax.f32 %v1220_v0, 0.0  ;;  %v1223_v8 = vadd.f32 %v15905_v24, %v982_v3 }
 0x19a   :  { %6058 = vmatmul.mubr.bf16.vlgmr.msra.gmra.mrb[52].mxu1 %v14038_v55 }
 0x19b   :  { %v1331_v42 = vmax.f32 %v1223_v8, 0.0  ;;  %6065 = vmatprep.mubr.bf16.mxu1 %v14041_v60 }
 0x19c   :  { %v986_v9 = vpop.f32.mrb[68].mxu0 }
 0x19d   :  { %v987_v17 = vadd.f32 %v15967_v37, %v986_v9  ;;  %v988_v20 = vpop.f32.mrb[69].mxu0  ;;  %v1366_v53 = vpack.c.bf16 %v1331_v42, %v1330_v4 }
 0x19e   :  { %v989_v26 = vpop.f32.mrb[70].mxu0 }
 0x19f   :  { %v1228_v14 = vadd.f32 %v15898_v15, %v987_v17  ;;  %v990_v24 = vadd.f32 %v15967_v37, %v989_v26  ;;  %6443 = vmatpush1.bf16.msra.mxu1 %v1366_v53  ;;  %v991_v58 = vpop.f32.mrb[71].mxu0  ;;  %v14046_v15 = vld [vmem:[%s20355_s1 + $0xcc0] ss:$16 sps:$4 sm:$0xff]  }
 0x1a0   :  { %6444 = vmatprep.subr.bf16.mxu1 %v20369_v1 }
 0x1a1   :  { %v1332_v18 = vmax.f32 %v1228_v14, 0.0  ;;  %v1231_v19 = vadd.f32 %v15903_v21, %v990_v24 }
 0x1a2   :  { %6066 = vmatmul.mubr.bf16.gmra.mrb[56].mxu1 %v14043_v10 }
 0x1a3   :  { %v1333_v23 = vmax.f32 %v1231_v19, 0.0  ;;  %6073 = vmatprep.mubr.bf16.mxu1 %v14044_v12 }
 0x1a4   :  { %v994_v51 = vpop.f32.mrb[72].mxu0 }
 0x1a5   :  { %v1367_v7 = vpack.c.bf16 %v1333_v23, %v1332_v18  ;;  %v995_v27 = vadd.f32 %v15967_v37, %v994_v51  ;;  %v996_v30 = vpop.f32.mrb[73].mxu0 }
 0x1a6   :  { %v997_v31 = vpop.f32.mrb[74].mxu0 }
 0x1a7   :  { %19 = vsyncpa [#allocation5], 0  ;;  %6445 = vmatpush1.bf16.msra.mxu1 %v1367_v7  ;;  %v14047_v52 = vld [vmem:[%s20355_s1 + $0xce4] ss:$16 sps:$4 sm:$0xff]   ;;  %v998_v21 = vadd.f32 %v15967_v37, %v997_v31  ;;  %v1236_v47 = vadd.f32 %v15932_v48, %v995_v27  ;;  %v999_v13 = vpop.f32.mrb[75].mxu0  ;;  %v13441_v34 = vpop.f32.mrb[40].mxu1 }
 0x1a8   :  { %6446 = vmatprep.subr.bf16.mxu1 %v20369_v1  ;;  %v1251_v39 = vpop.f32.mrb[41].mxu1  ;;  %v14049_v48 = vld [vmem:[%s20355_s1 + $0xce0] ss:$16 sps:$4 sm:$0xff]   ;;  %v14053_v55 = vld [vmem:[%s20355_s1 + $0xd24] ss:$16 sps:$4 sm:$0xff]   ;;  %vm4780_vm2 = vcmask 261120  }
 0x1a9   :  { %v1334_v32 = vmax.f32 %v1236_v47, 0.0  ;;  %v1239_v35 = vadd.f32 %v15937_v29, %v998_v21  ;;  %v13442_v40 = vpop.f32.mrb[42].mxu1  ;;  %v14050_v29 = vld [vmem:[%s20355_s1 + $0xd04] ss:$16 sps:$4 sm:$0xff]   ;;  %v14055_v8 = vld [vmem:[%s20355_s1 + $0xd20] ss:$16 sps:$4 sm:$0xff]  }
 0x1aa   :  { %6074 = vmatmul.mubr.bf16.gmra.mrb[60].mxu1 %v14046_v15  ;;  %v1254_v5 = vpop.f32.mrb[43].mxu1  ;;  %v14056_v9 = vld [vmem:[%s20355_s1 + $0xd44] ss:$16 sps:$4 sm:$0xff]   ;;  %v14058_v24 = vld [vmem:[%s20355_s1 + $0xd40] ss:$16 sps:$4 sm:$0xff]   ;;  %vm7659_vm3 = vcmask 130048  }
 0x1ab   :  { %6081 = vmatprep.mubr.bf16.mxu1 %v14047_v52  ;;  %v1335_v33 = vmax.f32 %v1239_v35, 0.0  ;;  %v14059_v58 = vld [vmem:[%s20355_s1 + $0xd64] ss:$16 sps:$4 sm:$0xff]   ;;  %v14061_v18 = vld [vmem:[%s20355_s1 + $0xd60] ss:$16 sps:$4 sm:$0xff]   ;;  %v13445_v30 = vpop.f32.mrb[44].mxu1 }
 0x1ac   :  { %v1002_v36 = vpop.f32.mrb[76].mxu0  ;;  %v14062_v19 = vld [vmem:[%s20355_s1 + $0xd84] ss:$16 sps:$4 sm:$0xff]   ;;  %v14064_v7 = vld [vmem:[%s20355_s1 + $0xd80] ss:$16 sps:$4 sm:$0xff]   ;;  %v1267_v52 = vpop.f32.mrb[45].mxu1 }
 0x1ad   :  { %v1003_v46 = vadd.f32 %v15967_v37, %v1002_v36  ;;  %v1368_v41 = vpack.c.bf16 %v1335_v33, %v1334_v32  ;;  %v1004_v44 = vpop.f32.mrb[77].mxu0  ;;  %v14065_v15 = vld [vmem:[%s20355_s1 + $0xda4] ss:$16 sps:$4 sm:$0xff]   ;;  %v13446_v13 = vpop.f32.mrb[46].mxu1  ;;  %s15373_s3 = smov 16   ;;  %s15374_s16 = smov 32  }
 0x1ae   :  { %v1005_v50 = vpop.f32.mrb[78].mxu0  ;;  %v1270_v35 = vpop.f32.mrb[47].mxu1  ;;  %s15375_s30 = smov 48   ;;  %s15376_s28 = smov 64   ;;  %vm7700_vm4 = vcmask 261248   ;;  %vm7741_vm5 = vcmask 392448  }
 0x1af   :  { %v1244_v45 = vadd.f32 %v15930_v16, %v1003_v46  ;;  %v1006_v49 = vadd.f32 %v15967_v37, %v1005_v50  ;;  %6447 = vmatpush1.bf16.msra.mxu1 %v1368_v41  ;;  %v1007_v11 = vpop.f32.mrb[79].mxu0  ;;  %v14052_v16 = vld [vmem:[%s20355_s1 + $0xd00] ss:$16 sps:$4 sm:$0xff]   ;;  %s15377_s18 = smov 80   ;;  %s15378_s4 = smov 96   ;;  %vm7782_vm6 = vcmask 523648  }
 0x1b0   :  { %6448 = vmatprep.subr.bf16.mxu1 %v20369_v1  ;;  %s15379_s25 = smov 112   ;;  %vm7823_vm7 = vcmask 654848   ;;  %vm7864_vm8 = vcmask 786048   ;;  %vm7905_vm9 = vcmask 917248   ;;  %vm7946_vm10 = vcmask 1048448  }
 0x1b1   :  { %v1336_v43 = vmax.f32 %v1244_v45, 0.0  ;;  %v1247_v54 = vadd.f32 %v15934_v25, %v1006_v49  ;;  %vm9350_vm11 = vcmask 654336   ;;  %vm9566_vm12 = vcmask 517120  }
 0x1b2   :  { %6082 = vmatmul.mubr.bf16.gmra.mrb[64].mxu1 %v14049_v48  ;;  %vm9580_vm13 = vcmask 1041920   ;;  %vm15384_vm14 = vmmov 0   ;;  %vm12032_vm15 = vcmask 58368  }
 0x1b3   :  { %6089 = vmatprep.mubr.bf16.mxu1 %v14050_v29  ;;  %v1337_v63 = vmax.f32 %v1247_v54, 0.0  ;;  %v14067_v29 = vld [vmem:[%s20355_s1 + $0xda0] ss:$16 sps:$4 sm:$0xff]  }
 0x1b4   :  { %v1010_v56 = vpop.f32.mrb[80].mxu0 }
 0x1b5   :  { %v1369_v6 = vpack.c.bf16 %v1337_v63, %v1336_v43  ;;  %v1011_v57 = vadd.f32 %v15967_v37, %v1010_v56  ;;  %v1012_v59 = vpop.f32.mrb[81].mxu0  ;;  %v13449_v63 = vpop.f32.mrb[48].mxu1  ;;  %v14068_v56 = vld [vmem:[%s20355_s1 + $0xdc4] ss:$16 sps:$4 sm:$0xff]  }
 0x1b6   :  { %v1013_v62 = vpop.f32.mrb[82].mxu0 }
 0x1b7   :  { %6449 = vmatpush1.bf16.msra.mxu1 %v1369_v6  ;;  %v1014_v25 = vadd.f32 %v15967_v37, %v1013_v62  ;;  %v1252_v61 = vadd.f32 %v1251_v39, %v1011_v57  ;;  %v1015_v38 = vpop.f32.mrb[83].mxu0  ;;  %v1283_v57 = vpop.f32.mrb[49].mxu1 }
 0x1b8   :  { %6450 = vmatprep.subr.bf16.mxu1 %v20369_v1 }
 0x1b9   :  { %v1338_v22 = vmax.f32 %v1252_v61, 0.0  ;;  %v1255_v60 = vadd.f32 %v1254_v5, %v1014_v25 }
 0x1ba   :  { %6090 = vmatmul.mubr.bf16.gmra.mrb[68].mxu1 %v14052_v16 }
 0x1bb   :  { %6097 = vmatprep.mubr.bf16.mxu1 %v14053_v55  ;;  %v1339_v28 = vmax.f32 %v1255_v60, 0.0  ;;  %v13450_v55 = vpop.f32.mrb[50].mxu1 }
 0x1bc   :  { %v1018_v0 = vpop.f32.mrb[84].mxu0  ;;  %v1286_v61 = vpop.f32.mrb[51].mxu1 }
 0x1bd   :  { %v1019_v3 = vadd.f32 %v15967_v37, %v1018_v0  ;;  %v1370_v2 = vpack.c.bf16 %v1339_v28, %v1338_v22  ;;  %v1020_v4 = vpop.f32.mrb[85].mxu0 }
 0x1be   :  { %v1021_v42 = vpop.f32.mrb[86].mxu0 }
 0x1bf   :  { %v1260_v10 = vadd.f32 %v13441_v34, %v1019_v3  ;;  %v1022_v17 = vadd.f32 %v15967_v37, %v1021_v42  ;;  %6451 = vmatpush1.bf16.msra.mxu1 %v1370_v2  ;;  %v1023_v20 = vpop.f32.mrb[87].mxu0 }
 0x1c0   :  { %6452 = vmatprep.subr.bf16.mxu1 %v20369_v1 }
 0x1c1   :  { %v1340_v53 = vmax.f32 %v1260_v10, 0.0  ;;  %v1263_v12 = vadd.f32 %v13442_v40, %v1022_v17  ;;  %v14070_v10 = vld [vmem:[%s20355_s1 + $0xdc0] ss:$16 sps:$4 sm:$0xff]  }
 0x1c2   :  { %6098 = vmatmul.mubr.bf16.gmra.mrb[72].mxu1 %v14055_v8 }
 0x1c3   :  { %6105 = vmatprep.mubr.bf16.mxu1 %v14056_v9  ;;  %v1341_v26 = vmax.f32 %v1263_v12, 0.0  ;;  %v14071_v12 = vld [vmem:[%s20355_s1 + $0xde4] ss:$16 sps:$4 sm:$0xff]  }
 0x1c4   :  { %v1026_v23 = vpop.f32.mrb[88].mxu0 }
 0x1c5   :  { %v1371_v14 = vpack.c.bf16 %v1341_v26, %v1340_v53  ;;  %v1028_v51 = vpop.f32.mrb[89].mxu0  ;;  %v1027_v27 = vadd.f32 %v15967_v37, %v1026_v23  ;;  %v14080_v23 = vld [vmem:[%s20355_s1 + $0xe44] ss:$16 sps:$4 sm:$0xff]  }
 0x1c6   :  { %v1029_v31 = vpop.f32.mrb[90].mxu0  ;;  %v14082_v51 = vld [vmem:[%s20355_s1 + $0xe40] ss:$16 sps:$4 sm:$0xff]  }
 0x1c7   :  { %6453 = vmatpush1.bf16.msra.mxu1 %v1371_v14  ;;  %v1030_v21 = vadd.f32 %v15967_v37, %v1029_v31  ;;  %v1031_v47 = vpop.f32.mrb[91].mxu0  ;;  %v1268_v33 = vadd.f32 %v1267_v52, %v1027_v27  ;;  %v14073_v14 = vld [vmem:[%s20355_s1 + $0xde0] ss:$16 sps:$4 sm:$0xff]   ;;  %v14089_v31 = vld [vmem:[%s20355_s1 + $0xea4] ss:$16 sps:$4 sm:$0xff]  }
 0x1c8   :  { %6454 = vmatprep.subr.bf16.mxu1 %v20369_v1  ;;  %v14085_v27 = vld [vmem:[%s20355_s1 + $0xe60] ss:$16 sps:$4 sm:$0xff]  }
 0x1c9   :  { %v1271_v36 = vadd.f32 %v1270_v35, %v1030_v21  ;;  %v1342_v41 = vmax.f32 %v1268_v33, 0.0  ;;  %v14091_v52 = vld [vmem:[%s20355_s1 + $0xea0] ss:$16 sps:$4 sm:$0xff]   ;;  %v14092_v21 = vld [vmem:[%s20355_s1 + $0xec4] ss:$16 sps:$4 sm:$0xff]  }
 0x1ca   :  { %6106 = vmatmul.mubr.bf16.gmra.mrb[76].mxu1 %v14058_v24  ;;  %v14074_v24 = vld [vmem:[%s20355_s1 + $0xe04] ss:$16 sps:$4 sm:$0xff]   ;;  %v14094_v47 = vld [vmem:[%s20355_s1 + $0xec0] ss:$16 sps:$4 sm:$0xff]  }
 0x1cb   :  { %6113 = vmatprep.mubr.bf16.mxu1 %v14059_v58  ;;  %v1343_v40 = vmax.f32 %v1271_v36, 0.0  ;;  %v14076_v58 = vld [vmem:[%s20355_s1 + $0xe00] ss:$16 sps:$4 sm:$0xff]   ;;  %v14098_v35 = vld [vmem:[%s20355_s1 + $0xf04] ss:$16 sps:$4 sm:$0xff]  }
 0x1cc   :  { %v1034_v32 = vpop.f32.mrb[92].mxu0  ;;  %v14100_v33 = vld [vmem:[%s20355_s1 + $0xf00] ss:$16 sps:$4 sm:$0xff]  }
 0x1cd   :  { %v1035_v34 = vadd.f32 %v15967_v37, %v1034_v32  ;;  %v1036_v39 = vpop.f32.mrb[93].mxu0  ;;  %v1372_v49 = vpack.c.bf16 %v1343_v40, %v1342_v41  ;;  %v14097_v32 = vld [vmem:[%s20355_s1 + $0xee0] ss:$16 sps:$4 sm:$0xff]   ;;  %v14107_v41 = vld [vmem:[%s20355_s1 + $0xf64] ss:$16 sps:$4 sm:$0xff]  }
 0x1ce   :  { %v1037_v46 = vpop.f32.mrb[94].mxu0  ;;  %v14103_v36 = vld [vmem:[%s20355_s1 + $0xf20] ss:$16 sps:$4 sm:$0xff]   ;;  %v14104_v39 = vld [vmem:[%s20355_s1 + $0xf44] ss:$16 sps:$4 sm:$0xff]  }
 0x1cf   :  { %v1276_v44 = vadd.f32 %v13445_v30, %v1035_v34  ;;  %v1038_v48 = vadd.f32 %v15967_v37, %v1037_v46  ;;  %v1039_v50 = vpop.f32.mrb[95].mxu0  ;;  %6455 = vmatpush1.bf16.msra.mxu1 %v1372_v49  ;;  %v14086_v30 = vld [vmem:[%s20355_s1 + $0xe84] ss:$16 sps:$4 sm:$0xff]   ;;  %v14106_v46 = vld [vmem:[%s20355_s1 + $0xf40] ss:$16 sps:$4 sm:$0xff]  }
 0x1d0   :  { %6456 = vmatprep.subr.bf16.mxu1 %v20369_v1  ;;  %v14101_v34 = vld [vmem:[%s20355_s1 + $0xf24] ss:$16 sps:$4 sm:$0xff]  }
 0x1d1   :  { %v1344_v45 = vmax.f32 %v1276_v44, 0.0  ;;  %v1279_v11 = vadd.f32 %v13446_v13, %v1038_v48  ;;  %v14095_v13 = vld [vmem:[%s20355_s1 + $0xee4] ss:$16 sps:$4 sm:$0xff]   ;;  %v14109_v44 = vld [vmem:[%s20355_s1 + $0xf60] ss:$16 sps:$4 sm:$0xff]  }
 0x1d2   :  { %6114 = vmatmul.mubr.bf16.gmra.mrb[80].mxu1 %v14061_v18  ;;  %v14077_v18 = vld [vmem:[%s20355_s1 + $0xe24] ss:$16 sps:$4 sm:$0xff]   ;;  %v14112_v48 = vld [vmem:[%s20355_s1 + $0xf80] ss:$16 sps:$4 sm:$0xff]  }
 0x1d3   :  { %6121 = vmatprep.mubr.bf16.mxu1 %v14062_v19  ;;  %v1345_v59 = vmax.f32 %v1279_v11, 0.0  ;;  %v14079_v19 = vld [vmem:[%s20355_s1 + $0xe20] ss:$16 sps:$4 sm:$0xff]   ;;  %v14110_v40 = vld [vmem:[%s20355_s1 + $0xf84] ss:$16 sps:$4 sm:$0xff]  }
 0x1d4   :  { %v1042_v5 = vpop.f32.mrb[96].mxu0  ;;  %v14113_v50 = vld [vmem:[%s20355_s1 + $0xfa4] ss:$16 sps:$4 sm:$0xff]   ;;  %v14121_v11 = vld [vmem:[%s20355_s1 + $0xfe0] ss:$16 sps:$4 sm:$0xff]  }
 0x1d5   :  { %v1043_v43 = vadd.f32 %v15967_v37, %v1042_v5  ;;  %v1044_v54 = vpop.f32.mrb[97].mxu0  ;;  %v1373_v0 = vpack.c.bf16 %v1345_v59, %v1344_v45  ;;  %v14115_v5 = vld [vmem:[%s20355_s1 + $0xfa0] ss:$16 sps:$4 sm:$0xff]   ;;  %v14119_v49 = vld [vmem:[%s20355_s1 + $0xfe4] ss:$16 sps:$4 sm:$0xff]  }
 0x1d6   :  { %v1045_v6 = vpop.f32.mrb[98].mxu0  ;;  %v14118_v45 = vld [vmem:[%s20355_s1 + $0xfc0] ss:$16 sps:$4 sm:$0xff]   ;;  %v14131_v59 = vld [vmem:[%s20355_s1 + $0x1064] ss:$16 sps:$4 sm:$0xff]  }
 0x1d7   :  { %v1046_v16 = vadd.f32 %v15967_v37, %v1045_v6  ;;  %v1047_v62 = vpop.f32.mrb[99].mxu0  ;;  %v1284_v38 = vadd.f32 %v1283_v57, %v1043_v43  ;;  %6457 = vmatpush1.bf16.msra.mxu1 %v1373_v0  ;;  %v14122_v43 = vld [vmem:[%s20355_s1 + $0x1004] ss:$16 sps:$4 sm:$0xff]   ;;  %v14124_v54 = vld [vmem:[%s20355_s1 + $0x1000] ss:$16 sps:$4 sm:$0xff]  }
 0x1d8   :  { %6458 = vmatprep.subr.bf16.mxu1 %v20369_v1  ;;  %v14128_v6 = vld [vmem:[%s20355_s1 + $0x1044] ss:$16 sps:$4 sm:$0xff]   ;;  %v14130_v57 = vld [vmem:[%s20355_s1 + $0x1040] ss:$16 sps:$4 sm:$0xff]  }
 0x1d9   :  { %v1287_v60 = vadd.f32 %v1286_v61, %v1046_v16  ;;  %v1346_v2 = vmax.f32 %v1284_v38, 0.0  ;;  %v14133_v16 = vld [vmem:[%s20355_s1 + $0x1060] ss:$16 sps:$4 sm:$0xff]   ;;  %v14134_v62 = vld [vmem:[%s20355_s1 + $0x1084] ss:$16 sps:$4 sm:$0xff]  }
 0x1da   :  { %6122 = vmatmul.mubr.bf16.gmra.mrb[84].mxu1 %v14064_v7  ;;  %v14083_v7 = vld [vmem:[%s20355_s1 + $0xe64] ss:$16 sps:$4 sm:$0xff]   ;;  %v14136_v61 = vld [vmem:[%s20355_s1 + $0x1080] ss:$16 sps:$4 sm:$0xff]  }
 0x1db   :  { %6129 = vmatprep.mubr.bf16.mxu1 %v14065_v15  ;;  %v1347_v8 = vmax.f32 %v1287_v60, 0.0  ;;  %v14088_v15 = vld [vmem:[%s20355_s1 + $0xe80] ss:$16 sps:$4 sm:$0xff]   ;;  %v14137_v38 = vld [vmem:[%s20355_s1 + $0x10a4] ss:$16 sps:$4 sm:$0xff]  }
 0x1dc   :  { %v1050_v25 = vpop.f32.mrb[100].mxu0  ;;  %v14192_v60 = vld [vmem:[%s20355_s1 + $0x20] ss:$16 sps:$4 sm:$0xff]   ;;  %v14140_v0 = vld [vmem:[%s20355_s1 + $0x10c4] ss:$16 sps:$4 sm:$0xff]  }
 0x1dd   :  { %v1051_v22 = vadd.f32 %v15967_v37, %v1050_v25  ;;  %v1052_v28 = vpop.f32.mrb[101].mxu0  ;;  %v1374_v20 = vpack.c.bf16 %v1347_v8, %v1346_v2  ;;  %v14184_v25 = vld [vmem:[%s20355_s1 + $0x4] ss:$16 sps:$4 sm:$0xff]   ;;  %v14198_v2 = vld [vmem:[%s20355_s1 + $0x40] ss:$16 sps:$4 sm:$0xff]  }
 0x1de   :  { %v1053_v3 = vpop.f32.mrb[102].mxu0  ;;  %5257 = vmatprep.mubr.bf16.mxu0 %v14184_v25  ;;  %v14139_v28 = vld [vmem:[%s20355_s1 + $0x10a0] ss:$16 sps:$4 sm:$0xff]   ;;  %v14143_v8 = vld [vmem:[%s20355_s1 + $0x10e4] ss:$16 sps:$4 sm:$0xff]  }
 0x1df   :  { %v1292_v4 = vadd.f32 %v13449_v63, %v1051_v22  ;;  %v1054_v42 = vadd.f32 %v15967_v37, %v1053_v3  ;;  %v1055_v9 = vpop.f32.mrb[103].mxu0  ;;  %6459 = vmatpush1.bf16.msra.mxu1 %v1374_v20  ;;  %v14125_v63 = vld [vmem:[%s20355_s1 + $0x1024] ss:$16 sps:$4 sm:$0xff]   ;;  %v14185_v25 = vld [vmem:[%s20355_s1 + $0x8] ss:$16 sps:$4 sm:$0xff]  }
 0x1e0   :  { %6460 = vmatprep.subr.bf16.mxu1 %v20369_v1  ;;  %v14188_v22 = vld [vmem:[%s20355_s1 + $0x24] ss:$16 sps:$4 sm:$0xff]   ;;  %v14205_v9 = vld [vmem:[%s20355_s1 + $0x60] ss:$16 sps:$4 sm:$0xff]  }
 0x1e1   :  { %v1348_v17 = vmax.f32 %v1292_v4, 0.0  ;;  %v1295_v53 = vadd.f32 %v13450_v55, %v1054_v42  ;;  %v14182_v55 = vld [vmem:[%s20355_s1] ss:$16 sps:$4 sm:$0xff]   ;;  %v14194_v3 = vld [vmem:[%s20355_s1 + $0x44] ss:$16 sps:$4 sm:$0xff]  }
 0x1e2   :  { %6130 = vmatmul.mubr.bf16.gmra.mrb[88].mxu1 %v14067_v29  ;;  %v14116_v29 = vld [vmem:[%s20355_s1 + $0xfc4] ss:$16 sps:$4 sm:$0xff]   ;;  %5258 = vmatmul.mubr.bf16.vlgmr.msra.gmra.mrb[104].mxu0 %v14182_v55  ;;  %v14142_v4 = vld [vmem:[%s20355_s1 + $0x10c0] ss:$16 sps:$4 sm:$0xff]   ;;  %v14187_v55 = vld [vmem:[%s20355_s1 + $0xc] ss:$16 sps:$4 sm:$0xff]  }
 0x1e3   :  { %6137 = vmatprep.mubr.bf16.mxu1 %v14068_v56  ;;  %v1349_v26 = vmax.f32 %v1295_v53, 0.0  ;;  %v14127_v56 = vld [vmem:[%s20355_s1 + $0x1020] ss:$16 sps:$4 sm:$0xff]   ;;  %5265 = vmatprep.mubr.bf16.mxu0 %v14188_v22  ;;  %v14200_v42 = vld [vmem:[%s20355_s1 + $0x64] ss:$16 sps:$4 sm:$0xff]  }
 0x1e4   :  { %v14206_v20 = vld [vmem:[%s20355_s1 + $0x84] ss:$16 sps:$4 sm:$0xff]   ;;  %v14211_v53 = vld [vmem:[%s20355_s1 + $0x80] ss:$16 sps:$4 sm:$0xff]  }
 0x1e5   :  { %v1375_v37 = vpack.c.bf16 %v1349_v26, %v1348_v17  ;;  %v14146_v17 = vld [vmem:[%s20355_s1 + $0x1104] ss:$16 sps:$4 sm:$0xff]   ;;  %v14283_v22 = vld [vmem:[%s20355_s1 + $0x200] ss:$16 sps:$4 sm:$0xff]  }
 0x1e6   :  { %v14149_v26 = vld [vmem:[%s20355_s1 + $0x1124] ss:$16 sps:$4 sm:$0xff]  }
 0x1e7   :  { %6461 = vmatpush1.bf16.msra.mxu1 %v1375_v37  ;;  %v14212_v37 = vld [vmem:[%s20355_s1 + $0xa4] ss:$16 sps:$4 sm:$0xff]  }
 0x1ea   :  { %6138 = vmatmul.mubr.bf16.gmra.mrb[92].mxu1 %v14070_v10  ;;  %5266 = vmatmul.mubr.bf16.gmra.mrb[108].mxu0 %v14192_v60  ;;  %v14145_v10 = vld [vmem:[%s20355_s1 + $0x10e0] ss:$16 sps:$4 sm:$0xff]   ;;  %v14193_v60 = vld [vmem:[%s20355_s1 + $0x28] ss:$16 sps:$4 sm:$0xff]  }
 0x1eb   :  { %6145 = vmatprep.mubr.bf16.mxu1 %v14071_v12  ;;  %5273 = vmatprep.mubr.bf16.mxu0 %v14194_v3  ;;  %v14148_v12 = vld [vmem:[%s20355_s1 + $0x1100] ss:$16 sps:$4 sm:$0xff]  }
 0x1ec   :  { %v14289_v3 = vld [vmem:[%s20355_s1 + $0x220] ss:$16 sps:$4 sm:$0xff]  }
 0x1f2   :  { %6146 = vmatmul.mubr.bf16.gmra.mrb[96].mxu1 %v14073_v14  ;;  %5274 = vmatmul.mubr.bf16.gmra.mrb[112].mxu0 %v14198_v2  ;;  %v14217_v14 = vld [vmem:[%s20355_s1 + $0xa0] ss:$16 sps:$4 sm:$0xff]   ;;  %v14199_v2 = vld [vmem:[%s20355_s1 + $0x48] ss:$16 sps:$4 sm:$0xff]  }
 0x1f3   :  { %6153 = vmatprep.mubr.bf16.mxu1 %v14074_v24  ;;  %5281 = vmatprep.mubr.bf16.mxu0 %v14200_v42  ;;  %v14151_v24 = vld [vmem:[%s20355_s1 + $0x1120] ss:$16 sps:$4 sm:$0xff]  }
 0x1f4   :  { %v14295_v42 = vld [vmem:[%s20355_s1 + $0x240] ss:$16 sps:$4 sm:$0xff]  }
 0x1fa   :  { %6154 = vmatmul.mubr.bf16.gmra.mrb[100].mxu1 %v14076_v58  ;;  %5282 = vmatmul.mubr.bf16.gmra.mrb[116].mxu0 %v14205_v9  ;;  %v14152_v58 = vld [vmem:[%s20355_s1 + $0x1144] ss:$16 sps:$4 sm:$0xff]   ;;  %v14202_v9 = vld [vmem:[%s20355_s1 + $0x68] ss:$16 sps:$4 sm:$0xff]  }
 0x1fb   :  { %6161 = vmatprep.mubr.bf16.mxu1 %v14077_v18  ;;  %5289 = vmatprep.mubr.bf16.mxu0 %v14206_v20  ;;  %v14218_v18 = vld [vmem:[%s20355_s1 + $0xc4] ss:$16 sps:$4 sm:$0xff]   ;;  %v14301_v20 = vld [vmem:[%s20355_s1 + $0x260] ss:$16 sps:$4 sm:$0xff]  }
 0x202   :  { %6162 = vmatmul.mubr.bf16.gmra.mrb[104].mxu1 %v14079_v19  ;;  %5290 = vmatmul.mubr.bf16.gmra.mrb[120].mxu0 %v14211_v53  ;;  %v14223_v19 = vld [vmem:[%s20355_s1 + $0xc0] ss:$16 sps:$4 sm:$0xff]   ;;  %v14208_v53 = vld [vmem:[%s20355_s1 + $0x88] ss:$16 sps:$4 sm:$0xff]  }
 0x203   :  { %6169 = vmatprep.mubr.bf16.mxu1 %v14080_v23  ;;  %5297 = vmatprep.mubr.bf16.mxu0 %v14212_v37  ;;  %v14154_v23 = vld [vmem:[%s20355_s1 + $0x1140] ss:$16 sps:$4 sm:$0xff]  }
 0x204   :  { %v14307_v37 = vld [vmem:[%s20355_s1 + $0x280] ss:$16 sps:$4 sm:$0xff]  }
 0x20a   :  { %6170 = vmatmul.mubr.bf16.gmra.mrb[108].mxu1 %v14082_v51  ;;  %5298 = vmatmul.mubr.bf16.gmra.mrb[124].mxu0 %v14217_v14  ;;  %v14155_v51 = vld [vmem:[%s20355_s1 + $0x1164] ss:$16 sps:$4 sm:$0xff]   ;;  %v14214_v14 = vld [vmem:[%s20355_s1 + $0xa8] ss:$16 sps:$4 sm:$0xff]  }
 0x20b   :  { %6177 = vmatprep.mubr.bf16.mxu1 %v14083_v7  ;;  %5305 = vmatprep.mubr.bf16.mxu0 %v14218_v18  ;;  %v14224_v7 = vld [vmem:[%s20355_s1 + $0xe4] ss:$16 sps:$4 sm:$0xff]   ;;  %v14313_v18 = vld [vmem:[%s20355_s1 + $0x2a0] ss:$16 sps:$4 sm:$0xff]  }
 0x212   :  { %6178 = vmatmul.mubr.bf16.gmra.mrb[112].mxu1 %v14085_v27  ;;  %5306 = vmatmul.mubr.bf16.gmra.mrb[128].mxu0 %v14223_v19  ;;  %v14229_v27 = vld [vmem:[%s20355_s1 + $0xe0] ss:$16 sps:$4 sm:$0xff]   ;;  %v14220_v19 = vld [vmem:[%s20355_s1 + $0xc8] ss:$16 sps:$4 sm:$0xff]  }
 0x213   :  { %6185 = vmatprep.mubr.bf16.mxu1 %v14086_v30  ;;  %5313 = vmatprep.mubr.bf16.mxu0 %v14224_v7  ;;  %v14157_v30 = vld [vmem:[%s20355_s1 + $0x1160] ss:$16 sps:$4 sm:$0xff]  }
 0x214   :  { %v14319_v7 = vld [vmem:[%s20355_s1 + $0x2c0] ss:$16 sps:$4 sm:$0xff]  }
 0x21a   :  { %6186 = vmatmul.mubr.bf16.gmra.mrb[116].mxu1 %v14088_v15  ;;  %5314 = vmatmul.mubr.bf16.gmra.mrb[132].mxu0 %v14229_v27  ;;  %v14158_v15 = vld [vmem:[%s20355_s1 + $0x1184] ss:$16 sps:$4 sm:$0xff]   ;;  %v14226_v27 = vld [vmem:[%s20355_s1 + $0xe8] ss:$16 sps:$4 sm:$0xff]  }
 0x21b   :  { %6193 = vmatprep.mubr.bf16.mxu1 %v14089_v31  ;;  %v14230_v31 = vld [vmem:[%s20355_s1 + $0x104] ss:$16 sps:$4 sm:$0xff]  }
 0x21c   :  { %5321 = vmatprep.mubr.bf16.mxu0 %v14230_v31  ;;  %v14325_v31 = vld [vmem:[%s20355_s1 + $0x2e0] ss:$16 sps:$4 sm:$0xff]  }
 0x222   :  { %6194 = vmatmul.mubr.bf16.gmra.mrb[120].mxu1 %v14091_v52  ;;  %v14235_v52 = vld [vmem:[%s20355_s1 + $0x100] ss:$16 sps:$4 sm:$0xff]  }
 0x223   :  { %6201 = vmatprep.mubr.bf16.mxu1 %v14092_v21  ;;  %5322 = vmatmul.mubr.bf16.gmra.mrb[136].mxu0 %v14235_v52  ;;  %v14160_v21 = vld [vmem:[%s20355_s1 + $0x1180] ss:$16 sps:$4 sm:$0xff]   ;;  %v14232_v52 = vld [vmem:[%s20355_s1 + $0x108] ss:$16 sps:$4 sm:$0xff]  }
 0x22a   :  { %6202 = vmatmul.mubr.bf16.gmra.mrb[124].mxu1 %v14094_v47  ;;  %v14161_v47 = vld [vmem:[%s20355_s1 + $0x11a4] ss:$16 sps:$4 sm:$0xff]  }
 0x22b   :  { %6209 = vmatprep.mubr.bf16.mxu1 %v14095_v13  ;;  %v14236_v13 = vld [vmem:[%s20355_s1 + $0x124] ss:$16 sps:$4 sm:$0xff]  }
 0x22c   :  { %5329 = vmatprep.mubr.bf16.mxu0 %v14236_v13  ;;  %v14331_v13 = vld [vmem:[%s20355_s1 + $0x300] ss:$16 sps:$4 sm:$0xff]  }
 0x232   :  { %6210 = vmatmul.mubr.bf16.gmra.mrb[128].mxu1 %v14097_v32  ;;  %v14241_v32 = vld [vmem:[%s20355_s1 + $0x120] ss:$16 sps:$4 sm:$0xff]  }
 0x233   :  { %6217 = vmatprep.mubr.bf16.mxu1 %v14098_v35  ;;  %5330 = vmatmul.mubr.bf16.gmra.mrb[140].mxu0 %v14241_v32  ;;  %v14163_v35 = vld [vmem:[%s20355_s1 + $0x11a0] ss:$16 sps:$4 sm:$0xff]   ;;  %v14238_v32 = vld [vmem:[%s20355_s1 + $0x128] ss:$16 sps:$4 sm:$0xff]  }
 0x23a   :  { %6218 = vmatmul.mubr.bf16.gmra.mrb[132].mxu1 %v14100_v33  ;;  %v14164_v33 = vld [vmem:[%s20355_s1 + $0x11c4] ss:$16 sps:$4 sm:$0xff]  }
 0x23b   :  { %6225 = vmatprep.mubr.bf16.mxu1 %v14101_v34  ;;  %v14242_v34 = vld [vmem:[%s20355_s1 + $0x144] ss:$16 sps:$4 sm:$0xff]  }
 0x23c   :  { %5337 = vmatprep.mubr.bf16.mxu0 %v14242_v34  ;;  %v14337_v34 = vld [vmem:[%s20355_s1 + $0x320] ss:$16 sps:$4 sm:$0xff]  }
 0x242   :  { %6226 = vmatmul.mubr.bf16.gmra.mrb[136].mxu1 %v14103_v36  ;;  %v14247_v36 = vld [vmem:[%s20355_s1 + $0x140] ss:$16 sps:$4 sm:$0xff]  }
 0x243   :  { %6233 = vmatprep.mubr.bf16.mxu1 %v14104_v39  ;;  %5338 = vmatmul.mubr.bf16.gmra.mrb[144].mxu0 %v14247_v36  ;;  %v14166_v39 = vld [vmem:[%s20355_s1 + $0x11c0] ss:$16 sps:$4 sm:$0xff]   ;;  %v14244_v36 = vld [vmem:[%s20355_s1 + $0x148] ss:$16 sps:$4 sm:$0xff]  }
 0x24a   :  { %6234 = vmatmul.mubr.bf16.gmra.mrb[140].mxu1 %v14106_v46  ;;  %v14167_v46 = vld [vmem:[%s20355_s1 + $0x11e4] ss:$16 sps:$4 sm:$0xff]  }
 0x24b   :  { %6241 = vmatprep.mubr.bf16.mxu1 %v14107_v41  ;;  %v14248_v41 = vld [vmem:[%s20355_s1 + $0x164] ss:$16 sps:$4 sm:$0xff]  }
 0x24c   :  { %5345 = vmatprep.mubr.bf16.mxu0 %v14248_v41  ;;  %v14343_v41 = vld [vmem:[%s20355_s1 + $0x340] ss:$16 sps:$4 sm:$0xff]  }
 0x252   :  { %6242 = vmatmul.mubr.bf16.gmra.mrb[144].mxu1 %v14109_v44  ;;  %v14253_v44 = vld [vmem:[%s20355_s1 + $0x160] ss:$16 sps:$4 sm:$0xff]  }
 0x253   :  { %6249 = vmatprep.mubr.bf16.mxu1 %v14110_v40  ;;  %5346 = vmatmul.mubr.bf16.gmra.mrb[148].mxu0 %v14253_v44  ;;  %v14169_v40 = vld [vmem:[%s20355_s1 + $0x11e0] ss:$16 sps:$4 sm:$0xff]  }
 0x25a   :  { %6250 = vmatmul.mubr.bf16.gmra.mrb[148].mxu1 %v14112_v48  ;;  %v14170_v48 = vld [vmem:[%s20355_s1 + $0x1204] ss:$16 sps:$4 sm:$0xff]  }
 0x25b   :  { %6257 = vmatprep.mubr.bf16.mxu1 %v14113_v50  ;;  %v14254_v50 = vld [vmem:[%s20355_s1 + $0x184] ss:$16 sps:$4 sm:$0xff]  }
 0x25c   :  { %5353 = vmatprep.mubr.bf16.mxu0 %v14254_v50  ;;  %v14344_v50 = vld [vmem:[%s20355_s1 + $0x364] ss:$16 sps:$4 sm:$0xff]  }
 0x262   :  { %6258 = vmatmul.mubr.bf16.gmra.mrb[152].mxu1 %v14115_v5  ;;  %v14259_v5 = vld [vmem:[%s20355_s1 + $0x180] ss:$16 sps:$4 sm:$0xff]  }
 0x263   :  { %6265 = vmatprep.mubr.bf16.mxu1 %v14116_v29  ;;  %5354 = vmatmul.mubr.bf16.gmra.mrb[152].mxu0 %v14259_v5  ;;  %v14172_v29 = vld [vmem:[%s20355_s1 + $0x1200] ss:$16 sps:$4 sm:$0xff]   ;;  %v14258_v5 = vld [vmem:[%s20355_s1 + $0x18c] ss:$16 sps:$4 sm:$0xff]  }
 0x26a   :  { %6266 = vmatmul.mubr.bf16.gmra.mrb[156].mxu1 %v14118_v45  ;;  %v14173_v45 = vld [vmem:[%s20355_s1 + $0x1224] ss:$16 sps:$4 sm:$0xff]  }
 0x26b   :  { %6273 = vmatprep.mubr.bf16.mxu1 %v14119_v49  ;;  %v14260_v49 = vld [vmem:[%s20355_s1 + $0x1a4] ss:$16 sps:$4 sm:$0xff]  }
 0x26c   :  { %5361 = vmatprep.mubr.bf16.mxu0 %v14260_v49 }
 0x272   :  { %6274 = vmatmul.mubr.bf16.gmra.mrb[160].mxu1 %v14121_v11  ;;  %v14265_v11 = vld [vmem:[%s20355_s1 + $0x1a0] ss:$16 sps:$4 sm:$0xff]  }
 0x273   :  { %6281 = vmatprep.mubr.bf16.mxu1 %v14122_v43  ;;  %5362 = vmatmul.mubr.bf16.gmra.mrb[156].mxu0 %v14265_v11  ;;  %v14175_v43 = vld [vmem:[%s20355_s1 + $0x1220] ss:$16 sps:$4 sm:$0xff]  }
 0x27a   :  { %6282 = vmatmul.mubr.bf16.gmra.mrb[164].mxu1 %v14124_v54  ;;  %v14176_v54 = vld [vmem:[%s20355_s1 + $0x1244] ss:$16 sps:$4 sm:$0xff]  }
 0x27b   :  { %6289 = vmatprep.mubr.bf16.mxu1 %v14125_v63  ;;  %v14266_v63 = vld [vmem:[%s20355_s1 + $0x1c4] ss:$16 sps:$4 sm:$0xff]  }
 0x27c   :  { %5369 = vmatprep.mubr.bf16.mxu0 %v14266_v63  ;;  %v14350_v63 = vld [vmem:[%s20355_s1 + $0x384] ss:$16 sps:$4 sm:$0xff]  }
 0x282   :  { %6290 = vmatmul.mubr.bf16.gmra.mrb[168].mxu1 %v14127_v56  ;;  %v14271_v56 = vld [vmem:[%s20355_s1 + $0x1c0] ss:$16 sps:$4 sm:$0xff]  }
 0x283   :  { %6297 = vmatprep.mubr.bf16.mxu1 %v14128_v6  ;;  %5370 = vmatmul.mubr.bf16.gmra.mrb[160].mxu0 %v14271_v56  ;;  %v14178_v6 = vld [vmem:[%s20355_s1 + $0x1240] ss:$16 sps:$4 sm:$0xff]   ;;  %v14264_v56 = vld [vmem:[%s20355_s1 + $0x1ac] ss:$16 sps:$4 sm:$0xff]  }
 0x28a   :  { %6298 = vmatmul.mubr.bf16.gmra.mrb[172].mxu1 %v14130_v57  ;;  %v14179_v57 = vld [vmem:[%s20355_s1 + $0x1264] ss:$16 sps:$4 sm:$0xff]  }
 0x28b   :  { %6305 = vmatprep.mubr.bf16.mxu1 %v14131_v59  ;;  %v14272_v59 = vld [vmem:[%s20355_s1 + $0x1e4] ss:$16 sps:$4 sm:$0xff]  }
 0x28c   :  { %5377 = vmatprep.mubr.bf16.mxu0 %v14272_v59 }
 0x292   :  { %6306 = vmatmul.mubr.bf16.gmra.mrb[176].mxu1 %v14133_v16  ;;  %v14277_v16 = vld [vmem:[%s20355_s1 + $0x1e0] ss:$16 sps:$4 sm:$0xff]  }
 0x293   :  { %6313 = vmatprep.mubr.bf16.mxu1 %v14134_v62  ;;  %5378 = vmatmul.mubr.bf16.gmra.mrb[164].mxu0 %v14277_v16  ;;  %v14181_v62 = vld [vmem:[%s20355_s1 + $0x1260] ss:$16 sps:$4 sm:$0xff]  }
 0x29a   :  { %6314 = vmatmul.mubr.bf16.gmra.mrb[180].mxu1 %v14136_v61  ;;  %v14278_v61 = vld [vmem:[%s20355_s1 + $0x204] ss:$16 sps:$4 sm:$0xff]  }
 0x29b   :  { %6321 = vmatprep.mubr.bf16.mxu1 %v14137_v38  ;;  %v14190_v38 = vld [vmem:[%s20355_s1 + $0x2c] ss:$16 sps:$4 sm:$0xff]   ;;  %5385 = vmatprep.mubr.bf16.mxu0 %v14278_v61 }
 0x29c   :  { %5386 = vmatmul.mubr.bf16.gmra.mrb[168].mxu0 %v14283_v22  ;;  %v14270_v61 = vld [vmem:[%s20355_s1 + $0x1cc] ss:$16 sps:$4 sm:$0xff]   ;;  %v14361_v22 = vld [vmem:[%s20355_s1 + $0x3a0] ss:$16 sps:$4 sm:$0xff]  }
 0x2a2   :  { %6322 = vmatmul.mubr.bf16.gmra.mrb[184].mxu1 %v14139_v28  ;;  %v14284_v28 = vld [vmem:[%s20355_s1 + $0x224] ss:$16 sps:$4 sm:$0xff]  }
 0x2a3   :  { %6329 = vmatprep.mubr.bf16.mxu1 %v14140_v0  ;;  %v14196_v0 = vld [vmem:[%s20355_s1 + $0x4c] ss:$16 sps:$4 sm:$0xff]   ;;  %5393 = vmatprep.mubr.bf16.mxu0 %v14284_v28 }
 0x2a4   :  { %5394 = vmatmul.mubr.bf16.gmra.mrb[172].mxu0 %v14289_v3 }
 0x2aa   :  { %6330 = vmatmul.mubr.bf16.gmra.mrb[188].mxu1 %v14142_v4  ;;  %v14290_v4 = vld [vmem:[%s20355_s1 + $0x244] ss:$16 sps:$4 sm:$0xff]  }
 0x2ab   :  { %6337 = vmatprep.mubr.bf16.mxu1 %v14143_v8  ;;  %v14204_v8 = vld [vmem:[%s20355_s1 + $0x6c] ss:$16 sps:$4 sm:$0xff]   ;;  %5401 = vmatprep.mubr.bf16.mxu0 %v14290_v4 }
 0x2ac   :  { %5402 = vmatmul.mubr.bf16.gmra.mrb[176].mxu0 %v14295_v42  ;;  %v14276_v4 = vld [vmem:[%s20355_s1 + $0x1ec] ss:$16 sps:$4 sm:$0xff]   ;;  %v14367_v42 = vld [vmem:[%s20355_s1 + $0x3c0] ss:$16 sps:$4 sm:$0xff]  }
 0x2b2   :  { %6338 = vmatmul.mubr.bf16.gmra.mrb[192].mxu1 %v14145_v10  ;;  %v14296_v10 = vld [vmem:[%s20355_s1 + $0x264] ss:$16 sps:$4 sm:$0xff]  }
 0x2b3   :  { %6345 = vmatprep.mubr.bf16.mxu1 %v14146_v17  ;;  %v14210_v17 = vld [vmem:[%s20355_s1 + $0x8c] ss:$16 sps:$4 sm:$0xff]   ;;  %5409 = vmatprep.mubr.bf16.mxu0 %v14296_v10 }
 0x2b4   :  { %5410 = vmatmul.mubr.bf16.gmra.mrb[180].mxu0 %v14301_v20  ;;  %v14274_v20 = vld [vmem:[%s20355_s1 + $0x1e8] ss:$16 sps:$4 sm:$0xff]  }
 0x2b5   :  { %v16551_v44 = vpop.f32.mrb[104].mxu0 }
 0x2ba   :  { %6346 = vmatmul.mubr.bf16.gmra.mrb[196].mxu1 %v14148_v12  ;;  %v14302_v12 = vld [vmem:[%s20355_s1 + $0x284] ss:$16 sps:$4 sm:$0xff]  }
 0x2bb   :  { %6353 = vmatprep.mubr.bf16.mxu1 %v14149_v26  ;;  %v14216_v26 = vld [vmem:[%s20355_s1 + $0xac] ss:$16 sps:$4 sm:$0xff]   ;;  %5417 = vmatprep.mubr.bf16.mxu0 %v14302_v12 }
 0x2bc   :  { %5418 = vmatmul.mubr.bf16.gmra.mrb[184].mxu0 %v14307_v37  ;;  %v14282_v12 = vld [vmem:[%s20355_s1 + $0x20c] ss:$16 sps:$4 sm:$0xff]   ;;  %v14373_v37 = vld [vmem:[%s20355_s1 + $0x3e0] ss:$16 sps:$4 sm:$0xff]  }
 0x2c2   :  { %6354 = vmatmul.mubr.bf16.gmra.mrb[200].mxu1 %v14151_v24  ;;  %v14308_v24 = vld [vmem:[%s20355_s1 + $0x2a4] ss:$16 sps:$4 sm:$0xff]  }
 0x2c3   :  { %6361 = vmatprep.mubr.bf16.mxu1 %v14152_v58  ;;  %v14222_v58 = vld [vmem:[%s20355_s1 + $0xcc] ss:$16 sps:$4 sm:$0xff]   ;;  %5425 = vmatprep.mubr.bf16.mxu0 %v14308_v24 }
 0x2c4   :  { %5426 = vmatmul.mubr.bf16.gmra.mrb[188].mxu0 %v14313_v18 }
 0x2ca   :  { %6362 = vmatmul.mubr.bf16.gmra.mrb[204].mxu1 %v14154_v23  ;;  %v14314_v23 = vld [vmem:[%s20355_s1 + $0x2c4] ss:$16 sps:$4 sm:$0xff]  }
 0x2cb   :  { %6369 = vmatprep.mubr.bf16.mxu1 %v14155_v51  ;;  %v14228_v51 = vld [vmem:[%s20355_s1 + $0xec] ss:$16 sps:$4 sm:$0xff]   ;;  %5433 = vmatprep.mubr.bf16.mxu0 %v14314_v23 }
 0x2cc   :  { %5434 = vmatmul.mubr.bf16.gmra.mrb[192].mxu0 %v14319_v7 }
 0x2d2   :  { %6370 = vmatmul.mubr.bf16.gmra.mrb[208].mxu1 %v14157_v30  ;;  %v14320_v30 = vld [vmem:[%s20355_s1 + $0x2e4] ss:$16 sps:$4 sm:$0xff]  }
 0x2d3   :  { %6377 = vmatprep.mubr.bf16.mxu1 %v14158_v15  ;;  %v14234_v15 = vld [vmem:[%s20355_s1 + $0x10c] ss:$16 sps:$4 sm:$0xff]   ;;  %5441 = vmatprep.mubr.bf16.mxu0 %v14320_v30 }
 0x2d4   :  { %5442 = vmatmul.mubr.bf16.gmra.mrb[196].mxu0 %v14325_v31  ;;  %v14379_v31 = vld [vmem:[%s20355_s1 + $0x400] ss:$16 sps:$4 sm:$0xff]  }
 0x2da   :  { %6378 = vmatmul.mubr.bf16.gmra.mrb[212].mxu1 %v14160_v21  ;;  %v14326_v21 = vld [vmem:[%s20355_s1 + $0x304] ss:$16 sps:$4 sm:$0xff]  }
 0x2db   :  { %6385 = vmatprep.mubr.bf16.mxu1 %v14161_v47  ;;  %v14240_v47 = vld [vmem:[%s20355_s1 + $0x12c] ss:$16 sps:$4 sm:$0xff]   ;;  %5449 = vmatprep.mubr.bf16.mxu0 %v14326_v21 }
 0x2dc   :  { %5450 = vmatmul.mubr.bf16.gmra.mrb[200].mxu0 %v14331_v13 }
 0x2e2   :  { %6386 = vmatmul.mubr.bf16.gmra.mrb[216].mxu1 %v14163_v35  ;;  %v14332_v35 = vld [vmem:[%s20355_s1 + $0x324] ss:$16 sps:$4 sm:$0xff]  }
 0x2e3   :  { %6393 = vmatprep.mubr.bf16.mxu1 %v14164_v33  ;;  %v14246_v33 = vld [vmem:[%s20355_s1 + $0x14c] ss:$16 sps:$4 sm:$0xff]   ;;  %5457 = vmatprep.mubr.bf16.mxu0 %v14332_v35 }
 0x2e4   :  { %5458 = vmatmul.mubr.bf16.gmra.mrb[204].mxu0 %v14337_v34 }
 0x2ea   :  { %6394 = vmatmul.mubr.bf16.gmra.mrb[220].mxu1 %v14166_v39  ;;  %v14338_v39 = vld [vmem:[%s20355_s1 + $0x344] ss:$16 sps:$4 sm:$0xff]  }
 0x2eb   :  { %6401 = vmatprep.mubr.bf16.mxu1 %v14167_v46  ;;  %v14252_v46 = vld [vmem:[%s20355_s1 + $0x16c] ss:$16 sps:$4 sm:$0xff]   ;;  %5465 = vmatprep.mubr.bf16.mxu0 %v14338_v39 }
 0x2ec   :  { %5466 = vmatmul.mubr.bf16.gmra.mrb[208].mxu0 %v14343_v41  ;;  %v14385_v41 = vld [vmem:[%s20355_s1 + $0x420] ss:$16 sps:$4 sm:$0xff]  }
 0x2ed   :  { %5473 = vmatprep.mubr.bf16.mxu0 %v14344_v50 }
 0x2f2   :  { %6402 = vmatmul.mubr.bf16.gmra.mrb[224].mxu1 %v14169_v40  ;;  %v14250_v40 = vld [vmem:[%s20355_s1 + $0x168] ss:$16 sps:$4 sm:$0xff]  }
 0x2f3   :  { %6409 = vmatprep.mubr.bf16.mxu1 %v14170_v48  ;;  %v5261_v48 = vpop.f32.mrb[105].mxu0 }
 0x2fa   :  { %6410 = vmatmul.mubr.bf16.gmra.mrb[228].mxu1 %v14172_v29  ;;  %v16562_v29 = vpop.f32.mrb[106].mxu0 }
 0x2fb   :  { %6417 = vmatprep.mubr.bf16.mxu1 %v14173_v45  ;;  %v14349_v45 = vld [vmem:[%s20355_s1 + $0x360] ss:$16 sps:$4 sm:$0xff]   ;;  %v5264_v49 = vpop.f32.mrb[107].mxu0 }
 0x2fc   :  { %5474 = vmatmul.mubr.bf16.gmra.mrb[212].mxu0 %v14349_v45  ;;  %v16568_v11 = vpop.f32.mrb[108].mxu0  ;;  %v14292_v45 = vld [vmem:[%s20355_s1 + $0x248] ss:$16 sps:$4 sm:$0xff]  }
 0x2fd   :  { %5481 = vmatprep.mubr.bf16.mxu0 %v14350_v63  ;;  %v14300_v63 = vld [vmem:[%s20355_s1 + $0x26c] ss:$16 sps:$4 sm:$0xff]  }
 0x302   :  { %6418 = vmatmul.mubr.bf16.gmra.mrb[232].mxu1 %v14175_v43  ;;  %v14256_v43 = vld [vmem:[%s20355_s1 + $0x188] ss:$16 sps:$4 sm:$0xff]  }
 0x303   :  { %6425 = vmatprep.mubr.bf16.mxu1 %v14176_v54  ;;  %v5269_v54 = vpop.f32.mrb[109].mxu0 }
 0x30a   :  { %6426 = vmatmul.mubr.bf16.gmra.mrb[236].mxu1 %v14178_v6  ;;  %v16579_v6 = vpop.f32.mrb[110].mxu0 }
 0x30b   :  { %6433 = vmatprep.mubr.bf16.mxu1 %v14179_v57  ;;  %v14355_v57 = vld [vmem:[%s20355_s1 + $0x380] ss:$16 sps:$4 sm:$0xff]   ;;  %v5272_v59 = vpop.f32.mrb[111].mxu0 }
 0x30c   :  { %5482 = vmatmul.mubr.bf16.gmra.mrb[216].mxu0 %v14355_v57  ;;  %v16585_v16 = vpop.f32.mrb[112].mxu0  ;;  %v14391_v59 = vld [vmem:[%s20355_s1 + $0x440] ss:$16 sps:$4 sm:$0xff]  }
 0x312   :  { %6434 = vmatmul.mubr.bf16.gmra.mrb[240].mxu1 %v14181_v62  ;;  %v14262_v62 = vld [vmem:[%s20355_s1 + $0x1a8] ss:$16 sps:$4 sm:$0xff]  }
 0x313   :  { %12774 = vmatprep.mubr.msk.bf16.mxu1 %vm4780_vm2, %v14187_v55  ;;  %v5277_v55 = vpop.f32.mrb[113].mxu0 }
 0x31a   :  { %6475 = vmatmul.mubr.bf16.vlgmr.msra.gmra.mrb[244].mxu1 %v14185_v25  ;;  %v14356_v25 = vld [vmem:[%s20355_s1 + $0x3a4] ss:$16 sps:$4 sm:$0xff]  }
 0x31b   :  { %12775 = vmatprep.mubr.msk.bf16.mxu1 %vm4780_vm2, %v14190_v38  ;;  %v16596_v38 = vpop.f32.mrb[114].mxu0  ;;  %5489 = vmatprep.mubr.bf16.mxu0 %v14356_v25 }
 0x31c   :  { %5490 = vmatmul.mubr.bf16.gmra.mrb[220].mxu0 %v14361_v22  ;;  %v14298_v22 = vld [vmem:[%s20355_s1 + $0x268] ss:$16 sps:$4 sm:$0xff]  }
 0x322   :  { %6483 = vmatmul.mubr.bf16.gmra.mrb[248].mxu1 %v14193_v60  ;;  %v5280_v60 = vpop.f32.mrb[115].mxu0 }
 0x323   :  { %12776 = vmatprep.mubr.msk.bf16.mxu1 %vm4780_vm2, %v14196_v0  ;;  %v16602_v28 = vpop.f32.mrb[116].mxu0  ;;  %v14268_v0 = vld [vmem:[%s20355_s1 + $0x1c8] ss:$16 sps:$4 sm:$0xff]  }
 0x324   :  { %v5285_v3 = vpop.f32.mrb[117].mxu0 }
 0x32a   :  { %6491 = vmatmul.mubr.bf16.gmra.mrb[252].mxu1 %v14199_v2  ;;  %v14362_v2 = vld [vmem:[%s20355_s1 + $0x3c4] ss:$16 sps:$4 sm:$0xff]  }
 0x32b   :  { %12777 = vmatprep.mubr.msk.bf16.mxu1 %vm4780_vm2, %v14204_v8  ;;  %v16613_v8 = vpop.f32.mrb[118].mxu0  ;;  %5497 = vmatprep.mubr.bf16.mxu0 %v14362_v2  ;;  %v14306_v2 = vld [vmem:[%s20355_s1 + $0x28c] ss:$16 sps:$4 sm:$0xff]  }
 0x32c   :  { %5498 = vmatmul.mubr.bf16.gmra.mrb[224].mxu0 %v14367_v42 }
 0x332   :  { %6499 = vmatmul.mubr.bf16.gmra.mrb[0].mxu1 %v14202_v9  ;;  %v5288_v9 = vpop.f32.mrb[119].mxu0 }
 0x333   :  { %12778 = vmatprep.mubr.msk.bf16.mxu1 %vm4780_vm2, %v14210_v17  ;;  %v16618_v10 = vpop.f32.mrb[120].mxu0  ;;  %v14397_v9 = vld [vmem:[%s20355_s1 + $0x460] ss:$16 sps:$4 sm:$0xff]  }
 0x334   :  { %v5293_v17 = vpop.f32.mrb[121].mxu0 }
 0x33a   :  { %6507 = vmatmul.mubr.bf16.gmra.mrb[4].mxu1 %v14208_v53  ;;  %v14368_v53 = vld [vmem:[%s20355_s1 + $0x3e4] ss:$16 sps:$4 sm:$0xff]  }
 0x33b   :  { %12779 = vmatprep.mubr.msk.bf16.mxu1 %vm4780_vm2, %v14216_v26  ;;  %v16630_v26 = vpop.f32.mrb[122].mxu0  ;;  %5505 = vmatprep.mubr.bf16.mxu0 %v14368_v53 }
 0x33c   :  { %5506 = vmatmul.mubr.bf16.gmra.mrb[228].mxu0 %v14373_v37  ;;  %v14304_v37 = vld [vmem:[%s20355_s1 + $0x288] ss:$16 sps:$4 sm:$0xff]  }
 0x342   :  { %6515 = vmatmul.mubr.bf16.gmra.mrb[8].mxu1 %v14214_v14  ;;  %v5296_v14 = vpop.f32.mrb[123].mxu0 }
 0x343   :  { %12780 = vmatprep.mubr.msk.bf16.mxu1 %vm4780_vm2, %v14222_v58  ;;  %v16638_v58 = vpop.f32.mrb[124].mxu0 }
 0x344   :  { %v5301_v23 = vpop.f32.mrb[125].mxu0 }
 0x345   :  { %v16651_v30 = vpop.f32.mrb[126].mxu0  ;;  %v14312_v23 = vld [vmem:[%s20355_s1 + $0x2ac] ss:$16 sps:$4 sm:$0xff]  }
 0x34a   :  { %6523 = vmatmul.mubr.bf16.gmra.mrb[12].mxu1 %v14220_v19  ;;  %v14280_v19 = vld [vmem:[%s20355_s1 + $0x208] ss:$16 sps:$4 sm:$0xff]  }
 0x34b   :  { %12781 = vmatprep.mubr.msk.bf16.mxu1 %vm4780_vm2, %v14228_v51  ;;  %v14374_v51 = vld [vmem:[%s20355_s1 + $0x404] ss:$16 sps:$4 sm:$0xff]  }
 0x34c   :  { %5513 = vmatprep.mubr.bf16.mxu0 %v14374_v51 }
 0x34d   :  { %5514 = vmatmul.mubr.bf16.gmra.mrb[232].mxu0 %v14379_v31 }
 0x352   :  { %6531 = vmatmul.mubr.bf16.gmra.mrb[16].mxu1 %v14226_v27  ;;  %v14288_v27 = vld [vmem:[%s20355_s1 + $0x22c] ss:$16 sps:$4 sm:$0xff]  }
 0x353   :  { %12782 = vmatprep.mubr.msk.bf16.mxu1 %vm4780_vm2, %v14234_v15 }
 0x35a   :  { %6539 = vmatmul.mubr.bf16.gmra.mrb[20].mxu1 %v14232_v52  ;;  %v5304_v52 = vpop.f32.mrb[127].mxu0 }
 0x35b   :  { %12783 = vmatprep.mubr.msk.bf16.mxu1 %vm4780_vm2, %v14240_v47  ;;  %v16659_v47 = vpop.f32.mrb[128].mxu0 }
 0x35c   :  { %v5309_v35 = vpop.f32.mrb[129].mxu0 }
 0x35d   :  { %v16672_v39 = vpop.f32.mrb[130].mxu0  ;;  %v14310_v35 = vld [vmem:[%s20355_s1 + $0x2a8] ss:$16 sps:$4 sm:$0xff]  }
 0x362   :  { %6547 = vmatmul.mubr.bf16.gmra.mrb[24].mxu1 %v14238_v32  ;;  %v14286_v32 = vld [vmem:[%s20355_s1 + $0x228] ss:$16 sps:$4 sm:$0xff]  }
 0x363   :  { %12784 = vmatprep.mubr.msk.bf16.mxu1 %vm4780_vm2, %v14246_v33  ;;  %v14380_v33 = vld [vmem:[%s20355_s1 + $0x424] ss:$16 sps:$4 sm:$0xff]  }
 0x364   :  { %5521 = vmatprep.mubr.bf16.mxu0 %v14380_v33 }
 0x365   :  { %5522 = vmatmul.mubr.bf16.gmra.mrb[236].mxu0 %v14385_v41  ;;  %v14318_v41 = vld [vmem:[%s20355_s1 + $0x2cc] ss:$16 sps:$4 sm:$0xff]  }
 0x36a   :  { %6555 = vmatmul.mubr.bf16.gmra.mrb[28].mxu1 %v14244_v36  ;;  %v14294_v36 = vld [vmem:[%s20355_s1 + $0x24c] ss:$16 sps:$4 sm:$0xff]  }
 0x36b   :  { %12785 = vmatprep.mubr.msk.bf16.mxu1 %vm4780_vm2, %v14252_v46 }
 0x372   :  { %6563 = vmatmul.mubr.bf16.gmra.mrb[32].mxu1 %v14250_v40  ;;  %v5312_v40 = vpop.f32.mrb[131].mxu0 }
 0x373   :  { %12786 = vmatprep.mubr.msk.bf16.mxu1 %vm4780_vm2, %v14258_v5  ;;  %v16680_v50 = vpop.f32.mrb[132].mxu0 }
 0x374   :  { %v5317_v49 = vpop.f32.mrb[133].mxu0 }
 0x37a   :  { %6571 = vmatmul.mubr.bf16.gmra.mrb[36].mxu1 %v14256_v43  ;;  %v14386_v43 = vld [vmem:[%s20355_s1 + $0x444] ss:$16 sps:$4 sm:$0xff]  }
 0x37b   :  { %12787 = vmatprep.mubr.msk.bf16.mxu1 %vm4780_vm2, %v14264_v56  ;;  %v16693_v56 = vpop.f32.mrb[134].mxu0  ;;  %5529 = vmatprep.mubr.bf16.mxu0 %v14386_v43 }
 0x37c   :  { %5530 = vmatmul.mubr.bf16.gmra.mrb[240].mxu0 %v14391_v59 }
 0x382   :  { %6579 = vmatmul.mubr.bf16.gmra.mrb[40].mxu1 %v14262_v62  ;;  %v5320_v62 = vpop.f32.mrb[135].mxu0 }
 0x383   :  { %12788 = vmatprep.mubr.msk.bf16.mxu1 %vm4780_vm2, %v14270_v61  ;;  %v16701_v25 = vpop.f32.mrb[136].mxu0 }
 0x384   :  { %v5325_v60 = vpop.f32.mrb[137].mxu0 }
 0x38a   :  { %6587 = vmatmul.mubr.bf16.gmra.mrb[44].mxu1 %v14268_v0  ;;  %v14392_v0 = vld [vmem:[%s20355_s1 + $0x464] ss:$16 sps:$4 sm:$0xff]  }
 0x38b   :  { %12789 = vmatprep.mubr.msk.bf16.mxu1 %vm4780_vm2, %v14276_v4  ;;  %v16714_v4 = vpop.f32.mrb[138].mxu0  ;;  %5537 = vmatprep.mubr.bf16.mxu0 %v14392_v0  ;;  %v14324_v0 = vld [vmem:[%s20355_s1 + $0x2ec] ss:$16 sps:$4 sm:$0xff]  }
 0x38c   :  { %v5328_v17 = vpop.f32.mrb[139].mxu0  ;;  %5538 = vmatmul.mubr.bf16.gmra.mrb[244].mxu0 %v14397_v9 }
 0x38d   :  { %v16722_v53 = vpop.f32.mrb[140].mxu0 }
 0x38e   :  { %v5333_v14 = vpop.f32.mrb[141].mxu0 }
 0x38f   :  { %v16735_v51 = vpop.f32.mrb[142].mxu0 }
 0x390   :  { %v5336_v31 = vpop.f32.mrb[143].mxu0 }
 0x391   :  { %v14330_v31 = vld [vmem:[%s20355_s1 + $0x30c] ss:$16 sps:$4 sm:$0xff]  }
 0x392   :  { %6595 = vmatmul.mubr.bf16.gmra.mrb[48].mxu1 %v14274_v20 }
 0x393   :  { %12790 = vmatprep.mubr.msk.bf16.mxu1 %vm4780_vm2, %v14282_v12 }
 0x395   :  { %v16636_v24 = vpop.f32.mrb[200].mxu1 }
 0x396   :  { %v6357_v18 = vpop.f32.mrb[201].mxu1 }
 0x397   :  { %v16646_v7 = vpop.f32.mrb[202].mxu1  ;;  %v14398_v18 = vld [vmem:[%s20355_s1 + $0x484] ss:$16 sps:$4 sm:$0xff]  }
 0x398   :  { %v6360_v15 = vpop.f32.mrb[203].mxu1  ;;  %5545 = vmatprep.mubr.bf16.mxu0 %v14398_v18 }
 0x399   :  { %v14403_v15 = vld [vmem:[%s20355_s1 + $0x480] ss:$16 sps:$4 sm:$0xff]  }
 0x39a   :  { %6603 = vmatmul.mubr.bf16.gmra.mrb[200].mxu1 %v14280_v19  ;;  %5546 = vmatmul.mubr.bf16.gmra.mrb[248].mxu0 %v14403_v15 }
 0x39b   :  { %12791 = vmatprep.mubr.msk.bf16.mxu1 %vm4780_vm2, %v14288_v27 }
 0x39d   :  { %v16657_v21 = vpop.f32.mrb[204].mxu1 }
 0x39e   :  { %v6365_v13 = vpop.f32.mrb[205].mxu1 }
 0x39f   :  { %v16667_v34 = vpop.f32.mrb[206].mxu1  ;;  %v16743_v13 = vpop.f32.mrb[144].mxu0 }
 0x3a0   :  { %v6368_v46 = vpop.f32.mrb[207].mxu1  ;;  %v5341_v33 = vpop.f32.mrb[145].mxu0 }
 0x3a1   :  { %v16756_v40 = vpop.f32.mrb[146].mxu0 }
 0x3a2   :  { %6611 = vmatmul.mubr.bf16.gmra.mrb[204].mxu1 %v14286_v32  ;;  %v5344_v49 = vpop.f32.mrb[147].mxu0 }
 0x3a3   :  { %12792 = vmatprep.mubr.msk.bf16.mxu1 %vm4780_vm2, %v14294_v36  ;;  %v14404_v36 = vld [vmem:[%s20355_s1 + $0x4a4] ss:$16 sps:$4 sm:$0xff]  }
 0x3a4   :  { %5553 = vmatprep.mubr.bf16.mxu0 %v14404_v36 }
 0x3a5   :  { %v16678_v48 = vpop.f32.mrb[208].mxu1 }
 0x3a6   :  { %v6373_v5 = vpop.f32.mrb[209].mxu1 }
 0x3a7   :  { %v16688_v54 = vpop.f32.mrb[210].mxu1 }
 0x3a8   :  { %v6376_v57 = vpop.f32.mrb[211].mxu1 }
 0x3a9   :  { %v16767_v57 = vpop.f32.mrb[148].mxu0 }
 0x3aa   :  { %6619 = vmatmul.mubr.bf16.gmra.mrb[208].mxu1 %v14292_v45  ;;  %v14409_v45 = vld [vmem:[%s20355_s1 + $0x4a0] ss:$16 sps:$4 sm:$0xff]   ;;  %v5349_v62 = vpop.f32.mrb[149].mxu0 }
 0x3ab   :  { %12793 = vmatprep.mubr.msk.bf16.mxu1 %vm4780_vm2, %v14300_v63  ;;  %5554 = vmatmul.mubr.bf16.gmra.mrb[252].mxu0 %v14409_v45  ;;  %v14316_v63 = vld [vmem:[%s20355_s1 + $0x2c8] ss:$16 sps:$4 sm:$0xff]  }
 0x3ad   :  { %v16699_v55 = vpop.f32.mrb[212].mxu1 }
 0x3ae   :  { %v6381_v61 = vpop.f32.mrb[213].mxu1 }
 0x3af   :  { %v16709_v3 = vpop.f32.mrb[214].mxu1  ;;  %v14410_v61 = vld [vmem:[%s20355_s1 + $0x4c0] ss:$16 sps:$4 sm:$0xff]  }
 0x3b0   :  { %v6384_v42 = vpop.f32.mrb[215].mxu1 }
 0x3b2   :  { %6627 = vmatmul.mubr.bf16.gmra.mrb[212].mxu1 %v14298_v22  ;;  %v14412_v22 = vld [vmem:[%s20355_s1 + $0x4c4] ss:$16 sps:$4 sm:$0xff]  }
 0x3b3   :  { %12794 = vmatprep.mubr.msk.bf16.mxu1 %vm4780_vm2, %v14306_v2  ;;  %v16780_v2 = vpop.f32.mrb[150].mxu0  ;;  %5561 = vmatprep.mubr.bf16.mxu0 %v14412_v22 }
 0x3b4   :  { %v5352_v9 = vpop.f32.mrb[151].mxu0  ;;  %5562 = vmatmul.mubr.bf16.gmra.mrb[0].mxu0 %v14410_v61  ;;  %v14336_v61 = vld [vmem:[%s20355_s1 + $0x32c] ss:$16 sps:$4 sm:$0xff]  }
 0x3b5   :  { %v16720_v20 = vpop.f32.mrb[216].mxu1 }
 0x3b6   :  { %v6389_v12 = vpop.f32.mrb[217].mxu1 }
 0x3b7   :  { %v16730_v19 = vpop.f32.mrb[218].mxu1  ;;  %v14322_v12 = vld [vmem:[%s20355_s1 + $0x2e8] ss:$16 sps:$4 sm:$0xff]  }
 0x3b8   :  { %v6392_v27 = vpop.f32.mrb[219].mxu1 }
 0x3b9   :  { %v14418_v27 = vld [vmem:[%s20355_s1 + $0x4e4] ss:$16 sps:$4 sm:$0xff]  }
 0x3ba   :  { %6635 = vmatmul.mubr.bf16.gmra.mrb[216].mxu1 %v14304_v37  ;;  %v16788_v37 = vpop.f32.mrb[152].mxu0  ;;  %5569 = vmatprep.mubr.bf16.mxu0 %v14418_v27  ;;  %v14428_v27 = vld [vmem:[%s20355_s1 + $0x520] ss:$16 sps:$4 sm:$0xff]  }
 0x3bb   :  { %12795 = vmatprep.mubr.msk.bf16.mxu1 %vm4780_vm2, %v14312_v23  ;;  %v5357_v18 = vpop.f32.mrb[153].mxu0  ;;  %v14416_v23 = vld [vmem:[%s20355_s1 + $0x4e0] ss:$16 sps:$4 sm:$0xff]  }
 0x3bc   :  { %5570 = vmatmul.mubr.bf16.gmra.mrb[4].mxu0 %v14416_v23 }
 0x3bd   :  { %v16741_v52 = vpop.f32.mrb[220].mxu1 }
 0x3be   :  { %v6397_v32 = vpop.f32.mrb[221].mxu1 }
 0x3bf   :  { %v16751_v46 = vpop.f32.mrb[222].mxu1  ;;  %v16801_v32 = vpop.f32.mrb[154].mxu0 }
 0x3c0   :  { %v6400_v5 = vpop.f32.mrb[223].mxu1  ;;  %v5360_v33 = vpop.f32.mrb[155].mxu0 }
 0x3c1   :  { %v16809_v5 = vpop.f32.mrb[156].mxu0  ;;  %v14342_v33 = vld [vmem:[%s20355_s1 + $0x34c] ss:$16 sps:$4 sm:$0xff]  }
 0x3c2   :  { %6643 = vmatmul.mubr.bf16.gmra.mrb[220].mxu1 %v14310_v35  ;;  %v5365_v49 = vpop.f32.mrb[157].mxu0 }
 0x3c3   :  { %12796 = vmatprep.mubr.msk.bf16.mxu1 %vm4780_vm2, %v14318_v41  ;;  %v14328_v41 = vld [vmem:[%s20355_s1 + $0x308] ss:$16 sps:$4 sm:$0xff]   ;;  %v16822_v22 = vpop.f32.mrb[158].mxu0 }
 0x3c5   :  { %v16762_v43 = vpop.f32.mrb[224].mxu1 }
 0x3c6   :  { %v6405_v59 = vpop.f32.mrb[225].mxu1 }
 0x3c7   :  { %v16775_v60 = vpop.f32.mrb[226].mxu1  ;;  %v14424_v59 = vld [vmem:[%s20355_s1 + $0x504] ss:$16 sps:$4 sm:$0xff]  }
 0x3c8   :  { %v6408_v42 = vpop.f32.mrb[227].mxu1  ;;  %5577 = vmatprep.mubr.bf16.mxu0 %v14424_v59  ;;  %v14340_v59 = vld [vmem:[%s20355_s1 + $0x348] ss:$16 sps:$4 sm:$0xff]  }
 0x3c9   :  { %v5368_v42 = vpop.f32.mrb[159].mxu0 }
 0x3ca   :  { %6651 = vmatmul.mubr.bf16.gmra.mrb[224].mxu1 %v14316_v63  ;;  %v14422_v63 = vld [vmem:[%s20355_s1 + $0x500] ss:$16 sps:$4 sm:$0xff]  }
 0x3cb   :  { %12797 = vmatprep.mubr.msk.bf16.mxu1 %vm4780_vm2, %v14324_v0  ;;  %5578 = vmatmul.mubr.bf16.gmra.mrb[8].mxu0 %v14422_v63 }
 0x3cd   :  { %v16783_v17 = vpop.f32.mrb[228].mxu1 }
 0x3ce   :  { %v6413_v14 = vpop.f32.mrb[229].mxu1 }
 0x3cf   :  { %v16796_v15 = vpop.f32.mrb[230].mxu1  ;;  %v16830_v14 = vpop.f32.mrb[160].mxu0 }
 0x3d0   :  { %v6416_v35 = vpop.f32.mrb[231].mxu1  ;;  %v5373_v23 = vpop.f32.mrb[161].mxu0 }
 0x3d2   :  { %6659 = vmatmul.mubr.bf16.gmra.mrb[228].mxu1 %v14322_v12  ;;  %v14334_v12 = vld [vmem:[%s20355_s1 + $0x328] ss:$16 sps:$4 sm:$0xff]  }
 0x3d3   :  { %12798 = vmatprep.mubr.msk.bf16.mxu1 %vm4780_vm2, %v14330_v31  ;;  %v14430_v31 = vld [vmem:[%s20355_s1 + $0x524] ss:$16 sps:$4 sm:$0xff]  }
 0x3d4   :  { %5585 = vmatprep.mubr.bf16.mxu0 %v14430_v31 }
 0x3d5   :  { %v16804_v36 = vpop.f32.mrb[232].mxu1  ;;  %5586 = vmatmul.mubr.bf16.gmra.mrb[12].mxu0 %v14428_v27  ;;  %v14348_v27 = vld [vmem:[%s20355_s1 + $0x36c] ss:$16 sps:$4 sm:$0xff]  }
 0x3d6   :  { %v6421_v45 = vpop.f32.mrb[233].mxu1 }
 0x3d7   :  { %v16817_v62 = vpop.f32.mrb[234].mxu1 }
 0x3d8   :  { %20370 = vst [vmem:[#allocation7_spill] sm:$0xff] %v16817_v62  ;;  %v6424_v0 = vpop.f32.mrb[235].mxu1 }
 0x3da   :  { %6667 = vmatmul.mubr.bf16.gmra.mrb[232].mxu1 %v14328_v41  ;;  %v16843_v41 = vpop.f32.mrb[162].mxu0 }
 0x3db   :  { %12799 = vmatprep.mubr.msk.bf16.mxu1 %vm4780_vm2, %v14336_v61  ;;  %v5376_v49 = vpop.f32.mrb[163].mxu0 }
 0x3dc   :  { %v16851_v61 = vpop.f32.mrb[164].mxu0 }
 0x3dd   :  { %v16825_v9 = vpop.f32.mrb[236].mxu1  ;;  %v5381_v42 = vpop.f32.mrb[165].mxu0 }
 0x3de   :  { %20371 = vst [vmem:[#allocation8_spill] sm:$0xff] %v16825_v9  ;;  %v6429_v18 = vpop.f32.mrb[237].mxu1  ;;  %v16864_v31 = vpop.f32.mrb[166].mxu0 }
 0x3df   :  { %v16838_v35 = vpop.f32.mrb[238].mxu1  ;;  %v14434_v18 = vld [vmem:[%s20355_s1 + $0x540] ss:$16 sps:$4 sm:$0xff]  }
 0x3e0   :  { %20372 = vst [vmem:[#allocation9_spill] sm:$0xff] %v16838_v35  ;;  %v6432_v45 = vpop.f32.mrb[239].mxu1 }
 0x3e1   :  { %v5384_v45 = vpop.f32.mrb[167].mxu0 }
 0x3e2   :  { %6675 = vmatmul.mubr.bf16.gmra.mrb[236].mxu1 %v14334_v12  ;;  %v14436_v12 = vld [vmem:[%s20355_s1 + $0x544] ss:$16 sps:$4 sm:$0xff]   ;;  %v16870_v42 = vpop.f32.mrb[168].mxu0 }
 0x3e3   :  { %12800 = vmatprep.mubr.msk.bf16.mxu1 %vm4780_vm2, %v14342_v33  ;;  %5593 = vmatprep.mubr.bf16.mxu0 %v14436_v12  ;;  %v14440_v12 = vld [vmem:[%s20355_s1 + $0x560] ss:$16 sps:$4 sm:$0xff]  }
 0x3e4   :  { %5594 = vmatmul.mubr.bf16.gmra.mrb[16].mxu0 %v14434_v18 }
 0x3e5   :  { %v16846_v63 = vpop.f32.mrb[240].mxu1 }
 0x3e6   :  { %20373 = vst [vmem:[#allocation10_spill] sm:$0xff] %v16846_v63  ;;  %v6437_v0 = vpop.f32.mrb[241].mxu1  ;;  %v5389_v63 = vpop.f32.mrb[169].mxu0 }
 0x3e7   :  { %v16859_v23 = vpop.f32.mrb[242].mxu1  ;;  %v14346_v0 = vld [vmem:[%s20355_s1 + $0x368] ss:$16 sps:$4 sm:$0xff]  }
 0x3e8   :  { %20374 = vst [vmem:[#allocation11_spill] sm:$0xff] %v16859_v23  ;;  %v6440_v33 = vpop.f32.mrb[243].mxu1 }
 0x3e9   :  { %v16882_v33 = vpop.f32.mrb[170].mxu0 }
 0x3ea   :  { %6683 = vmatmul.mubr.bf16.gmra.mrb[240].mxu1 %v14340_v59  ;;  %v14442_v59 = vld [vmem:[%s20355_s1 + $0x564] ss:$16 sps:$4 sm:$0xff]   ;;  %v5392_v63 = vpop.f32.mrb[171].mxu0 }
 0x3eb   :  { %12801 = vmatprep.mubr.msk.bf16.mxu1 %vm4780_vm2, %v14348_v27  ;;  %v14354_v27 = vld [vmem:[%s20355_s1 + $0x38c] ss:$16 sps:$4 sm:$0xff]   ;;  %5601 = vmatprep.mubr.bf16.mxu0 %v14442_v59  ;;  %v16891_v35 = vpop.f32.mrb[172].mxu0 }
 0x3ec   :  { %5602 = vmatmul.mubr.bf16.gmra.mrb[20].mxu0 %v14440_v12  ;;  %v5397_v59 = vpop.f32.mrb[173].mxu0 }
 0x3ed   :  { %v6476_v49 = vpop.f32.mrb[244].mxu1 }
 0x3ee   :  { %v6477_v1 = vadd.f32 %v6476_v49, %v16551_v44  ;;  %v6478_v23 = vpop.f32.mrb[245].mxu1  ;;  %v14352_v49 = vld [vmem:[%s20355_s1 + $0x388] ss:$16 sps:$4 sm:$0xff]  }
 0x3ef   :  { %v6479_v18 = vpop.f32.mrb[246].mxu1 }
 0x3f0   :  { %v6480_v45 = vadd.f32 %v6479_v18, %v16562_v29  ;;  %v6481_v44 = vpop.f32.mrb[247].mxu1  ;;  %7660 = vst.msk [vmem:[#allocation2] sm:$0xff] %vm7659_vm3, %v6477_v1  ;;  %v14446_v1 = vld [vmem:[%s20355_s1 + $0x580] ss:$16 sps:$4 sm:$0xff]  }
 0x3f2   :  { %6691 = vmatmul.mubr.bf16.gmra.mrb[244].mxu1 %v14346_v0  ;;  %7661 = vst.msk [vmem:[#allocation2 + $0x28] sm:$0xff] %vm7659_vm3, %v6480_v45  ;;  %v14448_v0 = vld [vmem:[%s20355_s1 + $0x584] ss:$16 sps:$4 sm:$0xff]   ;;  %v16903_v45 = vpop.f32.mrb[174].mxu0 }
 0x3f3   :  { %12802 = vmatprep.mubr.msk.bf16.mxu1 %vm4780_vm2, %v14354_v27  ;;  %v14360_v27 = vld [vmem:[%s20355_s1 + $0x3ac] ss:$16 sps:$4 sm:$0xff]   ;;  %5609 = vmatprep.mubr.bf16.mxu0 %v14448_v0  ;;  %v5400_v63 = vpop.f32.mrb[175].mxu0 }
 0x3f4   :  { %5610 = vmatmul.mubr.bf16.gmra.mrb[24].mxu0 %v14446_v1  ;;  %v16912_v59 = vpop.f32.mrb[176].mxu0 }
 0x3f5   :  { %v6484_v23 = vpop.f32.mrb[248].mxu1  ;;  %v5405_v0 = vpop.f32.mrb[177].mxu0 }
 0x3f6   :  { %v6485_v29 = vadd.f32 %v6484_v23, %v16568_v11  ;;  %v6486_v18 = vpop.f32.mrb[249].mxu1 }
 0x3f7   :  { %v6487_v12 = vpop.f32.mrb[250].mxu1  ;;  %v14358_v18 = vld [vmem:[%s20355_s1 + $0x3a8] ss:$16 sps:$4 sm:$0xff]  }
 0x3f8   :  { %v6488_v44 = vadd.f32 %v6487_v12, %v16579_v6  ;;  %v6489_v11 = vpop.f32.mrb[251].mxu1  ;;  %7662 = vst.msk [vmem:[#allocation2 + $0x50] sm:$0xff] %vm7659_vm3, %v6485_v29  ;;  %v14454_v29 = vld [vmem:[%s20355_s1 + $0x5a4] ss:$16 sps:$4 sm:$0xff]  }
 0x3f9   :  { %5617 = vmatprep.mubr.bf16.mxu0 %v14454_v29  ;;  %v14458_v29 = vld [vmem:[%s20355_s1 + $0x5c0] ss:$16 sps:$4 sm:$0xff]  }
 0x3fa   :  { %6699 = vmatmul.mubr.bf16.gmra.mrb[248].mxu1 %v14352_v49  ;;  %7663 = vst.msk [vmem:[#allocation2 + $0x78] sm:$0xff] %vm7659_vm3, %v6488_v44  ;;  %v14452_v49 = vld [vmem:[%s20355_s1 + $0x5a0] ss:$16 sps:$4 sm:$0xff]   ;;  %v16924_v44 = vpop.f32.mrb[178].mxu0 }
 0x3fb   :  { %12803 = vmatprep.mubr.msk.bf16.mxu1 %vm4780_vm2, %v14360_v27  ;;  %v14366_v27 = vld [vmem:[%s20355_s1 + $0x3cc] ss:$16 sps:$4 sm:$0xff]   ;;  %v5408_v63 = vpop.f32.mrb[179].mxu0 }
 0x3fc   :  { %5618 = vmatmul.mubr.bf16.gmra.mrb[28].mxu0 %v14452_v49  ;;  %v14370_v63 = vld [vmem:[%s20355_s1 + $0x3e8] ss:$16 sps:$4 sm:$0xff]  }
 0x3fd   :  { %v6492_v23 = vpop.f32.mrb[252].mxu1 }
 0x3fe   :  { %v6493_v6 = vadd.f32 %v6492_v23, %v16585_v16  ;;  %v6494_v12 = vpop.f32.mrb[253].mxu1 }
 0x3ff   :  { %v6495_v1 = vpop.f32.mrb[254].mxu1  ;;  %v16930_v12 = vpop.f32.mrb[180].mxu0 }
 0x400   :  { %v6496_v11 = vadd.f32 %v6495_v1, %v16596_v38  ;;  %v6497_v16 = vpop.f32.mrb[255].mxu1  ;;  %7664 = vst.msk [vmem:[#allocation2 + $0xa0] sm:$0xff] %vm7659_vm3, %v6493_v6  ;;  %v14364_v38 = vld [vmem:[%s20355_s1 + $0x3c8] ss:$16 sps:$4 sm:$0xff]   ;;  %v14372_v6 = vld [vmem:[%s20355_s1 + $0x3ec] ss:$16 sps:$4 sm:$0xff]  }
 0x401   :  { %v14460_v1 = vld [vmem:[%s20355_s1 + $0x5c4] ss:$16 sps:$4 sm:$0xff]  }
 0x402   :  { %6707 = vmatmul.mubr.bf16.gmra.mrb[252].mxu1 %v14358_v18  ;;  %7665 = vst.msk [vmem:[#allocation2 + $0xc8] sm:$0xff] %vm7659_vm3, %v6496_v11  ;;  %v5413_v18 = vpop.f32.mrb[181].mxu0  ;;  %5625 = vmatprep.mubr.bf16.mxu0 %v14460_v1 }
 0x403   :  { %12804 = vmatprep.mubr.msk.bf16.mxu1 %vm4780_vm2, %v14366_v27 }
 0x404   :  { %5626 = vmatmul.mubr.bf16.gmra.mrb[32].mxu0 %v14458_v29  ;;  %v14378_v29 = vld [vmem:[%s20355_s1 + $0x40c] ss:$16 sps:$4 sm:$0xff]  }
 0x405   :  { %v6500_v23 = vpop.f32.mrb[0].mxu1 }
 0x406   :  { %v6501_v0 = vadd.f32 %v6500_v23, %v16602_v28  ;;  %v6502_v9 = vpop.f32.mrb[1].mxu1  ;;  %v16945_v28 = vpop.f32.mrb[182].mxu0 }
 0x407   :  { %v6503_v49 = vpop.f32.mrb[2].mxu1  ;;  %v5416_v11 = vpop.f32.mrb[183].mxu0 }
 0x408   :  { %v6504_v9 = vadd.f32 %v6503_v49, %v16613_v8  ;;  %v6505_v27 = vpop.f32.mrb[3].mxu1  ;;  %7666 = vst.msk [vmem:[#allocation2 + $0xf0] sm:$0xff] %vm7659_vm3, %v6501_v0  ;;  %v16954_v23 = vpop.f32.mrb[184].mxu0  ;;  %v14464_v0 = vld [vmem:[%s20355_s1 + $0x5e0] ss:$16 sps:$4 sm:$0xff]  }
 0x409   :  { %v5421_v49 = vpop.f32.mrb[185].mxu0 }
 0x40a   :  { %6715 = vmatmul.mubr.bf16.gmra.mrb[0].mxu1 %v14364_v38  ;;  %7667 = vst.msk [vmem:[#allocation2 + $0x118] sm:$0xff] %vm7659_vm3, %v6504_v9  ;;  %v14466_v38 = vld [vmem:[%s20355_s1 + $0x5e4] ss:$16 sps:$4 sm:$0xff]   ;;  %v16966_v1 = vpop.f32.mrb[186].mxu0  ;;  %v14376_v49 = vld [vmem:[%s20355_s1 + $0x408] ss:$16 sps:$4 sm:$0xff]  }
 0x40b   :  { %12805 = vmatprep.mubr.msk.bf16.mxu1 %vm4780_vm2, %v14372_v6  ;;  %5633 = vmatprep.mubr.bf16.mxu0 %v14466_v38  ;;  %v5424_v27 = vpop.f32.mrb[187].mxu0  ;;  %v14384_v38 = vld [vmem:[%s20355_s1 + $0x42c] ss:$16 sps:$4 sm:$0xff]  }
 0x40c   :  { %5634 = vmatmul.mubr.bf16.gmra.mrb[36].mxu0 %v14464_v0 }
 0x40d   :  { %v6508_v16 = vpop.f32.mrb[4].mxu1 }
 0x40e   :  { %v6510_v18 = vpop.f32.mrb[5].mxu1  ;;  %v6509_v8 = vadd.f32 %v6508_v16, %v16618_v10  ;;  %v16972_v16 = vpop.f32.mrb[188].mxu0 }
 0x40f   :  { %v6511_v6 = vpop.f32.mrb[6].mxu1 }
 0x410   :  { %7676 = vrot.lane.b32.xlu1 %v6509_v8, %s15373_s3  ;;  %v6512_v10 = vadd.f32 %v6511_v6, %v16630_v26  ;;  %v6513_v9 = vpop.f32.mrb[7].mxu1  ;;  %v5429_v26 = vpop.f32.mrb[189].mxu0  ;;  %v14470_v6 = vld [vmem:[%s20355_s1 + $0x600] ss:$16 sps:$4 sm:$0xff]  }
 0x412   :  { %6723 = vmatmul.mubr.bf16.gmra.mrb[4].mxu1 %v14370_v63  ;;  %v14472_v63 = vld [vmem:[%s20355_s1 + $0x604] ss:$16 sps:$4 sm:$0xff]  }
 0x413   :  { %12806 = vmatprep.mubr.msk.bf16.mxu1 %vm4780_vm2, %v14378_v29  ;;  %v16987_v29 = vpop.f32.mrb[190].mxu0  ;;  %5641 = vmatprep.mubr.bf16.mxu0 %v14472_v63  ;;  %v14390_v63 = vld [vmem:[%s20355_s1 + $0x44c] ss:$16 sps:$4 sm:$0xff]  }
 0x414   :  { %7678 = vrot.lane.b32.xlu1 %v6512_v10, %s15373_s3  ;;  %5642 = vmatmul.mubr.bf16.gmra.mrb[40].mxu0 %v14470_v6 }
 0x415   :  { %v6516_v11 = vpop.f32.mrb[8].mxu1 }
 0x416   :  { %v6518_v18 = vpop.f32.mrb[9].mxu1  ;;  %v6517_v8 = vadd.f32 %v6516_v11, %v16638_v58  ;;  %v5432_v58 = vpop.f32.mrb[191].mxu0 }
 0x417   :  { %v6519_v0 = vpop.f32.mrb[10].mxu1  ;;  %v16993_v11 = vpop.f32.mrb[192].mxu0 }
 0x418   :  { %v6520_v10 = vadd.f32 %v6519_v0, %v16651_v30  ;;  %v6521_v9 = vpop.f32.mrb[11].mxu1  ;;  %7680 = vrot.lane.b32.xlu0 %v6517_v8, %s15373_s3  ;;  %v14382_v30 = vld [vmem:[%s20355_s1 + $0x428] ss:$16 sps:$4 sm:$0xff]   ;;  %v5437_v0 = vpop.f32.mrb[193].mxu0 }
 0x41a   :  { %6731 = vmatmul.mubr.bf16.gmra.mrb[8].mxu1 %v14376_v49  ;;  %7682 = vrot.lane.b32.xlu1 %v6520_v10, %s15373_s3  ;;  %v14478_v49 = vld [vmem:[%s20355_s1 + $0x624] ss:$16 sps:$4 sm:$0xff]  }
 0x41b   :  { %12807 = vmatprep.mubr.msk.bf16.mxu1 %vm4780_vm2, %v14384_v38  ;;  %v14476_v38 = vld [vmem:[%s20355_s1 + $0x620] ss:$16 sps:$4 sm:$0xff]   ;;  %5649 = vmatprep.mubr.bf16.mxu0 %v14478_v49  ;;  %v14396_v49 = vld [vmem:[%s20355_s1 + $0x46c] ss:$16 sps:$4 sm:$0xff]  }
 0x41c   :  { %5650 = vmatmul.mubr.bf16.gmra.mrb[44].mxu0 %v14476_v38 }
 0x41d   :  { %v6524_v27 = vpop.f32.mrb[12].mxu1 }
 0x41e   :  { %v6525_v18 = vadd.f32 %v6524_v27, %v16659_v47  ;;  %v6526_v26 = vpop.f32.mrb[13].mxu1  ;;  %v17008_v47 = vpop.f32.mrb[194].mxu0 }
 0x41f   :  { %v6527_v8 = vpop.f32.mrb[14].mxu1  ;;  %v5440_v9 = vpop.f32.mrb[195].mxu0 }
 0x420   :  { %v6528_v6 = vadd.f32 %v6527_v8, %v16672_v39  ;;  %v6529_v10 = vpop.f32.mrb[15].mxu1  ;;  %7684 = vrot.lane.b32.xlu0 %v6525_v18, %s15373_s3  ;;  %v17014_v27 = vpop.f32.mrb[196].mxu0  ;;  %v14388_v39 = vld [vmem:[%s20355_s1 + $0x448] ss:$16 sps:$4 sm:$0xff]   ;;  %v14484_v18 = vld [vmem:[%s20355_s1 + $0x644] ss:$16 sps:$4 sm:$0xff]  }
 0x421   :  { %v5445_v8 = vpop.f32.mrb[197].mxu0  ;;  %5657 = vmatprep.mubr.bf16.mxu0 %v14484_v18  ;;  %v14402_v18 = vld [vmem:[%s20355_s1 + $0x48c] ss:$16 sps:$4 sm:$0xff]  }
 0x422   :  { %6739 = vmatmul.mubr.bf16.gmra.mrb[12].mxu1 %v14382_v30  ;;  %7686 = vrot.lane.b32.xlu1 %v6528_v6, %s15373_s3 }
 0x423   :  { %12808 = vmatprep.mubr.msk.bf16.mxu1 %vm4780_vm2, %v14390_v63  ;;  %v14482_v63 = vld [vmem:[%s20355_s1 + $0x640] ss:$16 sps:$4 sm:$0xff]  }
 0x424   :  { %5658 = vmatmul.mubr.bf16.gmra.mrb[48].mxu0 %v14482_v63 }
 0x425   :  { %v6532_v58 = vpop.f32.mrb[16].mxu1 }
 0x426   :  { %v6533_v26 = vadd.f32 %v6532_v58, %v16680_v50  ;;  %v6534_v0 = vpop.f32.mrb[17].mxu1  ;;  %v17029_v50 = vpop.f32.mrb[198].mxu0 }
 0x427   :  { %v6535_v30 = vpop.f32.mrb[18].mxu1  ;;  %v5448_v10 = vpop.f32.mrb[199].mxu0 }
 0x428   :  { %v6536_v38 = vadd.f32 %v6535_v30, %v16693_v56  ;;  %v6537_v6 = vpop.f32.mrb[19].mxu1  ;;  %7688 = vrot.lane.b32.xlu0 %v6533_v26, %s15373_s3  ;;  %v17035_v58 = vpop.f32.mrb[200].mxu0  ;;  %v14394_v56 = vld [vmem:[%s20355_s1 + $0x468] ss:$16 sps:$4 sm:$0xff]   ;;  %v14490_v26 = vld [vmem:[%s20355_s1 + $0x664] ss:$16 sps:$4 sm:$0xff]  }
 0x429   :  { %v5453_v30 = vpop.f32.mrb[201].mxu0  ;;  %5665 = vmatprep.mubr.bf16.mxu0 %v14490_v26  ;;  %v14408_v26 = vld [vmem:[%s20355_s1 + $0x4ac] ss:$16 sps:$4 sm:$0xff]  }
 0x42a   :  { %6747 = vmatmul.mubr.bf16.gmra.mrb[16].mxu1 %v14388_v39  ;;  %7690 = vrot.lane.b32.xlu1 %v6536_v38, %s15373_s3 }
 0x42b   :  { %12809 = vmatprep.mubr.msk.bf16.mxu1 %vm4780_vm2, %v14396_v49  ;;  %v14488_v49 = vld [vmem:[%s20355_s1 + $0x660] ss:$16 sps:$4 sm:$0xff]  }
 0x42c   :  { %5666 = vmatmul.mubr.bf16.gmra.mrb[52].mxu0 %v14488_v49 }
 0x42d   :  { %v6540_v9 = vpop.f32.mrb[20].mxu1 }
 0x42e   :  { %v6541_v0 = vadd.f32 %v6540_v9, %v16701_v25  ;;  %v6542_v8 = vpop.f32.mrb[21].mxu1  ;;  %v17050_v25 = vpop.f32.mrb[202].mxu0 }
 0x42f   :  { %v6543_v39 = vpop.f32.mrb[22].mxu1  ;;  %v5456_v6 = vpop.f32.mrb[203].mxu0 }
 0x430   :  { %v6544_v63 = vadd.f32 %v6543_v39, %v16714_v4  ;;  %v6545_v38 = vpop.f32.mrb[23].mxu1  ;;  %7717 = vrot.lane.b32.xlu0 %v6541_v0, %s15374_s16  ;;  %v17056_v9 = vpop.f32.mrb[204].mxu0  ;;  %v14400_v4 = vld [vmem:[%s20355_s1 + $0x488] ss:$16 sps:$4 sm:$0xff]   ;;  %v14496_v0 = vld [vmem:[%s20355_s1 + $0x684] ss:$16 sps:$4 sm:$0xff]  }
 0x431   :  { %v5461_v39 = vpop.f32.mrb[205].mxu0  ;;  %5673 = vmatprep.mubr.bf16.mxu0 %v14496_v0  ;;  %v14415_v0 = vld [vmem:[%s20355_s1 + $0x4cc] ss:$16 sps:$4 sm:$0xff]  }
 0x432   :  { %6755 = vmatmul.mubr.bf16.gmra.mrb[20].mxu1 %v14394_v56  ;;  %7719 = vrot.lane.b32.xlu1 %v6544_v63, %s15374_s16 }
 0x433   :  { %12810 = vmatprep.mubr.msk.bf16.mxu1 %vm4780_vm2, %v14402_v18  ;;  %v14494_v18 = vld [vmem:[%s20355_s1 + $0x680] ss:$16 sps:$4 sm:$0xff]  }
 0x434   :  { %5674 = vmatmul.mubr.bf16.gmra.mrb[56].mxu0 %v14494_v18 }
 0x435   :  { %v6548_v10 = vpop.f32.mrb[24].mxu1 }
 0x436   :  { %v6549_v8 = vadd.f32 %v6548_v10, %v16722_v53  ;;  %v6550_v30 = vpop.f32.mrb[25].mxu1  ;;  %v17071_v53 = vpop.f32.mrb[206].mxu0 }
 0x437   :  { %v6551_v56 = vpop.f32.mrb[26].mxu1  ;;  %v5464_v38 = vpop.f32.mrb[207].mxu0 }
 0x438   :  { %v6552_v49 = vadd.f32 %v6551_v56, %v16735_v51  ;;  %v6553_v63 = vpop.f32.mrb[27].mxu1  ;;  %7721 = vrot.lane.b32.xlu0 %v6549_v8, %s15374_s16  ;;  %v17077_v10 = vpop.f32.mrb[208].mxu0  ;;  %v14406_v51 = vld [vmem:[%s20355_s1 + $0x4a8] ss:$16 sps:$4 sm:$0xff]   ;;  %v14502_v8 = vld [vmem:[%s20355_s1 + $0x6a4] ss:$16 sps:$4 sm:$0xff]  }
 0x439   :  { %v5469_v56 = vpop.f32.mrb[209].mxu0  ;;  %5681 = vmatprep.mubr.bf16.mxu0 %v14502_v8  ;;  %v14421_v8 = vld [vmem:[%s20355_s1 + $0x4ec] ss:$16 sps:$4 sm:$0xff]  }
 0x43a   :  { %6763 = vmatmul.mubr.bf16.gmra.mrb[24].mxu1 %v14400_v4  ;;  %7723 = vrot.lane.b32.xlu1 %v6552_v49, %s15374_s16 }
 0x43b   :  { %12811 = vmatprep.mubr.msk.bf16.mxu1 %vm4780_vm2, %v14408_v26  ;;  %v14500_v26 = vld [vmem:[%s20355_s1 + $0x6a0] ss:$16 sps:$4 sm:$0xff]  }
 0x43c   :  { %5682 = vmatmul.mubr.bf16.gmra.mrb[60].mxu0 %v14500_v26 }
 0x43d   :  { %v6556_v6 = vpop.f32.mrb[28].mxu1 }
 0x43e   :  { %v6557_v30 = vadd.f32 %v6556_v6, %v16743_v13  ;;  %v6558_v39 = vpop.f32.mrb[29].mxu1  ;;  %v17092_v13 = vpop.f32.mrb[210].mxu0 }
 0x43f   :  { %v6559_v4 = vpop.f32.mrb[30].mxu1  ;;  %v5472_v63 = vpop.f32.mrb[211].mxu0 }
 0x440   :  { %v6560_v18 = vadd.f32 %v6559_v4, %v16756_v40  ;;  %v6561_v49 = vpop.f32.mrb[31].mxu1  ;;  %7725 = vrot.lane.b32.xlu0 %v6557_v30, %s15374_s16  ;;  %v17098_v6 = vpop.f32.mrb[212].mxu0  ;;  %v14413_v40 = vld [vmem:[%s20355_s1 + $0x4c8] ss:$16 sps:$4 sm:$0xff]   ;;  %v14508_v30 = vld [vmem:[%s20355_s1 + $0x6c4] ss:$16 sps:$4 sm:$0xff]  }
 0x441   :  { %v5477_v4 = vpop.f32.mrb[213].mxu0  ;;  %5689 = vmatprep.mubr.bf16.mxu0 %v14508_v30  ;;  %v14427_v30 = vld [vmem:[%s20355_s1 + $0x50c] ss:$16 sps:$4 sm:$0xff]  }
 0x442   :  { %6771 = vmatmul.mubr.bf16.gmra.mrb[28].mxu1 %v14406_v51  ;;  %7727 = vrot.lane.b32.xlu1 %v6560_v18, %s15374_s16 }
 0x443   :  { %12812 = vmatprep.mubr.msk.bf16.mxu1 %vm4780_vm2, %v14415_v0  ;;  %v14506_v0 = vld [vmem:[%s20355_s1 + $0x6c0] ss:$16 sps:$4 sm:$0xff]  }
 0x444   :  { %5690 = vmatmul.mubr.bf16.gmra.mrb[64].mxu0 %v14506_v0 }
 0x445   :  { %v6564_v38 = vpop.f32.mrb[32].mxu1 }
 0x446   :  { %v6565_v39 = vadd.f32 %v6564_v38, %v16767_v57  ;;  %v6566_v56 = vpop.f32.mrb[33].mxu1  ;;  %v17113_v57 = vpop.f32.mrb[214].mxu0 }
 0x447   :  { %v6567_v51 = vpop.f32.mrb[34].mxu1  ;;  %v5480_v49 = vpop.f32.mrb[215].mxu0 }
 0x448   :  { %v6568_v26 = vadd.f32 %v6567_v51, %v16780_v2  ;;  %v6569_v18 = vpop.f32.mrb[35].mxu1  ;;  %7729 = vrot.lane.b32.xlu0 %v6565_v39, %s15374_s16  ;;  %v17119_v38 = vpop.f32.mrb[216].mxu0  ;;  %v14419_v2 = vld [vmem:[%s20355_s1 + $0x4e8] ss:$16 sps:$4 sm:$0xff]   ;;  %v14514_v39 = vld [vmem:[%s20355_s1 + $0x6e4] ss:$16 sps:$4 sm:$0xff]  }
 0x449   :  { %v5485_v51 = vpop.f32.mrb[217].mxu0  ;;  %5697 = vmatprep.mubr.bf16.mxu0 %v14514_v39  ;;  %v14433_v39 = vld [vmem:[%s20355_s1 + $0x52c] ss:$16 sps:$4 sm:$0xff]  }
 0x44a   :  { %6779 = vmatmul.mubr.bf16.gmra.mrb[32].mxu1 %v14413_v40  ;;  %7731 = vrot.lane.b32.xlu1 %v6568_v26, %s15374_s16 }
 0x44b   :  { %12813 = vmatprep.mubr.msk.bf16.mxu1 %vm4780_vm2, %v14421_v8  ;;  %v14512_v8 = vld [vmem:[%s20355_s1 + $0x6e0] ss:$16 sps:$4 sm:$0xff]  }
 0x44c   :  { %5698 = vmatmul.mubr.bf16.gmra.mrb[68].mxu0 %v14512_v8 }
 0x44d   :  { %v6572_v63 = vpop.f32.mrb[36].mxu1 }
 0x44e   :  { %v6573_v56 = vadd.f32 %v6572_v63, %v16788_v37  ;;  %v6574_v4 = vpop.f32.mrb[37].mxu1  ;;  %v17134_v37 = vpop.f32.mrb[218].mxu0 }
 0x44f   :  { %v6575_v40 = vpop.f32.mrb[38].mxu1  ;;  %v5488_v18 = vpop.f32.mrb[219].mxu0 }
 0x450   :  { %v6576_v0 = vadd.f32 %v6575_v40, %v16801_v32  ;;  %v6577_v26 = vpop.f32.mrb[39].mxu1  ;;  %7758 = vrot.lane.b32.xlu0 %v6573_v56, %s15375_s30  ;;  %v17140_v63 = vpop.f32.mrb[220].mxu0  ;;  %v14425_v32 = vld [vmem:[%s20355_s1 + $0x508] ss:$16 sps:$4 sm:$0xff]   ;;  %v14520_v56 = vld [vmem:[%s20355_s1 + $0x704] ss:$16 sps:$4 sm:$0xff]  }
 0x451   :  { %v5493_v40 = vpop.f32.mrb[221].mxu0  ;;  %5705 = vmatprep.mubr.bf16.mxu0 %v14520_v56  ;;  %v14439_v56 = vld [vmem:[%s20355_s1 + $0x54c] ss:$16 sps:$4 sm:$0xff]  }
 0x452   :  { %6787 = vmatmul.mubr.bf16.gmra.mrb[36].mxu1 %v14419_v2  ;;  %7760 = vrot.lane.b32.xlu1 %v6576_v0, %s15375_s30 }
 0x453   :  { %12814 = vmatprep.mubr.msk.bf16.mxu1 %vm4780_vm2, %v14427_v30  ;;  %v14518_v30 = vld [vmem:[%s20355_s1 + $0x700] ss:$16 sps:$4 sm:$0xff]  }
 0x454   :  { %5706 = vmatmul.mubr.bf16.gmra.mrb[72].mxu0 %v14518_v30 }
 0x455   :  { %v6580_v49 = vpop.f32.mrb[40].mxu1 }
 0x456   :  { %v6581_v4 = vadd.f32 %v6580_v49, %v16809_v5  ;;  %v6582_v51 = vpop.f32.mrb[41].mxu1  ;;  %v17155_v5 = vpop.f32.mrb[222].mxu0 }
 0x457   :  { %v6583_v2 = vpop.f32.mrb[42].mxu1  ;;  %v5496_v26 = vpop.f32.mrb[223].mxu0 }
 0x458   :  { %v6584_v8 = vadd.f32 %v6583_v2, %v16822_v22  ;;  %v6585_v0 = vpop.f32.mrb[43].mxu1  ;;  %7762 = vrot.lane.b32.xlu0 %v6581_v4, %s15375_s30  ;;  %v17161_v49 = vpop.f32.mrb[224].mxu0  ;;  %v14431_v22 = vld [vmem:[%s20355_s1 + $0x528] ss:$16 sps:$4 sm:$0xff]   ;;  %v14526_v4 = vld [vmem:[%s20355_s1 + $0x724] ss:$16 sps:$4 sm:$0xff]  }
 0x459   :  { %v5501_v2 = vpop.f32.mrb[225].mxu0  ;;  %5713 = vmatprep.mubr.bf16.mxu0 %v14526_v4  ;;  %v14445_v4 = vld [vmem:[%s20355_s1 + $0x56c] ss:$16 sps:$4 sm:$0xff]  }
 0x45a   :  { %6795 = vmatmul.mubr.bf16.gmra.mrb[40].mxu1 %v14425_v32  ;;  %7764 = vrot.lane.b32.xlu1 %v6584_v8, %s15375_s30 }
 0x45b   :  { %12815 = vmatprep.mubr.msk.bf16.mxu1 %vm4780_vm2, %v14433_v39  ;;  %v14524_v39 = vld [vmem:[%s20355_s1 + $0x720] ss:$16 sps:$4 sm:$0xff]  }
 0x45c   :  { %5714 = vmatmul.mubr.bf16.gmra.mrb[76].mxu0 %v14524_v39 }
 0x45d   :  { %v6588_v18 = vpop.f32.mrb[44].mxu1 }
 0x45e   :  { %v6589_v51 = vadd.f32 %v6588_v18, %v16830_v14  ;;  %v6590_v40 = vpop.f32.mrb[45].mxu1  ;;  %v17176_v14 = vpop.f32.mrb[226].mxu0 }
 0x45f   :  { %v6591_v32 = vpop.f32.mrb[46].mxu1  ;;  %v5504_v0 = vpop.f32.mrb[227].mxu0 }
 0x460   :  { %v6592_v30 = vadd.f32 %v6591_v32, %v16843_v41  ;;  %v6593_v8 = vpop.f32.mrb[47].mxu1  ;;  %7766 = vrot.lane.b32.xlu0 %v6589_v51, %s15375_s30  ;;  %v17182_v18 = vpop.f32.mrb[228].mxu0  ;;  %v14437_v41 = vld [vmem:[%s20355_s1 + $0x548] ss:$16 sps:$4 sm:$0xff]   ;;  %v14532_v51 = vld [vmem:[%s20355_s1 + $0x744] ss:$16 sps:$4 sm:$0xff]  }
 0x461   :  { %v5509_v32 = vpop.f32.mrb[229].mxu0  ;;  %5721 = vmatprep.mubr.bf16.mxu0 %v14532_v51  ;;  %v14538_v51 = vld [vmem:[%s20355_s1 + $0x764] ss:$16 sps:$4 sm:$0xff]  }
 0x462   :  { %6803 = vmatmul.mubr.bf16.gmra.mrb[44].mxu1 %v14431_v22  ;;  %7768 = vrot.lane.b32.xlu1 %v6592_v30, %s15375_s30 }
 0x463   :  { %12816 = vmatprep.mubr.msk.bf16.mxu1 %vm4780_vm2, %v14439_v56  ;;  %v14530_v56 = vld [vmem:[%s20355_s1 + $0x740] ss:$16 sps:$4 sm:$0xff]  }
 0x464   :  { %5722 = vmatmul.mubr.bf16.gmra.mrb[80].mxu0 %v14530_v56 }
 0x465   :  { %v6596_v26 = vpop.f32.mrb[48].mxu1  ;;  %5729 = vmatprep.mubr.bf16.mxu0 %v14538_v51 }
 0x466   :  { %v6597_v40 = vadd.f32 %v6596_v26, %v16851_v61  ;;  %v6598_v2 = vpop.f32.mrb[49].mxu1  ;;  %v17197_v61 = vpop.f32.mrb[230].mxu0 }
 0x467   :  { %v6599_v22 = vpop.f32.mrb[50].mxu1  ;;  %v5512_v8 = vpop.f32.mrb[231].mxu0 }
 0x468   :  { %v6600_v39 = vadd.f32 %v6599_v22, %v16864_v31  ;;  %v6601_v30 = vpop.f32.mrb[51].mxu1  ;;  %7770 = vrot.lane.b32.xlu0 %v6597_v40, %s15375_s30  ;;  %v17203_v26 = vpop.f32.mrb[232].mxu0  ;;  %v14443_v31 = vld [vmem:[%s20355_s1 + $0x568] ss:$16 sps:$4 sm:$0xff]  }
 0x469   :  { %v5517_v22 = vpop.f32.mrb[233].mxu0 }
 0x46a   :  { %6811 = vmatmul.mubr.bf16.gmra.mrb[48].mxu1 %v14437_v41  ;;  %7772 = vrot.lane.b32.xlu1 %v6600_v39, %s15375_s30  ;;  %v14451_v41 = vld [vmem:[%s20355_s1 + $0x58c] ss:$16 sps:$4 sm:$0xff]   ;;  %v14536_v39 = vld [vmem:[%s20355_s1 + $0x760] ss:$16 sps:$4 sm:$0xff]  }
 0x46b   :  { %12817 = vmatprep.mubr.msk.bf16.mxu1 %vm4780_vm2, %v14445_v4  ;;  %v17215_v4 = vpop.f32.mrb[234].mxu0 }
 0x46c   :  { %v5520_v30 = vpop.f32.mrb[235].mxu0  ;;  %5730 = vmatmul.mubr.bf16.gmra.mrb[84].mxu0 %v14536_v39 }
 0x46d   :  { %v6604_v0 = vpop.f32.mrb[200].mxu1 }
 0x46e   :  { %v6605_v2 = vadd.f32 %v6604_v0, %v16870_v42  ;;  %v6606_v32 = vpop.f32.mrb[201].mxu1  ;;  %v17224_v0 = vpop.f32.mrb[236].mxu0 }
 0x46f   :  { %v6607_v40 = vpop.f32.mrb[202].mxu1  ;;  %v5525_v22 = vpop.f32.mrb[237].mxu0 }
 0x470   :  { %v6608_v56 = vadd.f32 %v6607_v40, %v16882_v33  ;;  %v6609_v42 = vpop.f32.mrb[203].mxu1  ;;  %7799 = vrot.lane.b32.xlu0 %v6605_v2, %s15376_s28  ;;  %v14449_v2 = vld [vmem:[%s20355_s1 + $0x588] ss:$16 sps:$4 sm:$0xff]   ;;  %v17236_v51 = vpop.f32.mrb[238].mxu0 }
 0x471   :  { %v14542_v42 = vld [vmem:[%s20355_s1 + $0x780] ss:$16 sps:$4 sm:$0xff]   ;;  %v5528_v39 = vpop.f32.mrb[239].mxu0 }
 0x472   :  { %6819 = vmatmul.mubr.bf16.gmra.mrb[200].mxu1 %v14443_v31  ;;  %7801 = vrot.lane.b32.xlu1 %v6608_v56, %s15376_s28  ;;  %v14457_v31 = vld [vmem:[%s20355_s1 + $0x5ac] ss:$16 sps:$4 sm:$0xff]  }
 0x473   :  { %12818 = vmatprep.mubr.msk.bf16.mxu1 %vm4780_vm2, %v14451_v41  ;;  %v14544_v41 = vld [vmem:[%s20355_s1 + $0x784] ss:$16 sps:$4 sm:$0xff]  }
 0x474   :  { %5737 = vmatprep.mubr.bf16.mxu0 %v14544_v41 }
 0x475   :  { %v6612_v8 = vpop.f32.mrb[204].mxu1  ;;  %5738 = vmatmul.mubr.bf16.gmra.mrb[88].mxu0 %v14542_v42 }
 0x476   :  { %v6613_v33 = vadd.f32 %v6612_v8, %v16891_v35  ;;  %v6614_v32 = vpop.f32.mrb[205].mxu1  ;;  %v17245_v8 = vpop.f32.mrb[240].mxu0 }
 0x477   :  { %v6615_v40 = vpop.f32.mrb[206].mxu1  ;;  %v5533_v22 = vpop.f32.mrb[241].mxu0 }
 0x478   :  { %v6616_v56 = vadd.f32 %v6615_v40, %v16903_v45  ;;  %v6617_v35 = vpop.f32.mrb[207].mxu1  ;;  %7803 = vrot.lane.b32.xlu0 %v6613_v33, %s15376_s28  ;;  %v14455_v33 = vld [vmem:[%s20355_s1 + $0x5a8] ss:$16 sps:$4 sm:$0xff]   ;;  %v17257_v41 = vpop.f32.mrb[242].mxu0 }
 0x479   :  { %v14548_v35 = vld [vmem:[%s20355_s1 + $0x7a0] ss:$16 sps:$4 sm:$0xff]   ;;  %v5536_v42 = vpop.f32.mrb[243].mxu0 }
 0x47a   :  { %6827 = vmatmul.mubr.bf16.gmra.mrb[204].mxu1 %v14449_v2  ;;  %7805 = vrot.lane.b32.xlu1 %v6616_v56, %s15376_s28  ;;  %v14463_v2 = vld [vmem:[%s20355_s1 + $0x5cc] ss:$16 sps:$4 sm:$0xff]  }
 0x47b   :  { %12819 = vmatprep.mubr.msk.bf16.mxu1 %vm4780_vm2, %v14457_v31  ;;  %v14550_v31 = vld [vmem:[%s20355_s1 + $0x7a4] ss:$16 sps:$4 sm:$0xff]  }
 0x47c   :  { %5745 = vmatprep.mubr.bf16.mxu0 %v14550_v31  ;;  %v14469_v31 = vld [vmem:[%s20355_s1 + $0x5ec] ss:$16 sps:$4 sm:$0xff]  }
 0x47d   :  { %v6620_v30 = vpop.f32.mrb[208].mxu1  ;;  %5746 = vmatmul.mubr.bf16.gmra.mrb[92].mxu0 %v14548_v35  ;;  %v14554_v35 = vld [vmem:[%s20355_s1 + $0x7c0] ss:$16 sps:$4 sm:$0xff]  }
 0x47e   :  { %v6621_v45 = vadd.f32 %v6620_v30, %v16912_v59  ;;  %v6622_v32 = vpop.f32.mrb[209].mxu1  ;;  %v17267_v30 = vpop.f32.mrb[244].mxu0 }
 0x47f   :  { %v6623_v40 = vpop.f32.mrb[210].mxu1 }
 0x480   :  { %v6624_v56 = vadd.f32 %v6623_v40, %v16924_v44  ;;  %v6625_v59 = vpop.f32.mrb[211].mxu1  ;;  %7807 = vrot.lane.b32.xlu0 %v6621_v45, %s15376_s28  ;;  %v14461_v40 = vld [vmem:[%s20355_s1 + $0x5c8] ss:$16 sps:$4 sm:$0xff]  }
 0x482   :  { %6835 = vmatmul.mubr.bf16.gmra.mrb[208].mxu1 %v14455_v33  ;;  %v7677_v39 = vpop.permute.xlu1 %7676  ;;  %7809 = vrot.lane.b32.xlu1 %v6624_v56, %s15376_s28  ;;  %v14556_v56 = vld [vmem:[%s20355_s1 + $0x7c4] ss:$16 sps:$4 sm:$0xff]  }
 0x483   :  { %7701 = vst.msk [vmem:[#allocation2] sm:$0xff] %vm7700_vm4, %v7677_v39  ;;  %12820 = vmatprep.mubr.msk.bf16.mxu1 %vm4780_vm2, %v14463_v2  ;;  %v5541_v2 = vpop.f32.mrb[245].mxu0  ;;  %5753 = vmatprep.mubr.bf16.mxu0 %v14556_v56 }
 0x484   :  { %v17285_v42 = vpop.f32.mrb[246].mxu0  ;;  %v14562_v2 = vld [vmem:[%s20355_s1 + $0x7e4] ss:$16 sps:$4 sm:$0xff]  }
 0x485   :  { %v6628_v44 = vpop.f32.mrb[212].mxu1  ;;  %v5544_v39 = vpop.f32.mrb[247].mxu0  ;;  %5754 = vmatmul.mubr.bf16.gmra.mrb[96].mxu0 %v14554_v35 }
 0x486   :  { %v7679_v32 = vpop.permute.xlu1 %7678  ;;  %v6629_v45 = vadd.f32 %v6628_v44, %v16930_v12  ;;  %v6630_v22 = vpop.f32.mrb[213].mxu1  ;;  %5761 = vmatprep.mubr.bf16.mxu0 %v14562_v2 }
 0x487   :  { %7702 = vst.msk [vmem:[#allocation2 + $0x28] sm:$0xff] %vm7700_vm4, %v7679_v32  ;;  %v6631_v33 = vpop.f32.mrb[214].mxu1 }
 0x488   :  { %v6632_v59 = vadd.f32 %v6631_v33, %v16945_v28  ;;  %v6633_v12 = vpop.f32.mrb[215].mxu1  ;;  %7811 = vrot.lane.b32.xlu0 %v6629_v45, %s15376_s28  ;;  %v17291_v45 = vpop.f32.mrb[248].mxu0 }
 0x489   :  { %v5549_v56 = vpop.f32.mrb[249].mxu0  ;;  %v14560_v12 = vld [vmem:[%s20355_s1 + $0x7e0] ss:$16 sps:$4 sm:$0xff]  }
 0x48a   :  { %6843 = vmatmul.mubr.bf16.gmra.mrb[212].mxu1 %v14461_v40  ;;  %7813 = vrot.lane.b32.xlu1 %v6632_v59, %s15376_s28  ;;  %v7681_v44 = vpop.permute.xlu0 %7680  ;;  %v14467_v40 = vld [vmem:[%s20355_s1 + $0x5e8] ss:$16 sps:$4 sm:$0xff]   ;;  %v14475_v59 = vld [vmem:[%s20355_s1 + $0x60c] ss:$16 sps:$4 sm:$0xff]  }
 0x48b   :  { %7703 = vst.msk [vmem:[#allocation2 + $0x50] sm:$0xff] %vm7700_vm4, %v7681_v44  ;;  %12821 = vmatprep.mubr.msk.bf16.mxu1 %vm4780_vm2, %v14469_v31 }
 0x48c   :  { %v7683_v28 = vpop.permute.xlu1 %7682 }
 0x48d   :  { %v6636_v32 = vpop.f32.mrb[216].mxu1  ;;  %7704 = vst.msk [vmem:[#allocation2 + $0x78] sm:$0xff] %vm7700_vm4, %v7683_v28  ;;  %5762 = vmatmul.mubr.bf16.gmra.mrb[100].mxu0 %v14560_v12 }
 0x48e   :  { %v6637_v22 = vadd.f32 %v6636_v32, %v16954_v23  ;;  %v6638_v33 = vpop.f32.mrb[217].mxu1  ;;  %v17306_v23 = vpop.f32.mrb[250].mxu0 }
 0x48f   :  { %v6639_v31 = vpop.f32.mrb[218].mxu1  ;;  %v5552_v44 = vpop.f32.mrb[251].mxu0 }
 0x490   :  { %v6640_v35 = vadd.f32 %v6639_v31, %v16966_v1  ;;  %v6641_v39 = vpop.f32.mrb[219].mxu1  ;;  %7840 = vrot.lane.b32.xlu0 %v6637_v22, %s15377_s18  ;;  %v17314_v1 = vpop.f32.mrb[252].mxu0  ;;  %v14571_v44 = vld [vmem:[%s20355_s1 + $0x804] ss:$16 sps:$4 sm:$0xff]  }
 0x491   :  { %v5557_v2 = vpop.f32.mrb[253].mxu0  ;;  %5769 = vmatprep.mubr.bf16.mxu0 %v14571_v44 }
 0x492   :  { %6851 = vmatmul.mubr.bf16.gmra.mrb[216].mxu1 %v14467_v40  ;;  %7842 = vrot.lane.b32.xlu1 %v6640_v35, %s15377_s18  ;;  %v7685_v28 = vpop.permute.xlu0 %7684  ;;  %v14473_v40 = vld [vmem:[%s20355_s1 + $0x608] ss:$16 sps:$4 sm:$0xff]   ;;  %v17323_v12 = vpop.f32.mrb[254].mxu0 }
 0x493   :  { %7705 = vst.msk [vmem:[#allocation2 + $0xa0] sm:$0xff] %vm7700_vm4, %v7685_v28  ;;  %12822 = vmatprep.mubr.msk.bf16.mxu1 %vm4780_vm2, %v14475_v59  ;;  %v14481_v59 = vld [vmem:[%s20355_s1 + $0x62c] ss:$16 sps:$4 sm:$0xff]   ;;  %v5560_v28 = vpop.f32.mrb[255].mxu0 }
 0x494   :  { %v7687_v32 = vpop.permute.xlu1 %7686  ;;  %v14577_v28 = vld [vmem:[%s20355_s1 + $0x824] ss:$16 sps:$4 sm:$0xff]  }
 0x495   :  { %v6644_v33 = vpop.f32.mrb[220].mxu1  ;;  %7706 = vst.msk [vmem:[#allocation2 + $0xc8] sm:$0xff] %vm7700_vm4, %v7687_v32 }
 0x496   :  { %v6645_v56 = vadd.f32 %v6644_v33, %v16972_v16  ;;  %v6646_v22 = vpop.f32.mrb[221].mxu1  ;;  %v14569_v16 = vld [vmem:[%s20355_s1 + $0x800] ss:$16 sps:$4 sm:$0xff]  }
 0x497   :  { %v6647_v31 = vpop.f32.mrb[222].mxu1  ;;  %5770 = vmatmul.mubr.bf16.gmra.mrb[252].mxu0 %v14569_v16 }
 0x498   :  { %v6648_v35 = vadd.f32 %v6647_v31, %v16987_v29  ;;  %v6649_v39 = vpop.f32.mrb[223].mxu1  ;;  %7844 = vrot.lane.b32.xlu0 %v6645_v56, %s15377_s18  ;;  %v17337_v56 = vpop.f32.mrb[0].mxu0  ;;  %5777 = vmatprep.mubr.bf16.mxu0 %v14577_v28 }
 0x499   :  { %v5565_v31 = vpop.f32.mrb[1].mxu0 }
 0x49a   :  { %6859 = vmatmul.mubr.bf16.gmra.mrb[220].mxu1 %v14473_v40  ;;  %7846 = vrot.lane.b32.xlu1 %v6648_v35, %s15377_s18  ;;  %v7689_v32 = vpop.permute.xlu0 %7688  ;;  %v14479_v40 = vld [vmem:[%s20355_s1 + $0x628] ss:$16 sps:$4 sm:$0xff]   ;;  %v17346_v39 = vpop.f32.mrb[2].mxu0 }
 0x49b   :  { %7707 = vst.msk [vmem:[#allocation2 + $0xf0] sm:$0xff] %vm7700_vm4, %v7689_v32  ;;  %12823 = vmatprep.mubr.msk.bf16.mxu1 %vm4780_vm2, %v14481_v59  ;;  %v14487_v59 = vld [vmem:[%s20355_s1 + $0x64c] ss:$16 sps:$4 sm:$0xff]   ;;  %v5568_v32 = vpop.f32.mrb[3].mxu0 }
 0x49c   :  { %v7691_v29 = vpop.permute.xlu1 %7690  ;;  %v14583_v32 = vld [vmem:[%s20355_s1 + $0x844] ss:$16 sps:$4 sm:$0xff]  }
 0x49d   :  { %v6652_v33 = vpop.f32.mrb[224].mxu1  ;;  %7708 = vst.msk [vmem:[#allocation2 + $0x118] sm:$0xff] %vm7700_vm4, %v7691_v29 }
 0x49e   :  { %v6653_v22 = vadd.f32 %v6652_v33, %v16993_v11  ;;  %v6654_v2 = vpop.f32.mrb[225].mxu1  ;;  %v14575_v11 = vld [vmem:[%s20355_s1 + $0x820] ss:$16 sps:$4 sm:$0xff]  }
 0x49f   :  { %v6655_v35 = vpop.f32.mrb[226].mxu1  ;;  %5778 = vmatmul.mubr.bf16.gmra.mrb[0].mxu0 %v14575_v11 }
 0x4a0   :  { %v6656_v16 = vadd.f32 %v6655_v35, %v17008_v47  ;;  %v6657_v44 = vpop.f32.mrb[227].mxu1  ;;  %7848 = vrot.lane.b32.xlu0 %v6653_v22, %s15377_s18  ;;  %v17360_v22 = vpop.f32.mrb[4].mxu0  ;;  %5785 = vmatprep.mubr.bf16.mxu0 %v14583_v32 }
 0x4a1   :  { %v5573_v35 = vpop.f32.mrb[5].mxu0 }
 0x4a2   :  { %6867 = vmatmul.mubr.bf16.gmra.mrb[224].mxu1 %v14479_v40  ;;  %7850 = vrot.lane.b32.xlu1 %v6656_v16, %s15377_s18  ;;  %v7718_v29 = vpop.permute.xlu0 %7717  ;;  %v14485_v40 = vld [vmem:[%s20355_s1 + $0x648] ss:$16 sps:$4 sm:$0xff]   ;;  %v17369_v44 = vpop.f32.mrb[6].mxu0 }
 0x4a3   :  { %7742 = vst.msk [vmem:[#allocation2] sm:$0xff] %vm7741_vm5, %v7718_v29  ;;  %12824 = vmatprep.mubr.msk.bf16.mxu1 %vm4780_vm2, %v14487_v59  ;;  %v14493_v59 = vld [vmem:[%s20355_s1 + $0x66c] ss:$16 sps:$4 sm:$0xff]   ;;  %v5576_v29 = vpop.f32.mrb[7].mxu0 }
 0x4a4   :  { %v7720_v47 = vpop.permute.xlu1 %7719  ;;  %v14589_v29 = vld [vmem:[%s20355_s1 + $0x864] ss:$16 sps:$4 sm:$0xff]  }
 0x4a5   :  { %v6660_v33 = vpop.f32.mrb[228].mxu1  ;;  %7743 = vst.msk [vmem:[#allocation2 + $0x28] sm:$0xff] %vm7741_vm5, %v7720_v47 }
 0x4a6   :  { %v6661_v2 = vadd.f32 %v6660_v33, %v17014_v27  ;;  %v6662_v31 = vpop.f32.mrb[229].mxu1  ;;  %v14581_v27 = vld [vmem:[%s20355_s1 + $0x840] ss:$16 sps:$4 sm:$0xff]  }
 0x4a7   :  { %v6663_v16 = vpop.f32.mrb[230].mxu1  ;;  %5786 = vmatmul.mubr.bf16.gmra.mrb[4].mxu0 %v14581_v27 }
 0x4a8   :  { %v6664_v11 = vadd.f32 %v6663_v16, %v17029_v50  ;;  %v6665_v28 = vpop.f32.mrb[231].mxu1  ;;  %7852 = vrot.lane.b32.xlu0 %v6661_v2, %s15377_s18  ;;  %v17383_v2 = vpop.f32.mrb[8].mxu0  ;;  %5793 = vmatprep.mubr.bf16.mxu0 %v14589_v29 }
 0x4a9   :  { %v5581_v16 = vpop.f32.mrb[9].mxu0 }
 0x4aa   :  { %6875 = vmatmul.mubr.bf16.gmra.mrb[228].mxu1 %v14485_v40  ;;  %7854 = vrot.lane.b32.xlu1 %v6664_v11, %s15377_s18  ;;  %v7722_v47 = vpop.permute.xlu0 %7721  ;;  %v14491_v40 = vld [vmem:[%s20355_s1 + $0x668] ss:$16 sps:$4 sm:$0xff]   ;;  %v17392_v28 = vpop.f32.mrb[10].mxu0 }
 0x4ab   :  { %7744 = vst.msk [vmem:[#allocation2 + $0x50] sm:$0xff] %vm7741_vm5, %v7722_v47  ;;  %12825 = vmatprep.mubr.msk.bf16.mxu1 %vm4780_vm2, %v14493_v59  ;;  %v14499_v59 = vld [vmem:[%s20355_s1 + $0x68c] ss:$16 sps:$4 sm:$0xff]   ;;  %v5584_v47 = vpop.f32.mrb[11].mxu0 }
 0x4ac   :  { %v7724_v50 = vpop.permute.xlu1 %7723  ;;  %v14595_v47 = vld [vmem:[%s20355_s1 + $0x884] ss:$16 sps:$4 sm:$0xff]  }
 0x4ad   :  { %v6668_v33 = vpop.f32.mrb[232].mxu1  ;;  %7745 = vst.msk [vmem:[#allocation2 + $0x78] sm:$0xff] %vm7741_vm5, %v7724_v50 }
 0x4ae   :  { %v6669_v31 = vadd.f32 %v6668_v33, %v17035_v58  ;;  %v6670_v35 = vpop.f32.mrb[233].mxu1  ;;  %v14587_v58 = vld [vmem:[%s20355_s1 + $0x860] ss:$16 sps:$4 sm:$0xff]  }
 0x4af   :  { %v6671_v11 = vpop.f32.mrb[234].mxu1  ;;  %5794 = vmatmul.mubr.bf16.gmra.mrb[8].mxu0 %v14587_v58 }
 0x4b0   :  { %v6672_v27 = vadd.f32 %v6671_v11, %v17050_v25  ;;  %v6673_v32 = vpop.f32.mrb[235].mxu1  ;;  %7881 = vrot.lane.b32.xlu0 %v6669_v31, %s15378_s4  ;;  %v17406_v31 = vpop.f32.mrb[12].mxu0  ;;  %5801 = vmatprep.mubr.bf16.mxu0 %v14595_v47 }
 0x4b1   :  { %v5589_v11 = vpop.f32.mrb[13].mxu0 }
 0x4b2   :  { %6883 = vmatmul.mubr.bf16.gmra.mrb[232].mxu1 %v14491_v40  ;;  %7883 = vrot.lane.b32.xlu1 %v6672_v27, %s15378_s4  ;;  %v7726_v50 = vpop.permute.xlu0 %7725  ;;  %v14497_v40 = vld [vmem:[%s20355_s1 + $0x688] ss:$16 sps:$4 sm:$0xff]   ;;  %v17415_v32 = vpop.f32.mrb[14].mxu0 }
 0x4b3   :  { %7746 = vst.msk [vmem:[#allocation2 + $0xa0] sm:$0xff] %vm7741_vm5, %v7726_v50  ;;  %12826 = vmatprep.mubr.msk.bf16.mxu1 %vm4780_vm2, %v14499_v59  ;;  %v14505_v59 = vld [vmem:[%s20355_s1 + $0x6ac] ss:$16 sps:$4 sm:$0xff]   ;;  %v5592_v50 = vpop.f32.mrb[15].mxu0 }
 0x4b4   :  { %v7728_v25 = vpop.permute.xlu1 %7727  ;;  %v14601_v50 = vld [vmem:[%s20355_s1 + $0x8a4] ss:$16 sps:$4 sm:$0xff]  }
 0x4b5   :  { %v6676_v33 = vpop.f32.mrb[236].mxu1  ;;  %7747 = vst.msk [vmem:[#allocation2 + $0xc8] sm:$0xff] %vm7741_vm5, %v7728_v25 }
 0x4b6   :  { %v6677_v35 = vadd.f32 %v6676_v33, %v17056_v9  ;;  %v6678_v16 = vpop.f32.mrb[237].mxu1  ;;  %v14593_v9 = vld [vmem:[%s20355_s1 + $0x880] ss:$16 sps:$4 sm:$0xff]  }
 0x4b7   :  { %v6679_v27 = vpop.f32.mrb[238].mxu1  ;;  %5802 = vmatmul.mubr.bf16.gmra.mrb[12].mxu0 %v14593_v9 }
 0x4b8   :  { %v6680_v58 = vadd.f32 %v6679_v27, %v17071_v53  ;;  %v6681_v29 = vpop.f32.mrb[239].mxu1  ;;  %7885 = vrot.lane.b32.xlu0 %v6677_v35, %s15378_s4  ;;  %v17429_v35 = vpop.f32.mrb[16].mxu0  ;;  %5809 = vmatprep.mubr.bf16.mxu0 %v14601_v50 }
 0x4b9   :  { %v5597_v27 = vpop.f32.mrb[17].mxu0 }
 0x4ba   :  { %6891 = vmatmul.mubr.bf16.gmra.mrb[236].mxu1 %v14497_v40  ;;  %7887 = vrot.lane.b32.xlu1 %v6680_v58, %s15378_s4  ;;  %v7730_v25 = vpop.permute.xlu0 %7729  ;;  %v14503_v40 = vld [vmem:[%s20355_s1 + $0x6a8] ss:$16 sps:$4 sm:$0xff]   ;;  %v17438_v29 = vpop.f32.mrb[18].mxu0 }
 0x4bb   :  { %7748 = vst.msk [vmem:[#allocation2 + $0xf0] sm:$0xff] %vm7741_vm5, %v7730_v25  ;;  %12827 = vmatprep.mubr.msk.bf16.mxu1 %vm4780_vm2, %v14505_v59  ;;  %v14511_v59 = vld [vmem:[%s20355_s1 + $0x6cc] ss:$16 sps:$4 sm:$0xff]   ;;  %v5600_v25 = vpop.f32.mrb[19].mxu0 }
 0x4bc   :  { %v7732_v53 = vpop.permute.xlu1 %7731  ;;  %v14605_v25 = vld [vmem:[%s20355_s1 + $0x8c0] ss:$16 sps:$4 sm:$0xff]  }
 0x4bd   :  { %v6684_v33 = vpop.f32.mrb[240].mxu1  ;;  %7749 = vst.msk [vmem:[#allocation2 + $0x118] sm:$0xff] %vm7741_vm5, %v7732_v53 }
 0x4be   :  { %v6685_v16 = vadd.f32 %v6684_v33, %v17077_v10  ;;  %v6686_v11 = vpop.f32.mrb[241].mxu1  ;;  %v14599_v10 = vld [vmem:[%s20355_s1 + $0x8a0] ss:$16 sps:$4 sm:$0xff]  }
 0x4bf   :  { %v6687_v58 = vpop.f32.mrb[242].mxu1  ;;  %5810 = vmatmul.mubr.bf16.gmra.mrb[16].mxu0 %v14599_v10  ;;  %v14607_v10 = vld [vmem:[%s20355_s1 + $0x8c4] ss:$16 sps:$4 sm:$0xff]  }
 0x4c0   :  { %v6688_v9 = vadd.f32 %v6687_v58, %v17092_v13  ;;  %v6689_v47 = vpop.f32.mrb[243].mxu1  ;;  %7889 = vrot.lane.b32.xlu0 %v6685_v16, %s15378_s4  ;;  %v17452_v16 = vpop.f32.mrb[20].mxu0  ;;  %5817 = vmatprep.mubr.bf16.mxu0 %v14607_v10 }
 0x4c1   :  { %v5605_v58 = vpop.f32.mrb[21].mxu0 }
 0x4c2   :  { %6899 = vmatmul.mubr.bf16.gmra.mrb[240].mxu1 %v14503_v40  ;;  %7891 = vrot.lane.b32.xlu1 %v6688_v9, %s15378_s4  ;;  %v7759_v53 = vpop.permute.xlu0 %7758  ;;  %v14509_v40 = vld [vmem:[%s20355_s1 + $0x6c8] ss:$16 sps:$4 sm:$0xff]   ;;  %v17461_v47 = vpop.f32.mrb[22].mxu0 }
 0x4c3   :  { %7783 = vst.msk [vmem:[#allocation2] sm:$0xff] %vm7782_vm6, %v7759_v53  ;;  %12828 = vmatprep.mubr.msk.bf16.mxu1 %vm4780_vm2, %v14511_v59  ;;  %v14517_v59 = vld [vmem:[%s20355_s1 + $0x6ec] ss:$16 sps:$4 sm:$0xff]   ;;  %v5608_v53 = vpop.f32.mrb[23].mxu0 }
 0x4c4   :  { %v7761_v13 = vpop.permute.xlu1 %7760  ;;  %v14613_v53 = vld [vmem:[%s20355_s1 + $0x8e4] ss:$16 sps:$4 sm:$0xff]  }
 0x4c5   :  { %v6692_v33 = vpop.f32.mrb[244].mxu1  ;;  %7784 = vst.msk [vmem:[#allocation2 + $0x28] sm:$0xff] %vm7782_vm6, %v7761_v13 }
 0x4c6   :  { %v6693_v11 = vadd.f32 %v6692_v33, %v17098_v6  ;;  %v6694_v27 = vpop.f32.mrb[245].mxu1 }
 0x4c7   :  { %v6695_v9 = vpop.f32.mrb[246].mxu1  ;;  %5818 = vmatmul.mubr.bf16.gmra.mrb[20].mxu0 %v14605_v25 }
 0x4c8   :  { %v6696_v50 = vadd.f32 %v6695_v9, %v17113_v57  ;;  %v6697_v6 = vpop.f32.mrb[247].mxu1  ;;  %7893 = vrot.lane.b32.xlu0 %v6693_v11, %s15378_s4  ;;  %v17475_v11 = vpop.f32.mrb[24].mxu0  ;;  %5825 = vmatprep.mubr.bf16.mxu0 %v14613_v53 }
 0x4c9   :  { %v5613_v9 = vpop.f32.mrb[25].mxu0 }
 0x4ca   :  { %6907 = vmatmul.mubr.bf16.gmra.mrb[244].mxu1 %v14509_v40  ;;  %7895 = vrot.lane.b32.xlu1 %v6696_v50, %s15378_s4  ;;  %v7763_v13 = vpop.permute.xlu0 %7762  ;;  %v14515_v40 = vld [vmem:[%s20355_s1 + $0x6e8] ss:$16 sps:$4 sm:$0xff]   ;;  %v17484_v50 = vpop.f32.mrb[26].mxu0 }
 0x4cb   :  { %7785 = vst.msk [vmem:[#allocation2 + $0x50] sm:$0xff] %vm7782_vm6, %v7763_v13  ;;  %12829 = vmatprep.mubr.msk.bf16.mxu1 %vm4780_vm2, %v14517_v59  ;;  %v14523_v59 = vld [vmem:[%s20355_s1 + $0x70c] ss:$16 sps:$4 sm:$0xff]   ;;  %v5616_v13 = vpop.f32.mrb[27].mxu0 }
 0x4cc   :  { %v7765_v33 = vpop.permute.xlu1 %7764  ;;  %v14619_v13 = vld [vmem:[%s20355_s1 + $0x904] ss:$16 sps:$4 sm:$0xff]  }
 0x4cd   :  { %v6700_v57 = vpop.f32.mrb[248].mxu1  ;;  %7786 = vst.msk [vmem:[#allocation2 + $0x78] sm:$0xff] %vm7782_vm6, %v7765_v33 }
 0x4ce   :  { %v6701_v27 = vadd.f32 %v6700_v57, %v17119_v38  ;;  %v6702_v58 = vpop.f32.mrb[249].mxu1  ;;  %v14611_v38 = vld [vmem:[%s20355_s1 + $0x8e0] ss:$16 sps:$4 sm:$0xff]  }
 0x4cf   :  { %v6703_v10 = vpop.f32.mrb[250].mxu1  ;;  %5826 = vmatmul.mubr.bf16.gmra.mrb[24].mxu0 %v14611_v38 }
 0x4d0   :  { %v6704_v6 = vadd.f32 %v6703_v10, %v17134_v37  ;;  %v6705_v25 = vpop.f32.mrb[251].mxu1  ;;  %7922 = vrot.lane.b32.xlu0 %v6701_v27, %s15379_s25  ;;  %v17498_v27 = vpop.f32.mrb[28].mxu0  ;;  %5833 = vmatprep.mubr.bf16.mxu0 %v14619_v13 }
 0x4d1   :  { %v5621_v10 = vpop.f32.mrb[29].mxu0 }
 0x4d2   :  { %6915 = vmatmul.mubr.bf16.gmra.mrb[248].mxu1 %v14515_v40  ;;  %7924 = vrot.lane.b32.xlu1 %v6704_v6, %s15379_s25  ;;  %v7767_v33 = vpop.permute.xlu0 %7766  ;;  %v14521_v40 = vld [vmem:[%s20355_s1 + $0x708] ss:$16 sps:$4 sm:$0xff]   ;;  %v17507_v25 = vpop.f32.mrb[30].mxu0 }
 0x4d3   :  { %7787 = vst.msk [vmem:[#allocation2 + $0xa0] sm:$0xff] %vm7782_vm6, %v7767_v33  ;;  %12830 = vmatprep.mubr.msk.bf16.mxu1 %vm4780_vm2, %v14523_v59  ;;  %v14529_v59 = vld [vmem:[%s20355_s1 + $0x72c] ss:$16 sps:$4 sm:$0xff]   ;;  %v5624_v33 = vpop.f32.mrb[31].mxu0 }
 0x4d4   :  { %v7769_v37 = vpop.permute.xlu1 %7768  ;;  %v14625_v33 = vld [vmem:[%s20355_s1 + $0x924] ss:$16 sps:$4 sm:$0xff]  }
 0x4d5   :  { %v6708_v57 = vpop.f32.mrb[252].mxu1  ;;  %7788 = vst.msk [vmem:[#allocation2 + $0xc8] sm:$0xff] %vm7782_vm6, %v7769_v37 }
 0x4d6   :  { %v6709_v58 = vadd.f32 %v6708_v57, %v17140_v63  ;;  %v6710_v9 = vpop.f32.mrb[253].mxu1  ;;  %v14617_v63 = vld [vmem:[%s20355_s1 + $0x900] ss:$16 sps:$4 sm:$0xff]  }
 0x4d7   :  { %v6711_v6 = vpop.f32.mrb[254].mxu1  ;;  %5834 = vmatmul.mubr.bf16.gmra.mrb[28].mxu0 %v14617_v63 }
 0x4d8   :  { %v6712_v38 = vadd.f32 %v6711_v6, %v17155_v5  ;;  %v6713_v53 = vpop.f32.mrb[255].mxu1  ;;  %7926 = vrot.lane.b32.xlu0 %v6709_v58, %s15379_s25  ;;  %v17521_v58 = vpop.f32.mrb[32].mxu0  ;;  %5841 = vmatprep.mubr.bf16.mxu0 %v14625_v33 }
 0x4d9   :  { %v5629_v6 = vpop.f32.mrb[33].mxu0 }
 0x4da   :  { %6923 = vmatmul.mubr.bf16.gmra.mrb[252].mxu1 %v14521_v40  ;;  %7928 = vrot.lane.b32.xlu1 %v6712_v38, %s15379_s25  ;;  %v7771_v37 = vpop.permute.xlu0 %7770  ;;  %v14527_v40 = vld [vmem:[%s20355_s1 + $0x728] ss:$16 sps:$4 sm:$0xff]   ;;  %v17530_v53 = vpop.f32.mrb[34].mxu0 }
 0x4db   :  { %7789 = vst.msk [vmem:[#allocation2 + $0xf0] sm:$0xff] %vm7782_vm6, %v7771_v37  ;;  %12831 = vmatprep.mubr.msk.bf16.mxu1 %vm4780_vm2, %v14529_v59  ;;  %v14535_v59 = vld [vmem:[%s20355_s1 + $0x74c] ss:$16 sps:$4 sm:$0xff]   ;;  %v5632_v37 = vpop.f32.mrb[35].mxu0 }
 0x4dc   :  { %v7773_v5 = vpop.permute.xlu1 %7772  ;;  %v14631_v37 = vld [vmem:[%s20355_s1 + $0x944] ss:$16 sps:$4 sm:$0xff]  }
 0x4dd   :  { %v6716_v57 = vpop.f32.mrb[0].mxu1  ;;  %7790 = vst.msk [vmem:[#allocation2 + $0x118] sm:$0xff] %vm7782_vm6, %v7773_v5 }
 0x4de   :  { %v6717_v9 = vadd.f32 %v6716_v57, %v17161_v49  ;;  %v6718_v10 = vpop.f32.mrb[1].mxu1  ;;  %v14623_v49 = vld [vmem:[%s20355_s1 + $0x920] ss:$16 sps:$4 sm:$0xff]  }
 0x4df   :  { %v6719_v38 = vpop.f32.mrb[2].mxu1  ;;  %5842 = vmatmul.mubr.bf16.gmra.mrb[32].mxu0 %v14623_v49 }
 0x4e0   :  { %v6720_v63 = vadd.f32 %v6719_v38, %v17176_v14  ;;  %v6721_v13 = vpop.f32.mrb[3].mxu1  ;;  %7930 = vrot.lane.b32.xlu0 %v6717_v9, %s15379_s25  ;;  %v17544_v9 = vpop.f32.mrb[36].mxu0  ;;  %5849 = vmatprep.mubr.bf16.mxu0 %v14631_v37 }
 0x4e1   :  { %v5637_v38 = vpop.f32.mrb[37].mxu0 }
 0x4e2   :  { %6931 = vmatmul.mubr.bf16.gmra.mrb[0].mxu1 %v14527_v40  ;;  %7932 = vrot.lane.b32.xlu1 %v6720_v63, %s15379_s25  ;;  %v7800_v5 = vpop.permute.xlu0 %7799  ;;  %v14533_v40 = vld [vmem:[%s20355_s1 + $0x748] ss:$16 sps:$4 sm:$0xff]   ;;  %v17553_v13 = vpop.f32.mrb[38].mxu0 }
 0x4e3   :  { %7824 = vst.msk [vmem:[#allocation2] sm:$0xff] %vm7823_vm7, %v7800_v5  ;;  %12832 = vmatprep.mubr.msk.bf16.mxu1 %vm4780_vm2, %v14535_v59  ;;  %v14541_v59 = vld [vmem:[%s20355_s1 + $0x76c] ss:$16 sps:$4 sm:$0xff]   ;;  %v5640_v5 = vpop.f32.mrb[39].mxu0 }
 0x4e4   :  { %v7802_v14 = vpop.permute.xlu1 %7801  ;;  %v14637_v5 = vld [vmem:[%s20355_s1 + $0x964] ss:$16 sps:$4 sm:$0xff]  }
 0x4e5   :  { %v6724_v57 = vpop.f32.mrb[4].mxu1  ;;  %7825 = vst.msk [vmem:[#allocation2 + $0x28] sm:$0xff] %vm7823_vm7, %v7802_v14 }
 0x4e6   :  { %v6725_v10 = vadd.f32 %v6724_v57, %v17182_v18  ;;  %v6726_v6 = vpop.f32.mrb[5].mxu1  ;;  %v14629_v18 = vld [vmem:[%s20355_s1 + $0x940] ss:$16 sps:$4 sm:$0xff]  }
 0x4e7   :  { %v6727_v63 = vpop.f32.mrb[6].mxu1  ;;  %5850 = vmatmul.mubr.bf16.gmra.mrb[36].mxu0 %v14629_v18  ;;  %v17571_v38 = vpop.f32.mrb[40].mxu0 }
 0x4e8   :  { %v6728_v49 = vadd.f32 %v6727_v63, %v17197_v61  ;;  %v6729_v33 = vpop.f32.mrb[7].mxu1  ;;  %7934 = vrot.lane.b32.xlu0 %v6725_v10, %s15379_s25  ;;  %5857 = vmatprep.mubr.bf16.mxu0 %v14637_v5 }
 0x4ea   :  { %6939 = vmatmul.mubr.bf16.gmra.mrb[4].mxu1 %v14533_v40  ;;  %7936 = vrot.lane.b32.xlu1 %v6728_v49, %s15379_s25  ;;  %v7804_v14 = vpop.permute.xlu0 %7803  ;;  %v14539_v40 = vld [vmem:[%s20355_s1 + $0x768] ss:$16 sps:$4 sm:$0xff]   ;;  %v5645_v49 = vpop.f32.mrb[41].mxu0 }
 0x4eb   :  { %7826 = vst.msk [vmem:[#allocation2 + $0x50] sm:$0xff] %vm7823_vm7, %v7804_v14  ;;  %12833 = vmatprep.mubr.msk.bf16.mxu1 %vm4780_vm2, %v14541_v59  ;;  %v14547_v59 = vld [vmem:[%s20355_s1 + $0x78c] ss:$16 sps:$4 sm:$0xff]   ;;  %v17578_v37 = vpop.f32.mrb[42].mxu0 }
 0x4ec   :  { %v7806_v61 = vpop.permute.xlu1 %7805  ;;  %v5648_v14 = vpop.f32.mrb[43].mxu0 }
 0x4ed   :  { %v6732_v57 = vpop.f32.mrb[8].mxu1  ;;  %7827 = vst.msk [vmem:[#allocation2 + $0x78] sm:$0xff] %vm7823_vm7, %v7806_v61  ;;  %v14643_v14 = vld [vmem:[%s20355_s1 + $0x984] ss:$16 sps:$4 sm:$0xff]  }
 0x4ee   :  { %v6733_v10 = vadd.f32 %v6732_v57, %v17203_v26  ;;  %v6734_v6 = vpop.f32.mrb[9].mxu1  ;;  %v14635_v26 = vld [vmem:[%s20355_s1 + $0x960] ss:$16 sps:$4 sm:$0xff]  }
 0x4ef   :  { %v6735_v63 = vpop.f32.mrb[10].mxu1  ;;  %5858 = vmatmul.mubr.bf16.gmra.mrb[40].mxu0 %v14635_v26  ;;  %v17594_v49 = vpop.f32.mrb[44].mxu0 }
 0x4f0   :  { %7955 = vst.msk [vmem:[#allocation2 + $0x8] sm:$0xff] %vm7659_vm3, %v6733_v10  ;;  %v6736_v33 = vadd.f32 %v6735_v63, %v17215_v4  ;;  %v6737_v18 = vpop.f32.mrb[11].mxu1  ;;  %v14545_v63 = vld [vmem:[%s20355_s1 + $0x788] ss:$16 sps:$4 sm:$0xff]   ;;  %5865 = vmatprep.mubr.bf16.mxu0 %v14643_v14  ;;  %v14647_v14 = vld [vmem:[%s20355_s1 + $0x9a0] ss:$16 sps:$4 sm:$0xff]  }
 0x4f2   :  { %7956 = vst.msk [vmem:[#allocation2 + $0x30] sm:$0xff] %vm7659_vm3, %v6736_v33  ;;  %6947 = vmatmul.mubr.bf16.gmra.mrb[8].mxu1 %v14539_v40  ;;  %v7808_v61 = vpop.permute.xlu0 %7807  ;;  %v14553_v33 = vld [vmem:[%s20355_s1 + $0x7ac] ss:$16 sps:$4 sm:$0xff]  }
 0x4f3   :  { %7828 = vst.msk [vmem:[#allocation2 + $0xa0] sm:$0xff] %vm7823_vm7, %v7808_v61  ;;  %12834 = vmatprep.mubr.msk.bf16.mxu1 %vm4780_vm2, %v14547_v59  ;;  %v5653_v59 = vpop.f32.mrb[45].mxu0 }
 0x4f4   :  { %v7810_v4 = vpop.permute.xlu1 %7809  ;;  %v17601_v5 = vpop.f32.mrb[46].mxu0 }
 0x4f5   :  { %v6740_v57 = vpop.f32.mrb[12].mxu1  ;;  %7829 = vst.msk [vmem:[#allocation2 + $0xc8] sm:$0xff] %vm7823_vm7, %v7810_v4  ;;  %v5656_v61 = vpop.f32.mrb[47].mxu0 }
 0x4f6   :  { %v6741_v10 = vadd.f32 %v6740_v57, %v17224_v0  ;;  %v6742_v6 = vpop.f32.mrb[13].mxu1  ;;  %v14641_v0 = vld [vmem:[%s20355_s1 + $0x980] ss:$16 sps:$4 sm:$0xff]   ;;  %v14649_v61 = vld [vmem:[%s20355_s1 + $0x9a4] ss:$16 sps:$4 sm:$0xff]  }
 0x4f7   :  { %v6743_v40 = vpop.f32.mrb[14].mxu1  ;;  %5866 = vmatmul.mubr.bf16.gmra.mrb[44].mxu0 %v14641_v0  ;;  %v17617_v59 = vpop.f32.mrb[48].mxu0 }
 0x4f8   :  { %7957 = vst.msk [vmem:[#allocation2 + $0x58] sm:$0xff] %vm7659_vm3, %v6741_v10  ;;  %v6744_v18 = vadd.f32 %v6743_v40, %v17236_v51  ;;  %v6745_v26 = vpop.f32.mrb[15].mxu1  ;;  %v14551_v40 = vld [vmem:[%s20355_s1 + $0x7a8] ss:$16 sps:$4 sm:$0xff]   ;;  %5873 = vmatprep.mubr.bf16.mxu0 %v14649_v61 }
 0x4fa   :  { %7958 = vst.msk [vmem:[#allocation2 + $0x80] sm:$0xff] %vm7659_vm3, %v6744_v18  ;;  %6955 = vmatmul.mubr.bf16.gmra.mrb[12].mxu1 %v14545_v63  ;;  %v7812_v4 = vpop.permute.xlu0 %7811  ;;  %v5661_v18 = vpop.f32.mrb[49].mxu0 }
 0x4fb   :  { %7830 = vst.msk [vmem:[#allocation2 + $0xf0] sm:$0xff] %vm7823_vm7, %v7812_v4  ;;  %12835 = vmatprep.mubr.msk.bf16.mxu1 %vm4780_vm2, %v14553_v33  ;;  %v14559_v33 = vld [vmem:[%s20355_s1 + $0x7cc] ss:$16 sps:$4 sm:$0xff]  }
 0x4fc   :  { %v7814_v51 = vpop.permute.xlu1 %7813 }
 0x4fd   :  { %v6748_v57 = vpop.f32.mrb[16].mxu1  ;;  %7831 = vst.msk [vmem:[#allocation2 + $0x118] sm:$0xff] %vm7823_vm7, %v7814_v51 }
 0x4fe   :  { %v6749_v10 = vadd.f32 %v6748_v57, %v17245_v8  ;;  %v6750_v6 = vpop.f32.mrb[17].mxu1  ;;  %v17624_v8 = vpop.f32.mrb[50].mxu0 }
 0x4ff   :  { %v6751_v63 = vpop.f32.mrb[18].mxu1  ;;  %v5664_v4 = vpop.f32.mrb[51].mxu0  ;;  %5874 = vmatmul.mubr.bf16.gmra.mrb[48].mxu0 %v14647_v14 }
 0x500   :  { %7959 = vst.msk [vmem:[#allocation2 + $0xa8] sm:$0xff] %vm7659_vm3, %v6749_v10  ;;  %v6752_v26 = vadd.f32 %v6751_v63, %v17257_v41  ;;  %v6753_v0 = vpop.f32.mrb[19].mxu1  ;;  %v14557_v63 = vld [vmem:[%s20355_s1 + $0x7c8] ss:$16 sps:$4 sm:$0xff]   ;;  %v17640_v18 = vpop.f32.mrb[52].mxu0 }
 0x501   :  { %v14655_v4 = vld [vmem:[%s20355_s1 + $0x9c4] ss:$16 sps:$4 sm:$0xff]  }
 0x502   :  { %7960 = vst.msk [vmem:[#allocation2 + $0xd0] sm:$0xff] %vm7659_vm3, %v6752_v26  ;;  %6963 = vmatmul.mubr.bf16.gmra.mrb[16].mxu1 %v14551_v40  ;;  %v7841_v51 = vpop.permute.xlu0 %7840  ;;  %v14565_v26 = vld [vmem:[%s20355_s1 + $0x7ec] ss:$16 sps:$4 sm:$0xff]   ;;  %5881 = vmatprep.mubr.bf16.mxu0 %v14655_v4 }
 0x503   :  { %7865 = vst.msk [vmem:[#allocation2] sm:$0xff] %vm7864_vm8, %v7841_v51  ;;  %12836 = vmatprep.mubr.msk.bf16.mxu1 %vm4780_vm2, %v14559_v33  ;;  %v5669_v33 = vpop.f32.mrb[53].mxu0 }
 0x504   :  { %v7843_v41 = vpop.permute.xlu1 %7842  ;;  %v17647_v61 = vpop.f32.mrb[54].mxu0 }
 0x505   :  { %v6756_v57 = vpop.f32.mrb[20].mxu1  ;;  %7866 = vst.msk [vmem:[#allocation2 + $0x28] sm:$0xff] %vm7864_vm8, %v7843_v41  ;;  %v5672_v51 = vpop.f32.mrb[55].mxu0 }
 0x506   :  { %v6757_v10 = vadd.f32 %v6756_v57, %v17267_v30  ;;  %v6758_v6 = vpop.f32.mrb[21].mxu1  ;;  %v14653_v30 = vld [vmem:[%s20355_s1 + $0x9c0] ss:$16 sps:$4 sm:$0xff]   ;;  %v14661_v51 = vld [vmem:[%s20355_s1 + $0x9e4] ss:$16 sps:$4 sm:$0xff]  }
 0x507   :  { %v6759_v40 = vpop.f32.mrb[22].mxu1  ;;  %5882 = vmatmul.mubr.bf16.gmra.mrb[52].mxu0 %v14653_v30  ;;  %v17663_v33 = vpop.f32.mrb[56].mxu0 }
 0x508   :  { %7961 = vst.msk [vmem:[#allocation2 + $0xf8] sm:$0xff] %vm7659_vm3, %v6757_v10  ;;  %v6760_v0 = vadd.f32 %v6759_v40, %v17285_v42  ;;  %v6761_v14 = vpop.f32.mrb[23].mxu1  ;;  %v14563_v40 = vld [vmem:[%s20355_s1 + $0x7e8] ss:$16 sps:$4 sm:$0xff]   ;;  %5889 = vmatprep.mubr.bf16.mxu0 %v14661_v51 }
 0x50a   :  { %7962 = vst.msk [vmem:[#allocation2 + $0x120] sm:$0xff] %vm7659_vm3, %v6760_v0  ;;  %6971 = vmatmul.mubr.bf16.gmra.mrb[20].mxu1 %v14557_v63  ;;  %v7845_v41 = vpop.permute.xlu0 %7844  ;;  %v14568_v0 = vld [vmem:[%s20355_s1 + $0x80c] ss:$16 sps:$4 sm:$0xff]  }
 0x50b   :  { %7867 = vst.msk [vmem:[#allocation2 + $0x50] sm:$0xff] %vm7864_vm8, %v7845_v41  ;;  %12837 = vmatprep.mubr.msk.bf16.mxu1 %vm4780_vm2, %v14565_v26  ;;  %v5677_v26 = vpop.f32.mrb[57].mxu0 }
 0x50c   :  { %v7847_v42 = vpop.permute.xlu1 %7846  ;;  %v17670_v4 = vpop.f32.mrb[58].mxu0 }
 0x50d   :  { %v6764_v57 = vpop.f32.mrb[24].mxu1  ;;  %7868 = vst.msk [vmem:[#allocation2 + $0x78] sm:$0xff] %vm7864_vm8, %v7847_v42  ;;  %v5680_v41 = vpop.f32.mrb[59].mxu0 }
 0x50e   :  { %v6765_v10 = vadd.f32 %v6764_v57, %v17291_v45  ;;  %v6766_v6 = vpop.f32.mrb[25].mxu1  ;;  %v14659_v45 = vld [vmem:[%s20355_s1 + $0x9e0] ss:$16 sps:$4 sm:$0xff]   ;;  %v14668_v41 = vld [vmem:[%s20355_s1 + $0xa04] ss:$16 sps:$4 sm:$0xff]  }
 0x50f   :  { %v6767_v63 = vpop.f32.mrb[26].mxu1  ;;  %5890 = vmatmul.mubr.bf16.gmra.mrb[56].mxu0 %v14659_v45 }
 0x510   :  { %7971 = vrot.lane.b32.xlu0 %v6765_v10, %s15373_s3  ;;  %v6768_v14 = vadd.f32 %v6767_v63, %v17306_v23  ;;  %v6769_v30 = vpop.f32.mrb[27].mxu1  ;;  %v17686_v63 = vpop.f32.mrb[60].mxu0  ;;  %5897 = vmatprep.mubr.bf16.mxu0 %v14668_v41 }
 0x512   :  { %6979 = vmatmul.mubr.bf16.gmra.mrb[24].mxu1 %v14563_v40  ;;  %v7849_v42 = vpop.permute.xlu0 %7848  ;;  %v14566_v40 = vld [vmem:[%s20355_s1 + $0x808] ss:$16 sps:$4 sm:$0xff]  }
 0x513   :  { %7869 = vst.msk [vmem:[#allocation2 + $0xa0] sm:$0xff] %vm7864_vm8, %v7849_v42  ;;  %12838 = vmatprep.mubr.msk.bf16.mxu1 %vm4780_vm2, %v14568_v0  ;;  %v14574_v0 = vld [vmem:[%s20355_s1 + $0x82c] ss:$16 sps:$4 sm:$0xff]  }
 0x514   :  { %7973 = vrot.lane.b32.xlu0 %v6768_v14, %s15373_s3  ;;  %v7851_v23 = vpop.permute.xlu1 %7850  ;;  %v5685_v14 = vpop.f32.mrb[61].mxu0 }
 0x515   :  { %v6772_v57 = vpop.f32.mrb[28].mxu1  ;;  %7870 = vst.msk [vmem:[#allocation2 + $0xc8] sm:$0xff] %vm7864_vm8, %v7851_v23  ;;  %v17693_v51 = vpop.f32.mrb[62].mxu0  ;;  %v14572_v14 = vld [vmem:[%s20355_s1 + $0x828] ss:$16 sps:$4 sm:$0xff]  }
 0x516   :  { %v6773_v10 = vadd.f32 %v6772_v57, %v17314_v1  ;;  %v6774_v6 = vpop.f32.mrb[29].mxu1  ;;  %v14666_v1 = vld [vmem:[%s20355_s1 + $0xa00] ss:$16 sps:$4 sm:$0xff]   ;;  %v5688_v42 = vpop.f32.mrb[63].mxu0 }
 0x517   :  { %v6775_v26 = vpop.f32.mrb[30].mxu1  ;;  %v14669_v57 = vld [vmem:[%s20359_s5] sm:$0xff]   ;;  %5898 = vmatmul.mubr.bf16.gmra.mrb[60].mxu0 %v14666_v1 }
 0x518   :  { %v6776_v30 = vadd.f32 %v6775_v26, %v17323_v12  ;;  %v6777_v45 = vpop.f32.mrb[31].mxu1  ;;  %7975 = vrot.lane.b32.xlu0 %v6773_v10, %s15373_s3  ;;  %v14665_v12 = vld [vmem:[%s20359_s5 + $0x40] sm:$0xff]  }
 0x519   :  { %13265 = vmatprep.subr.bf16.mxu0 %v14665_v12  ;;  %v14675_v12 = vld [vmem:[%s20355_s1 + $0xa24] ss:$16 sps:$4 sm:$0xff]  }
 0x51a   :  { %6987 = vmatmul.mubr.bf16.gmra.mrb[28].mxu1 %v14566_v40  ;;  %7977 = vrot.lane.b32.xlu1 %v6776_v30, %s15373_s3  ;;  %v7853_v23 = vpop.permute.xlu0 %7852  ;;  %v17715_v30 = vpop.f32.mrb[64].mxu0 }
 0x51b   :  { %7871 = vst.msk [vmem:[#allocation2 + $0xf0] sm:$0xff] %vm7864_vm8, %v7853_v23  ;;  %12839 = vmatprep.mubr.msk.bf16.mxu1 %vm4780_vm2, %v14574_v0  ;;  %13266 = vmatpush3.bf16.msra.mxu0 %v14669_v57  ;;  %v14580_v0 = vld [vmem:[%s20355_s1 + $0x84c] ss:$16 sps:$4 sm:$0xff]   ;;  %v5693_v1 = vpop.f32.mrb[65].mxu0  ;;  %v14673_v23 = vld [vmem:[%s20355_s1 + $0xa20] ss:$16 sps:$4 sm:$0xff]  }
 0x51c   :  { %v7855_v10 = vpop.permute.xlu1 %7854  ;;  %5905 = vmatprep.mubr.bf16.mxu0 %v14675_v12 }
 0x51d   :  { %v6780_v6 = vpop.f32.mrb[32].mxu1  ;;  %7872 = vst.msk [vmem:[#allocation2 + $0x118] sm:$0xff] %vm7864_vm8, %v7855_v10 }
 0x51e   :  { %v6781_v40 = vadd.f32 %v6780_v6, %v17337_v56  ;;  %v6782_v26 = vpop.f32.mrb[33].mxu1  ;;  %v17722_v56 = vpop.f32.mrb[66].mxu0 }
 0x51f   :  { %v6783_v45 = vpop.f32.mrb[34].mxu1  ;;  %v5696_v57 = vpop.f32.mrb[67].mxu0  ;;  %5906 = vmatmul.mubr.bf16.gmra.mrb[64].mxu0 %v14673_v23 }
 0x520   :  { %v6784_v41 = vadd.f32 %v6783_v45, %v17346_v39  ;;  %v6785_v42 = vpop.f32.mrb[35].mxu1  ;;  %7979 = vrot.lane.b32.xlu0 %v6781_v40, %s15373_s3  ;;  %v17738_v45 = vpop.f32.mrb[68].mxu0  ;;  %v14681_v57 = vld [vmem:[%s20355_s1 + $0xa44] ss:$16 sps:$4 sm:$0xff]  }
 0x521   :  { %5913 = vmatprep.mubr.bf16.mxu0 %v14681_v57 }
 0x522   :  { %6995 = vmatmul.mubr.bf16.gmra.mrb[32].mxu1 %v14572_v14  ;;  %7981 = vrot.lane.b32.xlu1 %v6784_v41, %s15373_s3  ;;  %v7882_v10 = vpop.permute.xlu0 %7881  ;;  %v14578_v14 = vld [vmem:[%s20355_s1 + $0x848] ss:$16 sps:$4 sm:$0xff]   ;;  %v5701_v41 = vpop.f32.mrb[69].mxu0 }
 0x523   :  { %7906 = vst.msk [vmem:[#allocation2] sm:$0xff] %vm7905_vm9, %v7882_v10  ;;  %12840 = vmatprep.mubr.msk.bf16.mxu1 %vm4780_vm2, %v14580_v0  ;;  %v14586_v0 = vld [vmem:[%s20355_s1 + $0x86c] ss:$16 sps:$4 sm:$0xff]   ;;  %v17745_v12 = vpop.f32.mrb[70].mxu0 }
 0x524   :  { %v7884_v39 = vpop.permute.xlu1 %7883  ;;  %v5704_v10 = vpop.f32.mrb[71].mxu0 }
 0x525   :  { %v6788_v6 = vpop.f32.mrb[36].mxu1  ;;  %7907 = vst.msk [vmem:[#allocation2 + $0x28] sm:$0xff] %vm7905_vm9, %v7884_v39  ;;  %v14687_v10 = vld [vmem:[%s20355_s1 + $0xa64] ss:$16 sps:$4 sm:$0xff]  }
 0x526   :  { %v6789_v40 = vadd.f32 %v6788_v6, %v17360_v22  ;;  %v6790_v26 = vpop.f32.mrb[37].mxu1  ;;  %v14679_v22 = vld [vmem:[%s20355_s1 + $0xa40] ss:$16 sps:$4 sm:$0xff]  }
 0x527   :  { %v6791_v1 = vpop.f32.mrb[38].mxu1  ;;  %5914 = vmatmul.mubr.bf16.gmra.mrb[68].mxu0 %v14679_v22 }
 0x528   :  { %v6792_v42 = vadd.f32 %v6791_v1, %v17369_v44  ;;  %v6793_v23 = vpop.f32.mrb[39].mxu1  ;;  %7983 = vrot.lane.b32.xlu0 %v6789_v40, %s15373_s3  ;;  %v17761_v1 = vpop.f32.mrb[72].mxu0  ;;  %5921 = vmatprep.mubr.bf16.mxu0 %v14687_v10 }
 0x52a   :  { %7003 = vmatmul.mubr.bf16.gmra.mrb[36].mxu1 %v14578_v14  ;;  %7985 = vrot.lane.b32.xlu1 %v6792_v42, %s15373_s3  ;;  %v7886_v39 = vpop.permute.xlu0 %7885  ;;  %v14584_v14 = vld [vmem:[%s20355_s1 + $0x868] ss:$16 sps:$4 sm:$0xff]   ;;  %v5709_v42 = vpop.f32.mrb[73].mxu0 }
 0x52b   :  { %7908 = vst.msk [vmem:[#allocation2 + $0x50] sm:$0xff] %vm7905_vm9, %v7886_v39  ;;  %12841 = vmatprep.mubr.msk.bf16.mxu1 %vm4780_vm2, %v14586_v0  ;;  %v14592_v0 = vld [vmem:[%s20355_s1 + $0x88c] ss:$16 sps:$4 sm:$0xff]   ;;  %v17768_v57 = vpop.f32.mrb[74].mxu0 }
 0x52c   :  { %v7888_v44 = vpop.permute.xlu1 %7887  ;;  %v5712_v39 = vpop.f32.mrb[75].mxu0 }
 0x52d   :  { %v6796_v6 = vpop.f32.mrb[40].mxu1  ;;  %7909 = vst.msk [vmem:[#allocation2 + $0x78] sm:$0xff] %vm7905_vm9, %v7888_v44  ;;  %v14693_v39 = vld [vmem:[%s20355_s1 + $0xa84] ss:$16 sps:$4 sm:$0xff]  }
 0x52e   :  { %v6797_v40 = vadd.f32 %v6796_v6, %v17383_v2  ;;  %v6798_v26 = vpop.f32.mrb[41].mxu1  ;;  %v14685_v2 = vld [vmem:[%s20355_s1 + $0xa60] ss:$16 sps:$4 sm:$0xff]  }
 0x52f   :  { %v6799_v41 = vpop.f32.mrb[42].mxu1  ;;  %5922 = vmatmul.mubr.bf16.gmra.mrb[72].mxu0 %v14685_v2 }
 0x530   :  { %v6800_v23 = vadd.f32 %v6799_v41, %v17392_v28  ;;  %v6801_v22 = vpop.f32.mrb[43].mxu1  ;;  %8011 = vrot.lane.b32.xlu0 %v6797_v40, %s15374_s16  ;;  %v17784_v41 = vpop.f32.mrb[76].mxu0  ;;  %5929 = vmatprep.mubr.bf16.mxu0 %v14693_v39  ;;  %v14697_v39 = vld [vmem:[%s20355_s1 + $0xaa0] ss:$16 sps:$4 sm:$0xff]  }
 0x532   :  { %7011 = vmatmul.mubr.bf16.gmra.mrb[40].mxu1 %v14584_v14  ;;  %8013 = vrot.lane.b32.xlu1 %v6800_v23, %s15374_s16  ;;  %v7890_v44 = vpop.permute.xlu0 %7889  ;;  %v14590_v14 = vld [vmem:[%s20355_s1 + $0x888] ss:$16 sps:$4 sm:$0xff]   ;;  %v5717_v23 = vpop.f32.mrb[77].mxu0 }
 0x533   :  { %7910 = vst.msk [vmem:[#allocation2 + $0xa0] sm:$0xff] %vm7905_vm9, %v7890_v44  ;;  %12842 = vmatprep.mubr.msk.bf16.mxu1 %vm4780_vm2, %v14592_v0  ;;  %v14598_v0 = vld [vmem:[%s20355_s1 + $0x8ac] ss:$16 sps:$4 sm:$0xff]   ;;  %v17791_v10 = vpop.f32.mrb[78].mxu0 }
 0x534   :  { %v7892_v28 = vpop.permute.xlu1 %7891  ;;  %v5720_v44 = vpop.f32.mrb[79].mxu0 }
 0x535   :  { %v6804_v6 = vpop.f32.mrb[44].mxu1  ;;  %7911 = vst.msk [vmem:[#allocation2 + $0xc8] sm:$0xff] %vm7905_vm9, %v7892_v28  ;;  %v14699_v44 = vld [vmem:[%s20355_s1 + $0xaa4] ss:$16 sps:$4 sm:$0xff]  }
 0x536   :  { %v6805_v40 = vadd.f32 %v6804_v6, %v17406_v31  ;;  %v6806_v26 = vpop.f32.mrb[45].mxu1  ;;  %v14691_v31 = vld [vmem:[%s20355_s1 + $0xa80] ss:$16 sps:$4 sm:$0xff]  }
 0x537   :  { %v6807_v42 = vpop.f32.mrb[46].mxu1  ;;  %5930 = vmatmul.mubr.bf16.gmra.mrb[76].mxu0 %v14691_v31 }
 0x538   :  { %v6808_v22 = vadd.f32 %v6807_v42, %v17415_v32  ;;  %v6809_v2 = vpop.f32.mrb[47].mxu1  ;;  %8015 = vrot.lane.b32.xlu0 %v6805_v40, %s15374_s16  ;;  %v17807_v42 = vpop.f32.mrb[80].mxu0  ;;  %5937 = vmatprep.mubr.bf16.mxu0 %v14699_v44 }
 0x53a   :  { %7019 = vmatmul.mubr.bf16.gmra.mrb[44].mxu1 %v14590_v14  ;;  %8017 = vrot.lane.b32.xlu1 %v6808_v22, %s15374_s16  ;;  %v7894_v28 = vpop.permute.xlu0 %7893  ;;  %v14596_v14 = vld [vmem:[%s20355_s1 + $0x8a8] ss:$16 sps:$4 sm:$0xff]   ;;  %v5725_v22 = vpop.f32.mrb[81].mxu0 }
 0x53b   :  { %7912 = vst.msk [vmem:[#allocation2 + $0xf0] sm:$0xff] %vm7905_vm9, %v7894_v28  ;;  %12843 = vmatprep.mubr.msk.bf16.mxu1 %vm4780_vm2, %v14598_v0  ;;  %v14604_v0 = vld [vmem:[%s20355_s1 + $0x8cc] ss:$16 sps:$4 sm:$0xff]  }
 0x53c   :  { %v7896_v32 = vpop.permute.xlu1 %7895 }
 0x53d   :  { %v6812_v6 = vpop.f32.mrb[48].mxu1  ;;  %7913 = vst.msk [vmem:[#allocation2 + $0x118] sm:$0xff] %vm7905_vm9, %v7896_v32 }
 0x53e   :  { %v6813_v40 = vadd.f32 %v6812_v6, %v17429_v35  ;;  %v6814_v26 = vpop.f32.mrb[49].mxu1  ;;  %v17814_v35 = vpop.f32.mrb[82].mxu0 }
 0x53f   :  { %v6815_v23 = vpop.f32.mrb[50].mxu1  ;;  %v5728_v28 = vpop.f32.mrb[83].mxu0  ;;  %5938 = vmatmul.mubr.bf16.gmra.mrb[80].mxu0 %v14697_v39 }
 0x540   :  { %v6816_v2 = vadd.f32 %v6815_v23, %v17438_v29  ;;  %v6817_v31 = vpop.f32.mrb[51].mxu1  ;;  %8019 = vrot.lane.b32.xlu0 %v6813_v40, %s15374_s16  ;;  %v17830_v23 = vpop.f32.mrb[84].mxu0  ;;  %v14705_v28 = vld [vmem:[%s20355_s1 + $0xac4] ss:$16 sps:$4 sm:$0xff]  }
 0x541   :  { %5945 = vmatprep.mubr.bf16.mxu0 %v14705_v28 }
 0x542   :  { %7027 = vmatmul.mubr.bf16.gmra.mrb[48].mxu1 %v14596_v14  ;;  %8021 = vrot.lane.b32.xlu1 %v6816_v2, %s15374_s16  ;;  %v7923_v32 = vpop.permute.xlu0 %7922  ;;  %v14602_v14 = vld [vmem:[%s20355_s1 + $0x8c8] ss:$16 sps:$4 sm:$0xff]   ;;  %v5733_v2 = vpop.f32.mrb[85].mxu0 }
 0x543   :  { %7947 = vst.msk [vmem:[#allocation2] sm:$0xff] %vm7946_vm10, %v7923_v32  ;;  %12844 = vmatprep.mubr.msk.bf16.mxu1 %vm4780_vm2, %v14604_v0  ;;  %v14610_v0 = vld [vmem:[%s20355_s1 + $0x8ec] ss:$16 sps:$4 sm:$0xff]   ;;  %v17837_v44 = vpop.f32.mrb[86].mxu0 }
 0x544   :  { %v7925_v29 = vpop.permute.xlu1 %7924  ;;  %v5736_v32 = vpop.f32.mrb[87].mxu0 }
 0x545   :  { %v6820_v6 = vpop.f32.mrb[200].mxu1  ;;  %7948 = vst.msk [vmem:[#allocation2 + $0x28] sm:$0xff] %vm7946_vm10, %v7925_v29  ;;  %v14709_v32 = vld [vmem:[%s20355_s1 + $0xae0] ss:$16 sps:$4 sm:$0xff]  }
 0x546   :  { %v6821_v40 = vadd.f32 %v6820_v6, %v17452_v16  ;;  %v6822_v26 = vpop.f32.mrb[201].mxu1  ;;  %v14703_v16 = vld [vmem:[%s20355_s1 + $0xac0] ss:$16 sps:$4 sm:$0xff]  }
 0x547   :  { %v6823_v22 = vpop.f32.mrb[202].mxu1  ;;  %5946 = vmatmul.mubr.bf16.gmra.mrb[84].mxu0 %v14703_v16 }
 0x548   :  { %v6824_v31 = vadd.f32 %v6823_v22, %v17461_v47  ;;  %v6825_v39 = vpop.f32.mrb[203].mxu1  ;;  %8023 = vrot.lane.b32.xlu0 %v6821_v40, %s15374_s16  ;;  %v17853_v22 = vpop.f32.mrb[88].mxu0 }
 0x549   :  { %v14711_v39 = vld [vmem:[%s20355_s1 + $0xae4] ss:$16 sps:$4 sm:$0xff]  }
 0x54a   :  { %7035 = vmatmul.mubr.bf16.gmra.mrb[200].mxu1 %v14602_v14  ;;  %8025 = vrot.lane.b32.xlu1 %v6824_v31, %s15374_s16  ;;  %v7927_v29 = vpop.permute.xlu0 %7926  ;;  %v14608_v14 = vld [vmem:[%s20355_s1 + $0x8e8] ss:$16 sps:$4 sm:$0xff]   ;;  %v5741_v31 = vpop.f32.mrb[89].mxu0 }
 0x54b   :  { %7949 = vst.msk [vmem:[#allocation2 + $0x50] sm:$0xff] %vm7946_vm10, %v7927_v29  ;;  %12845 = vmatprep.mubr.msk.bf16.mxu1 %vm4780_vm2, %v14610_v0  ;;  %v14616_v0 = vld [vmem:[%s20355_s1 + $0x90c] ss:$16 sps:$4 sm:$0xff]   ;;  %v17863_v28 = vpop.f32.mrb[90].mxu0  ;;  %5953 = vmatprep.mubr.bf16.mxu0 %v14711_v39 }
 0x54c   :  { %v7929_v47 = vpop.permute.xlu1 %7928  ;;  %v5744_v29 = vpop.f32.mrb[91].mxu0  ;;  %v14622_v39 = vld [vmem:[%s20355_s1 + $0x92c] ss:$16 sps:$4 sm:$0xff]  }
 0x54d   :  { %v6828_v6 = vpop.f32.mrb[204].mxu1  ;;  %7950 = vst.msk [vmem:[#allocation2 + $0x78] sm:$0xff] %vm7946_vm10, %v7929_v47  ;;  %v14715_v29 = vld [vmem:[%s20355_s1 + $0xb00] ss:$16 sps:$4 sm:$0xff]  }
 0x54e   :  { %v6829_v40 = vadd.f32 %v6828_v6, %v17475_v11  ;;  %v6830_v26 = vpop.f32.mrb[205].mxu1 }
 0x54f   :  { %v6831_v2 = vpop.f32.mrb[206].mxu1  ;;  %5954 = vmatmul.mubr.bf16.gmra.mrb[88].mxu0 %v14709_v32 }
 0x550   :  { %v6832_v16 = vadd.f32 %v6831_v2, %v17484_v50  ;;  %v6833_v11 = vpop.f32.mrb[207].mxu1  ;;  %8051 = vrot.lane.b32.xlu0 %v6829_v40, %s15375_s30  ;;  %v14614_v2 = vld [vmem:[%s20355_s1 + $0x908] ss:$16 sps:$4 sm:$0xff]  }
 0x552   :  { %7043 = vmatmul.mubr.bf16.gmra.mrb[204].mxu1 %v14608_v14  ;;  %8053 = vrot.lane.b32.xlu1 %v6832_v16, %s15375_s30  ;;  %v7931_v47 = vpop.permute.xlu0 %7930  ;;  %v17876_v14 = vpop.f32.mrb[92].mxu0  ;;  %v14717_v16 = vld [vmem:[%s20355_s1 + $0xb04] ss:$16 sps:$4 sm:$0xff]  }
 0x553   :  { %7951 = vst.msk [vmem:[#allocation2 + $0xa0] sm:$0xff] %vm7946_vm10, %v7931_v47  ;;  %12846 = vmatprep.mubr.msk.bf16.mxu1 %vm4780_vm2, %v14616_v0  ;;  %v5749_v0 = vpop.f32.mrb[93].mxu0  ;;  %5961 = vmatprep.mubr.bf16.mxu0 %v14717_v16  ;;  %v14628_v16 = vld [vmem:[%s20355_s1 + $0x94c] ss:$16 sps:$4 sm:$0xff]  }
 0x554   :  { %v7933_v50 = vpop.permute.xlu1 %7932  ;;  %v17886_v32 = vpop.f32.mrb[94].mxu0 }
 0x555   :  { %v6836_v6 = vpop.f32.mrb[208].mxu1  ;;  %7952 = vst.msk [vmem:[#allocation2 + $0xc8] sm:$0xff] %vm7946_vm10, %v7933_v50  ;;  %v5752_v47 = vpop.f32.mrb[95].mxu0 }
 0x556   :  { %v6837_v40 = vadd.f32 %v6836_v6, %v17498_v27  ;;  %v6838_v26 = vpop.f32.mrb[209].mxu1  ;;  %v14721_v47 = vld [vmem:[%s20355_s1 + $0xb20] ss:$16 sps:$4 sm:$0xff]  }
 0x557   :  { %v6839_v31 = vpop.f32.mrb[210].mxu1  ;;  %5962 = vmatmul.mubr.bf16.gmra.mrb[92].mxu0 %v14715_v29 }
 0x558   :  { %v6840_v11 = vadd.f32 %v6839_v31, %v17507_v25  ;;  %v6841_v27 = vpop.f32.mrb[211].mxu1  ;;  %8055 = vrot.lane.b32.xlu0 %v6837_v40, %s15375_s30  ;;  %v14620_v31 = vld [vmem:[%s20355_s1 + $0x928] ss:$16 sps:$4 sm:$0xff]  }
 0x55a   :  { %7051 = vmatmul.mubr.bf16.gmra.mrb[208].mxu1 %v14614_v2  ;;  %8057 = vrot.lane.b32.xlu1 %v6840_v11, %s15375_s30  ;;  %v7935_v50 = vpop.permute.xlu0 %7934  ;;  %v17899_v2 = vpop.f32.mrb[96].mxu0  ;;  %v14723_v11 = vld [vmem:[%s20355_s1 + $0xb24] ss:$16 sps:$4 sm:$0xff]  }
 0x55b   :  { %7953 = vst.msk [vmem:[#allocation2 + $0xf0] sm:$0xff] %vm7946_vm10, %v7935_v50  ;;  %12847 = vmatprep.mubr.msk.bf16.mxu1 %vm4780_vm2, %v14622_v39  ;;  %v5757_v39 = vpop.f32.mrb[97].mxu0  ;;  %5969 = vmatprep.mubr.bf16.mxu0 %v14723_v11 }
 0x55c   :  { %v7937_v25 = vpop.permute.xlu1 %7936  ;;  %v17909_v29 = vpop.f32.mrb[98].mxu0 }
 0x55d   :  { %v6844_v6 = vpop.f32.mrb[212].mxu1  ;;  %7954 = vst.msk [vmem:[#allocation2 + $0x118] sm:$0xff] %vm7946_vm10, %v7937_v25  ;;  %v5760_v50 = vpop.f32.mrb[99].mxu0 }
 0x55e   :  { %v6845_v40 = vadd.f32 %v6844_v6, %v17521_v58  ;;  %v6846_v26 = vpop.f32.mrb[213].mxu1 }
 0x55f   :  { %v6847_v0 = vpop.f32.mrb[214].mxu1  ;;  %5970 = vmatmul.mubr.bf16.gmra.mrb[96].mxu0 %v14721_v47 }
 0x560   :  { %v6848_v27 = vadd.f32 %v6847_v0, %v17530_v53  ;;  %v6849_v58 = vpop.f32.mrb[215].mxu1  ;;  %8059 = vrot.lane.b32.xlu0 %v6845_v40, %s15375_s30  ;;  %v14626_v40 = vld [vmem:[%s20355_s1 + $0x948] ss:$16 sps:$4 sm:$0xff]   ;;  %v17920_v26 = vpop.f32.mrb[100].mxu0 }
 0x561   :  { %v5765_v39 = vpop.f32.mrb[101].mxu0  ;;  %v14727_v58 = vld [vmem:[%s20355_s1 + $0xb40] ss:$16 sps:$4 sm:$0xff]  }
 0x562   :  { %7059 = vmatmul.mubr.bf16.gmra.mrb[212].mxu1 %v14620_v31  ;;  %8061 = vrot.lane.b32.xlu1 %v6848_v27, %s15375_s30  ;;  %v14634_v31 = vld [vmem:[%s20355_s1 + $0x96c] ss:$16 sps:$4 sm:$0xff]   ;;  %v17930_v27 = vpop.f32.mrb[102].mxu0 }
 0x563   :  { %12848 = vmatprep.mubr.msk.bf16.mxu1 %vm4780_vm2, %v14628_v16  ;;  %v14729_v16 = vld [vmem:[%s20355_s1 + $0xb44] ss:$16 sps:$4 sm:$0xff]   ;;  %v5768_v47 = vpop.f32.mrb[103].mxu0 }
 0x564   :  { %5977 = vmatprep.mubr.bf16.mxu0 %v14729_v16 }
 0x565   :  { %v6852_v25 = vpop.f32.mrb[216].mxu1 }
 0x566   :  { %v6853_v53 = vadd.f32 %v6852_v25, %v17544_v9  ;;  %v6854_v6 = vpop.f32.mrb[217].mxu1 }
 0x567   :  { %v6855_v0 = vpop.f32.mrb[218].mxu1  ;;  %5978 = vmatmul.mubr.bf16.gmra.mrb[100].mxu0 %v14727_v58 }
 0x568   :  { %v6856_v11 = vadd.f32 %v6855_v0, %v17553_v13  ;;  %v6857_v9 = vpop.f32.mrb[219].mxu1  ;;  %8063 = vrot.lane.b32.xlu0 %v6853_v53, %s15375_s30  ;;  %v14632_v53 = vld [vmem:[%s20355_s1 + $0x968] ss:$16 sps:$4 sm:$0xff]   ;;  %v14640_v0 = vld [vmem:[%s20355_s1 + $0x98c] ss:$16 sps:$4 sm:$0xff]  }
 0x56a   :  { %7067 = vmatmul.mubr.bf16.gmra.mrb[216].mxu1 %v14626_v40  ;;  %8065 = vrot.lane.b32.xlu1 %v6856_v11, %s15375_s30  ;;  %v17944_v39 = vpop.f32.mrb[252].mxu0  ;;  %v14735_v40 = vld [vmem:[%s20355_s1 + $0xb64] ss:$16 sps:$4 sm:$0xff]   ;;  %v14733_v11 = vld [vmem:[%s20355_s1 + $0xb60] ss:$16 sps:$4 sm:$0xff]  }
 0x56b   :  { %12849 = vmatprep.mubr.msk.bf16.mxu1 %vm4780_vm2, %v14634_v31  ;;  %5985 = vmatprep.mubr.bf16.mxu0 %v14735_v40 }
 0x56d   :  { %v6860_v50 = vpop.f32.mrb[220].mxu1 }
 0x56e   :  { %v6861_v13 = vadd.f32 %v6860_v50, %v17571_v38  ;;  %v6862_v25 = vpop.f32.mrb[221].mxu1  ;;  %v5773_v38 = vpop.f32.mrb[253].mxu0 }
 0x56f   :  { %v6863_v6 = vpop.f32.mrb[222].mxu1  ;;  %v17954_v9 = vpop.f32.mrb[254].mxu0 }
 0x570   :  { %v6864_v31 = vadd.f32 %v6863_v6, %v17578_v37  ;;  %v6865_v16 = vpop.f32.mrb[223].mxu1  ;;  %8091 = vrot.lane.b32.xlu0 %v6861_v13, %s15376_s28  ;;  %v5776_v58 = vpop.f32.mrb[255].mxu0  ;;  %5986 = vmatmul.mubr.bf16.gmra.mrb[252].mxu0 %v14733_v11  ;;  %v14638_v13 = vld [vmem:[%s20355_s1 + $0x988] ss:$16 sps:$4 sm:$0xff]   ;;  %v14646_v6 = vld [vmem:[%s20355_s1 + $0x9ac] ss:$16 sps:$4 sm:$0xff]  }
 0x571   :  { %v14739_v16 = vld [vmem:[%s20355_s1 + $0xb80] ss:$16 sps:$4 sm:$0xff]  }
 0x572   :  { %7075 = vmatmul.mubr.bf16.gmra.mrb[220].mxu1 %v14632_v53  ;;  %8093 = vrot.lane.b32.xlu1 %v6864_v31, %s15376_s28  ;;  %v17965_v53 = vpop.f32.mrb[0].mxu0 }
 0x573   :  { %12850 = vmatprep.mubr.msk.bf16.mxu1 %vm4780_vm2, %v14640_v0  ;;  %v14741_v0 = vld [vmem:[%s20355_s1 + $0xb84] ss:$16 sps:$4 sm:$0xff]  }
 0x574   :  { %5993 = vmatprep.mubr.bf16.mxu0 %v14741_v0  ;;  %v14749_v0 = vld [vmem:[%s20355_s1 + $0xba4] ss:$16 sps:$4 sm:$0xff]  }
 0x575   :  { %v6868_v47 = vpop.f32.mrb[224].mxu1 }
 0x576   :  { %v6869_v37 = vadd.f32 %v6868_v47, %v17594_v49  ;;  %v6870_v50 = vpop.f32.mrb[225].mxu1  ;;  %v5781_v49 = vpop.f32.mrb[1].mxu0 }
 0x577   :  { %v6871_v25 = vpop.f32.mrb[226].mxu1  ;;  %v17975_v38 = vpop.f32.mrb[2].mxu0  ;;  %v14644_v50 = vld [vmem:[%s20355_s1 + $0x9a8] ss:$16 sps:$4 sm:$0xff]  }
 0x578   :  { %v6872_v40 = vadd.f32 %v6871_v25, %v17601_v5  ;;  %v6873_v31 = vpop.f32.mrb[227].mxu1  ;;  %8095 = vrot.lane.b32.xlu0 %v6869_v37, %s15376_s28  ;;  %v5784_v11 = vpop.f32.mrb[3].mxu0  ;;  %5994 = vmatmul.mubr.bf16.gmra.mrb[0].mxu0 %v14739_v16  ;;  %v14742_v5 = vld [vmem:[%s20359_s5 + $0x48] sm:$0xff]  }
 0x579   :  { %13267 = vmatprep.subr.bf16.mxu0 %v14742_v5  ;;  %v14743_v31 = vld [vmem:[%s20359_s5 + $0x8] sm:$0xff]   ;;  %v14747_v11 = vld [vmem:[%s20355_s1 + $0xba0] ss:$16 sps:$4 sm:$0xff]   ;;  %6001 = vmatprep.mubr.bf16.mxu0 %v14749_v0 }
 0x57a   :  { %7083 = vmatmul.mubr.bf16.gmra.mrb[224].mxu1 %v14638_v13  ;;  %8097 = vrot.lane.b32.xlu1 %v6872_v40, %s15376_s28  ;;  %v14652_v13 = vld [vmem:[%s20355_s1 + $0x9cc] ss:$16 sps:$4 sm:$0xff]   ;;  %v14650_v0 = vld [vmem:[%s20355_s1 + $0x9c8] ss:$16 sps:$4 sm:$0xff]  }
 0x57b   :  { %12851 = vmatprep.mubr.msk.bf16.mxu1 %vm4780_vm2, %v14646_v6  ;;  %v17989_v6 = vpop.f32.mrb[4].mxu0  ;;  %13268 = vmatpush3.bf16.msra.mxu0 %v14743_v31 }
 0x57c   :  { %v5789_v49 = vpop.f32.mrb[5].mxu0 }
 0x57d   :  { %v6876_v58 = vpop.f32.mrb[228].mxu1  ;;  %v17999_v16 = vpop.f32.mrb[6].mxu0 }
 0x57e   :  { %v6877_v47 = vadd.f32 %v6876_v58, %v17617_v59  ;;  %v6878_v37 = vpop.f32.mrb[229].mxu1 }
 0x57f   :  { %v6879_v25 = vpop.f32.mrb[230].mxu1 }
 0x580   :  { %v6880_v40 = vadd.f32 %v6879_v25, %v17624_v8  ;;  %v6881_v59 = vpop.f32.mrb[231].mxu1  ;;  %8099 = vrot.lane.b32.xlu0 %v6877_v47, %s15376_s28  ;;  %v5792_v8 = vpop.f32.mrb[7].mxu0  ;;  %6002 = vmatmul.mubr.bf16.gmra.mrb[4].mxu0 %v14747_v11  ;;  %v14753_v11 = vld [vmem:[%s20355_s1 + $0xbc0] ss:$16 sps:$4 sm:$0xff]  }
 0x582   :  { %7091 = vmatmul.mubr.bf16.gmra.mrb[228].mxu1 %v14644_v50  ;;  %v7972_v58 = vpop.permute.xlu0 %7971  ;;  %8101 = vrot.lane.b32.xlu1 %v6880_v40, %s15376_s28  ;;  %v14658_v40 = vld [vmem:[%s20355_s1 + $0x9ec] ss:$16 sps:$4 sm:$0xff]   ;;  %v18015_v59 = vpop.f32.mrb[8].mxu0 }
 0x583   :  { %7995 = vst.msk [vmem:[#allocation2 + $0x8] sm:$0xff] %vm7700_vm4, %v7972_v58  ;;  %12852 = vmatprep.mubr.msk.bf16.mxu1 %vm4780_vm2, %v14652_v13  ;;  %v14755_v13 = vld [vmem:[%s20355_s1 + $0xbc4] ss:$16 sps:$4 sm:$0xff]   ;;  %v5797_v49 = vpop.f32.mrb[9].mxu0 }
 0x584   :  { %v18025_v58 = vpop.f32.mrb[10].mxu0  ;;  %6009 = vmatprep.mubr.bf16.mxu0 %v14755_v13  ;;  %v14664_v13 = vld [vmem:[%s20355_s1 + $0xa0c] ss:$16 sps:$4 sm:$0xff]  }
 0x585   :  { %v6884_v5 = vpop.f32.mrb[232].mxu1 }
 0x586   :  { %v7974_v47 = vpop.permute.xlu0 %7973  ;;  %v6885_v37 = vadd.f32 %v6884_v5, %v17640_v18  ;;  %v6886_v25 = vpop.f32.mrb[233].mxu1 }
 0x587   :  { %7996 = vst.msk [vmem:[#allocation2 + $0x30] sm:$0xff] %vm7700_vm4, %v7974_v47  ;;  %v6887_v50 = vpop.f32.mrb[234].mxu1  ;;  %v5800_v5 = vpop.f32.mrb[11].mxu0 }
 0x588   :  { %v6888_v18 = vadd.f32 %v6887_v50, %v17647_v61  ;;  %v6889_v31 = vpop.f32.mrb[235].mxu1  ;;  %8103 = vrot.lane.b32.xlu0 %v6885_v37, %s15376_s28  ;;  %6010 = vmatmul.mubr.bf16.gmra.mrb[8].mxu0 %v14753_v11  ;;  %v14761_v11 = vld [vmem:[%s20355_s1 + $0xbe4] ss:$16 sps:$4 sm:$0xff]  }
 0x589   :  { %6017 = vmatprep.mubr.bf16.mxu0 %v14761_v11  ;;  %v14767_v11 = vld [vmem:[%s20355_s1 + $0xc04] ss:$16 sps:$4 sm:$0xff]  }
 0x58a   :  { %7099 = vmatmul.mubr.bf16.gmra.mrb[232].mxu1 %v14650_v0  ;;  %8105 = vrot.lane.b32.xlu1 %v6888_v18, %s15376_s28  ;;  %v7976_v8 = vpop.permute.xlu0 %7975  ;;  %v14656_v0 = vld [vmem:[%s20355_s1 + $0x9e8] ss:$16 sps:$4 sm:$0xff]   ;;  %v18038_v18 = vpop.f32.mrb[12].mxu0 }
 0x58b   :  { %7997 = vst.msk [vmem:[#allocation2 + $0x58] sm:$0xff] %vm7700_vm4, %v7976_v8  ;;  %12853 = vmatprep.mubr.msk.bf16.mxu1 %vm4780_vm2, %v14658_v40  ;;  %v5805_v49 = vpop.f32.mrb[13].mxu0 }
 0x58c   :  { %v7978_v61 = vpop.permute.xlu1 %7977  ;;  %v18048_v8 = vpop.f32.mrb[14].mxu0 }
 0x58d   :  { %v6892_v47 = vpop.f32.mrb[236].mxu1  ;;  %7998 = vst.msk [vmem:[#allocation2 + $0x80] sm:$0xff] %vm7700_vm4, %v7978_v61  ;;  %v5808_v61 = vpop.f32.mrb[15].mxu0 }
 0x58e   :  { %v6893_v37 = vadd.f32 %v6892_v47, %v17663_v33  ;;  %v6894_v25 = vpop.f32.mrb[237].mxu1  ;;  %v14759_v33 = vld [vmem:[%s20355_s1 + $0xbe0] ss:$16 sps:$4 sm:$0xff]  }
 0x58f   :  { %v6895_v50 = vpop.f32.mrb[238].mxu1 }
 0x590   :  { %v6896_v40 = vadd.f32 %v6895_v50, %v17670_v4  ;;  %v6897_v31 = vpop.f32.mrb[239].mxu1  ;;  %8131 = vrot.lane.b32.xlu0 %v6893_v37, %s15377_s18  ;;  %6018 = vmatmul.mubr.bf16.gmra.mrb[12].mxu0 %v14759_v33 }
 0x591   :  { %6025 = vmatprep.mubr.bf16.mxu0 %v14767_v11  ;;  %v14773_v11 = vld [vmem:[%s20355_s1 + $0xc24] ss:$16 sps:$4 sm:$0xff]  }
 0x592   :  { %7107 = vmatmul.mubr.bf16.gmra.mrb[236].mxu1 %v14656_v0  ;;  %8133 = vrot.lane.b32.xlu1 %v6896_v40, %s15377_s18  ;;  %v7980_v5 = vpop.permute.xlu0 %7979  ;;  %v14662_v0 = vld [vmem:[%s20355_s1 + $0xa08] ss:$16 sps:$4 sm:$0xff]   ;;  %v14672_v40 = vld [vmem:[%s20355_s1 + $0xa2c] ss:$16 sps:$4 sm:$0xff]   ;;  %v18061_v31 = vpop.f32.mrb[16].mxu0 }
 0x593   :  { %7999 = vst.msk [vmem:[#allocation2 + $0xa8] sm:$0xff] %vm7700_vm4, %v7980_v5  ;;  %12854 = vmatprep.mubr.msk.bf16.mxu1 %vm4780_vm2, %v14664_v13  ;;  %v5813_v33 = vpop.f32.mrb[17].mxu0 }
 0x594   :  { %v7982_v4 = vpop.permute.xlu1 %7981  ;;  %v18071_v5 = vpop.f32.mrb[18].mxu0 }
 0x595   :  { %v6900_v47 = vpop.f32.mrb[240].mxu1  ;;  %8000 = vst.msk [vmem:[#allocation2 + $0xd0] sm:$0xff] %vm7700_vm4, %v7982_v4  ;;  %v5816_v4 = vpop.f32.mrb[19].mxu0 }
 0x596   :  { %v6901_v37 = vadd.f32 %v6900_v47, %v17686_v63  ;;  %v6902_v25 = vpop.f32.mrb[241].mxu1  ;;  %v14765_v63 = vld [vmem:[%s20355_s1 + $0xc00] ss:$16 sps:$4 sm:$0xff]  }
 0x597   :  { %v6903_v50 = vpop.f32.mrb[242].mxu1 }
 0x598   :  { %v6904_v13 = vadd.f32 %v6903_v50, %v17693_v51  ;;  %v6905_v49 = vpop.f32.mrb[243].mxu1  ;;  %8135 = vrot.lane.b32.xlu0 %v6901_v37, %s15377_s18  ;;  %6026 = vmatmul.mubr.bf16.gmra.mrb[16].mxu0 %v14765_v63 }
 0x599   :  { %6033 = vmatprep.mubr.bf16.mxu0 %v14773_v11  ;;  %v14779_v11 = vld [vmem:[%s20355_s1 + $0xc44] ss:$16 sps:$4 sm:$0xff]  }
 0x59a   :  { %7115 = vmatmul.mubr.bf16.gmra.mrb[240].mxu1 %v14662_v0  ;;  %8137 = vrot.lane.b32.xlu1 %v6904_v13, %s15377_s18  ;;  %v7984_v61 = vpop.permute.xlu0 %7983  ;;  %v14670_v0 = vld [vmem:[%s20355_s1 + $0xa28] ss:$16 sps:$4 sm:$0xff]   ;;  %v14678_v13 = vld [vmem:[%s20355_s1 + $0xa4c] ss:$16 sps:$4 sm:$0xff]   ;;  %v18084_v49 = vpop.f32.mrb[20].mxu0 }
 0x59b   :  { %8001 = vst.msk [vmem:[#allocation2 + $0xf8] sm:$0xff] %vm7700_vm4, %v7984_v61  ;;  %12855 = vmatprep.mubr.msk.bf16.mxu1 %vm4780_vm2, %v14672_v40  ;;  %v5821_v63 = vpop.f32.mrb[21].mxu0 }
 0x59c   :  { %v7986_v51 = vpop.permute.xlu1 %7985  ;;  %v18094_v61 = vpop.f32.mrb[22].mxu0 }
 0x59d   :  { %v6908_v47 = vpop.f32.mrb[244].mxu1  ;;  %8002 = vst.msk [vmem:[#allocation2 + $0x120] sm:$0xff] %vm7700_vm4, %v7986_v51  ;;  %v5824_v51 = vpop.f32.mrb[23].mxu0 }
 0x59e   :  { %v6909_v37 = vadd.f32 %v6908_v47, %v17715_v30  ;;  %v6910_v25 = vpop.f32.mrb[245].mxu1  ;;  %v14771_v30 = vld [vmem:[%s20355_s1 + $0xc20] ss:$16 sps:$4 sm:$0xff]  }
 0x59f   :  { %v6911_v50 = vpop.f32.mrb[246].mxu1 }
 0x5a0   :  { %v6912_v40 = vadd.f32 %v6911_v50, %v17722_v56  ;;  %v6913_v33 = vpop.f32.mrb[247].mxu1  ;;  %8139 = vrot.lane.b32.xlu0 %v6909_v37, %s15377_s18  ;;  %6034 = vmatmul.mubr.bf16.gmra.mrb[20].mxu0 %v14771_v30 }
 0x5a1   :  { %6041 = vmatprep.mubr.bf16.mxu0 %v14779_v11  ;;  %v14785_v11 = vld [vmem:[%s20355_s1 + $0xc64] ss:$16 sps:$4 sm:$0xff]  }
 0x5a2   :  { %7123 = vmatmul.mubr.bf16.gmra.mrb[244].mxu1 %v14670_v0  ;;  %8141 = vrot.lane.b32.xlu1 %v6912_v40, %s15377_s18  ;;  %v8012_v4 = vpop.permute.xlu0 %8011  ;;  %v14676_v0 = vld [vmem:[%s20355_s1 + $0xa48] ss:$16 sps:$4 sm:$0xff]   ;;  %v14684_v40 = vld [vmem:[%s20355_s1 + $0xa6c] ss:$16 sps:$4 sm:$0xff]   ;;  %v18107_v33 = vpop.f32.mrb[24].mxu0 }
 0x5a3   :  { %8035 = vst.msk [vmem:[#allocation2 + $0x8] sm:$0xff] %vm7741_vm5, %v8012_v4  ;;  %12856 = vmatprep.mubr.msk.bf16.mxu1 %vm4780_vm2, %v14678_v13  ;;  %v5829_v30 = vpop.f32.mrb[25].mxu0 }
 0x5a4   :  { %v8014_v56 = vpop.permute.xlu1 %8013  ;;  %v18117_v4 = vpop.f32.mrb[26].mxu0 }
 0x5a5   :  { %v6916_v47 = vpop.f32.mrb[248].mxu1  ;;  %8036 = vst.msk [vmem:[#allocation2 + $0x30] sm:$0xff] %vm7741_vm5, %v8014_v56  ;;  %v5832_v56 = vpop.f32.mrb[27].mxu0 }
 0x5a6   :  { %v6917_v37 = vadd.f32 %v6916_v47, %v17738_v45  ;;  %v6918_v25 = vpop.f32.mrb[249].mxu1  ;;  %v14777_v45 = vld [vmem:[%s20355_s1 + $0xc40] ss:$16 sps:$4 sm:$0xff]  }
 0x5a7   :  { %v6919_v50 = vpop.f32.mrb[250].mxu1 }
 0x5a8   :  { %v6920_v13 = vadd.f32 %v6919_v50, %v17745_v12  ;;  %v6921_v63 = vpop.f32.mrb[251].mxu1  ;;  %8143 = vrot.lane.b32.xlu0 %v6917_v37, %s15377_s18  ;;  %6042 = vmatmul.mubr.bf16.gmra.mrb[24].mxu0 %v14777_v45 }
 0x5a9   :  { %6049 = vmatprep.mubr.bf16.mxu0 %v14785_v11 }
 0x5aa   :  { %7131 = vmatmul.mubr.bf16.gmra.mrb[248].mxu1 %v14676_v0  ;;  %8145 = vrot.lane.b32.xlu1 %v6920_v13, %s15377_s18  ;;  %v8016_v51 = vpop.permute.xlu0 %8015  ;;  %v14682_v0 = vld [vmem:[%s20355_s1 + $0xa68] ss:$16 sps:$4 sm:$0xff]   ;;  %v14690_v13 = vld [vmem:[%s20355_s1 + $0xa8c] ss:$16 sps:$4 sm:$0xff]   ;;  %v18130_v63 = vpop.f32.mrb[28].mxu0 }
 0x5ab   :  { %8037 = vst.msk [vmem:[#allocation2 + $0x58] sm:$0xff] %vm7741_vm5, %v8016_v51  ;;  %12857 = vmatprep.mubr.msk.bf16.mxu1 %vm4780_vm2, %v14684_v40  ;;  %v5837_v45 = vpop.f32.mrb[29].mxu0 }
 0x5ac   :  { %v8018_v12 = vpop.permute.xlu1 %8017  ;;  %v18140_v51 = vpop.f32.mrb[30].mxu0 }
 0x5ad   :  { %v6924_v47 = vpop.f32.mrb[252].mxu1  ;;  %8038 = vst.msk [vmem:[#allocation2 + $0x80] sm:$0xff] %vm7741_vm5, %v8018_v12  ;;  %v5840_v12 = vpop.f32.mrb[31].mxu0 }
 0x5ae   :  { %v6925_v37 = vadd.f32 %v6924_v47, %v17761_v1  ;;  %v6926_v25 = vpop.f32.mrb[253].mxu1  ;;  %v14783_v1 = vld [vmem:[%s20355_s1 + $0xc60] ss:$16 sps:$4 sm:$0xff]  }
 0x5af   :  { %v6927_v50 = vpop.f32.mrb[254].mxu1 }
 0x5b0   :  { %v6928_v40 = vadd.f32 %v6927_v50, %v17768_v57  ;;  %v6929_v30 = vpop.f32.mrb[255].mxu1  ;;  %8171 = vrot.lane.b32.xlu0 %v6925_v37, %s15378_s4  ;;  %6050 = vmatmul.mubr.bf16.gmra.mrb[28].mxu0 %v14783_v1  ;;  %v14786_v50 = vld [vmem:[%s20359_s5 + $0x50] sm:$0xff]  }
 0x5b1   :  { %13269 = vmatprep.subr.bf16.mxu0 %v14786_v50 }
 0x5b2   :  { %7139 = vmatmul.mubr.bf16.gmra.mrb[252].mxu1 %v14682_v0  ;;  %8173 = vrot.lane.b32.xlu1 %v6928_v40, %s15378_s4  ;;  %v8020_v56 = vpop.permute.xlu0 %8019  ;;  %v14688_v0 = vld [vmem:[%s20355_s1 + $0xa88] ss:$16 sps:$4 sm:$0xff]   ;;  %v18156_v30 = vpop.f32.mrb[32].mxu0 }
 0x5b3   :  { %8039 = vst.msk [vmem:[#allocation2 + $0xa8] sm:$0xff] %vm7741_vm5, %v8020_v56  ;;  %12858 = vmatprep.mubr.msk.bf16.mxu1 %vm4780_vm2, %v14690_v13  ;;  %v14696_v13 = vld [vmem:[%s20355_s1 + $0xaac] ss:$16 sps:$4 sm:$0xff]   ;;  %v5845_v11 = vpop.f32.mrb[33].mxu0 }
 0x5b4   :  { %v8022_v57 = vpop.permute.xlu1 %8021  ;;  %v18163_v56 = vpop.f32.mrb[34].mxu0 }
 0x5b5   :  { %v6932_v47 = vpop.f32.mrb[0].mxu1  ;;  %8040 = vst.msk [vmem:[#allocation2 + $0xd0] sm:$0xff] %vm7741_vm5, %v8022_v57  ;;  %v14791_v57 = vld [vmem:[%s20359_s5 + $0x58] sm:$0xff]  }
 0x5b6   :  { %v6933_v37 = vadd.f32 %v6932_v47, %v17784_v41  ;;  %v6934_v25 = vpop.f32.mrb[1].mxu1  ;;  %v14789_v41 = vld [vmem:[%s20359_s5 + $0x10] sm:$0xff]   ;;  %v5848_v47 = vpop.f32.mrb[35].mxu0 }
 0x5b7   :  { %v6935_v40 = vpop.f32.mrb[2].mxu1  ;;  %13270 = vmatpush3.bf16.msra.mxu0 %v14789_v41  ;;  %v14793_v41 = vld [vmem:[%s20359_s5 + $0x60] sm:$0xff]  }
 0x5b8   :  { %v6936_v45 = vadd.f32 %v6935_v40, %v17791_v10  ;;  %v6937_v1 = vpop.f32.mrb[3].mxu1  ;;  %8175 = vrot.lane.b32.xlu0 %v6933_v37, %s15378_s4  ;;  %v14792_v10 = vld [vmem:[%s20359_s5 + $0x18] sm:$0xff]   ;;  %13271 = vmatprep.subr.bf16.mxu0 %v14791_v57 }
 0x5b9   :  { %v14694_v40 = vld [vmem:[%s20355_s1 + $0xaa8] ss:$16 sps:$4 sm:$0xff]  }
 0x5ba   :  { %7147 = vmatmul.mubr.bf16.gmra.mrb[0].mxu1 %v14688_v0  ;;  %8177 = vrot.lane.b32.xlu1 %v6936_v45, %s15378_s4  ;;  %v8024_v12 = vpop.permute.xlu0 %8023  ;;  %v18185_v1 = vpop.f32.mrb[36].mxu0 }
 0x5bb   :  { %8041 = vst.msk [vmem:[#allocation2 + $0xf8] sm:$0xff] %vm7741_vm5, %v8024_v12  ;;  %12859 = vmatprep.mubr.msk.bf16.mxu1 %vm4780_vm2, %v14696_v13  ;;  %13272 = vmatpush3.bf16.msra.mxu0 %v14792_v10  ;;  %v14702_v13 = vld [vmem:[%s20355_s1 + $0xacc] ss:$16 sps:$4 sm:$0xff]   ;;  %v5853_v57 = vpop.f32.mrb[37].mxu0 }
 0x5bc   :  { %v8026_v37 = vpop.permute.xlu1 %8025  ;;  %13273 = vmatprep.subr.bf16.mxu0 %v14793_v41  ;;  %v18192_v10 = vpop.f32.mrb[38].mxu0 }
 0x5bd   :  { %v6940_v25 = vpop.f32.mrb[4].mxu1  ;;  %8042 = vst.msk [vmem:[#allocation2 + $0x120] sm:$0xff] %vm7741_vm5, %v8026_v37  ;;  %v14798_v37 = vld [vmem:[%s20359_s5 + $0x68] sm:$0xff]  }
 0x5be   :  { %v6941_v0 = vadd.f32 %v6940_v25, %v17807_v42  ;;  %v6942_v50 = vpop.f32.mrb[5].mxu1  ;;  %v14796_v42 = vld [vmem:[%s20359_s5 + $0x20] sm:$0xff]   ;;  %v5856_v25 = vpop.f32.mrb[39].mxu0 }
 0x5bf   :  { %v6943_v45 = vpop.f32.mrb[6].mxu1  ;;  %13274 = vmatpush3.bf16.msra.mxu0 %v14796_v42 }
 0x5c0   :  { %v6944_v11 = vadd.f32 %v6943_v45, %v17814_v35  ;;  %v6945_v12 = vpop.f32.mrb[7].mxu1  ;;  %8179 = vrot.lane.b32.xlu0 %v6941_v0, %s15378_s4  ;;  %v14799_v35 = vld [vmem:[%s20359_s5 + $0x28] sm:$0xff]   ;;  %13275 = vmatprep.subr.bf16.mxu0 %v14798_v37 }
 0x5c1   :  { %v14700_v45 = vld [vmem:[%s20355_s1 + $0xac8] ss:$16 sps:$4 sm:$0xff]  }
 0x5c2   :  { %7155 = vmatmul.mubr.bf16.gmra.mrb[4].mxu1 %v14694_v40  ;;  %8181 = vrot.lane.b32.xlu1 %v6944_v11, %s15378_s4  ;;  %v8052_v47 = vpop.permute.xlu0 %8051  ;;  %v14708_v11 = vld [vmem:[%s20355_s1 + $0xaec] ss:$16 sps:$4 sm:$0xff]   ;;  %v18214_v12 = vpop.f32.mrb[40].mxu0 }
 0x5c3   :  { %8075 = vst.msk [vmem:[#allocation2 + $0x8] sm:$0xff] %vm7782_vm6, %v8052_v47  ;;  %12860 = vmatprep.mubr.msk.bf16.mxu1 %vm4780_vm2, %v14702_v13  ;;  %13276 = vmatpush3.bf16.msra.mxu0 %v14799_v35  ;;  %v14800_v13 = vld [vmem:[%s20359_s5 + $0x70] sm:$0xff]   ;;  %v5861_v37 = vpop.f32.mrb[41].mxu0 }
 0x5c4   :  { %v8054_v0 = vpop.permute.xlu1 %8053  ;;  %13277 = vmatprep.subr.bf16.mxu0 %v14800_v13  ;;  %v18221_v25 = vpop.f32.mrb[42].mxu0 }
 0x5c5   :  { %v6948_v50 = vpop.f32.mrb[8].mxu1  ;;  %8076 = vst.msk [vmem:[#allocation2 + $0x30] sm:$0xff] %vm7782_vm6, %v8054_v0  ;;  %v14805_v0 = vld [vmem:[%s20359_s5 + $0x78] sm:$0xff]  }
 0x5c6   :  { %v6949_v40 = vadd.f32 %v6948_v50, %v17830_v23  ;;  %v6950_v41 = vpop.f32.mrb[9].mxu1  ;;  %v14803_v23 = vld [vmem:[%s20359_s5 + $0x30] sm:$0xff]   ;;  %v5864_v50 = vpop.f32.mrb[43].mxu0 }
 0x5c7   :  { %v6951_v42 = vpop.f32.mrb[10].mxu1  ;;  %13278 = vmatpush3.bf16.msra.mxu0 %v14803_v23 }
 0x5c8   :  { %v6952_v57 = vadd.f32 %v6951_v42, %v17837_v44  ;;  %v6953_v47 = vpop.f32.mrb[11].mxu1  ;;  %8183 = vrot.lane.b32.xlu0 %v6949_v40, %s15378_s4  ;;  %v14806_v44 = vld [vmem:[%s20359_s5 + $0x38] sm:$0xff]   ;;  %13279 = vmatprep.subr.bf16.mxu0 %v14805_v0 }
 0x5c9   :  { %v14706_v42 = vld [vmem:[%s20355_s1 + $0xae8] ss:$16 sps:$4 sm:$0xff]  }
 0x5ca   :  { %7163 = vmatmul.mubr.bf16.gmra.mrb[8].mxu1 %v14700_v45  ;;  %8185 = vrot.lane.b32.xlu1 %v6952_v57, %s15378_s4  ;;  %v8056_v35 = vpop.permute.xlu0 %8055  ;;  %v18240_v57 = vpop.f32.mrb[44].mxu0 }
 0x5cb   :  { %8077 = vst.msk [vmem:[#allocation2 + $0x58] sm:$0xff] %vm7782_vm6, %v8056_v35  ;;  %12861 = vmatprep.mubr.msk.bf16.mxu1 %vm4780_vm2, %v14708_v11  ;;  %13280 = vmatpush3.bf16.msra.mxu0 %v14806_v44  ;;  %v14714_v11 = vld [vmem:[%s20355_s1 + $0xb0c] ss:$16 sps:$4 sm:$0xff]   ;;  %v5869_v35 = vpop.f32.mrb[45].mxu0 }
 0x5cc   :  { %v8058_v40 = vpop.permute.xlu1 %8057  ;;  %v18244_v0 = vpop.f32.mrb[46].mxu0 }
 0x5cd   :  { %v6956_v41 = vpop.f32.mrb[12].mxu1  ;;  %8078 = vst.msk [vmem:[#allocation2 + $0x80] sm:$0xff] %vm7782_vm6, %v8058_v40  ;;  %v5872_v50 = vpop.f32.mrb[47].mxu0 }
 0x5ce   :  { %v6957_v45 = vadd.f32 %v6956_v41, %v17853_v22  ;;  %v6958_v13 = vpop.f32.mrb[13].mxu1 }
 0x5cf   :  { %v6959_v23 = vpop.f32.mrb[14].mxu1 }
 0x5d0   :  { %v6960_v47 = vadd.f32 %v6959_v23, %v17863_v28  ;;  %v6961_v37 = vpop.f32.mrb[15].mxu1  ;;  %8211 = vrot.lane.b32.xlu0 %v6957_v45, %s15379_s25  ;;  %v14712_v45 = vld [vmem:[%s20355_s1 + $0xb08] ss:$16 sps:$4 sm:$0xff]  }
 0x5d2   :  { %7171 = vmatmul.mubr.bf16.gmra.mrb[12].mxu1 %v14706_v42  ;;  %8213 = vrot.lane.b32.xlu1 %v6960_v47, %s15379_s25  ;;  %v8060_v22 = vpop.permute.xlu0 %8059  ;;  %v14720_v42 = vld [vmem:[%s20355_s1 + $0xb2c] ss:$16 sps:$4 sm:$0xff]   ;;  %v18257_v23 = vpop.f32.mrb[48].mxu0 }
 0x5d3   :  { %8079 = vst.msk [vmem:[#allocation2 + $0xa8] sm:$0xff] %vm7782_vm6, %v8060_v22  ;;  %12862 = vmatprep.mubr.msk.bf16.mxu1 %vm4780_vm2, %v14714_v11  ;;  %v5877_v37 = vpop.f32.mrb[49].mxu0 }
 0x5d4   :  { %v8062_v44 = vpop.permute.xlu1 %8061  ;;  %v18261_v35 = vpop.f32.mrb[50].mxu0 }
 0x5d5   :  { %v6964_v40 = vpop.f32.mrb[16].mxu1  ;;  %8080 = vst.msk [vmem:[#allocation2 + $0xd0] sm:$0xff] %vm7782_vm6, %v8062_v44  ;;  %v5880_v22 = vpop.f32.mrb[51].mxu0 }
 0x5d6   :  { %v6965_v28 = vadd.f32 %v6964_v40, %v17876_v14  ;;  %v6966_v41 = vpop.f32.mrb[17].mxu1 }
 0x5d7   :  { %v6967_v13 = vpop.f32.mrb[18].mxu1 }
 0x5d8   :  { %v6968_v11 = vadd.f32 %v6967_v13, %v17886_v32  ;;  %v6969_v47 = vpop.f32.mrb[19].mxu1  ;;  %8215 = vrot.lane.b32.xlu0 %v6965_v28, %s15379_s25  ;;  %v14718_v28 = vld [vmem:[%s20355_s1 + $0xb28] ss:$16 sps:$4 sm:$0xff]  }
 0x5da   :  { %7179 = vmatmul.mubr.bf16.gmra.mrb[16].mxu1 %v14712_v45  ;;  %8217 = vrot.lane.b32.xlu1 %v6968_v11, %s15379_s25  ;;  %v8064_v14 = vpop.permute.xlu0 %8063  ;;  %v14726_v45 = vld [vmem:[%s20355_s1 + $0xb4c] ss:$16 sps:$4 sm:$0xff]   ;;  %v18274_v13 = vpop.f32.mrb[52].mxu0 }
 0x5db   :  { %8081 = vst.msk [vmem:[#allocation2 + $0xf8] sm:$0xff] %vm7782_vm6, %v8064_v14  ;;  %12863 = vmatprep.mubr.msk.bf16.mxu1 %vm4780_vm2, %v14720_v42  ;;  %v5885_v47 = vpop.f32.mrb[53].mxu0 }
 0x5dc   :  { %v8066_v50 = vpop.permute.xlu1 %8065  ;;  %v18278_v37 = vpop.f32.mrb[54].mxu0 }
 0x5dd   :  { %v6972_v44 = vpop.f32.mrb[20].mxu1  ;;  %8082 = vst.msk [vmem:[#allocation2 + $0x120] sm:$0xff] %vm7782_vm6, %v8066_v50  ;;  %v5888_v14 = vpop.f32.mrb[55].mxu0 }
 0x5de   :  { %v6973_v32 = vadd.f32 %v6972_v44, %v17899_v2  ;;  %v6974_v40 = vpop.f32.mrb[21].mxu1 }
 0x5df   :  { %v6975_v41 = vpop.f32.mrb[22].mxu1 }
 0x5e0   :  { %v6976_v42 = vadd.f32 %v6975_v41, %v17909_v29  ;;  %v6977_v11 = vpop.f32.mrb[23].mxu1  ;;  %8219 = vrot.lane.b32.xlu0 %v6973_v32, %s15379_s25  ;;  %v14724_v32 = vld [vmem:[%s20355_s1 + $0xb48] ss:$16 sps:$4 sm:$0xff]  }
 0x5e2   :  { %7187 = vmatmul.mubr.bf16.gmra.mrb[20].mxu1 %v14718_v28  ;;  %8221 = vrot.lane.b32.xlu1 %v6976_v42, %s15379_s25  ;;  %v8092_v2 = vpop.permute.xlu0 %8091  ;;  %v14732_v28 = vld [vmem:[%s20355_s1 + $0xb6c] ss:$16 sps:$4 sm:$0xff]   ;;  %v18291_v41 = vpop.f32.mrb[56].mxu0 }
 0x5e3   :  { %8115 = vst.msk [vmem:[#allocation2 + $0x8] sm:$0xff] %vm7823_vm7, %v8092_v2  ;;  %12864 = vmatprep.mubr.msk.bf16.mxu1 %vm4780_vm2, %v14726_v45  ;;  %v5893_v11 = vpop.f32.mrb[57].mxu0 }
 0x5e4   :  { %v8094_v22 = vpop.permute.xlu1 %8093  ;;  %v18295_v47 = vpop.f32.mrb[58].mxu0 }
 0x5e5   :  { %v6980_v50 = vpop.f32.mrb[24].mxu1  ;;  %8116 = vst.msk [vmem:[#allocation2 + $0x30] sm:$0xff] %vm7823_vm7, %v8094_v22  ;;  %v5896_v2 = vpop.f32.mrb[59].mxu0 }
 0x5e6   :  { %v6981_v29 = vadd.f32 %v6980_v50, %v17920_v26  ;;  %v6982_v44 = vpop.f32.mrb[25].mxu1 }
 0x5e7   :  { %v6983_v40 = vpop.f32.mrb[26].mxu1 }
 0x5e8   :  { %v6984_v45 = vadd.f32 %v6983_v40, %v17930_v27  ;;  %v6985_v42 = vpop.f32.mrb[27].mxu1  ;;  %8223 = vrot.lane.b32.xlu0 %v6981_v29, %s15379_s25  ;;  %v14730_v29 = vld [vmem:[%s20355_s1 + $0xb68] ss:$16 sps:$4 sm:$0xff]  }
 0x5ea   :  { %7195 = vmatmul.mubr.bf16.gmra.mrb[24].mxu1 %v14724_v32  ;;  %8225 = vrot.lane.b32.xlu1 %v6984_v45, %s15379_s25  ;;  %v8096_v26 = vpop.permute.xlu0 %8095  ;;  %v14738_v32 = vld [vmem:[%s20355_s1 + $0xb8c] ss:$16 sps:$4 sm:$0xff]   ;;  %v18308_v40 = vpop.f32.mrb[60].mxu0 }
 0x5eb   :  { %8117 = vst.msk [vmem:[#allocation2 + $0x58] sm:$0xff] %vm7823_vm7, %v8096_v26  ;;  %12865 = vmatprep.mubr.msk.bf16.mxu1 %vm4780_vm2, %v14732_v28  ;;  %v5901_v42 = vpop.f32.mrb[61].mxu0 }
 0x5ec   :  { %v8098_v14 = vpop.permute.xlu1 %8097  ;;  %v18312_v11 = vpop.f32.mrb[62].mxu0 }
 0x5ed   :  { %v6988_v22 = vpop.f32.mrb[28].mxu1  ;;  %8118 = vst.msk [vmem:[#allocation2 + $0x80] sm:$0xff] %vm7823_vm7, %v8098_v14  ;;  %v5904_v26 = vpop.f32.mrb[63].mxu0 }
 0x5ee   :  { %v6989_v27 = vadd.f32 %v6988_v22, %v17944_v39  ;;  %v6990_v50 = vpop.f32.mrb[29].mxu1 }
 0x5ef   :  { %v6991_v44 = vpop.f32.mrb[30].mxu1 }
 0x5f0   :  { %8243 = vst.msk [vmem:[#allocation2 + $0x10] sm:$0xff] %vm7659_vm3, %v6989_v27  ;;  %v6992_v28 = vadd.f32 %v6991_v44, %v17954_v9  ;;  %v6993_v45 = vpop.f32.mrb[31].mxu1  ;;  %v14736_v27 = vld [vmem:[%s20355_s1 + $0xb88] ss:$16 sps:$4 sm:$0xff]  }
 0x5f2   :  { %8244 = vst.msk [vmem:[#allocation2 + $0x38] sm:$0xff] %vm7659_vm3, %v6992_v28  ;;  %7203 = vmatmul.mubr.bf16.gmra.mrb[28].mxu1 %v14730_v29  ;;  %v8100_v39 = vpop.permute.xlu0 %8099  ;;  %v14746_v29 = vld [vmem:[%s20355_s1 + $0xbac] ss:$16 sps:$4 sm:$0xff]   ;;  %v18325_v44 = vpop.f32.mrb[64].mxu0 }
 0x5f3   :  { %8119 = vst.msk [vmem:[#allocation2 + $0xa8] sm:$0xff] %vm7823_vm7, %v8100_v39  ;;  %12866 = vmatprep.mubr.msk.bf16.mxu1 %vm4780_vm2, %v14738_v32  ;;  %v5909_v45 = vpop.f32.mrb[65].mxu0 }
 0x5f4   :  { %v8102_v2 = vpop.permute.xlu1 %8101  ;;  %v18329_v42 = vpop.f32.mrb[66].mxu0 }
 0x5f5   :  { %v6996_v14 = vpop.f32.mrb[32].mxu1  ;;  %8120 = vst.msk [vmem:[#allocation2 + $0xd0] sm:$0xff] %vm7823_vm7, %v8102_v2  ;;  %v5912_v39 = vpop.f32.mrb[67].mxu0 }
 0x5f6   :  { %v6997_v22 = vadd.f32 %v6996_v14, %v17965_v53  ;;  %v6998_v9 = vpop.f32.mrb[33].mxu1 }
 0x5f7   :  { %v6999_v50 = vpop.f32.mrb[34].mxu1 }
 0x5f8   :  { %8245 = vst.msk [vmem:[#allocation2 + $0x60] sm:$0xff] %vm7659_vm3, %v6997_v22  ;;  %v7000_v32 = vadd.f32 %v6999_v50, %v17975_v38  ;;  %v7001_v28 = vpop.f32.mrb[35].mxu1  ;;  %v14744_v22 = vld [vmem:[%s20355_s1 + $0xba8] ss:$16 sps:$4 sm:$0xff]  }
 0x5fa   :  { %8246 = vst.msk [vmem:[#allocation2 + $0x88] sm:$0xff] %vm7659_vm3, %v7000_v32  ;;  %7211 = vmatmul.mubr.bf16.gmra.mrb[32].mxu1 %v14736_v27  ;;  %v8104_v53 = vpop.permute.xlu0 %8103  ;;  %v14752_v27 = vld [vmem:[%s20355_s1 + $0xbcc] ss:$16 sps:$4 sm:$0xff]   ;;  %v18342_v50 = vpop.f32.mrb[68].mxu0 }
 0x5fb   :  { %8121 = vst.msk [vmem:[#allocation2 + $0xf8] sm:$0xff] %vm7823_vm7, %v8104_v53  ;;  %12867 = vmatprep.mubr.msk.bf16.mxu1 %vm4780_vm2, %v14746_v29  ;;  %v5917_v28 = vpop.f32.mrb[69].mxu0 }
 0x5fc   :  { %v8106_v26 = vpop.permute.xlu1 %8105  ;;  %v18346_v45 = vpop.f32.mrb[70].mxu0 }
 0x5fd   :  { %v7004_v2 = vpop.f32.mrb[36].mxu1  ;;  %8122 = vst.msk [vmem:[#allocation2 + $0x120] sm:$0xff] %vm7823_vm7, %v8106_v26  ;;  %v5920_v53 = vpop.f32.mrb[71].mxu0 }
 0x5fe   :  { %v7005_v14 = vadd.f32 %v7004_v2, %v17989_v6  ;;  %v7006_v38 = vpop.f32.mrb[37].mxu1 }
 0x5ff   :  { %v7007_v9 = vpop.f32.mrb[38].mxu1 }
 0x600   :  { %8247 = vst.msk [vmem:[#allocation2 + $0xb0] sm:$0xff] %vm7659_vm3, %v7005_v14  ;;  %v7008_v29 = vadd.f32 %v7007_v9, %v17999_v16  ;;  %v7009_v32 = vpop.f32.mrb[39].mxu1  ;;  %v14750_v14 = vld [vmem:[%s20355_s1 + $0xbc8] ss:$16 sps:$4 sm:$0xff]  }
 0x602   :  { %8248 = vst.msk [vmem:[#allocation2 + $0xd8] sm:$0xff] %vm7659_vm3, %v7008_v29  ;;  %7219 = vmatmul.mubr.bf16.gmra.mrb[36].mxu1 %v14744_v22  ;;  %v8132_v6 = vpop.permute.xlu0 %8131  ;;  %v14758_v22 = vld [vmem:[%s20355_s1 + $0xbec] ss:$16 sps:$4 sm:$0xff]   ;;  %v18359_v9 = vpop.f32.mrb[72].mxu0 }
 0x603   :  { %8155 = vst.msk [vmem:[#allocation2 + $0x8] sm:$0xff] %vm7864_vm8, %v8132_v6  ;;  %12868 = vmatprep.mubr.msk.bf16.mxu1 %vm4780_vm2, %v14752_v27  ;;  %v5925_v32 = vpop.f32.mrb[73].mxu0 }
 0x604   :  { %v8134_v39 = vpop.permute.xlu1 %8133  ;;  %v18363_v28 = vpop.f32.mrb[74].mxu0 }
 0x605   :  { %v7012_v26 = vpop.f32.mrb[40].mxu1  ;;  %8156 = vst.msk [vmem:[#allocation2 + $0x30] sm:$0xff] %vm7864_vm8, %v8134_v39  ;;  %v5928_v6 = vpop.f32.mrb[75].mxu0 }
 0x606   :  { %v7013_v2 = vadd.f32 %v7012_v26, %v18015_v59  ;;  %v7014_v16 = vpop.f32.mrb[41].mxu1 }
 0x607   :  { %v7015_v38 = vpop.f32.mrb[42].mxu1 }
 0x608   :  { %8249 = vst.msk [vmem:[#allocation2 + $0x100] sm:$0xff] %vm7659_vm3, %v7013_v2  ;;  %v7016_v27 = vadd.f32 %v7015_v38, %v18025_v58  ;;  %v7017_v29 = vpop.f32.mrb[43].mxu1  ;;  %v14756_v2 = vld [vmem:[%s20355_s1 + $0xbe8] ss:$16 sps:$4 sm:$0xff]  }
 0x60a   :  { %8250 = vst.msk [vmem:[#allocation2 + $0x128] sm:$0xff] %vm7659_vm3, %v7016_v27  ;;  %7227 = vmatmul.mubr.bf16.gmra.mrb[40].mxu1 %v14750_v14  ;;  %v8136_v59 = vpop.permute.xlu0 %8135  ;;  %v14764_v14 = vld [vmem:[%s20355_s1 + $0xc0c] ss:$16 sps:$4 sm:$0xff]   ;;  %v18376_v38 = vpop.f32.mrb[76].mxu0 }
 0x60b   :  { %8157 = vst.msk [vmem:[#allocation2 + $0x58] sm:$0xff] %vm7864_vm8, %v8136_v59  ;;  %12869 = vmatprep.mubr.msk.bf16.mxu1 %vm4780_vm2, %v14758_v22  ;;  %v5933_v29 = vpop.f32.mrb[77].mxu0 }
 0x60c   :  { %v8138_v53 = vpop.permute.xlu1 %8137  ;;  %v18380_v32 = vpop.f32.mrb[78].mxu0 }
 0x60d   :  { %v7020_v39 = vpop.f32.mrb[44].mxu1  ;;  %8158 = vst.msk [vmem:[#allocation2 + $0x80] sm:$0xff] %vm7864_vm8, %v8138_v53  ;;  %v5936_v59 = vpop.f32.mrb[79].mxu0 }
 0x60e   :  { %v7021_v26 = vadd.f32 %v7020_v39, %v18038_v18  ;;  %v7022_v58 = vpop.f32.mrb[45].mxu1 }
 0x60f   :  { %v7023_v16 = vpop.f32.mrb[46].mxu1 }
 0x610   :  { %v7024_v22 = vadd.f32 %v7023_v16, %v18048_v8  ;;  %v7025_v27 = vpop.f32.mrb[47].mxu1  ;;  %8259 = vrot.lane.b32.xlu0 %v7021_v26, %s15373_s3  ;;  %v14762_v26 = vld [vmem:[%s20355_s1 + $0xc08] ss:$16 sps:$4 sm:$0xff]  }
 0x612   :  { %7235 = vmatmul.mubr.bf16.gmra.mrb[44].mxu1 %v14756_v2  ;;  %8261 = vrot.lane.b32.xlu1 %v7024_v22, %s15373_s3  ;;  %v8140_v18 = vpop.permute.xlu0 %8139  ;;  %v14770_v2 = vld [vmem:[%s20355_s1 + $0xc2c] ss:$16 sps:$4 sm:$0xff]   ;;  %v18393_v16 = vpop.f32.mrb[80].mxu0 }
 0x613   :  { %8159 = vst.msk [vmem:[#allocation2 + $0xa8] sm:$0xff] %vm7864_vm8, %v8140_v18  ;;  %12870 = vmatprep.mubr.msk.bf16.mxu1 %vm4780_vm2, %v14764_v14  ;;  %v5941_v27 = vpop.f32.mrb[81].mxu0 }
 0x614   :  { %v8142_v6 = vpop.permute.xlu1 %8141  ;;  %v18397_v29 = vpop.f32.mrb[82].mxu0 }
 0x615   :  { %v7028_v53 = vpop.f32.mrb[48].mxu1  ;;  %8160 = vst.msk [vmem:[#allocation2 + $0xd0] sm:$0xff] %vm7864_vm8, %v8142_v6  ;;  %v5944_v18 = vpop.f32.mrb[83].mxu0 }
 0x616   :  { %v7029_v8 = vadd.f32 %v7028_v53, %v18061_v31  ;;  %v7030_v39 = vpop.f32.mrb[49].mxu1 }
 0x617   :  { %v7031_v58 = vpop.f32.mrb[50].mxu1 }
 0x618   :  { %v7032_v14 = vadd.f32 %v7031_v58, %v18071_v5  ;;  %v7033_v22 = vpop.f32.mrb[51].mxu1  ;;  %8263 = vrot.lane.b32.xlu0 %v7029_v8, %s15373_s3  ;;  %v14768_v8 = vld [vmem:[%s20355_s1 + $0xc28] ss:$16 sps:$4 sm:$0xff]  }
 0x61a   :  { %7243 = vmatmul.mubr.bf16.gmra.mrb[48].mxu1 %v14762_v26  ;;  %8265 = vrot.lane.b32.xlu1 %v7032_v14, %s15373_s3  ;;  %v8144_v31 = vpop.permute.xlu0 %8143  ;;  %v14776_v26 = vld [vmem:[%s20355_s1 + $0xc4c] ss:$16 sps:$4 sm:$0xff]   ;;  %v18410_v58 = vpop.f32.mrb[84].mxu0 }
 0x61b   :  { %8161 = vst.msk [vmem:[#allocation2 + $0xf8] sm:$0xff] %vm7864_vm8, %v8144_v31  ;;  %12871 = vmatprep.mubr.msk.bf16.mxu1 %vm4780_vm2, %v14770_v2  ;;  %v5949_v22 = vpop.f32.mrb[85].mxu0 }
 0x61c   :  { %v8146_v59 = vpop.permute.xlu1 %8145  ;;  %v18414_v27 = vpop.f32.mrb[86].mxu0 }
 0x61d   :  { %v7036_v6 = vpop.f32.mrb[200].mxu1  ;;  %8162 = vst.msk [vmem:[#allocation2 + $0x120] sm:$0xff] %vm7864_vm8, %v8146_v59  ;;  %v5952_v31 = vpop.f32.mrb[87].mxu0 }
 0x61e   :  { %v7037_v5 = vadd.f32 %v7036_v6, %v18084_v49  ;;  %v7038_v53 = vpop.f32.mrb[201].mxu1 }
 0x61f   :  { %v7039_v39 = vpop.f32.mrb[202].mxu1 }
 0x620   :  { %v7040_v2 = vadd.f32 %v7039_v39, %v18094_v61  ;;  %v7041_v14 = vpop.f32.mrb[203].mxu1  ;;  %8267 = vrot.lane.b32.xlu0 %v7037_v5, %s15373_s3  ;;  %v14774_v5 = vld [vmem:[%s20355_s1 + $0xc48] ss:$16 sps:$4 sm:$0xff]  }
 0x622   :  { %7251 = vmatmul.mubr.bf16.gmra.mrb[200].mxu1 %v14768_v8  ;;  %8269 = vrot.lane.b32.xlu1 %v7040_v2, %s15373_s3  ;;  %v8172_v49 = vpop.permute.xlu0 %8171  ;;  %v14782_v8 = vld [vmem:[%s20355_s1 + $0xc6c] ss:$16 sps:$4 sm:$0xff]   ;;  %v18427_v39 = vpop.f32.mrb[88].mxu0 }
 0x623   :  { %8195 = vst.msk [vmem:[#allocation2 + $0x8] sm:$0xff] %vm7905_vm9, %v8172_v49  ;;  %12872 = vmatprep.mubr.msk.bf16.mxu1 %vm4780_vm2, %v14776_v26  ;;  %v5957_v14 = vpop.f32.mrb[89].mxu0 }
 0x624   :  { %v8174_v18 = vpop.permute.xlu1 %8173  ;;  %v18431_v22 = vpop.f32.mrb[90].mxu0 }
 0x625   :  { %v7044_v59 = vpop.f32.mrb[204].mxu1  ;;  %8196 = vst.msk [vmem:[#allocation2 + $0x30] sm:$0xff] %vm7905_vm9, %v8174_v18  ;;  %v5960_v49 = vpop.f32.mrb[91].mxu0 }
 0x626   :  { %v7045_v61 = vadd.f32 %v7044_v59, %v18107_v33  ;;  %v7046_v6 = vpop.f32.mrb[205].mxu1 }
 0x627   :  { %v7047_v53 = vpop.f32.mrb[206].mxu1 }
 0x628   :  { %v7048_v26 = vadd.f32 %v7047_v53, %v18117_v4  ;;  %v7049_v2 = vpop.f32.mrb[207].mxu1  ;;  %8271 = vrot.lane.b32.xlu0 %v7045_v61, %s15373_s3  ;;  %v14780_v61 = vld [vmem:[%s20355_s1 + $0xc68] ss:$16 sps:$4 sm:$0xff]  }
 0x62a   :  { %7259 = vmatmul.mubr.bf16.gmra.mrb[204].mxu1 %v14774_v5  ;;  %8273 = vrot.lane.b32.xlu1 %v7048_v26, %s15373_s3  ;;  %v8176_v33 = vpop.permute.xlu0 %8175  ;;  %v14787_v5 = vld [vmem:[%s20355_s1 + $0xc8c] ss:$16 sps:$4 sm:$0xff]   ;;  %v18444_v53 = vpop.f32.mrb[92].mxu0 }
 0x62b   :  { %8197 = vst.msk [vmem:[#allocation2 + $0x58] sm:$0xff] %vm7905_vm9, %v8176_v33  ;;  %12873 = vmatprep.mubr.msk.bf16.mxu1 %vm4780_vm2, %v14782_v8  ;;  %v5965_v2 = vpop.f32.mrb[93].mxu0 }
 0x62c   :  { %v8178_v31 = vpop.permute.xlu1 %8177  ;;  %v18448_v14 = vpop.f32.mrb[94].mxu0 }
 0x62d   :  { %v7052_v18 = vpop.f32.mrb[208].mxu1  ;;  %8198 = vst.msk [vmem:[#allocation2 + $0x80] sm:$0xff] %vm7905_vm9, %v8178_v31  ;;  %v5968_v33 = vpop.f32.mrb[95].mxu0 }
 0x62e   :  { %v7053_v4 = vadd.f32 %v7052_v18, %v18130_v63  ;;  %v7054_v59 = vpop.f32.mrb[209].mxu1 }
 0x62f   :  { %v7055_v6 = vpop.f32.mrb[210].mxu1 }
 0x630   :  { %v7056_v8 = vadd.f32 %v7055_v6, %v18140_v51  ;;  %v7057_v26 = vpop.f32.mrb[211].mxu1  ;;  %8299 = vrot.lane.b32.xlu0 %v7053_v4, %s15374_s16  ;;  %v14790_v4 = vld [vmem:[%s20355_s1 + $0xc88] ss:$16 sps:$4 sm:$0xff]  }
 0x632   :  { %7267 = vmatmul.mubr.bf16.gmra.mrb[208].mxu1 %v14780_v61  ;;  %8301 = vrot.lane.b32.xlu1 %v7056_v8, %s15374_s16  ;;  %v8180_v63 = vpop.permute.xlu0 %8179  ;;  %v14794_v61 = vld [vmem:[%s20355_s1 + $0xcac] ss:$16 sps:$4 sm:$0xff]   ;;  %v18461_v6 = vpop.f32.mrb[96].mxu0 }
 0x633   :  { %8199 = vst.msk [vmem:[#allocation2 + $0xa8] sm:$0xff] %vm7905_vm9, %v8180_v63  ;;  %12874 = vmatprep.mubr.msk.bf16.mxu1 %vm4780_vm2, %v14787_v5  ;;  %v5973_v26 = vpop.f32.mrb[97].mxu0 }
 0x634   :  { %v8182_v49 = vpop.permute.xlu1 %8181  ;;  %v18465_v2 = vpop.f32.mrb[98].mxu0 }
 0x635   :  { %v7060_v31 = vpop.f32.mrb[212].mxu1  ;;  %8200 = vst.msk [vmem:[#allocation2 + $0xd0] sm:$0xff] %vm7905_vm9, %v8182_v49  ;;  %v5976_v63 = vpop.f32.mrb[99].mxu0 }
 0x636   :  { %v7061_v51 = vadd.f32 %v7060_v31, %v18156_v30  ;;  %v7062_v18 = vpop.f32.mrb[213].mxu1 }
 0x637   :  { %v7063_v59 = vpop.f32.mrb[214].mxu1 }
 0x638   :  { %v7064_v5 = vadd.f32 %v7063_v59, %v18163_v56  ;;  %v7065_v8 = vpop.f32.mrb[215].mxu1  ;;  %8303 = vrot.lane.b32.xlu0 %v7061_v51, %s15374_s16  ;;  %v14797_v51 = vld [vmem:[%s20355_s1 + $0xca8] ss:$16 sps:$4 sm:$0xff]  }
 0x63a   :  { %7275 = vmatmul.mubr.bf16.gmra.mrb[52].mxu1 %v14790_v4  ;;  %8305 = vrot.lane.b32.xlu1 %v7064_v5, %s15374_s16  ;;  %v8184_v30 = vpop.permute.xlu0 %8183  ;;  %v14801_v4 = vld [vmem:[%s20355_s1 + $0xccc] ss:$16 sps:$4 sm:$0xff]   ;;  %v18478_v59 = vpop.f32.mrb[100].mxu0 }
 0x63b   :  { %8201 = vst.msk [vmem:[#allocation2 + $0xf8] sm:$0xff] %vm7905_vm9, %v8184_v30  ;;  %12875 = vmatprep.mubr.msk.bf16.mxu1 %vm4780_vm2, %v14794_v61  ;;  %v5981_v8 = vpop.f32.mrb[101].mxu0 }
 0x63c   :  { %v8186_v33 = vpop.permute.xlu1 %8185  ;;  %v18482_v26 = vpop.f32.mrb[102].mxu0 }
 0x63d   :  { %v7068_v49 = vpop.f32.mrb[216].mxu1  ;;  %8202 = vst.msk [vmem:[#allocation2 + $0x120] sm:$0xff] %vm7905_vm9, %v8186_v33  ;;  %v5984_v30 = vpop.f32.mrb[103].mxu0 }
 0x63e   :  { %v7069_v56 = vadd.f32 %v7068_v49, %v18185_v1  ;;  %v7070_v31 = vpop.f32.mrb[217].mxu1  ;;  %v8992_v30 = vld [vmem:[#allocation2 + $0x28] sm:$0xff] }
 0x63f   :  { %v7071_v18 = vpop.f32.mrb[218].mxu1 }
 0x640   :  { %v7072_v61 = vadd.f32 %v7071_v18, %v18192_v10  ;;  %v7073_v5 = vpop.f32.mrb[219].mxu1  ;;  %8307 = vrot.lane.b32.xlu0 %v7069_v56, %s15374_s16  ;;  %v14804_v56 = vld [vmem:[%s20355_s1 + $0xcc8] ss:$16 sps:$4 sm:$0xff]  }
 0x642   :  { %7283 = vmatmul.mubr.bf16.gmra.mrb[56].mxu1 %v14797_v51  ;;  %v8212_v1 = vpop.permute.xlu0 %8211  ;;  %8309 = vrot.lane.b32.xlu1 %v7072_v61, %s15374_s16  ;;  %v14807_v51 = vld [vmem:[%s20355_s1 + $0xcec] ss:$16 sps:$4 sm:$0xff]  }
 0x643   :  { %8235 = vst.msk [vmem:[#allocation2 + $0x8] sm:$0xff] %vm7946_vm10, %v8212_v1  ;;  %12876 = vmatprep.mubr.msk.bf16.mxu1 %vm4780_vm2, %v14801_v4  ;;  %v18495_v18 = vpop.f32.mrb[252].mxu0 }
 0x644   :  { %v8214_v63 = vpop.permute.xlu1 %8213  ;;  %v5989_v5 = vpop.f32.mrb[253].mxu0 }
 0x645   :  { %8236 = vst.msk [vmem:[#allocation2 + $0x30] sm:$0xff] %vm7946_vm10, %v8214_v63  ;;  %v7076_v33 = vpop.f32.mrb[220].mxu1  ;;  %v18499_v8 = vpop.f32.mrb[254].mxu0 }
 0x646   :  { %v7077_v10 = vadd.f32 %v7076_v33, %v18214_v12  ;;  %v7078_v49 = vpop.f32.mrb[221].mxu1  ;;  %v5992_v1 = vpop.f32.mrb[255].mxu0 }
 0x647   :  { %v7079_v31 = vpop.f32.mrb[222].mxu1 }
 0x648   :  { %v7080_v4 = vadd.f32 %v7079_v31, %v18221_v25  ;;  %v7081_v61 = vpop.f32.mrb[223].mxu1  ;;  %8311 = vrot.lane.b32.xlu0 %v7077_v10, %s15374_s16  ;;  %v8987_v25 = vld [vmem:[#allocation2] sm:$0xff] }
 0x649   :  { %v9027_v61 = vpack.c.bf16 %v8992_v30, %v8987_v25 }
 0x64a   :  { %7291 = vmatmul.mubr.bf16.gmra.mrb[60].mxu1 %v14804_v56  ;;  %v8216_v12 = vpop.permute.xlu0 %8215  ;;  %8313 = vrot.lane.b32.xlu1 %v7080_v4, %s15374_s16  ;;  %v8988_v33 = vld [vmem:[#allocation2 + $0x8] sm:$0xff] }
 0x64b   :  { %8237 = vst.msk [vmem:[#allocation2 + $0x58] sm:$0xff] %vm7946_vm10, %v8216_v12  ;;  %12877 = vmatprep.mubr.msk.bf16.mxu1 %vm4780_vm2, %v14807_v51  ;;  %v14809_v4 = vld [vmem:[%s20355_s1 + $0xce8] ss:$16 sps:$4 sm:$0xff]   ;;  %v14810_v51 = vld [vmem:[%s20355_s1 + $0xd0c] ss:$16 sps:$4 sm:$0xff]   ;;  %v18512_v1 = vpop.f32.mrb[0].mxu0 }
 0x64c   :  { %v8218_v63 = vpop.permute.xlu1 %8217  ;;  %v8993_v49 = vld [vmem:[#allocation2 + $0x30] sm:$0xff] }
 0x64d   :  { %8238 = vst.msk [vmem:[#allocation2 + $0x80] sm:$0xff] %vm7946_vm10, %v8218_v63  ;;  %v7084_v10 = vpop.f32.mrb[224].mxu1  ;;  %v9028_v31 = vpack.c.bf16 %v8993_v49, %v8988_v33 }
 0x64e   :  { %v7085_v56 = vadd.f32 %v7084_v10, %v18240_v57  ;;  %v7086_v5 = vpop.f32.mrb[225].mxu1  ;;  %v5997_v57 = vpop.f32.mrb[1].mxu0  ;;  %v9002_v10 = vld [vmem:[#allocation2 + $0x78] sm:$0xff] }
 0x64f   :  { %9395 = vmatprep.mubr.bf16.mxu0 %v9028_v31  ;;  %v7087_v12 = vpop.f32.mrb[226].mxu1  ;;  %v18516_v30 = vpop.f32.mrb[2].mxu0 }
 0x650   :  { %9396 = vmatmul.mubr.bf16.vlgmr.msra.gmra.mrb[104].mxu0 %v9027_v61  ;;  %v7088_v63 = vadd.f32 %v7087_v12, %v18244_v0  ;;  %v7089_v33 = vpop.f32.mrb[227].mxu1  ;;  %8339 = vrot.lane.b32.xlu0 %v7085_v56, %s15375_s30  ;;  %v6000_v25 = vpop.f32.mrb[3].mxu0  ;;  %v8997_v12 = vld [vmem:[#allocation2 + $0x50] sm:$0xff] }
 0x651   :  { %v9032_v57 = vpack.c.bf16 %v9002_v10, %v8997_v12 }
 0x652   :  { %7299 = vmatmul.mubr.bf16.gmra.mrb[64].mxu1 %v14809_v4  ;;  %v8220_v49 = vpop.permute.xlu0 %8219  ;;  %8341 = vrot.lane.b32.xlu1 %v7088_v63, %s15375_s30  ;;  %v8998_v61 = vld [vmem:[#allocation2 + $0x58] sm:$0xff] }
 0x653   :  { %8239 = vst.msk [vmem:[#allocation2 + $0xa8] sm:$0xff] %vm7946_vm10, %v8220_v49  ;;  %12878 = vmatprep.mubr.msk.bf16.mxu1 %vm4780_vm2, %v14810_v51  ;;  %v14812_v63 = vld [vmem:[%s20355_s1 + $0xd08] ss:$16 sps:$4 sm:$0xff]   ;;  %v14813_v51 = vld [vmem:[%s20355_s1 + $0xd2c] ss:$16 sps:$4 sm:$0xff]   ;;  %v18529_v25 = vpop.f32.mrb[4].mxu0 }
 0x654   :  { %v8222_v31 = vpop.permute.xlu1 %8221  ;;  %v9003_v5 = vld [vmem:[#allocation2 + $0x80] sm:$0xff] }
 0x655   :  { %8240 = vst.msk [vmem:[#allocation2 + $0xd0] sm:$0xff] %vm7946_vm10, %v8222_v31  ;;  %v7092_v0 = vpop.f32.mrb[228].mxu1  ;;  %v9033_v56 = vpack.c.bf16 %v9003_v5, %v8998_v61 }
 0x656   :  { %v7093_v33 = vadd.f32 %v7092_v0, %v18257_v23  ;;  %v7094_v4 = vpop.f32.mrb[229].mxu1  ;;  %v6005_v23 = vpop.f32.mrb[5].mxu0 }
 0x657   :  { %9403 = vmatprep.mubr.bf16.mxu0 %v9033_v56  ;;  %v7095_v49 = vpop.f32.mrb[230].mxu1  ;;  %v18533_v10 = vpop.f32.mrb[6].mxu0  ;;  %v9012_v56 = vld [vmem:[#allocation2 + $0xc8] sm:$0xff] }
 0x658   :  { %9404 = vmatmul.mubr.bf16.gmra.mrb[108].mxu0 %v9032_v57  ;;  %v7096_v31 = vadd.f32 %v7095_v49, %v18261_v35  ;;  %v7097_v61 = vpop.f32.mrb[231].mxu1  ;;  %8343 = vrot.lane.b32.xlu0 %v7093_v33, %s15375_s30  ;;  %v6008_v0 = vpop.f32.mrb[7].mxu0  ;;  %v9007_v49 = vld [vmem:[#allocation2 + $0xa0] sm:$0xff] }
 0x659   :  { %v9037_v23 = vpack.c.bf16 %v9012_v56, %v9007_v49 }
 0x65a   :  { %7307 = vmatmul.mubr.bf16.gmra.mrb[68].mxu1 %v14812_v63  ;;  %v8224_v5 = vpop.permute.xlu0 %8223  ;;  %8345 = vrot.lane.b32.xlu1 %v7096_v31, %s15375_s30  ;;  %v9008_v4 = vld [vmem:[#allocation2 + $0xa8] sm:$0xff] }
 0x65b   :  { %8241 = vst.msk [vmem:[#allocation2 + $0xf8] sm:$0xff] %vm7946_vm10, %v8224_v5  ;;  %12879 = vmatprep.mubr.msk.bf16.mxu1 %vm4780_vm2, %v14813_v51  ;;  %v14815_v31 = vld [vmem:[%s20355_s1 + $0xd28] ss:$16 sps:$4 sm:$0xff]   ;;  %v14816_v51 = vld [vmem:[%s20355_s1 + $0xd4c] ss:$16 sps:$4 sm:$0xff]   ;;  %v18546_v0 = vpop.f32.mrb[8].mxu0 }
 0x65c   :  { %v8226_v12 = vpop.permute.xlu1 %8225  ;;  %v9013_v57 = vld [vmem:[#allocation2 + $0xd0] sm:$0xff] }
 0x65d   :  { %8242 = vst.msk [vmem:[#allocation2 + $0x120] sm:$0xff] %vm7946_vm10, %v8226_v12  ;;  %v7100_v35 = vpop.f32.mrb[232].mxu1  ;;  %v9038_v33 = vpack.c.bf16 %v9013_v57, %v9008_v4 }
 0x65e   :  { %v7101_v61 = vadd.f32 %v7100_v35, %v18274_v13  ;;  %v7102_v63 = vpop.f32.mrb[233].mxu1  ;;  %v6013_v13 = vpop.f32.mrb[9].mxu0  ;;  %v9022_v35 = vld [vmem:[#allocation2 + $0x118] sm:$0xff] }
 0x65f   :  { %9411 = vmatprep.mubr.bf16.mxu0 %v9038_v33  ;;  %v7103_v5 = vpop.f32.mrb[234].mxu1  ;;  %v18550_v56 = vpop.f32.mrb[10].mxu0 }
 0x660   :  { %9412 = vmatmul.mubr.bf16.gmra.mrb[112].mxu0 %v9037_v23  ;;  %v7104_v12 = vadd.f32 %v7103_v5, %v18278_v37  ;;  %v7105_v4 = vpop.f32.mrb[235].mxu1  ;;  %8347 = vrot.lane.b32.xlu0 %v7101_v61, %s15375_s30  ;;  %v6016_v57 = vpop.f32.mrb[11].mxu0  ;;  %v9017_v23 = vld [vmem:[#allocation2 + $0xf0] sm:$0xff]  ;;  %v14818_v61 = vld [vmem:[%s20355_s1 + $0xd48] ss:$16 sps:$4 sm:$0xff]  }
 0x661   :  { %v9042_v4 = vpack.c.bf16 %v9022_v35, %v9017_v23 }
 0x662   :  { %7315 = vmatmul.mubr.bf16.gmra.mrb[72].mxu1 %v14815_v31  ;;  %8349 = vrot.lane.b32.xlu1 %v7104_v12, %s15375_s30  ;;  %v9018_v33 = vld [vmem:[#allocation2 + $0xf8] sm:$0xff] }
 0x663   :  { %12880 = vmatprep.mubr.msk.bf16.mxu1 %vm4780_vm2, %v14816_v51  ;;  %v14819_v12 = vld [vmem:[%s20355_s1 + $0xd6c] ss:$16 sps:$4 sm:$0xff]   ;;  %v18561_v51 = vpop.f32.mrb[12].mxu0 }
 0x664   :  { %v9023_v49 = vld [vmem:[#allocation2 + $0x120] sm:$0xff] }
 0x665   :  { %v7108_v63 = vpop.f32.mrb[236].mxu1  ;;  %v9043_v62 = vpack.c.bf16 %v9023_v49, %v9018_v33 }
 0x666   :  { %v7109_v37 = vadd.f32 %v7108_v63, %v18291_v41  ;;  %v7110_v5 = vpop.f32.mrb[237].mxu1  ;;  %v6021_v41 = vpop.f32.mrb[13].mxu0 }
 0x667   :  { %9419 = vmatprep.mubr.bf16.mxu0 %v9043_v62  ;;  %v7111_v31 = vpop.f32.mrb[238].mxu1  ;;  %v18565_v35 = vpop.f32.mrb[14].mxu0 }
 0x668   :  { %9420 = vmatmul.mubr.bf16.gmra.mrb[116].mxu0 %v9042_v4  ;;  %v7112_v13 = vadd.f32 %v7111_v31, %v18295_v47  ;;  %v7113_v57 = vpop.f32.mrb[239].mxu1  ;;  %8351 = vrot.lane.b32.xlu0 %v7109_v37, %s15375_s30  ;;  %v6024_v62 = vpop.f32.mrb[15].mxu0  ;;  %v14821_v47 = vld [vmem:[%s20355_s1 + $0xd68] ss:$16 sps:$4 sm:$0xff]   ;;  %v14822_v37 = vld [vmem:[%s20355_s1 + $0xd8c] ss:$16 sps:$4 sm:$0xff]  }
 0x66a   :  { %7323 = vmatmul.mubr.bf16.gmra.mrb[76].mxu1 %v14818_v61  ;;  %8353 = vrot.lane.b32.xlu1 %v7112_v13, %s15375_s30 }
 0x66b   :  { %12881 = vmatprep.mubr.msk.bf16.mxu1 %vm4780_vm2, %v14819_v12  ;;  %v18576_v5 = vpop.f32.mrb[16].mxu0 }
 0x66c   :  { %v6029_v31 = vpop.f32.mrb[17].mxu0 }
 0x66d   :  { %v7116_v33 = vpop.f32.mrb[240].mxu1  ;;  %v18580_v12 = vpop.f32.mrb[18].mxu0 }
 0x66e   :  { %v7117_v49 = vadd.f32 %v7116_v33, %v18308_v40  ;;  %v7118_v63 = vpop.f32.mrb[241].mxu1  ;;  %v6032_v40 = vpop.f32.mrb[19].mxu0  ;;  %v14825_v33 = vld [vmem:[%s20355_s1 + $0xdac] ss:$16 sps:$4 sm:$0xff]  }
 0x66f   :  { %v7119_v23 = vpop.f32.mrb[242].mxu1 }
 0x670   :  { %v7120_v4 = vadd.f32 %v7119_v23, %v18312_v11  ;;  %v7121_v61 = vpop.f32.mrb[243].mxu1  ;;  %8379 = vrot.lane.b32.xlu0 %v7117_v49, %s15376_s28  ;;  %v14824_v11 = vld [vmem:[%s20355_s1 + $0xd88] ss:$16 sps:$4 sm:$0xff]  }
 0x672   :  { %7331 = vmatmul.mubr.bf16.gmra.mrb[80].mxu1 %v14821_v47  ;;  %8381 = vrot.lane.b32.xlu1 %v7120_v4, %s15376_s28 }
 0x673   :  { %12882 = vmatprep.mubr.msk.bf16.mxu1 %vm4780_vm2, %v14822_v37  ;;  %v18591_v49 = vpop.f32.mrb[20].mxu0 }
 0x674   :  { %v6037_v23 = vpop.f32.mrb[21].mxu0 }
 0x675   :  { %v7124_v13 = vpop.f32.mrb[244].mxu1  ;;  %v18595_v37 = vpop.f32.mrb[22].mxu0 }
 0x676   :  { %v7125_v57 = vadd.f32 %v7124_v13, %v18325_v44  ;;  %v7126_v41 = vpop.f32.mrb[245].mxu1  ;;  %v6040_v44 = vpop.f32.mrb[23].mxu0  ;;  %v14828_v13 = vld [vmem:[%s20355_s1 + $0xdcc] ss:$16 sps:$4 sm:$0xff]  }
 0x677   :  { %v7127_v62 = vpop.f32.mrb[246].mxu1 }
 0x678   :  { %v7128_v63 = vadd.f32 %v7127_v62, %v18329_v42  ;;  %v7129_v47 = vpop.f32.mrb[247].mxu1  ;;  %8383 = vrot.lane.b32.xlu0 %v7125_v57, %s15376_s28  ;;  %v14827_v42 = vld [vmem:[%s20355_s1 + $0xda8] ss:$16 sps:$4 sm:$0xff]  }
 0x67a   :  { %7339 = vmatmul.mubr.bf16.gmra.mrb[84].mxu1 %v14824_v11  ;;  %8385 = vrot.lane.b32.xlu1 %v7128_v63, %s15376_s28 }
 0x67b   :  { %12883 = vmatprep.mubr.msk.bf16.mxu1 %vm4780_vm2, %v14825_v33  ;;  %v18606_v57 = vpop.f32.mrb[24].mxu0 }
 0x67c   :  { %v6045_v62 = vpop.f32.mrb[25].mxu0 }
 0x67d   :  { %v7132_v4 = vpop.f32.mrb[248].mxu1  ;;  %v18610_v33 = vpop.f32.mrb[26].mxu0 }
 0x67e   :  { %v7133_v61 = vadd.f32 %v7132_v4, %v18342_v50  ;;  %v7134_v31 = vpop.f32.mrb[249].mxu1  ;;  %v6048_v63 = vpop.f32.mrb[27].mxu0  ;;  %v14830_v4 = vld [vmem:[%s20355_s1 + $0xdc8] ss:$16 sps:$4 sm:$0xff]  }
 0x67f   :  { %v7135_v40 = vpop.f32.mrb[250].mxu1  ;;  %v14831_v31 = vld [vmem:[%s20355_s1 + $0xdec] ss:$16 sps:$4 sm:$0xff]  }
 0x680   :  { %v7136_v41 = vadd.f32 %v7135_v40, %v18346_v45  ;;  %v7137_v11 = vpop.f32.mrb[251].mxu1  ;;  %8387 = vrot.lane.b32.xlu0 %v7133_v61, %s15376_s28 }
 0x682   :  { %7347 = vmatmul.mubr.bf16.gmra.mrb[88].mxu1 %v14827_v42  ;;  %8389 = vrot.lane.b32.xlu1 %v7136_v41, %s15376_s28  ;;  %v8260_v50 = vpop.permute.xlu0 %8259 }
 0x683   :  { %8283 = vst.msk [vmem:[#allocation2 + $0x10] sm:$0xff] %vm7700_vm4, %v8260_v50  ;;  %12884 = vmatprep.mubr.msk.bf16.mxu1 %vm4780_vm2, %v14828_v13  ;;  %v18623_v42 = vpop.f32.mrb[28].mxu0 }
 0x684   :  { %v8262_v47 = vpop.permute.xlu1 %8261  ;;  %v6053_v41 = vpop.f32.mrb[29].mxu0 }
 0x685   :  { %v7140_v23 = vpop.f32.mrb[252].mxu1  ;;  %8284 = vst.msk [vmem:[#allocation2 + $0x38] sm:$0xff] %vm7700_vm4, %v8262_v47  ;;  %v18627_v11 = vpop.f32.mrb[30].mxu0 }
 0x686   :  { %v7141_v45 = vadd.f32 %v7140_v23, %v18359_v9  ;;  %v7142_v44 = vpop.f32.mrb[253].mxu1  ;;  %v6056_v62 = vpop.f32.mrb[31].mxu0  ;;  %v14833_v23 = vld [vmem:[%s20355_s1 + $0xde8] ss:$16 sps:$4 sm:$0xff]  }
 0x687   :  { %v7143_v61 = vpop.f32.mrb[254].mxu1  ;;  %v14834_v44 = vld [vmem:[%s20355_s1 + $0xe0c] ss:$16 sps:$4 sm:$0xff]  }
 0x688   :  { %v7144_v40 = vadd.f32 %v7143_v61, %v18363_v28  ;;  %v7145_v13 = vpop.f32.mrb[255].mxu1  ;;  %8391 = vrot.lane.b32.xlu0 %v7141_v45, %s15376_s28  ;;  %v14837_v62 = vld [vmem:[%s20355_s1 + $0xe2c] ss:$16 sps:$4 sm:$0xff]  }
 0x68a   :  { %7355 = vmatmul.mubr.bf16.gmra.mrb[92].mxu1 %v14830_v4  ;;  %8393 = vrot.lane.b32.xlu1 %v7144_v40, %s15376_s28  ;;  %v8264_v9 = vpop.permute.xlu0 %8263 }
 0x68b   :  { %8285 = vst.msk [vmem:[#allocation2 + $0x60] sm:$0xff] %vm7700_vm4, %v8264_v9  ;;  %12885 = vmatprep.mubr.msk.bf16.mxu1 %vm4780_vm2, %v14831_v31 }
 0x68c   :  { %v8266_v50 = vpop.permute.xlu1 %8265 }
 0x68d   :  { %v7148_v63 = vpop.f32.mrb[0].mxu1  ;;  %8286 = vst.msk [vmem:[#allocation2 + $0x88] sm:$0xff] %vm7700_vm4, %v8266_v50 }
 0x68e   :  { %v7149_v28 = vadd.f32 %v7148_v63, %v18376_v38  ;;  %v7150_v47 = vpop.f32.mrb[1].mxu1 }
 0x68f   :  { %v7151_v45 = vpop.f32.mrb[2].mxu1 }
 0x690   :  { %v7152_v4 = vadd.f32 %v7151_v45, %v18380_v32  ;;  %v7153_v61 = vpop.f32.mrb[3].mxu1  ;;  %8419 = vrot.lane.b32.xlu0 %v7149_v28, %s15377_s18  ;;  %v14836_v32 = vld [vmem:[%s20355_s1 + $0xe08] ss:$16 sps:$4 sm:$0xff]  }
 0x692   :  { %7363 = vmatmul.mubr.bf16.gmra.mrb[96].mxu1 %v14833_v23  ;;  %8421 = vrot.lane.b32.xlu1 %v7152_v4, %s15377_s18  ;;  %v8268_v31 = vpop.permute.xlu0 %8267  ;;  %v14840_v4 = vld [vmem:[%s20355_s1 + $0xe4c] ss:$16 sps:$4 sm:$0xff]  }
 0x693   :  { %8287 = vst.msk [vmem:[#allocation2 + $0xb0] sm:$0xff] %vm7700_vm4, %v8268_v31  ;;  %12886 = vmatprep.mubr.msk.bf16.mxu1 %vm4780_vm2, %v14834_v44 }
 0x694   :  { %v8270_v38 = vpop.permute.xlu1 %8269 }
 0x695   :  { %v7156_v40 = vpop.f32.mrb[4].mxu1  ;;  %8288 = vst.msk [vmem:[#allocation2 + $0xd8] sm:$0xff] %vm7700_vm4, %v8270_v38 }
 0x696   :  { %v7157_v13 = vadd.f32 %v7156_v40, %v18393_v16  ;;  %v7158_v41 = vpop.f32.mrb[5].mxu1 }
 0x697   :  { %v7159_v9 = vpop.f32.mrb[6].mxu1 }
 0x698   :  { %v7160_v50 = vadd.f32 %v7159_v9, %v18397_v29  ;;  %v7161_v63 = vpop.f32.mrb[7].mxu1  ;;  %8423 = vrot.lane.b32.xlu0 %v7157_v13, %s15377_s18  ;;  %v14839_v29 = vld [vmem:[%s20355_s1 + $0xe28] ss:$16 sps:$4 sm:$0xff]   ;;  %v14843_v9 = vld [vmem:[%s20355_s1 + $0xe6c] ss:$16 sps:$4 sm:$0xff]  }
 0x69a   :  { %7371 = vmatmul.mubr.bf16.gmra.mrb[100].mxu1 %v14836_v32  ;;  %8425 = vrot.lane.b32.xlu1 %v7160_v50, %s15377_s18  ;;  %v8272_v28 = vpop.permute.xlu0 %8271 }
 0x69b   :  { %8289 = vst.msk [vmem:[#allocation2 + $0x100] sm:$0xff] %vm7700_vm4, %v8272_v28  ;;  %12887 = vmatprep.mubr.msk.bf16.mxu1 %vm4780_vm2, %v14837_v62 }
 0x69c   :  { %v8274_v16 = vpop.permute.xlu1 %8273 }
 0x69d   :  { %v7164_v47 = vpop.f32.mrb[8].mxu1  ;;  %8290 = vst.msk [vmem:[#allocation2 + $0x128] sm:$0xff] %vm7700_vm4, %v8274_v16 }
 0x69e   :  { %v7165_v23 = vadd.f32 %v7164_v47, %v18410_v58  ;;  %v7166_v45 = vpop.f32.mrb[9].mxu1 }
 0x69f   :  { %v7167_v44 = vpop.f32.mrb[10].mxu1  ;;  %v14846_v45 = vld [vmem:[%s20355_s1 + $0xe8c] ss:$16 sps:$4 sm:$0xff]  }
 0x6a0   :  { %v7168_v61 = vadd.f32 %v7167_v44, %v18414_v27  ;;  %v7169_v31 = vpop.f32.mrb[11].mxu1  ;;  %8427 = vrot.lane.b32.xlu0 %v7165_v23, %s15377_s18  ;;  %v14842_v27 = vld [vmem:[%s20355_s1 + $0xe48] ss:$16 sps:$4 sm:$0xff]  }
 0x6a2   :  { %7379 = vmatmul.mubr.bf16.gmra.mrb[104].mxu1 %v14839_v29  ;;  %8429 = vrot.lane.b32.xlu1 %v7168_v61, %s15377_s18  ;;  %v8300_v38 = vpop.permute.xlu0 %8299 }
 0x6a3   :  { %8323 = vst.msk [vmem:[#allocation2 + $0x10] sm:$0xff] %vm7741_vm5, %v8300_v38  ;;  %12888 = vmatprep.mubr.msk.bf16.mxu1 %vm4780_vm2, %v14840_v4 }
 0x6a4   :  { %v8302_v58 = vpop.permute.xlu1 %8301 }
 0x6a5   :  { %v7172_v40 = vpop.f32.mrb[12].mxu1  ;;  %8324 = vst.msk [vmem:[#allocation2 + $0x38] sm:$0xff] %vm7741_vm5, %v8302_v58 }
 0x6a6   :  { %v7173_v13 = vadd.f32 %v7172_v40, %v18427_v39  ;;  %v7174_v41 = vpop.f32.mrb[13].mxu1  ;;  %v14849_v40 = vld [vmem:[%s20355_s1 + $0xeac] ss:$16 sps:$4 sm:$0xff]  }
 0x6a7   :  { %v7175_v32 = vpop.f32.mrb[14].mxu1 }
 0x6a8   :  { %v7176_v62 = vadd.f32 %v7175_v32, %v18431_v22  ;;  %v7177_v50 = vpop.f32.mrb[15].mxu1  ;;  %8431 = vrot.lane.b32.xlu0 %v7173_v13, %s15377_s18  ;;  %v14845_v22 = vld [vmem:[%s20355_s1 + $0xe68] ss:$16 sps:$4 sm:$0xff]  }
 0x6aa   :  { %7387 = vmatmul.mubr.bf16.gmra.mrb[108].mxu1 %v14842_v27  ;;  %8433 = vrot.lane.b32.xlu1 %v7176_v62, %s15377_s18  ;;  %v8304_v63 = vpop.permute.xlu0 %8303 }
 0x6ab   :  { %8325 = vst.msk [vmem:[#allocation2 + $0x60] sm:$0xff] %vm7741_vm5, %v8304_v63  ;;  %12889 = vmatprep.mubr.msk.bf16.mxu1 %vm4780_vm2, %v14843_v9  ;;  %v14852_v63 = vld [vmem:[%s20355_s1 + $0xecc] ss:$16 sps:$4 sm:$0xff]  }
 0x6ac   :  { %v8306_v39 = vpop.permute.xlu1 %8305 }
 0x6ad   :  { %v7180_v28 = vpop.f32.mrb[16].mxu1  ;;  %8326 = vst.msk [vmem:[#allocation2 + $0x88] sm:$0xff] %vm7741_vm5, %v8306_v39 }
 0x6ae   :  { %v7181_v16 = vadd.f32 %v7180_v28, %v18444_v53  ;;  %v7182_v47 = vpop.f32.mrb[17].mxu1 }
 0x6af   :  { %v7183_v23 = vpop.f32.mrb[18].mxu1 }
 0x6b0   :  { %v7184_v29 = vadd.f32 %v7183_v23, %v18448_v14  ;;  %v7185_v44 = vpop.f32.mrb[19].mxu1  ;;  %8459 = vrot.lane.b32.xlu0 %v7181_v16, %s15378_s4  ;;  %v14848_v14 = vld [vmem:[%s20355_s1 + $0xe88] ss:$16 sps:$4 sm:$0xff]  }
 0x6b2   :  { %7395 = vmatmul.mubr.bf16.gmra.mrb[112].mxu1 %v14845_v22  ;;  %8461 = vrot.lane.b32.xlu1 %v7184_v29, %s15378_s4  ;;  %v8308_v4 = vpop.permute.xlu0 %8307  ;;  %v14855_v29 = vld [vmem:[%s20355_s1 + $0xeec] ss:$16 sps:$4 sm:$0xff]  }
 0x6b3   :  { %8327 = vst.msk [vmem:[#allocation2 + $0xb0] sm:$0xff] %vm7741_vm5, %v8308_v4  ;;  %12890 = vmatprep.mubr.msk.bf16.mxu1 %vm4780_vm2, %v14846_v45 }
 0x6b4   :  { %v8310_v53 = vpop.permute.xlu1 %8309 }
 0x6b5   :  { %v7188_v61 = vpop.f32.mrb[20].mxu1  ;;  %8328 = vst.msk [vmem:[#allocation2 + $0xd8] sm:$0xff] %vm7741_vm5, %v8310_v53 }
 0x6b6   :  { %v7189_v31 = vadd.f32 %v7188_v61, %v18461_v6  ;;  %v7190_v38 = vpop.f32.mrb[21].mxu1 }
 0x6b7   :  { %v7191_v58 = vpop.f32.mrb[22].mxu1 }
 0x6b8   :  { %v7192_v13 = vadd.f32 %v7191_v58, %v18465_v2  ;;  %v7193_v41 = vpop.f32.mrb[23].mxu1  ;;  %8463 = vrot.lane.b32.xlu0 %v7189_v31, %s15378_s4  ;;  %v14851_v2 = vld [vmem:[%s20355_s1 + $0xea8] ss:$16 sps:$4 sm:$0xff]   ;;  %v14858_v58 = vld [vmem:[%s20355_s1 + $0xf0c] ss:$16 sps:$4 sm:$0xff]  }
 0x6ba   :  { %7403 = vmatmul.mubr.bf16.gmra.mrb[116].mxu1 %v14848_v14  ;;  %8465 = vrot.lane.b32.xlu1 %v7192_v13, %s15378_s4  ;;  %v8312_v27 = vpop.permute.xlu0 %8311 }
 0x6bb   :  { %8329 = vst.msk [vmem:[#allocation2 + $0x100] sm:$0xff] %vm7741_vm5, %v8312_v27  ;;  %12891 = vmatprep.mubr.msk.bf16.mxu1 %vm4780_vm2, %v14849_v40 }
 0x6bc   :  { %v8314_v6 = vpop.permute.xlu1 %8313 }
 0x6bd   :  { %v7196_v32 = vpop.f32.mrb[24].mxu1  ;;  %8330 = vst.msk [vmem:[#allocation2 + $0x128] sm:$0xff] %vm7741_vm5, %v8314_v6 }
 0x6be   :  { %v7197_v9 = vadd.f32 %v7196_v32, %v18478_v59  ;;  %v7198_v62 = vpop.f32.mrb[25].mxu1 }
 0x6bf   :  { %v7199_v50 = vpop.f32.mrb[26].mxu1  ;;  %v14861_v62 = vld [vmem:[%s20355_s1 + $0xf2c] ss:$16 sps:$4 sm:$0xff]  }
 0x6c0   :  { %v7200_v39 = vadd.f32 %v7199_v50, %v18482_v26  ;;  %v7201_v28 = vpop.f32.mrb[27].mxu1  ;;  %8467 = vrot.lane.b32.xlu0 %v7197_v9, %s15378_s4  ;;  %v14854_v26 = vld [vmem:[%s20355_s1 + $0xec8] ss:$16 sps:$4 sm:$0xff]  }
 0x6c2   :  { %7411 = vmatmul.mubr.bf16.gmra.mrb[120].mxu1 %v14851_v2  ;;  %8469 = vrot.lane.b32.xlu1 %v7200_v39, %s15378_s4  ;;  %v8340_v16 = vpop.permute.xlu0 %8339 }
 0x6c3   :  { %8363 = vst.msk [vmem:[#allocation2 + $0x10] sm:$0xff] %vm7782_vm6, %v8340_v16  ;;  %12892 = vmatprep.mubr.msk.bf16.mxu1 %vm4780_vm2, %v14852_v63 }
 0x6c4   :  { %v8342_v59 = vpop.permute.xlu1 %8341 }
 0x6c5   :  { %v7204_v47 = vpop.f32.mrb[28].mxu1  ;;  %8364 = vst.msk [vmem:[#allocation2 + $0x38] sm:$0xff] %vm7782_vm6, %v8342_v59 }
 0x6c6   :  { %v7205_v22 = vadd.f32 %v7204_v47, %v18495_v18  ;;  %v7206_v23 = vpop.f32.mrb[29].mxu1  ;;  %v14864_v47 = vld [vmem:[%s20355_s1 + $0xf4c] ss:$16 sps:$4 sm:$0xff]  }
 0x6c7   :  { %v7207_v45 = vpop.f32.mrb[30].mxu1 }
 0x6c8   :  { %v7208_v44 = vadd.f32 %v7207_v45, %v18499_v8  ;;  %v7209_v4 = vpop.f32.mrb[31].mxu1  ;;  %8471 = vrot.lane.b32.xlu0 %v7205_v22, %s15378_s4  ;;  %v14857_v8 = vld [vmem:[%s20355_s1 + $0xee8] ss:$16 sps:$4 sm:$0xff]  }
 0x6ca   :  { %7419 = vmatmul.mubr.bf16.gmra.mrb[124].mxu1 %v14854_v26  ;;  %8473 = vrot.lane.b32.xlu1 %v7208_v44, %s15378_s4  ;;  %v8344_v53 = vpop.permute.xlu0 %8343 }
 0x6cb   :  { %8365 = vst.msk [vmem:[#allocation2 + $0x60] sm:$0xff] %vm7782_vm6, %v8344_v53  ;;  %12893 = vmatprep.mubr.msk.bf16.mxu1 %vm4780_vm2, %v14855_v29  ;;  %v14867_v53 = vld [vmem:[%s20355_s1 + $0xf6c] ss:$16 sps:$4 sm:$0xff]  }
 0x6cc   :  { %v8346_v18 = vpop.permute.xlu1 %8345 }
 0x6cd   :  { %v7212_v61 = vpop.f32.mrb[32].mxu1  ;;  %8366 = vst.msk [vmem:[#allocation2 + $0x88] sm:$0xff] %vm7782_vm6, %v8346_v18 }
 0x6ce   :  { %v7213_v31 = vadd.f32 %v7212_v61, %v18512_v1  ;;  %v7214_v38 = vpop.f32.mrb[33].mxu1 }
 0x6cf   :  { %v7215_v14 = vpop.f32.mrb[34].mxu1  ;;  %v1871_v38 = vld [vmem:[%s20355_s1 + $0xf78] sm:$0xff] }
 0x6d0   :  { %v7216_v40 = vadd.f32 %v7215_v14, %v18516_v30  ;;  %v7217_v13 = vpop.f32.mrb[35].mxu1  ;;  %8499 = vrot.lane.b32.xlu0 %v7213_v31, %s15379_s25  ;;  %v14860_v30 = vld [vmem:[%s20355_s1 + $0xf08] ss:$16 sps:$4 sm:$0xff]  }
 0x6d2   :  { %7427 = vmatmul.mubr.bf16.gmra.mrb[128].mxu1 %v14857_v8  ;;  %8501 = vrot.lane.b32.xlu1 %v7216_v40, %s15379_s25  ;;  %v8348_v41 = vpop.permute.xlu0 %8347 }
 0x6d3   :  { %8367 = vst.msk [vmem:[#allocation2 + $0xb0] sm:$0xff] %vm7782_vm6, %v8348_v41  ;;  %12894 = vmatprep.mubr.msk.bf16.mxu1 %vm4780_vm2, %v14858_v58  ;;  %v14869_v41 = vld [vmem:[%s20355_s1 + $0xf8c] ss:$16 sps:$4 sm:$0xff]  }
 0x6d4   :  { %v8350_v1 = vpop.permute.xlu1 %8349 }
 0x6d5   :  { %v7220_v27 = vpop.f32.mrb[36].mxu1  ;;  %8368 = vst.msk [vmem:[#allocation2 + $0xd8] sm:$0xff] %vm7782_vm6, %v8350_v1 }
 0x6d6   :  { %v7221_v6 = vadd.f32 %v7220_v27, %v18529_v25  ;;  %v7222_v32 = vpop.f32.mrb[37].mxu1 }
 0x6d7   :  { %v7223_v9 = vpop.f32.mrb[38].mxu1  ;;  %v1875_v32 = vld [vmem:[%s20355_s1 + $0xf98] sm:$0xff] }
 0x6d8   :  { %v7224_v2 = vadd.f32 %v7223_v9, %v18533_v10  ;;  %v7225_v50 = vpop.f32.mrb[39].mxu1  ;;  %8503 = vrot.lane.b32.xlu0 %v7221_v6, %s15379_s25  ;;  %v14863_v10 = vld [vmem:[%s20355_s1 + $0xf28] ss:$16 sps:$4 sm:$0xff]  }
 0x6da   :  { %7435 = vmatmul.mubr.bf16.gmra.mrb[132].mxu1 %v14860_v30  ;;  %8505 = vrot.lane.b32.xlu1 %v7224_v2, %s15379_s25  ;;  %v8352_v63 = vpop.permute.xlu0 %8351 }
 0x6db   :  { %8369 = vst.msk [vmem:[#allocation2 + $0x100] sm:$0xff] %vm7782_vm6, %v8352_v63  ;;  %12895 = vmatprep.mubr.msk.bf16.mxu1 %vm4780_vm2, %v14861_v62  ;;  %v14871_v63 = vld [vmem:[%s20355_s1 + $0xfac] ss:$16 sps:$4 sm:$0xff]  }
 0x6dc   :  { %v8354_v25 = vpop.permute.xlu1 %8353 }
 0x6dd   :  { %v7228_v39 = vpop.f32.mrb[40].mxu1  ;;  %8370 = vst.msk [vmem:[#allocation2 + $0x128] sm:$0xff] %vm7782_vm6, %v8354_v25 }
 0x6de   :  { %v7229_v28 = vadd.f32 %v7228_v39, %v18546_v0  ;;  %v7230_v16 = vpop.f32.mrb[41].mxu1 }
 0x6df   :  { %v7231_v59 = vpop.f32.mrb[42].mxu1  ;;  %v1879_v16 = vld [vmem:[%s20355_s1 + $0xfb8] sm:$0xff] }
 0x6e0   :  { %v7232_v22 = vadd.f32 %v7231_v59, %v18550_v56  ;;  %v7233_v23 = vpop.f32.mrb[43].mxu1  ;;  %8507 = vrot.lane.b32.xlu0 %v7229_v28, %s15379_s25  ;;  %v14866_v56 = vld [vmem:[%s20355_s1 + $0xf48] ss:$16 sps:$4 sm:$0xff]  }
 0x6e2   :  { %7443 = vmatmul.mubr.bf16.gmra.mrb[136].mxu1 %v14863_v10  ;;  %8509 = vrot.lane.b32.xlu1 %v7232_v22, %s15379_s25  ;;  %v8380_v26 = vpop.permute.xlu0 %8379 }
 0x6e3   :  { %8403 = vst.msk [vmem:[#allocation2 + $0x10] sm:$0xff] %vm7823_vm7, %v8380_v26  ;;  %12896 = vmatprep.mubr.msk.bf16.mxu1 %vm4780_vm2, %v14864_v47  ;;  %v14873_v26 = vld [vmem:[%s20355_s1 + $0xfcc] ss:$16 sps:$4 sm:$0xff]  }
 0x6e4   :  { %v8382_v0 = vpop.permute.xlu1 %8381 }
 0x6e5   :  { %v7236_v45 = vpop.f32.mrb[44].mxu1  ;;  %8404 = vst.msk [vmem:[#allocation2 + $0x38] sm:$0xff] %vm7823_vm7, %v8382_v0 }
 0x6e6   :  { %v7237_v29 = vadd.f32 %v7236_v45, %v18561_v51  ;;  %v7238_v44 = vpop.f32.mrb[45].mxu1  ;;  %v1869_v51 = vld [vmem:[%s20355_s1 + $0xf68] sm:$0xff] }
 0x6e7   :  { %v7239_v4 = vpop.f32.mrb[46].mxu1  ;;  %v12676_v40 = vcombine.low %v1869_v51, %v1871_v38  ;;  %v1883_v44 = vld [vmem:[%s20355_s1 + $0xfd8] sm:$0xff] }
 0x6e8   :  { %v7240_v18 = vadd.f32 %v7239_v4, %v18565_v35  ;;  %v7241_v61 = vpop.f32.mrb[47].mxu1  ;;  %8511 = vrot.lane.b32.xlu0 %v7237_v29, %s15379_s25 }
 0x6ea   :  { %7451 = vmatmul.mubr.bf16.gmra.mrb[140].mxu1 %v14866_v56  ;;  %8513 = vrot.lane.b32.xlu1 %v7240_v18, %s15379_s25  ;;  %v8384_v31 = vpop.permute.xlu0 %8383 }
 0x6eb   :  { %8405 = vst.msk [vmem:[#allocation2 + $0x60] sm:$0xff] %vm7823_vm7, %v8384_v31  ;;  %12897 = vmatprep.mubr.msk.bf16.mxu1 %vm4780_vm2, %v14867_v53  ;;  %v14875_v31 = vld [vmem:[%s20355_s1 + $0xfec] ss:$16 sps:$4 sm:$0xff]  }
 0x6ec   :  { %v8386_v35 = vpop.permute.xlu1 %8385 }
 0x6ed   :  { %v7244_v8 = vpop.f32.mrb[48].mxu1  ;;  %8406 = vst.msk [vmem:[#allocation2 + $0x88] sm:$0xff] %vm7823_vm7, %v8386_v35 }
 0x6ee   :  { %v7245_v14 = vadd.f32 %v7244_v8, %v18576_v5  ;;  %v7246_v58 = vpop.f32.mrb[49].mxu1  ;;  %v1873_v5 = vld [vmem:[%s20355_s1 + $0xf88] sm:$0xff] }
 0x6ef   :  { %v7247_v13 = vpop.f32.mrb[50].mxu1  ;;  %v12680_v2 = vcombine.low %v1873_v5, %v1875_v32  ;;  %v14880_v5 = vld [vmem:[%s20355_s1 + $0x1008] ss:$16 sps:$4 sm:$0xff]  }
 0x6f0   :  { %8531 = vst.msk [vmem:[#allocation2 + $0x18] sm:$0xff] %vm7659_vm3, %v7245_v14  ;;  %v7248_v1 = vadd.f32 %v7247_v13, %v18580_v12  ;;  %v7249_v27 = vpop.f32.mrb[51].mxu1 }
 0x6f2   :  { %8532 = vst.msk [vmem:[#allocation2 + $0x40] sm:$0xff] %vm7659_vm3, %v7248_v1  ;;  %7459 = vmatmul.mubr.bf16.gmra.mrb[144].mxu1 %v12676_v40  ;;  %v8388_v6 = vpop.permute.xlu0 %8387  ;;  %v14878_v40 = vld [vmem:[%s20355_s1 + $0x100c] ss:$16 sps:$4 sm:$0xff]  }
 0x6f3   :  { %8407 = vst.msk [vmem:[#allocation2 + $0xb0] sm:$0xff] %vm7823_vm7, %v8388_v6  ;;  %12898 = vmatprep.mubr.msk.bf16.mxu1 %vm4780_vm2, %v14869_v41 }
 0x6f4   :  { %v8390_v30 = vpop.permute.xlu1 %8389 }
 0x6f5   :  { %v7252_v9 = vpop.f32.mrb[200].mxu1  ;;  %8408 = vst.msk [vmem:[#allocation2 + $0xd8] sm:$0xff] %vm7823_vm7, %v8390_v30  ;;  %v14881_v30 = vld [vmem:[%s20355_s1 + $0x102c] ss:$16 sps:$4 sm:$0xff]  }
 0x6f6   :  { %v7253_v12 = vadd.f32 %v7252_v9, %v18591_v49  ;;  %v7254_v62 = vpop.f32.mrb[201].mxu1  ;;  %v1877_v49 = vld [vmem:[%s20355_s1 + $0xfa8] sm:$0xff] }
 0x6f7   :  { %v7255_v50 = vpop.f32.mrb[202].mxu1  ;;  %v12684_v22 = vcombine.low %v1877_v49, %v1879_v16 }
 0x6f8   :  { %8533 = vst.msk [vmem:[#allocation2 + $0x68] sm:$0xff] %vm7659_vm3, %v7253_v12  ;;  %v7256_v25 = vadd.f32 %v7255_v50, %v18595_v37  ;;  %v7257_v39 = vpop.f32.mrb[203].mxu1 }
 0x6f9   :  { %v14884_v39 = vld [vmem:[%s20355_s1 + $0x104c] ss:$16 sps:$4 sm:$0xff]  }
 0x6fa   :  { %8534 = vst.msk [vmem:[#allocation2 + $0x90] sm:$0xff] %vm7659_vm3, %v7256_v25  ;;  %7467 = vmatmul.mubr.bf16.gmra.mrb[148].mxu1 %v12680_v2  ;;  %v8392_v28 = vpop.permute.xlu0 %8391 }
 0x6fb   :  { %8409 = vst.msk [vmem:[#allocation2 + $0x100] sm:$0xff] %vm7823_vm7, %v8392_v28  ;;  %12899 = vmatprep.mubr.msk.bf16.mxu1 %vm4780_vm2, %v14871_v63  ;;  %v14883_v63 = vld [vmem:[%s20355_s1 + $0x1028] ss:$16 sps:$4 sm:$0xff]  }
 0x6fc   :  { %v8394_v10 = vpop.permute.xlu1 %8393 }
 0x6fd   :  { %v7260_v59 = vpop.f32.mrb[204].mxu1  ;;  %8410 = vst.msk [vmem:[#allocation2 + $0x128] sm:$0xff] %vm7823_vm7, %v8394_v10 }
 0x6fe   :  { %v7261_v37 = vadd.f32 %v7260_v59, %v18606_v57  ;;  %v7262_v47 = vpop.f32.mrb[205].mxu1  ;;  %v1881_v57 = vld [vmem:[%s20355_s1 + $0xfc8] sm:$0xff] }
 0x6ff   :  { %v7263_v23 = vpop.f32.mrb[206].mxu1  ;;  %v12688_v18 = vcombine.low %v1881_v57, %v1883_v44  ;;  %v14887_v57 = vld [vmem:[%s20355_s1 + $0x106c] ss:$16 sps:$4 sm:$0xff]  }
 0x700   :  { %8535 = vst.msk [vmem:[#allocation2 + $0xb8] sm:$0xff] %vm7659_vm3, %v7261_v37  ;;  %v7264_v0 = vadd.f32 %v7263_v23, %v18610_v33  ;;  %v7265_v45 = vpop.f32.mrb[207].mxu1 }
 0x702   :  { %8536 = vst.msk [vmem:[#allocation2 + $0xe0] sm:$0xff] %vm7659_vm3, %v7264_v0  ;;  %7475 = vmatmul.mubr.bf16.gmra.mrb[152].mxu1 %v12684_v22  ;;  %v8420_v29 = vpop.permute.xlu0 %8419  ;;  %v14886_v0 = vld [vmem:[%s20355_s1 + $0x1048] ss:$16 sps:$4 sm:$0xff]  }
 0x703   :  { %8443 = vst.msk [vmem:[#allocation2 + $0x10] sm:$0xff] %vm7864_vm8, %v8420_v29  ;;  %12900 = vmatprep.mubr.msk.bf16.mxu1 %vm4780_vm2, %v14873_v26 }
 0x704   :  { %v8422_v56 = vpop.permute.xlu1 %8421 }
 0x705   :  { %v7268_v4 = vpop.f32.mrb[208].mxu1  ;;  %8444 = vst.msk [vmem:[#allocation2 + $0x38] sm:$0xff] %vm7864_vm8, %v8422_v56 }
 0x706   :  { %v7269_v33 = vadd.f32 %v7268_v4, %v18623_v42  ;;  %v7270_v53 = vpop.f32.mrb[209].mxu1 }
 0x707   :  { %v7271_v61 = vpop.f32.mrb[210].mxu1 }
 0x708   :  { %8537 = vst.msk [vmem:[#allocation2 + $0x108] sm:$0xff] %vm7659_vm3, %v7269_v33  ;;  %v7272_v51 = vadd.f32 %v7271_v61, %v18627_v11  ;;  %v7273_v38 = vpop.f32.mrb[211].mxu1  ;;  %v14877_v11 = vld [vmem:[%s20355_s1 + $0xfe8] ss:$16 sps:$4 sm:$0xff]  }
 0x70a   :  { %8538 = vst.msk [vmem:[#allocation2 + $0x130] sm:$0xff] %vm7659_vm3, %v7272_v51  ;;  %7483 = vmatmul.mubr.bf16.gmra.mrb[156].mxu1 %v12688_v18  ;;  %v8424_v35 = vpop.permute.xlu0 %8423 }
 0x70b   :  { %8445 = vst.msk [vmem:[#allocation2 + $0x60] sm:$0xff] %vm7864_vm8, %v8424_v35  ;;  %12901 = vmatprep.mubr.msk.bf16.mxu1 %vm4780_vm2, %v14875_v31  ;;  %v14889_v35 = vld [vmem:[%s20355_s1 + $0x1068] ss:$16 sps:$4 sm:$0xff]  }
 0x70c   :  { %v8426_v42 = vpop.permute.xlu1 %8425 }
 0x70d   :  { %v7276_v8 = vpop.f32.mrb[52].mxu1  ;;  %8446 = vst.msk [vmem:[#allocation2 + $0x88] sm:$0xff] %vm7864_vm8, %v8426_v42 }
 0x70e   :  { %v7278_v14 = vpop.f32.mrb[53].mxu1  ;;  %8547 = vrot.lane.b32.xlu0 %v7276_v8, %s15373_s3 }
 0x70f   :  { %v7279_v58 = vpop.f32.mrb[54].mxu1  ;;  %v14890_v14 = vld [vmem:[%s20355_s1 + $0x108c] ss:$16 sps:$4 sm:$0xff]  }
 0x710   :  { %v7281_v13 = vpop.f32.mrb[55].mxu1  ;;  %8549 = vrot.lane.b32.xlu1 %v7279_v58, %s15373_s3 }
 0x712   :  { %7491 = vmatmul.mubr.bf16.gmra.mrb[160].mxu1 %v14877_v11  ;;  %v8428_v41 = vpop.permute.xlu0 %8427 }
 0x713   :  { %8447 = vst.msk [vmem:[#allocation2 + $0xb0] sm:$0xff] %vm7864_vm8, %v8428_v41  ;;  %12902 = vmatprep.mubr.msk.bf16.mxu1 %vm4780_vm2, %v14878_v40 }
 0x714   :  { %v8430_v1 = vpop.permute.xlu1 %8429 }
 0x715   :  { %v7284_v27 = vpop.f32.mrb[56].mxu1  ;;  %8448 = vst.msk [vmem:[#allocation2 + $0xd8] sm:$0xff] %vm7864_vm8, %v8430_v1 }
 0x716   :  { %v7286_v6 = vpop.f32.mrb[57].mxu1  ;;  %8551 = vrot.lane.b32.xlu0 %v7284_v27, %s15373_s3 }
 0x717   :  { %v7287_v32 = vpop.f32.mrb[58].mxu1 }
 0x718   :  { %v7289_v9 = vpop.f32.mrb[59].mxu1  ;;  %8553 = vrot.lane.b32.xlu1 %v7287_v32, %s15373_s3 }
 0x71a   :  { %7499 = vmatmul.mubr.bf16.gmra.mrb[164].mxu1 %v14880_v5  ;;  %v8432_v12 = vpop.permute.xlu0 %8431 }
 0x71b   :  { %8449 = vst.msk [vmem:[#allocation2 + $0x100] sm:$0xff] %vm7864_vm8, %v8432_v12  ;;  %12903 = vmatprep.mubr.msk.bf16.mxu1 %vm4780_vm2, %v14881_v30  ;;  %v14892_v30 = vld [vmem:[%s20355_s1 + $0x1088] ss:$16 sps:$4 sm:$0xff]  }
 0x71c   :  { %v8434_v62 = vpop.permute.xlu1 %8433 }
 0x71d   :  { %v7292_v2 = vpop.f32.mrb[60].mxu1  ;;  %8450 = vst.msk [vmem:[#allocation2 + $0x128] sm:$0xff] %vm7864_vm8, %v8434_v62  ;;  %v14893_v62 = vld [vmem:[%s20355_s1 + $0x10ac] ss:$16 sps:$4 sm:$0xff]  }
 0x71e   :  { %v7294_v50 = vpop.f32.mrb[61].mxu1  ;;  %8555 = vrot.lane.b32.xlu0 %v7292_v2, %s15373_s3 }
 0x71f   :  { %v7295_v25 = vpop.f32.mrb[62].mxu1 }
 0x720   :  { %v7297_v28 = vpop.f32.mrb[63].mxu1  ;;  %8557 = vrot.lane.b32.xlu1 %v7295_v25, %s15373_s3 }
 0x722   :  { %7507 = vmatmul.mubr.bf16.gmra.mrb[168].mxu1 %v14883_v63  ;;  %v8460_v49 = vpop.permute.xlu0 %8459 }
 0x723   :  { %v13281_v16 = vpop.f32.mrb[104].mxu0  ;;  %8483 = vst.msk [vmem:[#allocation2 + $0x10] sm:$0xff] %vm7905_vm9, %v8460_v49  ;;  %12904 = vmatprep.mubr.msk.bf16.mxu1 %vm4780_vm2, %v14884_v39 }
 0x724   :  { %v13282_v10 = vpop.f32.mrb[105].mxu0  ;;  %v8462_v59 = vpop.permute.xlu1 %8461 }
 0x725   :  { %v18885_v37 = vadd.f32 %v13282_v10, %v13281_v16  ;;  %v7300_v47 = vpop.f32.mrb[64].mxu1  ;;  %v13284_v22 = vpop.f32.mrb[106].mxu0  ;;  %8484 = vst.msk [vmem:[#allocation2 + $0x38] sm:$0xff] %vm7905_vm9, %v8462_v59 }
 0x726   :  { %v7302_v23 = vpop.f32.mrb[65].mxu1  ;;  %8559 = vrot.lane.b32.xlu0 %v7300_v47, %s15373_s3  ;;  %v13285_v26 = vpop.f32.mrb[107].mxu0  ;;  %v14895_v47 = vld [vmem:[%s20355_s1 + $0x10a8] ss:$16 sps:$4 sm:$0xff]  }
 0x727   :  { %v18892_v45 = vadd.f32 %v13285_v26, %v13284_v22  ;;  %v7303_v29 = vpop.f32.mrb[66].mxu1  ;;  %v14896_v26 = vld [vmem:[%s20355_s1 + $0x10cc] ss:$16 sps:$4 sm:$0xff]  }
 0x728   :  { %v7305_v44 = vpop.f32.mrb[67].mxu1  ;;  %8561 = vrot.lane.b32.xlu1 %v7303_v29, %s15373_s3 }
 0x72a   :  { %7515 = vmatmul.mubr.bf16.gmra.mrb[172].mxu1 %v14886_v0  ;;  %v8464_v56 = vpop.permute.xlu0 %8463 }
 0x72b   :  { %v13287_v4 = vpop.f32.mrb[108].mxu0  ;;  %8485 = vst.msk [vmem:[#allocation2 + $0x60] sm:$0xff] %vm7905_vm9, %v8464_v56  ;;  %12905 = vmatprep.mubr.msk.bf16.mxu1 %vm4780_vm2, %v14887_v57 }
 0x72c   :  { %v13288_v33 = vpop.f32.mrb[109].mxu0  ;;  %v8466_v53 = vpop.permute.xlu1 %8465 }
 0x72d   :  { %v18900_v18 = vadd.f32 %v13288_v33, %v13287_v4  ;;  %v7308_v61 = vpop.f32.mrb[68].mxu1  ;;  %v13290_v31 = vpop.f32.mrb[110].mxu0  ;;  %8486 = vst.msk [vmem:[#allocation2 + $0x88] sm:$0xff] %vm7905_vm9, %v8466_v53  ;;  %v14898_v4 = vld [vmem:[%s20355_s1 + $0x10c8] ss:$16 sps:$4 sm:$0xff]  }
 0x72e   :  { %v7310_v51 = vpop.f32.mrb[69].mxu1  ;;  %8587 = vrot.lane.b32.xlu0 %v7308_v61, %s15374_s16  ;;  %v13291_v38 = vpop.f32.mrb[111].mxu0  ;;  %v14899_v53 = vld [vmem:[%s20355_s1 + $0x10ec] ss:$16 sps:$4 sm:$0xff]  }
 0x72f   :  { %v18907_v42 = vadd.f32 %v13291_v38, %v13290_v31  ;;  %v7311_v8 = vpop.f32.mrb[70].mxu1 }
 0x730   :  { %v7313_v11 = vpop.f32.mrb[71].mxu1  ;;  %8589 = vrot.lane.b32.xlu1 %v7311_v8, %s15374_s16  ;;  %v14901_v8 = vld [vmem:[%s20355_s1 + $0x10e8] ss:$16 sps:$4 sm:$0xff]  }
 0x731   :  { %v14902_v11 = vld [vmem:[%s20355_s1 + $0x110c] ss:$16 sps:$4 sm:$0xff]  }
 0x732   :  { %7523 = vmatmul.mubr.bf16.gmra.mrb[176].mxu1 %v14889_v35  ;;  %v8468_v58 = vpop.permute.xlu0 %8467 }
 0x733   :  { %v13293_v40 = vpop.f32.mrb[112].mxu0  ;;  %8487 = vst.msk [vmem:[#allocation2 + $0xb0] sm:$0xff] %vm7905_vm9, %v8468_v58  ;;  %12906 = vmatprep.mubr.msk.bf16.mxu1 %vm4780_vm2, %v14890_v14 }
 0x734   :  { %v13294_v13 = vpop.f32.mrb[113].mxu0  ;;  %v8470_v41 = vpop.permute.xlu1 %8469 }
 0x735   :  { %v18915_v1 = vadd.f32 %v13294_v13, %v13293_v40  ;;  %v7316_v27 = vpop.f32.mrb[72].mxu1  ;;  %v13296_v6 = vpop.f32.mrb[114].mxu0  ;;  %8488 = vst.msk [vmem:[#allocation2 + $0xd8] sm:$0xff] %vm7905_vm9, %v8470_v41 }
 0x736   :  { %v7318_v5 = vpop.f32.mrb[73].mxu1  ;;  %8591 = vrot.lane.b32.xlu0 %v7316_v27, %s15374_s16  ;;  %v13297_v32 = vpop.f32.mrb[115].mxu0 }
 0x737   :  { %v18922_v9 = vadd.f32 %v13297_v32, %v13296_v6  ;;  %v7319_v12 = vpop.f32.mrb[74].mxu1  ;;  %v14904_v6 = vld [vmem:[%s20355_s1 + $0x1108] ss:$16 sps:$4 sm:$0xff]   ;;  %v14907_v32 = vld [vmem:[%s20355_s1 + $0x112c] ss:$16 sps:$4 sm:$0xff]  }
 0x738   :  { %v7321_v2 = vpop.f32.mrb[75].mxu1  ;;  %8593 = vrot.lane.b32.xlu1 %v7319_v12, %s15374_s16 }
 0x73a   :  { %7531 = vmatmul.mubr.bf16.gmra.mrb[180].mxu1 %v14892_v30  ;;  %v8472_v50 = vpop.permute.xlu0 %8471 }
 0x73b   :  { %v13299_v63 = vpop.f32.mrb[116].mxu0  ;;  %8489 = vst.msk [vmem:[#allocation2 + $0x100] sm:$0xff] %vm7905_vm9, %v8472_v50  ;;  %12907 = vmatprep.mubr.msk.bf16.mxu1 %vm4780_vm2, %v14893_v62 }
 0x73c   :  { %v13300_v25 = vpop.f32.mrb[117].mxu0  ;;  %v8474_v39 = vpop.permute.xlu1 %8473 }
 0x73d   :  { %v18930_v28 = vadd.f32 %v13300_v25, %v13299_v63  ;;  %v7324_v49 = vpop.f32.mrb[76].mxu1  ;;  %v13302_v16 = vpop.f32.mrb[118].mxu0  ;;  %8490 = vst.msk [vmem:[#allocation2 + $0x128] sm:$0xff] %vm7905_vm9, %v8474_v39  ;;  %v14905_v63 = vld [vmem:[%s20355_s1 + $0x1128] ss:$16 sps:$4 sm:$0xff]  }
 0x73e   :  { %v7326_v10 = vpop.f32.mrb[77].mxu1  ;;  %8595 = vrot.lane.b32.xlu0 %v7324_v49, %s15374_s16  ;;  %v13303_v59 = vpop.f32.mrb[119].mxu0  ;;  %v14910_v39 = vld [vmem:[%s20355_s1 + $0x114c] ss:$16 sps:$4 sm:$0xff]  }
 0x73f   :  { %v18937_v22 = vadd.f32 %v13303_v59, %v13302_v16  ;;  %v7327_v23 = vpop.f32.mrb[78].mxu1  ;;  %v14908_v59 = vld [vmem:[%s20355_s1 + $0x1148] ss:$16 sps:$4 sm:$0xff]  }
 0x740   :  { %v7329_v0 = vpop.f32.mrb[79].mxu1  ;;  %8597 = vrot.lane.b32.xlu1 %v7327_v23, %s15374_s16  ;;  %v14913_v23 = vld [vmem:[%s20355_s1 + $0x116c] ss:$16 sps:$4 sm:$0xff]  }
 0x742   :  { %7539 = vmatmul.mubr.bf16.gmra.mrb[184].mxu1 %v14895_v47  ;;  %v8500_v29 = vpop.permute.xlu0 %8499 }
 0x743   :  { %8523 = vst.msk [vmem:[#allocation2 + $0x10] sm:$0xff] %vm7946_vm10, %v8500_v29  ;;  %12908 = vmatprep.mubr.msk.bf16.mxu1 %vm4780_vm2, %v14896_v26 }
 0x744   :  { %v8502_v57 = vpop.permute.xlu1 %8501 }
 0x745   :  { %v7332_v44 = vpop.f32.mrb[80].mxu1  ;;  %8524 = vst.msk [vmem:[#allocation2 + $0x38] sm:$0xff] %vm7946_vm10, %v8502_v57  ;;  %v14911_v57 = vld [vmem:[%s20355_s1 + $0x1168] ss:$16 sps:$4 sm:$0xff]  }
 0x746   :  { %v7334_v56 = vpop.f32.mrb[81].mxu1  ;;  %8599 = vrot.lane.b32.xlu0 %v7332_v44, %s15374_s16 }
 0x747   :  { %v7335_v33 = vpop.f32.mrb[82].mxu1  ;;  %v14916_v56 = vld [vmem:[%s20355_s1 + $0x118c] ss:$16 sps:$4 sm:$0xff]  }
 0x748   :  { %v7337_v61 = vpop.f32.mrb[83].mxu1  ;;  %8601 = vrot.lane.b32.xlu1 %v7335_v33, %s15374_s16 }
 0x749   :  { %v14914_v61 = vld [vmem:[%s20355_s1 + $0x1188] ss:$16 sps:$4 sm:$0xff]  }
 0x74a   :  { %7547 = vmatmul.mubr.bf16.gmra.mrb[188].mxu1 %v14898_v4  ;;  %v8504_v31 = vpop.permute.xlu0 %8503 }
 0x74b   :  { %8525 = vst.msk [vmem:[#allocation2 + $0x60] sm:$0xff] %vm7946_vm10, %v8504_v31  ;;  %12909 = vmatprep.mubr.msk.bf16.mxu1 %vm4780_vm2, %v14899_v53 }
 0x74c   :  { %v8506_v51 = vpop.permute.xlu1 %8505 }
 0x74d   :  { %v7340_v38 = vpop.f32.mrb[84].mxu1  ;;  %8526 = vst.msk [vmem:[#allocation2 + $0x88] sm:$0xff] %vm7946_vm10, %v8506_v51  ;;  %v14919_v51 = vld [vmem:[%s20355_s1 + $0x11ac] ss:$16 sps:$4 sm:$0xff]  }
 0x74e   :  { %v7342_v35 = vpop.f32.mrb[85].mxu1  ;;  %8627 = vrot.lane.b32.xlu0 %v7340_v38, %s15375_s30 }
 0x74f   :  { %v7343_v14 = vpop.f32.mrb[86].mxu1 }
 0x750   :  { %v7345_v58 = vpop.f32.mrb[87].mxu1  ;;  %8629 = vrot.lane.b32.xlu1 %v7343_v14, %s15375_s30  ;;  %v14917_v14 = vld [vmem:[%s20355_s1 + $0x11a8] ss:$16 sps:$4 sm:$0xff]  }
 0x751   :  { %v14922_v58 = vld [vmem:[%s20355_s1 + $0x11cc] ss:$16 sps:$4 sm:$0xff]  }
 0x752   :  { %7555 = vmatmul.mubr.bf16.gmra.mrb[192].mxu1 %v14901_v8  ;;  %v8508_v40 = vpop.permute.xlu0 %8507 }
 0x753   :  { %8527 = vst.msk [vmem:[#allocation2 + $0xb0] sm:$0xff] %vm7946_vm10, %v8508_v40  ;;  %12910 = vmatprep.mubr.msk.bf16.mxu1 %vm4780_vm2, %v14902_v11 }
 0x754   :  { %v8510_v13 = vpop.permute.xlu1 %8509 }
 0x755   :  { %v7348_v41 = vpop.f32.mrb[88].mxu1  ;;  %8528 = vst.msk [vmem:[#allocation2 + $0xd8] sm:$0xff] %vm7946_vm10, %v8510_v13 }
 0x756   :  { %v7350_v27 = vpop.f32.mrb[89].mxu1  ;;  %8631 = vrot.lane.b32.xlu0 %v7348_v41, %s15375_s30 }
 0x757   :  { %v7351_v5 = vpop.f32.mrb[90].mxu1 }
 0x758   :  { %v7353_v30 = vpop.f32.mrb[91].mxu1  ;;  %8633 = vrot.lane.b32.xlu1 %v7351_v5, %s15375_s30  ;;  %v14920_v5 = vld [vmem:[%s20355_s1 + $0x11c8] ss:$16 sps:$4 sm:$0xff]  }
 0x759   :  { %v14925_v30 = vld [vmem:[%s20355_s1 + $0x11ec] ss:$16 sps:$4 sm:$0xff]  }
 0x75a   :  { %7563 = vmatmul.mubr.bf16.gmra.mrb[196].mxu1 %v14904_v6  ;;  %v8512_v12 = vpop.permute.xlu0 %8511 }
 0x75b   :  { %8529 = vst.msk [vmem:[#allocation2 + $0x100] sm:$0xff] %vm7946_vm10, %v8512_v12  ;;  %12911 = vmatprep.mubr.msk.bf16.mxu1 %vm4780_vm2, %v14907_v32 }
 0x75c   :  { %v8514_v62 = vpop.permute.xlu1 %8513 }
 0x75d   :  { %v7356_v2 = vpop.f32.mrb[92].mxu1  ;;  %8530 = vst.msk [vmem:[#allocation2 + $0x128] sm:$0xff] %vm7946_vm10, %v8514_v62 }
 0x75e   :  { %v7358_v50 = vpop.f32.mrb[93].mxu1  ;;  %8635 = vrot.lane.b32.xlu0 %v7356_v2, %s15375_s30 }
 0x75f   :  { %v7359_v25 = vpop.f32.mrb[94].mxu1 }
 0x760   :  { %v7361_v49 = vpop.f32.mrb[95].mxu1  ;;  %8637 = vrot.lane.b32.xlu1 %v7359_v25, %s15375_s30  ;;  %v14923_v25 = vld [vmem:[%s20355_s1 + $0x11e8] ss:$16 sps:$4 sm:$0xff]  }
 0x761   :  { %v14928_v49 = vld [vmem:[%s20355_s1 + $0x120c] ss:$16 sps:$4 sm:$0xff]  }
 0x762   :  { %7571 = vmatmul.mubr.bf16.gmra.mrb[212].mxu1 %v14905_v63 }
 0x763   :  { %12912 = vmatprep.mubr.msk.bf16.mxu1 %vm4780_vm2, %v14910_v39 }
 0x765   :  { %v7364_v16 = vpop.f32.mrb[96].mxu1 }
 0x766   :  { %v7366_v10 = vpop.f32.mrb[97].mxu1  ;;  %8639 = vrot.lane.b32.xlu0 %v7364_v16, %s15375_s30 }
 0x767   :  { %v7367_v47 = vpop.f32.mrb[98].mxu1 }
 0x768   :  { %v7369_v26 = vpop.f32.mrb[99].mxu1  ;;  %8641 = vrot.lane.b32.xlu1 %v7367_v47, %s15375_s30 }
 0x769   :  { %v14926_v26 = vld [vmem:[%s20355_s1 + $0x1208] ss:$16 sps:$4 sm:$0xff]  }
 0x76a   :  { %7579 = vmatmul.mubr.bf16.gmra.mrb[216].mxu1 %v14908_v59 }
 0x76b   :  { %12913 = vmatprep.mubr.msk.bf16.mxu1 %vm4780_vm2, %v14913_v23 }
 0x76d   :  { %v7372_v0 = vpop.f32.mrb[100].mxu1 }
 0x76e   :  { %v7374_v29 = vpop.f32.mrb[101].mxu1  ;;  %8667 = vrot.lane.b32.xlu0 %v7372_v0, %s15376_s28 }
 0x76f   :  { %v7375_v44 = vpop.f32.mrb[102].mxu1  ;;  %v14931_v29 = vld [vmem:[%s20355_s1 + $0x122c] ss:$16 sps:$4 sm:$0xff]  }
 0x770   :  { %v7377_v4 = vpop.f32.mrb[103].mxu1  ;;  %8669 = vrot.lane.b32.xlu1 %v7375_v44, %s15376_s28 }
 0x772   :  { %7587 = vmatmul.mubr.bf16.gmra.mrb[220].mxu1 %v14911_v57 }
 0x773   :  { %12914 = vmatprep.mubr.msk.bf16.mxu1 %vm4780_vm2, %v14916_v56 }
 0x775   :  { %v7380_v33 = vpop.f32.mrb[104].mxu1 }
 0x776   :  { %v7382_v53 = vpop.f32.mrb[105].mxu1  ;;  %8671 = vrot.lane.b32.xlu0 %v7380_v33, %s15376_s28 }
 0x777   :  { %v7383_v31 = vpop.f32.mrb[106].mxu1  ;;  %v14929_v53 = vld [vmem:[%s20355_s1 + $0x1228] ss:$16 sps:$4 sm:$0xff]  }
 0x778   :  { %v7385_v38 = vpop.f32.mrb[107].mxu1  ;;  %8673 = vrot.lane.b32.xlu1 %v7383_v31, %s15376_s28  ;;  %v14934_v31 = vld [vmem:[%s20355_s1 + $0x124c] ss:$16 sps:$4 sm:$0xff]  }
 0x77a   :  { %7595 = vmatmul.mubr.bf16.gmra.mrb[224].mxu1 %v14914_v61 }
 0x77b   :  { %12915 = vmatprep.mubr.msk.bf16.mxu1 %vm4780_vm2, %v14919_v51 }
 0x77d   :  { %v7388_v35 = vpop.f32.mrb[108].mxu1 }
 0x77e   :  { %v7390_v8 = vpop.f32.mrb[109].mxu1  ;;  %8675 = vrot.lane.b32.xlu0 %v7388_v35, %s15376_s28 }
 0x77f   :  { %v7391_v11 = vpop.f32.mrb[110].mxu1 }
 0x780   :  { %v7393_v40 = vpop.f32.mrb[111].mxu1  ;;  %v8548_v13 = vpop.permute.xlu0 %8547  ;;  %8677 = vrot.lane.b32.xlu1 %v7391_v11, %s15376_s28  ;;  %v14932_v11 = vld [vmem:[%s20355_s1 + $0x1248] ss:$16 sps:$4 sm:$0xff]  }
 0x781   :  { %8571 = vst.msk [vmem:[#allocation2 + $0x18] sm:$0xff] %vm7700_vm4, %v8548_v13  ;;  %v14937_v40 = vld [vmem:[%s20355_s1 + $0x126c] ss:$16 sps:$4 sm:$0xff]  }
 0x782   :  { %7603 = vmatmul.mubr.bf16.gmra.mrb[228].mxu1 %v14917_v14  ;;  %v8550_v41 = vpop.permute.xlu1 %8549 }
 0x783   :  { %8572 = vst.msk [vmem:[#allocation2 + $0x40] sm:$0xff] %vm7700_vm4, %v8550_v41  ;;  %12916 = vmatprep.mubr.msk.bf16.mxu1 %vm4780_vm2, %v14922_v58 }
 0x785   :  { %v7396_v27 = vpop.f32.mrb[112].mxu1 }
 0x786   :  { %v7398_v6 = vpop.f32.mrb[113].mxu1  ;;  %8679 = vrot.lane.b32.xlu0 %v7396_v27, %s15376_s28 }
 0x787   :  { %v7399_v32 = vpop.f32.mrb[114].mxu1  ;;  %v14938_v6 = vld [vmem:[%s20359_s5 + $0xc0] sm:$0xff]  }
 0x788   :  { %v7401_v12 = vpop.f32.mrb[115].mxu1  ;;  %v8552_v62 = vpop.permute.xlu0 %8551  ;;  %8681 = vrot.lane.b32.xlu1 %v7399_v32, %s15376_s28  ;;  %v14939_v32 = vld [vmem:[%s20359_s5 + $0x80] sm:$0xff]   ;;  %13305 = vmatprep.subr.bf16.mxu0 %v14938_v6  ;;  %v14953_v6 = vld [vmem:[%s20359_s5 + $0xb8] sm:$0xff]  }
 0x789   :  { %8573 = vst.msk [vmem:[#allocation2 + $0x68] sm:$0xff] %vm7700_vm4, %v8552_v62  ;;  %v14935_v12 = vld [vmem:[%s20355_s1 + $0x1268] ss:$16 sps:$4 sm:$0xff]   ;;  %13306 = vmatpush3.bf16.msra.mxu0 %v14939_v32 }
 0x78a   :  { %7611 = vmatmul.mubr.bf16.gmra.mrb[232].mxu1 %v14920_v5  ;;  %v8554_v2 = vpop.permute.xlu1 %8553 }
 0x78b   :  { %8574 = vst.msk [vmem:[#allocation2 + $0x90] sm:$0xff] %vm7700_vm4, %v8554_v2  ;;  %12917 = vmatprep.mubr.msk.bf16.mxu1 %vm4780_vm2, %v14925_v30 }
 0x78d   :  { %v7404_v50 = vpop.f32.mrb[116].mxu1 }
 0x78e   :  { %v7406_v63 = vpop.f32.mrb[117].mxu1  ;;  %8707 = vrot.lane.b32.xlu0 %v7404_v50, %s15377_s18 }
 0x78f   :  { %v7407_v39 = vpop.f32.mrb[118].mxu1  ;;  %v14940_v63 = vld [vmem:[%s20359_s5 + $0xc8] sm:$0xff]  }
 0x790   :  { %v7409_v16 = vpop.f32.mrb[119].mxu1  ;;  %v8556_v10 = vpop.permute.xlu0 %8555  ;;  %8709 = vrot.lane.b32.xlu1 %v7407_v39, %s15377_s18  ;;  %13307 = vmatprep.subr.bf16.mxu0 %v14940_v63 }
 0x791   :  { %8575 = vst.msk [vmem:[#allocation2 + $0xb8] sm:$0xff] %vm7700_vm4, %v8556_v10  ;;  %v14943_v10 = vld [vmem:[%s20359_s5 + $0x90] sm:$0xff]  }
 0x792   :  { %7619 = vmatmul.mubr.bf16.gmra.mrb[236].mxu1 %v14923_v25  ;;  %v8558_v59 = vpop.permute.xlu1 %8557  ;;  %v14941_v25 = vld [vmem:[%s20359_s5 + $0x88] sm:$0xff]  }
 0x793   :  { %8576 = vst.msk [vmem:[#allocation2 + $0xe0] sm:$0xff] %vm7700_vm4, %v8558_v59  ;;  %12918 = vmatprep.mubr.msk.bf16.mxu1 %vm4780_vm2, %v14928_v49  ;;  %13308 = vmatpush3.bf16.msra.mxu0 %v14941_v25  ;;  %v14942_v49 = vld [vmem:[%s20359_s5 + $0xd0] sm:$0xff]  }
 0x794   :  { %13309 = vmatprep.subr.bf16.mxu0 %v14942_v49 }
 0x795   :  { %v7412_v47 = vpop.f32.mrb[120].mxu1 }
 0x796   :  { %v7414_v23 = vpop.f32.mrb[121].mxu1  ;;  %8711 = vrot.lane.b32.xlu0 %v7412_v47, %s15377_s18 }
 0x797   :  { %v7415_v0 = vpop.f32.mrb[122].mxu1  ;;  %13310 = vmatpush3.bf16.msra.mxu0 %v14943_v10 }
 0x798   :  { %v7417_v57 = vpop.f32.mrb[123].mxu1  ;;  %v8560_v44 = vpop.permute.xlu0 %8559  ;;  %8713 = vrot.lane.b32.xlu1 %v7415_v0, %s15377_s18  ;;  %v14944_v0 = vld [vmem:[%s20359_s5 + $0xd8] sm:$0xff]  }
 0x799   :  { %8577 = vst.msk [vmem:[#allocation2 + $0x108] sm:$0xff] %vm7700_vm4, %v8560_v44  ;;  %13311 = vmatprep.subr.bf16.mxu0 %v14944_v0  ;;  %v14946_v44 = vld [vmem:[%s20359_s5 + $0xe0] sm:$0xff]  }
 0x79a   :  { %7627 = vmatmul.mubr.bf16.gmra.mrb[240].mxu1 %v14926_v26  ;;  %v8562_v56 = vpop.permute.xlu1 %8561 }
 0x79b   :  { %8578 = vst.msk [vmem:[#allocation2 + $0x130] sm:$0xff] %vm7700_vm4, %v8562_v56  ;;  %12919 = vmatprep.mubr.msk.bf16.mxu1 %vm4780_vm2, %v14931_v29  ;;  %v14945_v29 = vld [vmem:[%s20359_s5 + $0x98] sm:$0xff]  }
 0x79c   :  { %13312 = vmatpush3.bf16.msra.mxu0 %v14945_v29 }
 0x79d   :  { %v7420_v4 = vpop.f32.mrb[124].mxu1  ;;  %13313 = vmatprep.subr.bf16.mxu0 %v14946_v44 }
 0x79e   :  { %v7422_v33 = vpop.f32.mrb[125].mxu1  ;;  %8715 = vrot.lane.b32.xlu0 %v7420_v4, %s15377_s18  ;;  %v14947_v4 = vld [vmem:[%s20359_s5 + $0xa0] sm:$0xff]  }
 0x79f   :  { %v7423_v61 = vpop.f32.mrb[126].mxu1 }
 0x7a0   :  { %v7425_v51 = vpop.f32.mrb[127].mxu1  ;;  %v8588_v38 = vpop.permute.xlu0 %8587  ;;  %8717 = vrot.lane.b32.xlu1 %v7423_v61, %s15377_s18  ;;  %13314 = vmatpush3.bf16.msra.mxu0 %v14947_v4 }
 0x7a1   :  { %8611 = vst.msk [vmem:[#allocation2 + $0x18] sm:$0xff] %vm7741_vm5, %v8588_v38  ;;  %v14948_v51 = vld [vmem:[%s20359_s5 + $0xe8] sm:$0xff]  }
 0x7a2   :  { %7635 = vmatmul.mubr.bf16.gmra.mrb[244].mxu1 %v14929_v53  ;;  %v8590_v35 = vpop.permute.xlu1 %8589  ;;  %v14949_v38 = vld [vmem:[%s20359_s5 + $0xa8] sm:$0xff]   ;;  %13315 = vmatprep.subr.bf16.mxu0 %v14948_v51 }
 0x7a3   :  { %8612 = vst.msk [vmem:[#allocation2 + $0x40] sm:$0xff] %vm7741_vm5, %v8590_v35  ;;  %12920 = vmatprep.mubr.msk.bf16.mxu1 %vm4780_vm2, %v14934_v31 }
 0x7a4   :  { %13316 = vmatpush3.bf16.msra.mxu0 %v14949_v38 }
 0x7a5   :  { %v7428_v8 = vpop.f32.mrb[128].mxu1 }
 0x7a6   :  { %v7430_v14 = vpop.f32.mrb[129].mxu1  ;;  %8719 = vrot.lane.b32.xlu0 %v7428_v8, %s15377_s18  ;;  %v14950_v8 = vld [vmem:[%s20359_s5 + $0xf0] sm:$0xff]  }
 0x7a7   :  { %v7431_v58 = vpop.f32.mrb[130].mxu1  ;;  %13317 = vmatprep.subr.bf16.mxu0 %v14950_v8 }
 0x7a8   :  { %v7433_v13 = vpop.f32.mrb[131].mxu1  ;;  %v8592_v41 = vpop.permute.xlu0 %8591  ;;  %8721 = vrot.lane.b32.xlu1 %v7431_v58, %s15377_s18 }
 0x7a9   :  { %8613 = vst.msk [vmem:[#allocation2 + $0x68] sm:$0xff] %vm7741_vm5, %v8592_v41 }
 0x7aa   :  { %7643 = vmatmul.mubr.bf16.gmra.mrb[248].mxu1 %v14932_v11  ;;  %v8594_v27 = vpop.permute.xlu1 %8593  ;;  %v14951_v11 = vld [vmem:[%s20359_s5 + $0xb0] sm:$0xff]  }
 0x7ab   :  { %8614 = vst.msk [vmem:[#allocation2 + $0x90] sm:$0xff] %vm7741_vm5, %v8594_v27  ;;  %12921 = vmatprep.mubr.msk.bf16.mxu1 %vm4780_vm2, %v14937_v40  ;;  %13318 = vmatpush3.bf16.msra.mxu0 %v14951_v11  ;;  %v14952_v27 = vld [vmem:[%s20359_s5 + $0xf8] sm:$0xff]  }
 0x7ac   :  { %13319 = vmatprep.subr.bf16.mxu0 %v14952_v27 }
 0x7ad   :  { %v7436_v5 = vpop.f32.mrb[132].mxu1 }
 0x7ae   :  { %v7438_v30 = vpop.f32.mrb[133].mxu1  ;;  %8747 = vrot.lane.b32.xlu0 %v7436_v5, %s15378_s4 }
 0x7af   :  { %v7439_v62 = vpop.f32.mrb[134].mxu1  ;;  %13320 = vmatpush3.bf16.msra.mxu0 %v14953_v6 }
 0x7b0   :  { %v7441_v2 = vpop.f32.mrb[135].mxu1  ;;  %v8596_v50 = vpop.permute.xlu0 %8595  ;;  %8749 = vrot.lane.b32.xlu1 %v7439_v62, %s15378_s4 }
 0x7b1   :  { %8615 = vst.msk [vmem:[#allocation2 + $0xb8] sm:$0xff] %vm7741_vm5, %v8596_v50 }
 0x7b2   :  { %7651 = vmatmul.mubr.bf16.gmra.mrb[252].mxu1 %v14935_v12  ;;  %v8598_v39 = vpop.permute.xlu1 %8597 }
 0x7b3   :  { %8616 = vst.msk [vmem:[#allocation2 + $0xe0] sm:$0xff] %vm7741_vm5, %v8598_v39 }
 0x7b5   :  { %v7444_v16 = vpop.f32.mrb[136].mxu1 }
 0x7b6   :  { %v7446_v59 = vpop.f32.mrb[137].mxu1  ;;  %8751 = vrot.lane.b32.xlu0 %v7444_v16, %s15378_s4 }
 0x7b7   :  { %v7447_v47 = vpop.f32.mrb[138].mxu1 }
 0x7b8   :  { %v7449_v23 = vpop.f32.mrb[139].mxu1  ;;  %v8600_v26 = vpop.permute.xlu0 %8599  ;;  %8753 = vrot.lane.b32.xlu1 %v7447_v47, %s15378_s4 }
 0x7b9   :  { %8617 = vst.msk [vmem:[#allocation2 + $0x108] sm:$0xff] %vm7741_vm5, %v8600_v26 }
 0x7ba   :  { %v8602_v57 = vpop.permute.xlu1 %8601 }
 0x7bb   :  { %8618 = vst.msk [vmem:[#allocation2 + $0x130] sm:$0xff] %vm7741_vm5, %v8602_v57 }
 0x7bd   :  { %v7452_v56 = vpop.f32.mrb[140].mxu1 }
 0x7be   :  { %v7454_v33 = vpop.f32.mrb[141].mxu1  ;;  %8755 = vrot.lane.b32.xlu0 %v7452_v56, %s15378_s4 }
 0x7bf   :  { %v7455_v53 = vpop.f32.mrb[142].mxu1 }
 0x7c0   :  { %v7457_v61 = vpop.f32.mrb[143].mxu1  ;;  %v8628_v31 = vpop.permute.xlu0 %8627  ;;  %8757 = vrot.lane.b32.xlu1 %v7455_v53, %s15378_s4 }
 0x7c1   :  { %8651 = vst.msk [vmem:[#allocation2 + $0x18] sm:$0xff] %vm7782_vm6, %v8628_v31 }
 0x7c2   :  { %v8630_v35 = vpop.permute.xlu1 %8629 }
 0x7c3   :  { %8652 = vst.msk [vmem:[#allocation2 + $0x40] sm:$0xff] %vm7782_vm6, %v8630_v35 }
 0x7c5   :  { %v7460_v14 = vpop.f32.mrb[144].mxu1 }
 0x7c6   :  { %v7462_v58 = vpop.f32.mrb[145].mxu1  ;;  %8759 = vrot.lane.b32.xlu0 %v7460_v14, %s15378_s4 }
 0x7c7   :  { %v7463_v40 = vpop.f32.mrb[146].mxu1 }
 0x7c8   :  { %v7465_v13 = vpop.f32.mrb[147].mxu1  ;;  %v8632_v41 = vpop.permute.xlu0 %8631  ;;  %8761 = vrot.lane.b32.xlu1 %v7463_v40, %s15378_s4 }
 0x7c9   :  { %8653 = vst.msk [vmem:[#allocation2 + $0x68] sm:$0xff] %vm7782_vm6, %v8632_v41 }
 0x7ca   :  { %v8634_v5 = vpop.permute.xlu1 %8633 }
 0x7cb   :  { %8654 = vst.msk [vmem:[#allocation2 + $0x90] sm:$0xff] %vm7782_vm6, %v8634_v5 }
 0x7cd   :  { %v7468_v32 = vpop.f32.mrb[148].mxu1 }
 0x7ce   :  { %v7470_v30 = vpop.f32.mrb[149].mxu1  ;;  %8787 = vrot.lane.b32.xlu0 %v7468_v32, %s15379_s25 }
 0x7cf   :  { %v7471_v12 = vpop.f32.mrb[150].mxu1 }
 0x7d0   :  { %v7473_v62 = vpop.f32.mrb[151].mxu1  ;;  %v8636_v2 = vpop.permute.xlu0 %8635  ;;  %8789 = vrot.lane.b32.xlu1 %v7471_v12, %s15379_s25 }
 0x7d1   :  { %8655 = vst.msk [vmem:[#allocation2 + $0xb8] sm:$0xff] %vm7782_vm6, %v8636_v2 }
 0x7d2   :  { %v8638_v50 = vpop.permute.xlu1 %8637 }
 0x7d3   :  { %8656 = vst.msk [vmem:[#allocation2 + $0xe0] sm:$0xff] %vm7782_vm6, %v8638_v50 }
 0x7d5   :  { %v7476_v63 = vpop.f32.mrb[152].mxu1 }
 0x7d6   :  { %v7478_v25 = vpop.f32.mrb[153].mxu1  ;;  %8791 = vrot.lane.b32.xlu0 %v7476_v63, %s15379_s25 }
 0x7d7   :  { %v7479_v39 = vpop.f32.mrb[154].mxu1 }
 0x7d8   :  { %v7481_v49 = vpop.f32.mrb[155].mxu1  ;;  %v8640_v16 = vpop.permute.xlu0 %8639  ;;  %8793 = vrot.lane.b32.xlu1 %v7479_v39, %s15379_s25 }
 0x7d9   :  { %8657 = vst.msk [vmem:[#allocation2 + $0x108] sm:$0xff] %vm7782_vm6, %v8640_v16 }
 0x7da   :  { %v8642_v10 = vpop.permute.xlu1 %8641 }
 0x7db   :  { %8658 = vst.msk [vmem:[#allocation2 + $0x130] sm:$0xff] %vm7782_vm6, %v8642_v10 }
 0x7dd   :  { %v7484_v59 = vpop.f32.mrb[156].mxu1 }
 0x7de   :  { %v7486_v47 = vpop.f32.mrb[157].mxu1  ;;  %8795 = vrot.lane.b32.xlu0 %v7484_v59, %s15379_s25 }
 0x7df   :  { %v7487_v23 = vpop.f32.mrb[158].mxu1 }
 0x7e0   :  { %v7489_v26 = vpop.f32.mrb[159].mxu1  ;;  %v8668_v0 = vpop.permute.xlu0 %8667  ;;  %8797 = vrot.lane.b32.xlu1 %v7487_v23, %s15379_s25 }
 0x7e1   :  { %8691 = vst.msk [vmem:[#allocation2 + $0x18] sm:$0xff] %vm7823_vm7, %v8668_v0 }
 0x7e2   :  { %v8670_v29 = vpop.permute.xlu1 %8669 }
 0x7e3   :  { %8692 = vst.msk [vmem:[#allocation2 + $0x40] sm:$0xff] %vm7823_vm7, %v8670_v29 }
 0x7e5   :  { %v7492_v57 = vpop.f32.mrb[160].mxu1 }
 0x7e6   :  { %v7494_v44 = vpop.f32.mrb[161].mxu1  ;;  %8799 = vrot.lane.b32.xlu0 %v7492_v57, %s15379_s25 }
 0x7e7   :  { %v7495_v56 = vpop.f32.mrb[162].mxu1 }
 0x7e8   :  { %v7497_v4 = vpop.f32.mrb[163].mxu1  ;;  %v8672_v33 = vpop.permute.xlu0 %8671  ;;  %8801 = vrot.lane.b32.xlu1 %v7495_v56, %s15379_s25 }
 0x7e9   :  { %8693 = vst.msk [vmem:[#allocation2 + $0x68] sm:$0xff] %vm7823_vm7, %v8672_v33 }
 0x7ea   :  { %v8674_v53 = vpop.permute.xlu1 %8673 }
 0x7eb   :  { %8694 = vst.msk [vmem:[#allocation2 + $0x90] sm:$0xff] %vm7823_vm7, %v8674_v53 }
 0x7ed   :  { %v7500_v61 = vpop.f32.mrb[164].mxu1 }
 0x7ee   :  { %8819 = vst.msk [vmem:[#allocation2 + $0x20] sm:$0xff] %vm7659_vm3, %v7500_v61  ;;  %v7502_v31 = vpop.f32.mrb[165].mxu1 }
 0x7ef   :  { %v7503_v51 = vpop.f32.mrb[166].mxu1 }
 0x7f0   :  { %8820 = vst.msk [vmem:[#allocation2 + $0x48] sm:$0xff] %vm7659_vm3, %v7503_v51  ;;  %v7505_v38 = vpop.f32.mrb[167].mxu1  ;;  %v8676_v35 = vpop.permute.xlu0 %8675 }
 0x7f1   :  { %8695 = vst.msk [vmem:[#allocation2 + $0xb8] sm:$0xff] %vm7823_vm7, %v8676_v35 }
 0x7f2   :  { %v8678_v8 = vpop.permute.xlu1 %8677 }
 0x7f3   :  { %8696 = vst.msk [vmem:[#allocation2 + $0xe0] sm:$0xff] %vm7823_vm7, %v8678_v8 }
 0x7f5   :  { %v7508_v14 = vpop.f32.mrb[168].mxu1 }
 0x7f6   :  { %8821 = vst.msk [vmem:[#allocation2 + $0x70] sm:$0xff] %vm7659_vm3, %v7508_v14  ;;  %v7510_v11 = vpop.f32.mrb[169].mxu1 }
 0x7f7   :  { %v7511_v58 = vpop.f32.mrb[170].mxu1 }
 0x7f8   :  { %8822 = vst.msk [vmem:[#allocation2 + $0x98] sm:$0xff] %vm7659_vm3, %v7511_v58  ;;  %v7513_v40 = vpop.f32.mrb[171].mxu1  ;;  %v8680_v13 = vpop.permute.xlu0 %8679 }
 0x7f9   :  { %8697 = vst.msk [vmem:[#allocation2 + $0x108] sm:$0xff] %vm7823_vm7, %v8680_v13 }
 0x7fa   :  { %v8682_v41 = vpop.permute.xlu1 %8681 }
 0x7fb   :  { %8698 = vst.msk [vmem:[#allocation2 + $0x130] sm:$0xff] %vm7823_vm7, %v8682_v41 }
 0x7fd   :  { %v7516_v27 = vpop.f32.mrb[172].mxu1 }
 0x7fe   :  { %8823 = vst.msk [vmem:[#allocation2 + $0xc0] sm:$0xff] %vm7659_vm3, %v7516_v27  ;;  %v7518_v6 = vpop.f32.mrb[173].mxu1 }
 0x7ff   :  { %v7519_v5 = vpop.f32.mrb[174].mxu1 }
 0x800   :  { %8824 = vst.msk [vmem:[#allocation2 + $0xe8] sm:$0xff] %vm7659_vm3, %v7519_v5  ;;  %v7521_v32 = vpop.f32.mrb[175].mxu1  ;;  %v8708_v30 = vpop.permute.xlu0 %8707 }
 0x801   :  { %8731 = vst.msk [vmem:[#allocation2 + $0x18] sm:$0xff] %vm7864_vm8, %v8708_v30 }
 0x802   :  { %v8710_v12 = vpop.permute.xlu1 %8709 }
 0x803   :  { %8732 = vst.msk [vmem:[#allocation2 + $0x40] sm:$0xff] %vm7864_vm8, %v8710_v12 }
 0x805   :  { %v7524_v62 = vpop.f32.mrb[176].mxu1 }
 0x806   :  { %8825 = vst.msk [vmem:[#allocation2 + $0x110] sm:$0xff] %vm7659_vm3, %v7524_v62  ;;  %v7526_v2 = vpop.f32.mrb[177].mxu1 }
 0x807   :  { %v7527_v50 = vpop.f32.mrb[178].mxu1 }
 0x808   :  { %8826 = vst.msk [vmem:[#allocation2 + $0x138] sm:$0xff] %vm7659_vm3, %v7527_v50  ;;  %v7529_v63 = vpop.f32.mrb[179].mxu1  ;;  %v8712_v25 = vpop.permute.xlu0 %8711 }
 0x809   :  { %8733 = vst.msk [vmem:[#allocation2 + $0x68] sm:$0xff] %vm7864_vm8, %v8712_v25 }
 0x80a   :  { %v8714_v39 = vpop.permute.xlu1 %8713 }
 0x80b   :  { %8734 = vst.msk [vmem:[#allocation2 + $0x90] sm:$0xff] %vm7864_vm8, %v8714_v39 }
 0x80d   :  { %v7532_v49 = vpop.f32.mrb[180].mxu1 }
 0x80e   :  { %v7534_v16 = vpop.f32.mrb[181].mxu1  ;;  %8835 = vrot.lane.b32.xlu0 %v7532_v49, %s15373_s3 }
 0x80f   :  { %v7535_v10 = vpop.f32.mrb[182].mxu1 }
 0x810   :  { %v7537_v59 = vpop.f32.mrb[183].mxu1  ;;  %v8716_v47 = vpop.permute.xlu0 %8715  ;;  %8837 = vrot.lane.b32.xlu1 %v7535_v10, %s15373_s3 }
 0x811   :  { %8735 = vst.msk [vmem:[#allocation2 + $0xb8] sm:$0xff] %vm7864_vm8, %v8716_v47 }
 0x812   :  { %v8718_v23 = vpop.permute.xlu1 %8717 }
 0x813   :  { %8736 = vst.msk [vmem:[#allocation2 + $0xe0] sm:$0xff] %vm7864_vm8, %v8718_v23 }
 0x815   :  { %v7540_v26 = vpop.f32.mrb[184].mxu1 }
 0x816   :  { %v7542_v0 = vpop.f32.mrb[185].mxu1  ;;  %8839 = vrot.lane.b32.xlu0 %v7540_v26, %s15373_s3 }
 0x817   :  { %v7543_v29 = vpop.f32.mrb[186].mxu1 }
 0x818   :  { %v7545_v57 = vpop.f32.mrb[187].mxu1  ;;  %v8720_v44 = vpop.permute.xlu0 %8719  ;;  %8841 = vrot.lane.b32.xlu1 %v7543_v29, %s15373_s3 }
 0x819   :  { %8737 = vst.msk [vmem:[#allocation2 + $0x108] sm:$0xff] %vm7864_vm8, %v8720_v44 }
 0x81a   :  { %v8722_v56 = vpop.permute.xlu1 %8721 }
 0x81b   :  { %8738 = vst.msk [vmem:[#allocation2 + $0x130] sm:$0xff] %vm7864_vm8, %v8722_v56 }
 0x81d   :  { %v19188_v4 = vpop.f32.mrb[188].mxu1 }
 0x81e   :  { %v7550_v33 = vpop.f32.mrb[189].mxu1 }
 0x81f   :  { %v19190_v53 = vpop.f32.mrb[190].mxu1 }
 0x820   :  { %v7553_v61 = vpop.f32.mrb[191].mxu1  ;;  %v8748_v31 = vpop.permute.xlu0 %8747 }
 0x821   :  { %8771 = vst.msk [vmem:[#allocation2 + $0x18] sm:$0xff] %vm7905_vm9, %v8748_v31  ;;  %v8989_v31 = vld [vmem:[#allocation2 + $0x10] sm:$0xff] }
 0x822   :  { %v8750_v51 = vpop.permute.xlu1 %8749 }
 0x823   :  { %8772 = vst.msk [vmem:[#allocation2 + $0x40] sm:$0xff] %vm7905_vm9, %v8750_v51 }
 0x825   :  { %v19194_v38 = vpop.f32.mrb[192].mxu1 }
 0x826   :  { %v7558_v35 = vpop.f32.mrb[193].mxu1 }
 0x827   :  { %v19196_v8 = vpop.f32.mrb[194].mxu1 }
 0x828   :  { %v7561_v14 = vpop.f32.mrb[195].mxu1  ;;  %v8752_v11 = vpop.permute.xlu0 %8751 }
 0x829   :  { %8773 = vst.msk [vmem:[#allocation2 + $0x68] sm:$0xff] %vm7905_vm9, %v8752_v11 }
 0x82a   :  { %v8754_v58 = vpop.permute.xlu1 %8753 }
 0x82b   :  { %8774 = vst.msk [vmem:[#allocation2 + $0x90] sm:$0xff] %vm7905_vm9, %v8754_v58 }
 0x82d   :  { %v7564_v40 = vpop.f32.mrb[196].mxu1 }
 0x82e   :  { %v7566_v13 = vpop.f32.mrb[197].mxu1  ;;  %8875 = vrot.lane.b32.xlu0 %v7564_v40, %s15374_s16 }
 0x82f   :  { %v7567_v41 = vpop.f32.mrb[198].mxu1 }
 0x830   :  { %v7569_v27 = vpop.f32.mrb[199].mxu1  ;;  %v8756_v6 = vpop.permute.xlu0 %8755  ;;  %8877 = vrot.lane.b32.xlu1 %v7567_v41, %s15374_s16 }
 0x831   :  { %8775 = vst.msk [vmem:[#allocation2 + $0xb8] sm:$0xff] %vm7905_vm9, %v8756_v6  ;;  %v9004_v27 = vld [vmem:[#allocation2 + $0x88] sm:$0xff] }
 0x832   :  { %v8758_v5 = vpop.permute.xlu1 %8757 }
 0x833   :  { %8776 = vst.msk [vmem:[#allocation2 + $0xe0] sm:$0xff] %vm7905_vm9, %v8758_v5 }
 0x835   :  { %v7572_v32 = vpop.f32.mrb[212].mxu1 }
 0x836   :  { %v7573_v30 = vadd.f32 %v7572_v32, %v16636_v24  ;;  %v7574_v12 = vpop.f32.mrb[213].mxu1 }
 0x837   :  { %v7575_v62 = vpop.f32.mrb[214].mxu1 }
 0x838   :  { %v7576_v2 = vadd.f32 %v7575_v62, %v16646_v7  ;;  %8879 = vrot.lane.b32.xlu0 %v7573_v30, %s15374_s16  ;;  %v8760_v50 = vpop.permute.xlu0 %8759  ;;  %v7577_v63 = vpop.f32.mrb[215].mxu1  ;;  %v8999_v30 = vld [vmem:[#allocation2 + $0x60] sm:$0xff] }
 0x839   :  { %8777 = vst.msk [vmem:[#allocation2 + $0x108] sm:$0xff] %vm7905_vm9, %v8760_v50  ;;  %v9034_v12 = vpack.c.bf16 %v9004_v27, %v8999_v30 }
 0x83a   :  { %8881 = vrot.lane.b32.xlu1 %v7576_v2, %s15374_s16  ;;  %v8762_v25 = vpop.permute.xlu1 %8761 }
 0x83b   :  { %8778 = vst.msk [vmem:[#allocation2 + $0x130] sm:$0xff] %vm7905_vm9, %v8762_v25 }
 0x83d   :  { %v7580_v39 = vpop.f32.mrb[216].mxu1 }
 0x83e   :  { %v19211_v49 = vadd.f32 %v7580_v39, %v16657_v21  ;;  %v7582_v24 = vpop.f32.mrb[217].mxu1 }
 0x83f   :  { %v7583_v16 = vpop.f32.mrb[218].mxu1  ;;  %v9014_v24 = vld [vmem:[#allocation2 + $0xd8] sm:$0xff] }
 0x840   :  { %v19214_v10 = vadd.f32 %v7583_v16, %v16667_v34  ;;  %v8788_v7 = vpop.permute.xlu0 %8787  ;;  %v7585_v59 = vpop.f32.mrb[219].mxu1  ;;  %v8994_v34 = vld [vmem:[#allocation2 + $0x38] sm:$0xff] }
 0x841   :  { %8811 = vst.msk [vmem:[#allocation2 + $0x18] sm:$0xff] %vm7946_vm10, %v8788_v7  ;;  %v9029_v35 = vpack.c.bf16 %v8994_v34, %v8989_v31 }
 0x842   :  { %v8790_v47 = vpop.permute.xlu1 %8789 }
 0x843   :  { %8812 = vst.msk [vmem:[#allocation2 + $0x40] sm:$0xff] %vm7946_vm10, %v8790_v47  ;;  %v9009_v47 = vld [vmem:[#allocation2 + $0xb0] sm:$0xff] }
 0x845   :  { %v7588_v23 = vpop.f32.mrb[220].mxu1 }
 0x846   :  { %v19219_v26 = vadd.f32 %v7588_v23, %v16678_v48  ;;  %v7590_v0 = vpop.f32.mrb[221].mxu1  ;;  %v9039_v23 = vpack.c.bf16 %v9014_v24, %v9009_v47 }
 0x847   :  { %v7591_v29 = vpop.f32.mrb[222].mxu1 }
 0x848   :  { %v19222_v21 = vadd.f32 %v7591_v29, %v16688_v54  ;;  %v8792_v57 = vpop.permute.xlu0 %8791  ;;  %v7593_v44 = vpop.f32.mrb[223].mxu1  ;;  %v8990_v33 = vld [vmem:[#allocation2 + $0x18] sm:$0xff]  ;;  %v14954_v54 = vld [vmem:[%s20359_s5 + $0x100] sm:$0xff]  }
 0x849   :  { %8813 = vst.msk [vmem:[#allocation2 + $0x68] sm:$0xff] %vm7946_vm10, %v8792_v57  ;;  %13451 = vmatprep.subr.bf16.mxu0 %v14954_v54 }
 0x84a   :  { %v8794_v56 = vpop.permute.xlu1 %8793  ;;  %v8995_v61 = vld [vmem:[#allocation2 + $0x40] sm:$0xff] }
 0x84b   :  { %8814 = vst.msk [vmem:[#allocation2 + $0x90] sm:$0xff] %vm7946_vm10, %v8794_v56  ;;  %v9030_v51 = vpack.c.bf16 %v8995_v61, %v8990_v33  ;;  %v9024_v56 = vld [vmem:[#allocation2 + $0x128] sm:$0xff] }
 0x84d   :  { %v7596_v48 = vpop.f32.mrb[224].mxu1  ;;  %9460 = vmatprep.mubr.bf16.mxu0 %v9030_v51  ;;  %v9019_v51 = vld [vmem:[#allocation2 + $0x100] sm:$0xff] }
 0x84e   :  { %v7597_v14 = vadd.f32 %v7596_v48, %v16699_v55  ;;  %v7598_v11 = vpop.f32.mrb[225].mxu1  ;;  %9461 = vmatmul.mubr.bf16.vlgmr.msra.gmra.mrb[120].mxu0 %v9029_v35  ;;  %v14955_v35 = vld [vmem:[%s20359_s5 + $0x108] sm:$0xff]   ;;  %v9044_v48 = vpack.c.bf16 %v9024_v56, %v9019_v51 }
 0x84f   :  { %v7599_v58 = vpop.f32.mrb[226].mxu1  ;;  %13452 = vmatpush3.bf16.msra.mxu0 %v14954_v54 }
 0x850   :  { %v7600_v40 = vadd.f32 %v7599_v58, %v16709_v3  ;;  %8915 = vrot.lane.b32.xlu0 %v7597_v14, %s15375_s30  ;;  %v8796_v13 = vpop.permute.xlu0 %8795  ;;  %v7601_v41 = vpop.f32.mrb[227].mxu1  ;;  %v9000_v5 = vld [vmem:[#allocation2 + $0x68] sm:$0xff]  ;;  %13453 = vmatprep.subr.bf16.mxu0 %v14955_v35 }
 0x851   :  { %8815 = vst.msk [vmem:[#allocation2 + $0xb8] sm:$0xff] %vm7946_vm10, %v8796_v13  ;;  %v14957_v41 = vld [vmem:[%s20359_s5 + $0x118] sm:$0xff]  }
 0x852   :  { %8917 = vrot.lane.b32.xlu1 %v7600_v40, %s15375_s30  ;;  %v8798_v6 = vpop.permute.xlu1 %8797  ;;  %v9005_v32 = vld [vmem:[#allocation2 + $0x90] sm:$0xff] }
 0x853   :  { %8816 = vst.msk [vmem:[#allocation2 + $0xe0] sm:$0xff] %vm7946_vm10, %v8798_v6  ;;  %v9035_v55 = vpack.c.bf16 %v9005_v32, %v9000_v5  ;;  %13454 = vmatpush3.bf16.msra.mxu0 %v14955_v35 }
 0x855   :  { %v7604_v62 = vpop.f32.mrb[228].mxu1  ;;  %9468 = vmatprep.mubr.bf16.mxu0 %v9035_v55 }
 0x856   :  { %v7605_v3 = vadd.f32 %v7604_v62, %v16720_v20  ;;  %v7606_v2 = vpop.f32.mrb[229].mxu1  ;;  %9469 = vmatmul.mubr.bf16.gmra.mrb[124].mxu0 %v9034_v12  ;;  %v20375_v62 = vld [vmem:[#allocation7_spill] sm:$0xff] }
 0x857   :  { %v7607_v50 = vpop.f32.mrb[230].mxu1 }
 0x858   :  { %v7608_v63 = vadd.f32 %v7607_v50, %v16730_v19  ;;  %8919 = vrot.lane.b32.xlu0 %v7605_v3, %s15375_s30  ;;  %v8800_v25 = vpop.permute.xlu0 %8799  ;;  %v7609_v39 = vpop.f32.mrb[231].mxu1  ;;  %v9010_v7 = vld [vmem:[#allocation2 + $0xb8] sm:$0xff]  ;;  %v20376_v50 = vld [vmem:[#allocation8_spill] sm:$0xff] }
 0x859   :  { %8817 = vst.msk [vmem:[#allocation2 + $0x108] sm:$0xff] %vm7946_vm10, %v8800_v25  ;;  %v20377_v39 = vld [vmem:[#allocation9_spill] sm:$0xff] }
 0x85a   :  { %8921 = vrot.lane.b32.xlu1 %v7608_v63, %s15375_s30  ;;  %v8802_v16 = vpop.permute.xlu1 %8801  ;;  %v9015_v59 = vld [vmem:[#allocation2 + $0xe0] sm:$0xff] }
 0x85b   :  { %8818 = vst.msk [vmem:[#allocation2 + $0x130] sm:$0xff] %vm7946_vm10, %v8802_v16  ;;  %v9040_v20 = vpack.c.bf16 %v9015_v59, %v9010_v7  ;;  %v20378_v59 = vld [vmem:[#allocation10_spill] sm:$0xff] }
 0x85d   :  { %v7612_v0 = vpop.f32.mrb[232].mxu1  ;;  %9476 = vmatprep.mubr.bf16.mxu0 %v9040_v20 }
 0x85e   :  { %v19242_v19 = vadd.f32 %v7612_v0, %v16741_v52  ;;  %v7614_v29 = vpop.f32.mrb[233].mxu1  ;;  %9477 = vmatmul.mubr.bf16.gmra.mrb[128].mxu0 %v9039_v23  ;;  %v14956_v52 = vld [vmem:[%s20359_s5 + $0x110] sm:$0xff]   ;;  %v20379_v23 = vld [vmem:[#allocation11_spill] sm:$0xff] }
 0x85f   :  { %v7615_v57 = vpop.f32.mrb[234].mxu1  ;;  %13455 = vmatprep.subr.bf16.mxu0 %v14956_v52 }
 0x860   :  { %v19245_v44 = vadd.f32 %v7615_v57, %v16751_v46  ;;  %v7617_v34 = vpop.f32.mrb[235].mxu1  ;;  %v9020_v33 = vld [vmem:[#allocation2 + $0x108] sm:$0xff]  ;;  %13456 = vmatpush3.bf16.msra.mxu0 %v14956_v52 }
 0x861   :  { %13457 = vmatprep.subr.bf16.mxu0 %v14957_v41 }
 0x862   :  { %v9025_v61 = vld [vmem:[#allocation2 + $0x130] sm:$0xff] }
 0x863   :  { %v9045_v31 = vpack.c.bf16 %v9025_v61, %v9020_v33 }
 0x864   :  { %13458 = vmatpush3.bf16.msra.mxu0 %v14957_v41 }
 0x865   :  { %v7620_v54 = vpop.f32.mrb[236].mxu1  ;;  %9484 = vmatprep.mubr.bf16.mxu0 %v9045_v31 }
 0x866   :  { %v7621_v46 = vadd.f32 %v7620_v54, %v16762_v43  ;;  %v7622_v14 = vpop.f32.mrb[237].mxu1  ;;  %9485 = vmatmul.mubr.bf16.gmra.mrb[132].mxu0 %v9044_v48 }
 0x867   :  { %v7623_v11 = vpop.f32.mrb[238].mxu1 }
 0x868   :  { %v7624_v58 = vadd.f32 %v7623_v11, %v16775_v60  ;;  %v7625_v40 = vpop.f32.mrb[239].mxu1  ;;  %v14958_v60 = vld [vmem:[%s20359_s5 + $0x120] sm:$0xff]  }
 0x869   :  { %13459 = vmatprep.subr.bf16.mxu0 %v14958_v60 }
 0x86a   :  { %13460 = vmatpush3.bf16.msra.mxu0 %v14958_v60 }
 0x86d   :  { %v7628_v13 = vpop.f32.mrb[240].mxu1 }
 0x86e   :  { %v7629_v27 = vadd.f32 %v7628_v13, %v16783_v17  ;;  %v7630_v6 = vpop.f32.mrb[241].mxu1 }
 0x86f   :  { %v7631_v5 = vpop.f32.mrb[242].mxu1 }
 0x870   :  { %v7632_v43 = vadd.f32 %v7631_v5, %v16796_v15  ;;  %8955 = vrot.lane.b32.xlu0 %v7629_v27, %s15376_s28  ;;  %v7633_v32 = vpop.f32.mrb[243].mxu1 }
 0x872   :  { %8957 = vrot.lane.b32.xlu1 %v7632_v43, %s15376_s28 }
 0x875   :  { %v7636_v55 = vpop.f32.mrb[244].mxu1 }
 0x876   :  { %v7637_v17 = vadd.f32 %v7636_v55, %v16804_v36  ;;  %v7638_v30 = vpop.f32.mrb[245].mxu1 }
 0x877   :  { %v7639_v12 = vpop.f32.mrb[246].mxu1 }
 0x878   :  { %v7640_v3 = vadd.f32 %v7639_v12, %v20375_v62  ;;  %8959 = vrot.lane.b32.xlu0 %v7637_v17, %s15376_s28  ;;  %v7641_v15 = vpop.f32.mrb[247].mxu1 }
 0x87a   :  { %8961 = vrot.lane.b32.xlu1 %v7640_v3, %s15376_s28 }
 0x87c   :  { %8843 = vrot.lane.b32.xlu0 %v19188_v4, %s15373_s3 }
 0x87d   :  { %v7644_v2 = vpop.f32.mrb[248].mxu1 }
 0x87e   :  { %v7645_v63 = vadd.f32 %v7644_v2, %v20376_v50  ;;  %v7646_v25 = vpop.f32.mrb[249].mxu1  ;;  %8845 = vrot.lane.b32.xlu1 %v19190_v53, %s15373_s3 }
 0x87f   :  { %v7647_v36 = vpop.f32.mrb[250].mxu1 }
 0x880   :  { %v7648_v24 = vadd.f32 %v7647_v36, %v20377_v39  ;;  %8847 = vrot.lane.b32.xlu0 %v19194_v38, %s15373_s3  ;;  %v8836_v16 = vpop.permute.xlu0 %8835  ;;  %v7649_v7 = vpop.f32.mrb[251].mxu1  ;;  %v12922_v36 = vld [vmem:[%s20360_s6] ss:$0 sm:$0xff] }
 0x881   :  { %8859 = vst.msk [vmem:[#allocation2 + $0x20] sm:$0xff] %vm7700_vm4, %v8836_v16  ;;  %v9398_v16 = vadd.f32 %v18885_v37, %v12922_v36 }
 0x882   :  { %8849 = vrot.lane.b32.xlu1 %v19196_v8, %s15373_s3  ;;  %v8838_v4 = vpop.permute.xlu1 %8837 }
 0x883   :  { %8860 = vst.msk [vmem:[#allocation2 + $0x48] sm:$0xff] %vm7700_vm4, %v8838_v4 }
 0x884   :  { %8883 = vrot.lane.b32.xlu0 %v19211_v49, %s15374_s16 }
 0x885   :  { %v7652_v53 = vpop.f32.mrb[252].mxu1 }
 0x886   :  { %v7653_v20 = vadd.f32 %v7652_v53, %v20378_v59  ;;  %v7654_v47 = vpop.f32.mrb[253].mxu1  ;;  %8885 = vrot.lane.b32.xlu1 %v19214_v10, %s15374_s16  ;;  %v9401_v59 = vadd.f32 %v18892_v45, %v12922_v36 }
 0x887   :  { %v7655_v38 = vpop.f32.mrb[254].mxu1 }
 0x888   :  { %v7656_v0 = vadd.f32 %v7655_v38, %v20379_v23  ;;  %8887 = vrot.lane.b32.xlu0 %v19219_v26, %s15374_s16  ;;  %v8840_v8 = vpop.permute.xlu0 %8839  ;;  %v7657_v29 = vpop.f32.mrb[255].mxu1 }
 0x889   :  { %8861 = vst.msk [vmem:[#allocation2 + $0x70] sm:$0xff] %vm7700_vm4, %v8840_v8  ;;  %v9406_v8 = vadd.f32 %v18900_v18, %v12922_v36 }
 0x88a   :  { %8889 = vrot.lane.b32.xlu1 %v19222_v21, %s15374_s16  ;;  %v8842_v49 = vpop.permute.xlu1 %8841 }
 0x88b   :  { %8862 = vst.msk [vmem:[#allocation2 + $0x98] sm:$0xff] %vm7700_vm4, %v8842_v49 }
 0x88c   :  { %8923 = vrot.lane.b32.xlu0 %v19242_v19, %s15375_s30 }
 0x88e   :  { %8925 = vrot.lane.b32.xlu1 %v19245_v44, %s15375_s30 }
 0x890   :  { %8927 = vrot.lane.b32.xlu0 %v7621_v46, %s15375_s30 }
 0x892   :  { %8929 = vrot.lane.b32.xlu1 %v7624_v58, %s15375_s30 }
 0x894   :  { %8963 = vrot.lane.b32.xlu0 %v7645_v63, %s15376_s28 }
 0x896   :  { %8965 = vrot.lane.b32.xlu1 %v7648_v24, %s15376_s28 }
 0x898   :  { %8967 = vrot.lane.b32.xlu0 %v7653_v20, %s15376_s28 }
 0x89a   :  { %8969 = vrot.lane.b32.xlu1 %v7656_v0, %s15376_s28 }
 0x8a0   :  { %v8876_v10 = vpop.permute.xlu0 %8875 }
 0x8a1   :  { %8899 = vst.msk [vmem:[#allocation2 + $0x20] sm:$0xff] %vm7741_vm5, %v8876_v10 }
 0x8a2   :  { %v8878_v26 = vpop.permute.xlu1 %8877 }
 0x8a3   :  { %8900 = vst.msk [vmem:[#allocation2 + $0x48] sm:$0xff] %vm7741_vm5, %v8878_v26  ;;  %v9409_v26 = vadd.f32 %v18907_v42, %v12922_v36 }
 0x8aa   :  { %v8880_v21 = vpop.permute.xlu0 %8879 }
 0x8ab   :  { %8901 = vst.msk [vmem:[#allocation2 + $0x70] sm:$0xff] %vm7741_vm5, %v8880_v21 }
 0x8ac   :  { %v8882_v19 = vpop.permute.xlu1 %8881 }
 0x8ad   :  { %8902 = vst.msk [vmem:[#allocation2 + $0x98] sm:$0xff] %vm7741_vm5, %v8882_v19 }
 0x8c2   :  { %v8916_v57 = vpop.permute.xlu0 %8915 }
 0x8c3   :  { %8939 = vst.msk [vmem:[#allocation2 + $0x20] sm:$0xff] %vm7782_vm6, %v8916_v57 }
 0x8c4   :  { %v8918_v44 = vpop.permute.xlu1 %8917 }
 0x8c5   :  { %8940 = vst.msk [vmem:[#allocation2 + $0x48] sm:$0xff] %vm7782_vm6, %v8918_v44  ;;  %v9414_v44 = vadd.f32 %v18915_v1, %v12922_v36 }
 0x8ca   :  { %v8920_v34 = vpop.permute.xlu0 %8919 }
 0x8cb   :  { %8941 = vst.msk [vmem:[#allocation2 + $0x70] sm:$0xff] %vm7782_vm6, %v8920_v34 }
 0x8cc   :  { %v8922_v56 = vpop.permute.xlu1 %8921 }
 0x8cd   :  { %8942 = vst.msk [vmem:[#allocation2 + $0x98] sm:$0xff] %vm7782_vm6, %v8922_v56 }
 0x8e2   :  { %v8956_v33 = vpop.permute.xlu0 %8955 }
 0x8e3   :  { %8979 = vst.msk [vmem:[#allocation2 + $0x20] sm:$0xff] %vm7823_vm7, %v8956_v33 }
 0x8e4   :  { %v8958_v61 = vpop.permute.xlu1 %8957 }
 0x8e5   :  { %8980 = vst.msk [vmem:[#allocation2 + $0x48] sm:$0xff] %vm7823_vm7, %v8958_v61  ;;  %v9417_v61 = vadd.f32 %v18922_v9, %v12922_v36  ;;  %v14959_v9 = vld [vmem:[%s20361_s7] ss:$8 sps:$4 sm:$0xff]  }
 0x8ea   :  { %v8960_v31 = vpop.permute.xlu0 %8959  ;;  %v8991_v35 = vld [vmem:[#allocation2 + $0x20] sm:$0xff] }
 0x8eb   :  { %8981 = vst.msk [vmem:[#allocation2 + $0x70] sm:$0xff] %vm7823_vm7, %v8960_v31 }
 0x8ec   :  { %v8962_v51 = vpop.permute.xlu1 %8961  ;;  %v8996_v48 = vld [vmem:[#allocation2 + $0x48] sm:$0xff] }
 0x8ed   :  { %8982 = vst.msk [vmem:[#allocation2 + $0x98] sm:$0xff] %vm7823_vm7, %v8962_v51  ;;  %v9031_v54 = vpack.c.bf16 %v8996_v48, %v8991_v35  ;;  %v9422_v48 = vadd.f32 %v18930_v28, %v12922_v36  ;;  %v14964_v28 = vld [vmem:[%s20361_s7 + $0x14] ss:$8 sps:$4 sm:$0xff]  }
 0x8ee   :  { %v8844_v52 = vpop.permute.xlu0 %8843 }
 0x8ef   :  { %8863 = vst.msk [vmem:[#allocation2 + $0xc0] sm:$0xff] %vm7700_vm4, %v8844_v52  ;;  %13461 = vmatprep.mubr.msk.bf16.mxu0 %vm9350_vm11, %v9031_v54 }
 0x8f0   :  { %v8846_v46 = vpop.permute.xlu1 %8845 }
 0x8f1   :  { %8864 = vst.msk [vmem:[#allocation2 + $0xe8] sm:$0xff] %vm7700_vm4, %v8846_v46 }
 0x8f2   :  { %v8848_v14 = vpop.permute.xlu0 %8847  ;;  %v9001_v11 = vld [vmem:[#allocation2 + $0x70] sm:$0xff] }
 0x8f3   :  { %8865 = vst.msk [vmem:[#allocation2 + $0x110] sm:$0xff] %vm7700_vm4, %v8848_v14  ;;  %v9425_v14 = vadd.f32 %v18937_v22, %v12922_v36  ;;  %v14962_v22 = vld [vmem:[%s20361_s7 + $0x10] ss:$8 sps:$4 sm:$0xff]  }
 0x8f4   :  { %v9006_v58 = vld [vmem:[#allocation2 + $0x98] sm:$0xff]  ;;  %v8850_v40 = vpop.permute.xlu1 %8849 }
 0x8f5   :  { %v9036_v13 = vpack.c.bf16 %v9006_v58, %v9001_v11  ;;  %8866 = vst.msk [vmem:[#allocation2 + $0x138] sm:$0xff] %vm7700_vm4, %v8850_v40  ;;  %v14961_v40 = vld [vmem:[%s20361_s7 + $0x4] ss:$8 sps:$4 sm:$0xff]  }
 0x8f6   :  { %v8884_v41 = vpop.permute.xlu0 %8883  ;;  %11392 = vmatprep.subr.bf16.mxu0 %v14961_v40  ;;  %v15006_v40 = vld [vmem:[%s20361_s7 + $0xf4] ss:$8 sps:$4 sm:$0xff]  }
 0x8f7   :  { %8903 = vst.msk [vmem:[#allocation2 + $0xc0] sm:$0xff] %vm7741_vm5, %v8884_v41  ;;  %13462 = vmatmul.mubr.msk.bf16.vlgmr.msra.gmra.mrb[136].mxu0 %vm9350_vm11, %v9036_v13  ;;  %v14967_v13 = vld [vmem:[%s20361_s7 + $0x24] ss:$8 sps:$4 sm:$0xff]   ;;  %v14965_v41 = vld [vmem:[%s20361_s7 + $0x20] ss:$8 sps:$4 sm:$0xff]  }
 0x8f8   :  { %v8886_v27 = vpop.permute.xlu1 %8885  ;;  %11393 = vmatpush1.bf16.msra.mxu0 %v14959_v9  ;;  %v15004_v9 = vld [vmem:[%s20361_s7 + $0xf0] ss:$8 sps:$4 sm:$0xff]  }
 0x8f9   :  { %8904 = vst.msk [vmem:[#allocation2 + $0xe8] sm:$0xff] %vm7741_vm5, %v8886_v27  ;;  %11394 = vmatprep.subr.bf16.mxu0 %v14964_v28  ;;  %v14970_v27 = vld [vmem:[%s20361_s7 + $0x34] ss:$8 sps:$4 sm:$0xff]  }
 0x8fa   :  { %v8888_v6 = vpop.permute.xlu0 %8887 }
 0x8fb   :  { %8905 = vst.msk [vmem:[#allocation2 + $0x110] sm:$0xff] %vm7741_vm5, %v8888_v6  ;;  %v14968_v6 = vld [vmem:[%s20361_s7 + $0x30] ss:$8 sps:$4 sm:$0xff]  }
 0x8fc   :  { %v8890_v5 = vpop.permute.xlu1 %8889  ;;  %11395 = vmatpush1.bf16.msra.mxu0 %v14962_v22 }
 0x8fd   :  { %8906 = vst.msk [vmem:[#allocation2 + $0x138] sm:$0xff] %vm7741_vm5, %v8890_v5  ;;  %11396 = vmatprep.subr.bf16.mxu0 %v14967_v13  ;;  %v14973_v5 = vld [vmem:[%s20361_s7 + $0x44] ss:$8 sps:$4 sm:$0xff]  }
 0x8fe   :  { %v8924_v43 = vpop.permute.xlu0 %8923 }
 0x8ff   :  { %8943 = vst.msk [vmem:[#allocation2 + $0xc0] sm:$0xff] %vm7782_vm6, %v8924_v43  ;;  %v14971_v43 = vld [vmem:[%s20361_s7 + $0x40] ss:$8 sps:$4 sm:$0xff]  }
 0x900   :  { %v8926_v32 = vpop.permute.xlu1 %8925  ;;  %11397 = vmatpush1.bf16.msra.mxu0 %v14965_v41  ;;  %v15009_v41 = vld [vmem:[%s20361_s7 + $0x104] ss:$8 sps:$4 sm:$0xff]  }
 0x901   :  { %8944 = vst.msk [vmem:[#allocation2 + $0xe8] sm:$0xff] %vm7782_vm6, %v8926_v32  ;;  %11398 = vmatprep.subr.bf16.mxu0 %v14970_v27  ;;  %v14976_v32 = vld [vmem:[%s20361_s7 + $0x54] ss:$8 sps:$4 sm:$0xff]  }
 0x902   :  { %v8928_v60 = vpop.permute.xlu0 %8927 }
 0x903   :  { %8945 = vst.msk [vmem:[#allocation2 + $0x110] sm:$0xff] %vm7782_vm6, %v8928_v60  ;;  %v14974_v60 = vld [vmem:[%s20361_s7 + $0x50] ss:$8 sps:$4 sm:$0xff]  }
 0x904   :  { %v8930_v55 = vpop.permute.xlu1 %8929  ;;  %11399 = vmatpush1.bf16.msra.mxu0 %v14968_v6 }
 0x905   :  { %8946 = vst.msk [vmem:[#allocation2 + $0x138] sm:$0xff] %vm7782_vm6, %v8930_v55  ;;  %11400 = vmatprep.subr.bf16.mxu0 %v14973_v5  ;;  %v14979_v55 = vld [vmem:[%s20361_s7 + $0x64] ss:$8 sps:$4 sm:$0xff]  }
 0x906   :  { %v8964_v17 = vpop.permute.xlu0 %8963 }
 0x907   :  { %8983 = vst.msk [vmem:[#allocation2 + $0xc0] sm:$0xff] %vm7823_vm7, %v8964_v17  ;;  %v14977_v17 = vld [vmem:[%s20361_s7 + $0x60] ss:$8 sps:$4 sm:$0xff]  }
 0x908   :  { %v8966_v30 = vpop.permute.xlu1 %8965  ;;  %11401 = vmatpush1.bf16.msra.mxu0 %v14971_v43 }
 0x909   :  { %8984 = vst.msk [vmem:[#allocation2 + $0xe8] sm:$0xff] %vm7823_vm7, %v8966_v30  ;;  %11402 = vmatprep.subr.bf16.mxu0 %v14976_v32  ;;  %v14982_v30 = vld [vmem:[%s20361_s7 + $0x74] ss:$8 sps:$4 sm:$0xff]  }
 0x90a   :  { %v8968_v12 = vpop.permute.xlu0 %8967 }
 0x90b   :  { %8985 = vst.msk [vmem:[#allocation2 + $0x110] sm:$0xff] %vm7823_vm7, %v8968_v12  ;;  %v14980_v12 = vld [vmem:[%s20361_s7 + $0x70] ss:$8 sps:$4 sm:$0xff]  }
 0x90c   :  { %v8970_v62 = vpop.permute.xlu1 %8969  ;;  %11403 = vmatpush1.bf16.msra.mxu0 %v14974_v60 }
 0x90d   :  { %8986 = vst.msk [vmem:[#allocation2 + $0x138] sm:$0xff] %vm7823_vm7, %v8970_v62  ;;  %11404 = vmatprep.subr.bf16.mxu0 %v14979_v55  ;;  %v14985_v62 = vld [vmem:[%s20361_s7 + $0x84] ss:$8 sps:$4 sm:$0xff]  }
 0x90e   :  { %v9011_v3 = vld [vmem:[#allocation2 + $0xc0] sm:$0xff] }
 0x910   :  { %v9016_v15 = vld [vmem:[#allocation2 + $0xe8] sm:$0xff]  ;;  %11405 = vmatpush1.bf16.msra.mxu0 %v14977_v17 }
 0x911   :  { %v9041_v2 = vpack.c.bf16 %v9016_v15, %v9011_v3  ;;  %11406 = vmatprep.subr.bf16.mxu0 %v14982_v30  ;;  %v14983_v3 = vld [vmem:[%s20361_s7 + $0x80] ss:$8 sps:$4 sm:$0xff]   ;;  %v14988_v15 = vld [vmem:[%s20361_s7 + $0x94] ss:$8 sps:$4 sm:$0xff]  }
 0x912   :  { %v9021_v50 = vld [vmem:[#allocation2 + $0x110] sm:$0xff] }
 0x913   :  { %13465 = vmatprep.mubr.msk.bf16.mxu0 %vm9350_vm11, %v9041_v2  ;;  %v14986_v2 = vld [vmem:[%s20361_s7 + $0x90] ss:$8 sps:$4 sm:$0xff]  }
 0x914   :  { %v9026_v63 = vld [vmem:[#allocation2 + $0x138] sm:$0xff]  ;;  %11407 = vmatpush1.bf16.msra.mxu0 %v14980_v12 }
 0x915   :  { %v9046_v25 = vpack.c.bf16 %v9026_v63, %v9021_v50  ;;  %11408 = vmatprep.subr.bf16.mxu0 %v14985_v62  ;;  %v14991_v50 = vld [vmem:[%s20361_s7 + $0xa4] ss:$8 sps:$4 sm:$0xff]   ;;  %v14989_v63 = vld [vmem:[%s20361_s7 + $0xa0] ss:$8 sps:$4 sm:$0xff]  }
 0x917   :  { %13466 = vmatmul.mubr.msk.bf16.gmra.mrb[140].mxu0 %vm9350_vm11, %v9046_v25  ;;  %v15380_v25 = vmov 1983009808  }
 0x918   :  { %11409 = vmatpush1.bf16.msra.mxu0 %v14983_v3  ;;  %v9570_v36 = vunpack.c.l.s4 %v15380_v25 }
 0x919   :  { %11410 = vmatprep.subr.bf16.mxu0 %v14988_v15 }
 0x91c   :  { %11411 = vmatpush1.bf16.msra.mxu0 %v14986_v2 }
 0x91d   :  { %11412 = vmatprep.subr.bf16.mxu0 %v14991_v50 }
 0x920   :  { %11413 = vmatpush1.bf16.msra.mxu0 %v14989_v63 }
 0x921   :  { %v13321_v39 = vpop.f32.mrb[120].mxu0 }
 0x922   :  { %v13322_v24 = vpop.f32.mrb[121].mxu0 }
 0x923   :  { %v13323_v7 = vadd.f32 %v13322_v24, %v13321_v39  ;;  %v13324_v4 = vpop.f32.mrb[122].mxu0  ;;  %v9572_v39 = vlaneseq  ;;  %v14994_v24 = vld [vmem:[%s20361_s7 + $0xb4] ss:$8 sps:$4 sm:$0xff]  }
 0x924   :  { %v13325_v53 = vpop.f32.mrb[123].mxu0  ;;  %11414 = vmatprep.subr.bf16.mxu0 %v14994_v24 }
 0x925   :  { %v13326_v20 = vadd.f32 %v13325_v53, %v13324_v4  ;;  %v19340_v47 = vadd.f32 %v13323_v7, %v9398_v16  ;;  %v14992_v16 = vld [vmem:[%s20361_s7 + $0xb0] ss:$8 sps:$4 sm:$0xff]   ;;  %v9571_v7 = vunpack.c.0.s8 %v9570_v36  ;;  %v19434_v4 = vshrl.u32 %v9572_v39, 7  ;;  %v14997_v53 = vld [vmem:[%s20361_s7 + $0xc4] ss:$8 sps:$4 sm:$0xff]  }
 0x926   :  { %11415 = vmatpush1.bf16.msra.mxu0 %v14992_v16 }
 0x927   :  { %v19342_v38 = vadd.f32 %v13326_v20, %v9401_v59  ;;  %v14995_v20 = vld [vmem:[%s20361_s7 + $0xc0] ss:$8 sps:$4 sm:$0xff]   ;;  %11416 = vmatprep.subr.bf16.mxu0 %v14997_v53 }
 0x929   :  { %v13327_v23 = vpop.f32.mrb[124].mxu0 }
 0x92a   :  { %v13328_v0 = vpop.f32.mrb[125].mxu0  ;;  %11417 = vmatpush1.bf16.msra.mxu0 %v14995_v20 }
 0x92b   :  { %v13329_v29 = vadd.f32 %v13328_v0, %v13327_v23  ;;  %v13330_v49 = vpop.f32.mrb[126].mxu0 }
 0x92c   :  { %v13331_v10 = vpop.f32.mrb[127].mxu0 }
 0x92d   :  { %v13332_v37 = vadd.f32 %v13331_v10, %v13330_v49  ;;  %v19346_v21 = vadd.f32 %v13329_v29, %v9406_v8  ;;  %v19444_v8 = vsub.s32 %v9571_v7, %v19434_v4 }
 0x92f   :  { %v19348_v19 = vadd.f32 %v13332_v37, %v9409_v26 }
 0x931   :  { %v13333_v45 = vpop.f32.mrb[128].mxu0 }
 0x932   :  { %v13334_v57 = vpop.f32.mrb[129].mxu0 }
 0x933   :  { %v13335_v34 = vadd.f32 %v13334_v57, %v13333_v45  ;;  %v13336_v56 = vpop.f32.mrb[130].mxu0  ;;  %v15000_v45 = vld [vmem:[%s20361_s7 + $0xd4] ss:$8 sps:$4 sm:$0xff]  }
 0x934   :  { %v13337_v33 = vpop.f32.mrb[131].mxu0  ;;  %11418 = vmatprep.subr.bf16.mxu0 %v15000_v45  ;;  %v15382_v45 = vmov 2  }
 0x935   :  { %v13338_v18 = vadd.f32 %v13337_v33, %v13336_v56  ;;  %v19352_v31 = vadd.f32 %v13335_v34, %v9414_v44  ;;  %v14998_v44 = vld [vmem:[%s20361_s7 + $0xd0] ss:$8 sps:$4 sm:$0xff]  }
 0x936   :  { %11419 = vmatpush1.bf16.msra.mxu0 %v14998_v44 }
 0x937   :  { %v19354_v51 = vadd.f32 %v13338_v18, %v9417_v61 }
 0x939   :  { %v13339_v42 = vpop.f32.mrb[132].mxu0 }
 0x93a   :  { %v13340_v35 = vpop.f32.mrb[133].mxu0 }
 0x93b   :  { %v13341_v54 = vadd.f32 %v13340_v35, %v13339_v42  ;;  %v13342_v52 = vpop.f32.mrb[134].mxu0 }
 0x93c   :  { %v13343_v46 = vpop.f32.mrb[135].mxu0 }
 0x93d   :  { %v13344_v1 = vadd.f32 %v13343_v46, %v13342_v52  ;;  %v19358_v11 = vadd.f32 %v13341_v54, %v9422_v48  ;;  %v15001_v52 = vld [vmem:[%s20361_s7 + $0xe0] ss:$8 sps:$4 sm:$0xff]  }
 0x93f   :  { %v19360_v58 = vadd.f32 %v13344_v1, %v9425_v14 }
 0x9ca   :  { %v13463_v59 = vpop.f32.mrb[136].mxu0 }
 0x9cb   :  { %v9536_v23 = vadd.f32 %v13463_v59, %v19346_v21  ;;  %v9527_v0 = vpop.f32.mrb[137].mxu0 }
 0x9cc   :  { %v9528_v29 = vadd.f32 %v9527_v0, %v19340_v47  ;;  %v13464_v49 = vpop.f32.mrb[138].mxu0 }
 0x9cd   :  { %v9560_v10 = vmax.f32 %v9536_v23, 0.0  ;;  %v9539_v26 = vadd.f32 %v13464_v49, %v19348_v19  ;;  %v9530_v37 = vpop.f32.mrb[139].mxu0 }
 0x9ce   :  { %v9558_v57 = vmax.f32 %v9528_v29, 0.0  ;;  %v9531_v21 = vadd.f32 %v9530_v37, %v19342_v38  ;;  %v15003_v38 = vld [vmem:[%s20361_s7 + $0xe4] ss:$8 sps:$4 sm:$0xff]   ;;  %v15381_v37 = vmov 1  }
 0x9cf   :  { %v9640_v34 = vcombine.high %v9560_v10, %v9560_v10  ;;  %v9561_v47 = vmax.f32 %v9539_v26, 0.0  ;;  %9626 = vst.msk [vmem:[#allocation3 + $0x8] sm:$0x3] %vm9566_vm12, %v9560_v10  ;;  %11420 = vmatprep.subr.bf16.mxu0 %v15003_v38  ;;  %v9634_v28 = vrot.slane %v9560_v10, %v19444_v8  ;;  %v9785_v26 = vld [vmem:[%s20356_s2] sm:$0x3]  ;;  %13908 = vset.pattern.permute.xlu0 %v15381_v37 }
 0x9d0   :  { %v9575_v56 = vrot.slane %v9558_v57, %v19444_v8  ;;  %v9582_v19 = vcombine.high %v9558_v57, %v9558_v57  ;;  %v9559_v33 = vmax.f32 %v9531_v21, 0.0  ;;  %9567 = vst.msk [vmem:[#allocation3] sm:$0x3] %vm9566_vm12, %v9558_v57  ;;  %11421 = vmatpush1.bf16.msra.mxu0 %v15001_v52 }
 0x9d1   :  { %v9647_v61 = vrot.slane %v9640_v34, %v19444_v8  ;;  %v9669_v18 = vcombine.high %v9561_v47, %v9561_v47  ;;  %9655 = vst.msk [vmem:[#allocation3 + $0xc] sm:$0x3] %vm9566_vm12, %v9561_v47  ;;  %11422 = vmatprep.subr.bf16.mxu0 %v15006_v40  ;;  %v9635_v27 = vcombine.high %v9634_v28, %v9634_v28  ;;  %v15016_v40 = vld [vmem:[%s20361_s7 + $0x124] ss:$8 sps:$4 sm:$0xff]   ;;  %v15014_v28 = vld [vmem:[%s20361_s7 + $0x120] ss:$8 sps:$4 sm:$0xff]  }
 0x9d2   :  { %v9576_v42 = vcombine.high %v9575_v56, %v9575_v56  ;;  %v9589_v35 = vrot.slane %v9582_v19, %v19444_v8  ;;  %v9605_v48 = vrot.slane %v9559_v33, %v19444_v8  ;;  %v9611_v54 = vcombine.high %v9559_v33, %v9559_v33  ;;  %9597 = vst.msk [vmem:[#allocation3 + $0x4] sm:$0x3] %vm9566_vm12, %v9559_v33 }
 0x9d3   :  { %v9676_v46 = vrot.slane %v9669_v18, %v19444_v8  ;;  %9649 = vst.msk [vmem:[#allocation3 + $0xa] sm:$0x3] %vm9566_vm12, %v9647_v61  ;;  %v9663_v6 = vrot.slane %v9561_v47, %v19444_v8  ;;  %v9650_v5 = vcombine.high %v9647_v61, %v9647_v61 }
 0x9d4   :  { %v9618_v14 = vrot.slane %v9611_v54, %v19444_v8  ;;  %9577 = vrot.lane.b32.xlu0 %v9576_v42, %s15376_s28  ;;  %v9592_v1 = vcombine.high %v9589_v35, %v9589_v35  ;;  %9591 = vst.msk [vmem:[#allocation3 + $0x2] sm:$0x3] %vm9566_vm12, %v9589_v35  ;;  %v9606_v22 = vcombine.high %v9605_v48, %v9605_v48  ;;  %v15007_v54 = vld [vmem:[%s20361_s7 + $0x100] ss:$8 sps:$4 sm:$0xff]  }
 0x9d5   :  { %9678 = vst.msk [vmem:[#allocation3 + $0xe] sm:$0x3] %vm9566_vm12, %v9676_v46  ;;  %11423 = vmatpush1.bf16.msra.mxu0 %v15004_v9  ;;  %v9664_v43 = vcombine.high %v9663_v6, %v9663_v6  ;;  %v9679_v32 = vcombine.high %v9676_v46, %v9676_v46  ;;  %v15011_v9 = vld [vmem:[%s20361_s7 + $0x110] ss:$8 sps:$4 sm:$0xff]  }
 0x9d6   :  { %9593 = vrot.lane.b32.xlu1 %v9592_v1, %s15376_s28  ;;  %9620 = vst.msk [vmem:[#allocation3 + $0x6] sm:$0x3] %vm9566_vm12, %v9618_v14  ;;  %v9621_v13 = vcombine.high %v9618_v14, %v9618_v14  ;;  %11433 = vmatprep.subr.bf16.mxu0 %v15009_v41  ;;  %v15013_v14 = vld [vmem:[%s20361_s7 + $0x114] ss:$8 sps:$4 sm:$0xff]  }
 0x9d8   :  { %9607 = vrot.lane.b32.xlu0 %v9606_v22, %s15376_s28  ;;  %v15019_v22 = vld [vmem:[%s20361_s7 + $0x134] ss:$8 sps:$4 sm:$0xff]  }
 0x9da   :  { %9622 = vrot.lane.b32.xlu1 %v9621_v13, %s15376_s28  ;;  %v15017_v13 = vld [vmem:[%s20361_s7 + $0x130] ss:$8 sps:$4 sm:$0xff]  }
 0x9dc   :  { %9636 = vrot.lane.b32.xlu0 %v9635_v27, %s15376_s28  ;;  %v15022_v27 = vld [vmem:[%s20361_s7 + $0x144] ss:$8 sps:$4 sm:$0xff]  }
 0x9de   :  { %9651 = vrot.lane.b32.xlu1 %v9650_v5, %s15376_s28  ;;  %v15020_v5 = vld [vmem:[%s20361_s7 + $0x140] ss:$8 sps:$4 sm:$0xff]  }
 0x9e0   :  { %9665 = vrot.lane.b32.xlu0 %v9664_v43, %s15376_s28 }
 0x9e2   :  { %9680 = vrot.lane.b32.xlu1 %v9679_v32, %s15376_s28  ;;  %v15025_v32 = vld [vmem:[%s20361_s7 + $0x154] ss:$8 sps:$4 sm:$0xff]  }
 0x9ea   :  { %v13467_v60 = vpop.f32.mrb[140].mxu0 }
 0x9eb   :  { %v9552_v55 = vadd.f32 %v13467_v60, %v19358_v11  ;;  %v9543_v17 = vpop.f32.mrb[141].mxu0 }
 0x9ec   :  { %v9544_v30 = vadd.f32 %v9543_v17, %v19352_v31  ;;  %v13468_v12 = vpop.f32.mrb[142].mxu0 }
 0x9ed   :  { %v9564_v62 = vmax.f32 %v9552_v55, 0.0  ;;  %v9555_v3 = vadd.f32 %v13468_v12, %v19360_v58  ;;  %v9546_v15 = vpop.f32.mrb[143].mxu0  ;;  %v15023_v55 = vld [vmem:[%s20361_s7 + $0x150] ss:$8 sps:$4 sm:$0xff]  }
 0x9ee   :  { %v9562_v2 = vmax.f32 %v9544_v30, 0.0  ;;  %v9547_v50 = vadd.f32 %v9546_v15, %v19354_v51  ;;  %v15028_v30 = vld [vmem:[%s20361_s7 + $0x164] ss:$8 sps:$4 sm:$0xff]   ;;  %v15031_v15 = vld [vmem:[%s20361_s7 + $0x174] ss:$8 sps:$4 sm:$0xff]  }
 0x9ef   :  { %v9756_v63 = vcombine.high %v9564_v62, %v9564_v62  ;;  %v9565_v25 = vmax.f32 %v9555_v3, 0.0  ;;  %9742 = vst.msk [vmem:[#allocation3 + $0x18] sm:$0x3] %vm9566_vm12, %v9564_v62  ;;  %v9750_v59 = vrot.slane %v9564_v62, %v19444_v8  ;;  %v15026_v62 = vld [vmem:[%s20361_s7 + $0x160] ss:$8 sps:$4 sm:$0xff]  }
 0x9f0   :  { %v9692_v36 = vrot.slane %v9562_v2, %v19444_v8  ;;  %v9698_v39 = vcombine.high %v9562_v2, %v9562_v2  ;;  %9684 = vst.msk [vmem:[#allocation3 + $0x10] sm:$0x3] %vm9566_vm12, %v9562_v2  ;;  %v9563_v11 = vmax.f32 %v9547_v50, 0.0  ;;  %v15029_v2 = vld [vmem:[%s20361_s7 + $0x170] ss:$8 sps:$4 sm:$0xff]  }
 0x9f1   :  { %v9763_v31 = vrot.slane %v9756_v63, %v19444_v8  ;;  %9771 = vst.msk [vmem:[#allocation3 + $0x1c] sm:$0x3] %vm9566_vm12, %v9565_v25  ;;  %v9751_v0 = vcombine.high %v9750_v59, %v9750_v59  ;;  %v9779_v29 = vrot.slane %v9565_v25, %v19444_v8  ;;  %v15034_v50 = vld [vmem:[%s20361_s7 + $0x184] ss:$8 sps:$4 sm:$0xff]   ;;  %v15032_v63 = vld [vmem:[%s20361_s7 + $0x180] ss:$8 sps:$4 sm:$0xff]  }
 0x9f2   :  { %v9693_v24 = vcombine.high %v9692_v36, %v9692_v36  ;;  %v9705_v58 = vrot.slane %v9698_v39, %v19444_v8  ;;  %v9721_v16 = vrot.slane %v9563_v11, %v19444_v8  ;;  %v9727_v51 = vcombine.high %v9563_v11, %v9563_v11  ;;  %9713 = vst.msk [vmem:[#allocation3 + $0x14] sm:$0x3] %vm9566_vm12, %v9563_v11  ;;  %v15037_v25 = vld [vmem:[%s20361_s7 + $0x194] ss:$8 sps:$4 sm:$0xff]   ;;  %v15035_v36 = vld [vmem:[%s20361_s7 + $0x190] ss:$8 sps:$4 sm:$0xff]  }
 0x9f3   :  { %9765 = vst.msk [vmem:[#allocation3 + $0x1a] sm:$0x3] %vm9566_vm12, %v9763_v31  ;;  %v9766_v49 = vcombine.high %v9763_v31, %v9763_v31  ;;  %v9780_v10 = vcombine.high %v9779_v29, %v9779_v29  ;;  %v15040_v39 = vld [vmem:[%s20361_s7 + $0x1a4] ss:$8 sps:$4 sm:$0xff]   ;;  %v15038_v11 = vld [vmem:[%s20361_s7 + $0x1a0] ss:$8 sps:$4 sm:$0xff]  }
 0x9f4   :  { %9707 = vst.msk [vmem:[#allocation3 + $0x12] sm:$0x3] %vm9566_vm12, %v9705_v58  ;;  %v9734_v7 = vrot.slane %v9727_v51, %v19444_v8  ;;  %9694 = vrot.lane.b32.xlu0 %v9693_v24, %s15376_s28  ;;  %v9708_v53 = vcombine.high %v9705_v58, %v9705_v58  ;;  %v9722_v20 = vcombine.high %v9721_v16, %v9721_v16  ;;  %v15043_v31 = vld [vmem:[%s20361_s7 + $0x1b4] ss:$8 sps:$4 sm:$0xff]   ;;  %v15041_v24 = vld [vmem:[%s20361_s7 + $0x1b0] ss:$8 sps:$4 sm:$0xff]  }
 0x9f5   :  { %v15046_v58 = vld [vmem:[%s20361_s7 + $0x1c4] ss:$8 sps:$4 sm:$0xff]   ;;  %v15044_v16 = vld [vmem:[%s20361_s7 + $0x1c0] ss:$8 sps:$4 sm:$0xff]   ;;  %v15049_v51 = vld [vmem:[%s20361_s7 + $0x1d4] ss:$8 sps:$4 sm:$0xff]  }
 0x9f6   :  { %9736 = vst.msk [vmem:[#allocation3 + $0x16] sm:$0x3] %vm9566_vm12, %v9734_v7  ;;  %9709 = vrot.lane.b32.xlu1 %v9708_v53, %s15376_s28  ;;  %v9737_v23 = vcombine.high %v9734_v7, %v9734_v7  ;;  %v15047_v7 = vld [vmem:[%s20361_s7 + $0x1d0] ss:$8 sps:$4 sm:$0xff]   ;;  %v15052_v53 = vld [vmem:[%s20361_s7 + $0x1e4] ss:$8 sps:$4 sm:$0xff]  }
 0x9f7   :  { %v15053_v29 = vld [vmem:[%s20361_s7 + $0x1f0] ss:$8 sps:$4 sm:$0xff]  }
 0x9f8   :  { %9723 = vrot.lane.b32.xlu0 %v9722_v20, %s15376_s28  ;;  %v15050_v20 = vld [vmem:[%s20361_s7 + $0x1e0] ss:$8 sps:$4 sm:$0xff]  }
 0x9fa   :  { %9738 = vrot.lane.b32.xlu1 %v9737_v23, %s15376_s28  ;;  %v15055_v23 = vld [vmem:[%s20361_s7 + $0x1f4] ss:$8 sps:$4 sm:$0xff]  }
 0x9fc   :  { %9752 = vrot.lane.b32.xlu0 %v9751_v0, %s15376_s28 }
 0x9fe   :  { %9767 = vrot.lane.b32.xlu1 %v9766_v49, %s15376_s28  ;;  %v15058_v49 = vld [vmem:[%s20361_s7 + $0x204] ss:$8 sps:$4 sm:$0xff]  }
 0xa00   :  { %9781 = vrot.lane.b32.xlu0 %v9780_v10, %s15376_s28 }
 0xa02   :  { %10134 = vperm.xlu1 %13907, %v9785_v26  }
 0xa04   :  { %10153 = vperm.xlu0 %13908, %v9785_v26  }
 0xa06   :  { %13909 = vset.pattern.permute.xlu1 %v15382_v45  ;;  %v15061_v45 = vld [vmem:[%s20361_s7 + $0x214] ss:$8 sps:$4 sm:$0xff]  }
 0xa07   :  { %10174 = vperm.xlu1 %13909, %v9785_v26   ;;  %v15056_v26 = vld [vmem:[%s20361_s7 + $0x200] ss:$8 sps:$4 sm:$0xff]  }
 0xa46   :  { %v9578_v57 = vpop.permute.xlu0 %9577 }
 0xa47   :  { %9581 = vst.msk [vmem:[#allocation3] sm:$0x3] %vm9580_vm13, %v9578_v57 }
 0xa48   :  { %v9594_v21 = vpop.permute.xlu1 %9593 }
 0xa49   :  { %9596 = vst.msk [vmem:[#allocation3 + $0x2] sm:$0x3] %vm9580_vm13, %v9594_v21  ;;  %v15059_v21 = vld [vmem:[%s20361_s7 + $0x210] ss:$8 sps:$4 sm:$0xff]  }
 0xa4a   :  { %v9608_v44 = vpop.permute.xlu0 %9607 }
 0xa4b   :  { %9610 = vst.msk [vmem:[#allocation3 + $0x4] sm:$0x3] %vm9580_vm13, %v9608_v44  ;;  %v15064_v44 = vld [vmem:[%s20361_s7 + $0x224] ss:$8 sps:$4 sm:$0xff]  }
 0xa4c   :  { %v9623_v34 = vpop.permute.xlu1 %9622 }
 0xa4d   :  { %9625 = vst.msk [vmem:[#allocation3 + $0x6] sm:$0x3] %vm9580_vm13, %v9623_v34  ;;  %v15062_v34 = vld [vmem:[%s20361_s7 + $0x220] ss:$8 sps:$4 sm:$0xff]  }
 0xa4e   :  { %v9637_v47 = vpop.permute.xlu0 %9636 }
 0xa4f   :  { %9639 = vst.msk [vmem:[#allocation3 + $0x8] sm:$0x3] %vm9580_vm13, %v9637_v47  ;;  %v15067_v47 = vld [vmem:[%s20361_s7 + $0x234] ss:$8 sps:$4 sm:$0xff]  }
 0xa50   :  { %v9652_v56 = vpop.permute.xlu1 %9651 }
 0xa51   :  { %9654 = vst.msk [vmem:[#allocation3 + $0xa] sm:$0x3] %vm9580_vm13, %v9652_v56  ;;  %v15065_v56 = vld [vmem:[%s20361_s7 + $0x230] ss:$8 sps:$4 sm:$0xff]  }
 0xa52   :  { %v9666_v19 = vpop.permute.xlu0 %9665 }
 0xa53   :  { %9668 = vst.msk [vmem:[#allocation3 + $0xc] sm:$0x3] %vm9580_vm13, %v9666_v19  ;;  %v15070_v19 = vld [vmem:[%s20361_s7 + $0x244] ss:$8 sps:$4 sm:$0xff]  }
 0xa54   :  { %v9681_v33 = vpop.permute.xlu1 %9680  ;;  %v9786_v61 = vld [vmem:[#allocation3] sm:$0xff] }
 0xa55   :  { %9683 = vst.msk [vmem:[#allocation3 + $0xe] sm:$0x3] %vm9580_vm13, %v9681_v33  ;;  %v9801_v18 = vrot.slane %v9786_v61, %v19444_v8  ;;  %v9794_v38 = vcombine.high %v9786_v61, %v9786_v61  ;;  %v15068_v33 = vld [vmem:[%s20361_s7 + $0x240] ss:$8 sps:$4 sm:$0xff]   ;;  %v15073_v61 = vld [vmem:[%s20361_s7 + $0x254] ss:$8 sps:$4 sm:$0xff]  }
 0xa57   :  { %v9809_v42 = vcombine.high %v9801_v18, %v9801_v18  ;;  %v19532_v35 = vrot.slane %v9794_v38, %v19444_v8  ;;  %v9876_v46 = vpack.c.bf16 %v9801_v18, %v9801_v18  ;;  %v15071_v18 = vld [vmem:[%s20361_s7 + $0x250] ss:$8 sps:$4 sm:$0xff]   ;;  %v15076_v38 = vld [vmem:[%s20361_s7 + $0x264] ss:$8 sps:$4 sm:$0xff]  }
 0xa59   :  { %v9877_v48 = vpack.c.bf16 %v9809_v42, %v9809_v42  ;;  %v9810_v52 = vcombine.high %v19532_v35, %v19532_v35  ;;  %v9878_v37 = vpack.c.bf16 %v19532_v35, %v19532_v35  ;;  %v15074_v42 = vld [vmem:[%s20361_s7 + $0x260] ss:$8 sps:$4 sm:$0xff]   ;;  %v15079_v35 = vld [vmem:[%s20361_s7 + $0x274] ss:$8 sps:$4 sm:$0xff]  }
 0xa5b   :  { %11424 = vmatprep.mubr.bf16.mxu0 %v9877_v48  ;;  %v9879_v1 = vpack.c.bf16 %v9810_v52, %v9810_v52  ;;  %v15077_v48 = vld [vmem:[%s20361_s7 + $0x270] ss:$8 sps:$4 sm:$0xff]   ;;  %v15080_v52 = vld [vmem:[%s20361_s7 + $0x280] ss:$8 sps:$4 sm:$0xff]  }
 0xa5c   :  { %11425 = vmatmul.mubr.bf16.vlgmr.msra.gmra.mrb[144].mxu0 %v9876_v46  ;;  %v19627_v59 = vld [vmem:[#allocation3 + $0x8] sm:$0xff]  ;;  %v15085_v46 = vld [vmem:[%s20361_s7 + $0x294] ss:$8 sps:$4 sm:$0xff]  }
 0xa5d   :  { %11434 = vmatpush1.bf16.msra.mxu0 %v15007_v54  ;;  %11465 = vmatprep.mubr.bf16.mxu0 %v9879_v1  ;;  %v19637_v0 = vrot.slane %v19627_v59, %v19444_v8  ;;  %v15082_v54 = vld [vmem:[%s20361_s7 + $0x284] ss:$8 sps:$4 sm:$0xff]  }
 0xa5e   :  { %11435 = vmatprep.subr.bf16.mxu0 %v15013_v14  ;;  %v15083_v14 = vld [vmem:[%s20361_s7 + $0x290] ss:$8 sps:$4 sm:$0xff]   ;;  %v15088_v1 = vld [vmem:[%s20361_s7 + $0x2a4] ss:$8 sps:$4 sm:$0xff]  }
 0xa5f   :  { %v9826_v10 = vcombine.high %v19637_v0, %v19637_v0 }
 0xa61   :  { %11436 = vmatpush1.bf16.msra.mxu0 %v15011_v9  ;;  %v9881_v57 = vpack.c.bf16 %v9826_v10, %v9826_v10  ;;  %v15086_v9 = vld [vmem:[%s20361_s7 + $0x2a0] ss:$8 sps:$4 sm:$0xff]   ;;  %v15138_v10 = vld [vmem:[%s20361_s7 + $0x3b0] ss:$8 sps:$4 sm:$0xff]  }
 0xa62   :  { %11437 = vmatprep.subr.bf16.mxu0 %v15016_v40  ;;  %v15091_v40 = vld [vmem:[%s20361_s7 + $0x2b4] ss:$8 sps:$4 sm:$0xff]  }
 0xa65   :  { %11438 = vmatpush1.bf16.msra.mxu0 %v15014_v28  ;;  %v15089_v28 = vld [vmem:[%s20361_s7 + $0x2b0] ss:$8 sps:$4 sm:$0xff]  }
 0xa66   :  { %v9695_v41 = vpop.permute.xlu0 %9694  ;;  %11439 = vmatprep.subr.bf16.mxu0 %v15019_v22  ;;  %v15094_v22 = vld [vmem:[%s20361_s7 + $0x2c4] ss:$8 sps:$4 sm:$0xff]  }
 0xa67   :  { %9697 = vst.msk [vmem:[#allocation3 + $0x10] sm:$0x3] %vm9580_vm13, %v9695_v41  ;;  %v15097_v41 = vld [vmem:[%s20361_s7 + $0x2d4] ss:$8 sps:$4 sm:$0xff]  }
 0xa68   :  { %v9710_v6 = vpop.permute.xlu1 %9709 }
 0xa69   :  { %9712 = vst.msk [vmem:[#allocation3 + $0x12] sm:$0x3] %vm9580_vm13, %v9710_v6  ;;  %11440 = vmatpush1.bf16.msra.mxu0 %v15017_v13  ;;  %v15092_v13 = vld [vmem:[%s20361_s7 + $0x2c0] ss:$8 sps:$4 sm:$0xff]   ;;  %v15100_v6 = vld [vmem:[%s20361_s7 + $0x2e4] ss:$8 sps:$4 sm:$0xff]  }
 0xa6a   :  { %v9724_v43 = vpop.permute.xlu0 %9723  ;;  %11441 = vmatprep.subr.bf16.mxu0 %v15022_v27  ;;  %v15095_v27 = vld [vmem:[%s20361_s7 + $0x2d0] ss:$8 sps:$4 sm:$0xff]  }
 0xa6b   :  { %9726 = vst.msk [vmem:[#allocation3 + $0x14] sm:$0x3] %vm9580_vm13, %v9724_v43  ;;  %v15098_v43 = vld [vmem:[%s20361_s7 + $0x2e0] ss:$8 sps:$4 sm:$0xff]  }
 0xa6c   :  { %v9739_v60 = vpop.permute.xlu1 %9738 }
 0xa6d   :  { %9741 = vst.msk [vmem:[#allocation3 + $0x16] sm:$0x3] %vm9580_vm13, %v9739_v60  ;;  %11442 = vmatpush1.bf16.msra.mxu0 %v15020_v5  ;;  %v9811_v5 = vcombine.high %v19627_v59, %v19627_v59  ;;  %v15129_v59 = vld [vmem:[%s20361_s7 + $0x380] ss:$8 sps:$4 sm:$0xff]  }
 0xa6e   :  { %v9753_v17 = vpop.permute.xlu0 %9752  ;;  %11443 = vmatprep.subr.bf16.mxu0 %v15025_v32  ;;  %v15103_v32 = vld [vmem:[%s20361_s7 + $0x2f4] ss:$8 sps:$4 sm:$0xff]  }
 0xa6f   :  { %9755 = vst.msk [vmem:[#allocation3 + $0x18] sm:$0x3] %vm9580_vm13, %v9753_v17  ;;  %v19742_v60 = vrot.slane %v9811_v5, %v19444_v8  ;;  %v15106_v17 = vld [vmem:[%s20361_s7 + $0x304] ss:$8 sps:$4 sm:$0xff]  }
 0xa70   :  { %v9768_v12 = vpop.permute.xlu1 %9767 }
 0xa71   :  { %9770 = vst.msk [vmem:[#allocation3 + $0x1a] sm:$0x3] %vm9580_vm13, %v9768_v12  ;;  %11444 = vmatpush1.bf16.msra.mxu0 %v15023_v55  ;;  %v15101_v55 = vld [vmem:[%s20361_s7 + $0x2f0] ss:$8 sps:$4 sm:$0xff]   ;;  %v15104_v12 = vld [vmem:[%s20361_s7 + $0x300] ss:$8 sps:$4 sm:$0xff]  }
 0xa72   :  { %v9782_v3 = vpop.permute.xlu0 %9781  ;;  %11445 = vmatprep.subr.bf16.mxu0 %v15028_v30  ;;  %v9827_v30 = vcombine.high %v19742_v60, %v19742_v60 }
 0xa73   :  { %9784 = vst.msk [vmem:[#allocation3 + $0x1c] sm:$0x3] %vm9580_vm13, %v9782_v3  ;;  %v15110_v3 = vld [vmem:[%s20361_s7 + $0x314] ss:$8 sps:$4 sm:$0xff]  }
 0xa75   :  { %11446 = vmatpush1.bf16.msra.mxu0 %v15026_v62  ;;  %v9880_v62 = vpack.c.bf16 %v19637_v0, %v19637_v0  ;;  %v15137_v0 = vld [vmem:[%s20361_s7 + $0x3a4] ss:$8 sps:$4 sm:$0xff]  }
 0xa76   :  { %11447 = vmatprep.subr.bf16.mxu0 %v15031_v15  ;;  %v9883_v15 = vpack.c.bf16 %v9827_v30, %v9827_v30  ;;  %v15180_v30 = vld [vmem:[%s20361_s7 + $0x490] ss:$8 sps:$4 sm:$0xff]  }
 0xa79   :  { %11448 = vmatpush1.bf16.msra.mxu0 %v15029_v2  ;;  %v15108_v2 = vld [vmem:[%s20361_s7 + $0x310] ss:$8 sps:$4 sm:$0xff]  }
 0xa7a   :  { %11449 = vmatprep.subr.bf16.mxu0 %v15034_v50  ;;  %v15113_v50 = vld [vmem:[%s20361_s7 + $0x324] ss:$8 sps:$4 sm:$0xff]  }
 0xa7d   :  { %11450 = vmatpush1.bf16.msra.mxu0 %v15032_v63  ;;  %v15111_v63 = vld [vmem:[%s20361_s7 + $0x320] ss:$8 sps:$4 sm:$0xff]  }
 0xa7e   :  { %11451 = vmatprep.subr.bf16.mxu0 %v15037_v25  ;;  %v15116_v25 = vld [vmem:[%s20361_s7 + $0x334] ss:$8 sps:$4 sm:$0xff]  }
 0xa81   :  { %11452 = vmatpush1.bf16.msra.mxu0 %v15035_v36  ;;  %v15114_v36 = vld [vmem:[%s20361_s7 + $0x330] ss:$8 sps:$4 sm:$0xff]  }
 0xa82   :  { %11453 = vmatprep.subr.bf16.mxu0 %v15040_v39  ;;  %v15119_v39 = vld [vmem:[%s20361_s7 + $0x344] ss:$8 sps:$4 sm:$0xff]  }
 0xa85   :  { %11454 = vmatpush1.bf16.msra.mxu0 %v15038_v11  ;;  %v15117_v11 = vld [vmem:[%s20361_s7 + $0x340] ss:$8 sps:$4 sm:$0xff]  }
 0xa86   :  { %11455 = vmatprep.subr.bf16.mxu0 %v15043_v31  ;;  %v15122_v31 = vld [vmem:[%s20361_s7 + $0x354] ss:$8 sps:$4 sm:$0xff]  }
 0xa89   :  { %11456 = vmatpush1.bf16.msra.mxu0 %v15041_v24  ;;  %v15120_v24 = vld [vmem:[%s20361_s7 + $0x350] ss:$8 sps:$4 sm:$0xff]  }
 0xa8a   :  { %11457 = vmatprep.subr.bf16.mxu0 %v15046_v58  ;;  %v15125_v58 = vld [vmem:[%s20361_s7 + $0x364] ss:$8 sps:$4 sm:$0xff]  }
 0xa8d   :  { %11458 = vmatpush1.bf16.msra.mxu0 %v15044_v16  ;;  %v15123_v16 = vld [vmem:[%s20361_s7 + $0x360] ss:$8 sps:$4 sm:$0xff]  }
 0xa8e   :  { %11459 = vmatprep.subr.bf16.mxu0 %v15049_v51  ;;  %v15128_v51 = vld [vmem:[%s20361_s7 + $0x374] ss:$8 sps:$4 sm:$0xff]  }
 0xa91   :  { %11460 = vmatpush1.bf16.msra.mxu0 %v15047_v7  ;;  %v15126_v7 = vld [vmem:[%s20361_s7 + $0x370] ss:$8 sps:$4 sm:$0xff]  }
 0xa92   :  { %11461 = vmatprep.subr.bf16.mxu0 %v15052_v53  ;;  %v15131_v53 = vld [vmem:[%s20361_s7 + $0x384] ss:$8 sps:$4 sm:$0xff]  }
 0xa95   :  { %11462 = vmatpush1.bf16.msra.mxu0 %v15050_v20  ;;  %v15134_v20 = vld [vmem:[%s20361_s7 + $0x394] ss:$8 sps:$4 sm:$0xff]  }
 0xa96   :  { %11463 = vmatprep.subr.bf16.mxu0 %v15055_v23  ;;  %v15132_v23 = vld [vmem:[%s20361_s7 + $0x390] ss:$8 sps:$4 sm:$0xff]  }
 0xa99   :  { %11464 = vmatpush1.bf16.msra.mxu0 %v15053_v29  ;;  %v15135_v29 = vld [vmem:[%s20361_s7 + $0x3a0] ss:$8 sps:$4 sm:$0xff]  }
 0xa9a   :  { %11474 = vmatprep.subr.bf16.mxu0 %v15058_v49  ;;  %v15140_v49 = vld [vmem:[%s20361_s7 + $0x3b4] ss:$8 sps:$4 sm:$0xff]  }
 0xa9c   :  { %11466 = vmatmul.mubr.bf16.vlgmr.msra.gmra.mrb[148].mxu0 %v9878_v37  ;;  %v15141_v37 = vld [vmem:[%s20361_s7 + $0x3c0] ss:$8 sps:$4 sm:$0xff]  }
 0xa9d   :  { %11475 = vmatpush1.bf16.msra.mxu0 %v15056_v26  ;;  %11506 = vmatprep.mubr.bf16.mxu0 %v9881_v57  ;;  %v15143_v26 = vld [vmem:[%s20361_s7 + $0x3c4] ss:$8 sps:$4 sm:$0xff]   ;;  %v15144_v57 = vld [vmem:[%s20361_s7 + $0x3d0] ss:$8 sps:$4 sm:$0xff]  }
 0xa9e   :  { %11476 = vmatprep.subr.bf16.mxu0 %v15061_v45  ;;  %v15146_v45 = vld [vmem:[%s20361_s7 + $0x3d4] ss:$8 sps:$4 sm:$0xff]  }
 0xaa1   :  { %11477 = vmatpush1.bf16.msra.mxu0 %v15059_v21  ;;  %v15149_v21 = vld [vmem:[%s20361_s7 + $0x3e4] ss:$8 sps:$4 sm:$0xff]  }
 0xaa2   :  { %11478 = vmatprep.subr.bf16.mxu0 %v15064_v44  ;;  %v19838_v44 = vld [vmem:[#allocation3 + $0x10] sm:$0xff] }
 0xaa5   :  { %11479 = vmatpush1.bf16.msra.mxu0 %v15062_v34  ;;  %v15147_v34 = vld [vmem:[%s20361_s7 + $0x3e0] ss:$8 sps:$4 sm:$0xff]  }
 0xaa6   :  { %11480 = vmatprep.subr.bf16.mxu0 %v15067_v47  ;;  %v15152_v47 = vld [vmem:[%s20361_s7 + $0x3f4] ss:$8 sps:$4 sm:$0xff]  }
 0xaa9   :  { %11481 = vmatpush1.bf16.msra.mxu0 %v15065_v56  ;;  %v19848_v56 = vrot.slane %v19838_v44, %v19444_v8 }
 0xaaa   :  { %11482 = vmatprep.subr.bf16.mxu0 %v15070_v19  ;;  %v15150_v19 = vld [vmem:[%s20361_s7 + $0x3f0] ss:$8 sps:$4 sm:$0xff]  }
 0xaad   :  { %11483 = vmatpush1.bf16.msra.mxu0 %v15068_v33  ;;  %v15155_v33 = vld [vmem:[%s20361_s7 + $0x404] ss:$8 sps:$4 sm:$0xff]  }
 0xaae   :  { %11484 = vmatprep.subr.bf16.mxu0 %v15073_v61  ;;  %v9843_v61 = vcombine.high %v19848_v56, %v19848_v56 }
 0xab1   :  { %11485 = vmatpush1.bf16.msra.mxu0 %v15071_v18  ;;  %v15153_v18 = vld [vmem:[%s20361_s7 + $0x400] ss:$8 sps:$4 sm:$0xff]  }
 0xab2   :  { %11486 = vmatprep.subr.bf16.mxu0 %v15076_v38  ;;  %v9882_v38 = vpack.c.bf16 %v19742_v60, %v19742_v60  ;;  %v15179_v60 = vld [vmem:[%s20361_s7 + $0x484] ss:$8 sps:$4 sm:$0xff]  }
 0xab5   :  { %11487 = vmatpush1.bf16.msra.mxu0 %v15074_v42  ;;  %v15158_v42 = vld [vmem:[%s20361_s7 + $0x414] ss:$8 sps:$4 sm:$0xff]  }
 0xab6   :  { %11488 = vmatprep.subr.bf16.mxu0 %v15079_v35  ;;  %v9885_v35 = vpack.c.bf16 %v9843_v61, %v9843_v61  ;;  %v15213_v61 = vld [vmem:[%s20361_s7 + $0x534] ss:$8 sps:$4 sm:$0xff]  }
 0xab9   :  { %11489 = vmatpush1.bf16.msra.mxu0 %v15077_v48  ;;  %v15156_v48 = vld [vmem:[%s20361_s7 + $0x410] ss:$8 sps:$4 sm:$0xff]  }
 0xaba   :  { %11490 = vmatprep.subr.bf16.mxu0 %v15082_v54  ;;  %v15161_v54 = vld [vmem:[%s20361_s7 + $0x424] ss:$8 sps:$4 sm:$0xff]  }
 0xabd   :  { %11491 = vmatpush1.bf16.msra.mxu0 %v15080_v52  ;;  %v15159_v52 = vld [vmem:[%s20361_s7 + $0x420] ss:$8 sps:$4 sm:$0xff]  }
 0xabe   :  { %11492 = vmatprep.subr.bf16.mxu0 %v15085_v46  ;;  %v15164_v46 = vld [vmem:[%s20361_s7 + $0x434] ss:$8 sps:$4 sm:$0xff]  }
 0xac1   :  { %11493 = vmatpush1.bf16.msra.mxu0 %v15083_v14  ;;  %v15162_v14 = vld [vmem:[%s20361_s7 + $0x430] ss:$8 sps:$4 sm:$0xff]  }
 0xac2   :  { %11494 = vmatprep.subr.bf16.mxu0 %v15088_v1  ;;  %v15167_v1 = vld [vmem:[%s20361_s7 + $0x444] ss:$8 sps:$4 sm:$0xff]  }
 0xac5   :  { %11495 = vmatpush1.bf16.msra.mxu0 %v15086_v9  ;;  %v15165_v9 = vld [vmem:[%s20361_s7 + $0x440] ss:$8 sps:$4 sm:$0xff]  }
 0xac6   :  { %11496 = vmatprep.subr.bf16.mxu0 %v15091_v40  ;;  %v15170_v40 = vld [vmem:[%s20361_s7 + $0x454] ss:$8 sps:$4 sm:$0xff]  }
 0xac9   :  { %11497 = vmatpush1.bf16.msra.mxu0 %v15089_v28  ;;  %v15168_v28 = vld [vmem:[%s20361_s7 + $0x450] ss:$8 sps:$4 sm:$0xff]  }
 0xaca   :  { %11498 = vmatprep.subr.bf16.mxu0 %v15094_v22  ;;  %v15173_v22 = vld [vmem:[%s20361_s7 + $0x464] ss:$8 sps:$4 sm:$0xff]  }
 0xacd   :  { %11499 = vmatpush1.bf16.msra.mxu0 %v15092_v13 }
 0xace   :  { %11500 = vmatprep.subr.bf16.mxu0 %v15097_v41 }
 0xad1   :  { %11501 = vmatpush1.bf16.msra.mxu0 %v15095_v27 }
 0xad2   :  { %11502 = vmatprep.subr.bf16.mxu0 %v15100_v6  ;;  %v15171_v6 = vld [vmem:[%s20361_s7 + $0x460] ss:$8 sps:$4 sm:$0xff]  }
 0xad5   :  { %11503 = vmatpush1.bf16.msra.mxu0 %v15098_v43  ;;  %v15176_v43 = vld [vmem:[%s20361_s7 + $0x474] ss:$8 sps:$4 sm:$0xff]  }
 0xad6   :  { %11504 = vmatprep.subr.bf16.mxu0 %v15103_v32  ;;  %v15174_v32 = vld [vmem:[%s20361_s7 + $0x470] ss:$8 sps:$4 sm:$0xff]  }
 0xad9   :  { %11505 = vmatpush1.bf16.msra.mxu0 %v15101_v55  ;;  %v15177_v55 = vld [vmem:[%s20361_s7 + $0x480] ss:$8 sps:$4 sm:$0xff]  }
 0xada   :  { %11515 = vmatprep.subr.bf16.mxu0 %v15106_v17  ;;  %v15182_v17 = vld [vmem:[%s20361_s7 + $0x494] ss:$8 sps:$4 sm:$0xff]  }
 0xadc   :  { %11507 = vmatmul.mubr.bf16.vlgmr.msra.gmra.mrb[152].mxu0 %v9880_v62  ;;  %v15183_v62 = vld [vmem:[%s20361_s7 + $0x4a0] ss:$8 sps:$4 sm:$0xff]  }
 0xadd   :  { %11516 = vmatpush1.bf16.msra.mxu0 %v15104_v12  ;;  %11547 = vmatprep.mubr.bf16.mxu0 %v9883_v15  ;;  %v15185_v12 = vld [vmem:[%s20361_s7 + $0x4a4] ss:$8 sps:$4 sm:$0xff]   ;;  %v15186_v15 = vld [vmem:[%s20361_s7 + $0x4b0] ss:$8 sps:$4 sm:$0xff]  }
 0xade   :  { %11517 = vmatprep.subr.bf16.mxu0 %v15110_v3  ;;  %v15188_v3 = vld [vmem:[%s20361_s7 + $0x4b4] ss:$8 sps:$4 sm:$0xff]  }
 0xae1   :  { %11518 = vmatpush1.bf16.msra.mxu0 %v15108_v2  ;;  %v15191_v2 = vld [vmem:[%s20361_s7 + $0x4c4] ss:$8 sps:$4 sm:$0xff]  }
 0xae2   :  { %11519 = vmatprep.subr.bf16.mxu0 %v15113_v50  ;;  %v15189_v50 = vld [vmem:[%s20361_s7 + $0x4c0] ss:$8 sps:$4 sm:$0xff]  }
 0xae5   :  { %11520 = vmatpush1.bf16.msra.mxu0 %v15111_v63  ;;  %v15194_v63 = vld [vmem:[%s20361_s7 + $0x4d4] ss:$8 sps:$4 sm:$0xff]  }
 0xae6   :  { %11521 = vmatprep.subr.bf16.mxu0 %v15116_v25  ;;  %v15192_v25 = vld [vmem:[%s20361_s7 + $0x4d0] ss:$8 sps:$4 sm:$0xff]  }
 0xae9   :  { %11522 = vmatpush1.bf16.msra.mxu0 %v15114_v36  ;;  %v15197_v36 = vld [vmem:[%s20361_s7 + $0x4e4] ss:$8 sps:$4 sm:$0xff]  }
 0xaea   :  { %11523 = vmatprep.subr.bf16.mxu0 %v15119_v39  ;;  %v9828_v39 = vcombine.high %v19838_v44, %v19838_v44  ;;  %v10154_v44 = vpop.permute.xlu0 %10153 }
 0xaed   :  { %11524 = vmatpush1.bf16.msra.mxu0 %v15117_v11  ;;  %v15195_v11 = vld [vmem:[%s20361_s7 + $0x4e0] ss:$8 sps:$4 sm:$0xff]  }
 0xaee   :  { %11525 = vmatprep.subr.bf16.mxu0 %v15122_v31  ;;  %v15200_v31 = vld [vmem:[%s20361_s7 + $0x4f4] ss:$8 sps:$4 sm:$0xff]  }
 0xaf1   :  { %11526 = vmatpush1.bf16.msra.mxu0 %v15120_v24  ;;  %v19957_v24 = vrot.slane %v9828_v39, %v19444_v8  ;;  %v15235_v39 = vld [vmem:[%s20361_s7 + $0x5b0] ss:$8 sps:$4 sm:$0xff]  }
 0xaf2   :  { %11527 = vmatprep.subr.bf16.mxu0 %v15125_v58  ;;  %v15198_v58 = vld [vmem:[%s20361_s7 + $0x4f0] ss:$8 sps:$4 sm:$0xff]  }
 0xaf5   :  { %11528 = vmatpush1.bf16.msra.mxu0 %v15123_v16  ;;  %v15203_v16 = vld [vmem:[%s20361_s7 + $0x504] ss:$8 sps:$4 sm:$0xff]  }
 0xaf6   :  { %11529 = vmatprep.subr.bf16.mxu0 %v15128_v51  ;;  %v9844_v51 = vcombine.high %v19957_v24, %v19957_v24 }
 0xaf9   :  { %11530 = vmatpush1.bf16.msra.mxu0 %v15126_v7  ;;  %v15201_v7 = vld [vmem:[%s20361_s7 + $0x500] ss:$8 sps:$4 sm:$0xff]  }
 0xafa   :  { %11531 = vmatprep.subr.bf16.mxu0 %v15131_v53  ;;  %v9884_v53 = vpack.c.bf16 %v19848_v56, %v19848_v56 }
 0xafd   :  { %11532 = vmatpush1.bf16.msra.mxu0 %v15129_v59  ;;  %v10131_v59 = vld [vmem:[%s20362_s8] ss:$4 sm:$0x3] }
 0xafe   :  { %11533 = vmatprep.subr.bf16.mxu0 %v15134_v20  ;;  %v19976_v20 = vsub.s32 0, %v19434_v4 }
 0xb01   :  { %11534 = vmatpush1.bf16.msra.mxu0 %v15132_v23  ;;  %v15207_v23 = vld [vmem:[%s20361_s7 + $0x514] ss:$8 sps:$4 sm:$0xff]  }
 0xb02   :  { %11535 = vmatprep.subr.bf16.mxu0 %v15137_v0  ;;  %v19982_v0 = vsub.s32 1, %v19434_v4  ;;  %v15210_v4 = vld [vmem:[%s20361_s7 + $0x524] ss:$8 sps:$4 sm:$0xff]  }
 0xb05   :  { %11536 = vmatpush1.bf16.msra.mxu0 %v15135_v29  ;;  %v12964_v29 = vld [vmem:[%s20362_s8 + $0x1] ss:$4 sm:$0x3] }
 0xb06   :  { %11537 = vmatprep.subr.bf16.mxu0 %v15140_v49  ;;  %v9887_v49 = vpack.c.bf16 %v9844_v51, %v9844_v51  ;;  %v15246_v51 = vld [vmem:[%s20361_s7 + $0x5e4] ss:$8 sps:$4 sm:$0xff]  }
 0xb09   :  { %11538 = vmatpush1.bf16.msra.mxu0 %v15138_v10  ;;  %v10135_v10 = vpop.permute.xlu1 %10134 }
 0xb0a   :  { %11539 = vmatprep.subr.bf16.mxu0 %v15143_v26  ;;  %v15205_v26 = vld [vmem:[%s20361_s7 + $0x510] ss:$8 sps:$4 sm:$0xff]  }
 0xb0d   :  { %11540 = vmatpush1.bf16.msra.mxu0 %v15141_v37  ;;  %v10141_v37 = vrot.slane %v10131_v59, %v19976_v20 }
 0xb0e   :  { %11541 = vmatprep.subr.bf16.mxu0 %v15146_v45  ;;  %v10160_v45 = vrot.slane %v12964_v29, %v19976_v20 }
 0xb0f   :  { %v10148_v56 = vmul.f32 %v10141_v37, %v10135_v10  ;;  %v9886_v37 = vpack.c.bf16 %v19957_v24, %v19957_v24  ;;  %v15257_v24 = vld [vmem:[%s20361_s7 + $0x620] ss:$8 sps:$4 sm:$0xff]  }
 0xb11   :  { %11542 = vmatpush1.bf16.msra.mxu0 %v15144_v57  ;;  %v10145_v57 = vrot.slane %v10131_v59, %v19982_v0  ;;  %v15249_v59 = vld [vmem:[%s20361_s7 + $0x5f4] ss:$8 sps:$4 sm:$0xff]  }
 0xb12   :  { %11543 = vmatprep.subr.bf16.mxu0 %v15149_v21  ;;  %v10164_v21 = vrot.slane %v12964_v29, %v19982_v0  ;;  %v15247_v29 = vld [vmem:[%s20361_s7 + $0x5f0] ss:$8 sps:$4 sm:$0xff]  }
 0xb15   :  { %11544 = vmatpush1.bf16.msra.mxu0 %v15147_v34  ;;  %v12965_v34 = vld [vmem:[%s20362_s8 + $0x2] ss:$4 sm:$0x3] }
 0xb16   :  { %11545 = vmatprep.subr.bf16.mxu0 %v15152_v47  ;;  %v15208_v47 = vld [vmem:[%s20361_s7 + $0x520] ss:$8 sps:$4 sm:$0xff]  }
 0xb19   :  { %11546 = vmatpush1.bf16.msra.mxu0 %v15150_v19  ;;  %v10167_v19 = vmul.f32 %v10160_v45, %v10154_v44  ;;  %v15256_v45 = vld [vmem:[%s20361_s7 + $0x614] ss:$8 sps:$4 sm:$0xff]  }
 0xb1a   :  { %11556 = vmatprep.subr.bf16.mxu0 %v15155_v33  ;;  %v10181_v33 = vrot.slane %v12965_v34, %v19976_v20 }
 0xb1c   :  { %11548 = vmatmul.mubr.bf16.vlgmr.msra.gmra.mrb[156].mxu0 %v9882_v38  ;;  %v10168_v38 = vmul.f32 %v10164_v21, %v10154_v44  ;;  %v15259_v21 = vld [vmem:[%s20361_s7 + $0x624] ss:$8 sps:$4 sm:$0xff]   ;;  %v15262_v44 = vld [vmem:[%s20361_s7 + $0x634] ss:$8 sps:$4 sm:$0xff]  }
 0xb1d   :  { %11557 = vmatpush1.bf16.msra.mxu0 %v15153_v18  ;;  %11588 = vmatprep.mubr.bf16.mxu0 %v9885_v35  ;;  %v10149_v18 = vmul.f32 %v10145_v57, %v10135_v10  ;;  %v10175_v35 = vpop.permute.xlu1 %10174  ;;  %v15254_v57 = vld [vmem:[%s20361_s7 + $0x610] ss:$8 sps:$4 sm:$0xff]  }
 0xb1e   :  { %11558 = vmatprep.subr.bf16.mxu0 %v15158_v42  ;;  %v10185_v42 = vrot.slane %v12965_v34, %v19982_v0  ;;  %v15260_v34 = vld [vmem:[%s20361_s7 + $0x630] ss:$8 sps:$4 sm:$0xff]  }
 0xb21   :  { %11559 = vmatpush1.bf16.msra.mxu0 %v15156_v48  ;;  %v15211_v48 = vld [vmem:[%s20361_s7 + $0x530] ss:$8 sps:$4 sm:$0xff]  }
 0xb22   :  { %11560 = vmatprep.subr.bf16.mxu0 %v15161_v54  ;;  %v10169_v54 = vadd.f32 %v10167_v19, %v10148_v56  ;;  %v15263_v56 = vld [vmem:[%s20361_s7 + $0x640] ss:$8 sps:$4 sm:$0xff]   ;;  %v15268_v19 = vld [vmem:[%s20361_s7 + $0x654] ss:$8 sps:$4 sm:$0xff]  }
 0xb25   :  { %11561 = vmatpush1.bf16.msra.mxu0 %v15159_v52  ;;  %v10188_v52 = vmul.f32 %v10181_v33, %v10175_v35  ;;  %v15266_v33 = vld [vmem:[%s20361_s7 + $0x650] ss:$8 sps:$4 sm:$0xff]  }
 0xb26   :  { %11562 = vmatprep.subr.bf16.mxu0 %v15164_v46  ;;  %v15216_v46 = vld [vmem:[%s20361_s7 + $0x544] ss:$8 sps:$4 sm:$0xff]  }
 0xb29   :  { %11563 = vmatpush1.bf16.msra.mxu0 %v15162_v14  ;;  %v10170_v14 = vadd.f32 %v10168_v38, %v10149_v18 }
 0xb2a   :  { %11564 = vmatprep.subr.bf16.mxu0 %v15167_v1  ;;  %v10189_v1 = vmul.f32 %v10185_v42, %v10175_v35 }
 0xb2d   :  { %11565 = vmatpush1.bf16.msra.mxu0 %v15165_v9  ;;  %v15214_v9 = vld [vmem:[%s20361_s7 + $0x540] ss:$8 sps:$4 sm:$0xff]  }
 0xb2e   :  { %11566 = vmatprep.subr.bf16.mxu0 %v15170_v40  ;;  %v10190_v40 = vadd.f32 %v10188_v52, %v10169_v54  ;;  %v15269_v54 = vld [vmem:[%s20361_s7 + $0x660] ss:$8 sps:$4 sm:$0xff]  }
 0xb2f   :  { %v19896_v13 = vpop.f32.mrb[144].mxu0 }
 0xb30   :  { %v19898_v41 = vpop.f32.mrb[145].mxu0 }
 0xb31   :  { %11567 = vmatpush1.bf16.msra.mxu0 %v15168_v28  ;;  %v11430_v27 = vpop.f32.mrb[146].mxu0  ;;  %v15219_v28 = vld [vmem:[%s20361_s7 + $0x554] ss:$8 sps:$4 sm:$0xff]  }
 0xb32   :  { %v11431_v5 = vpop.f32.mrb[147].mxu0  ;;  %11568 = vmatprep.subr.bf16.mxu0 %v15173_v22  ;;  %v10191_v22 = vadd.f32 %v10189_v1, %v10170_v14  ;;  %v15217_v27 = vld [vmem:[%s20361_s7 + $0x550] ss:$8 sps:$4 sm:$0xff]   ;;  %v15277_v1 = vld [vmem:[%s20361_s7 + $0x684] ss:$8 sps:$4 sm:$0xff]  }
 0xb33   :  { %v15222_v5 = vld [vmem:[%s20361_s7 + $0x564] ss:$8 sps:$4 sm:$0xff]   ;;  %v15272_v14 = vld [vmem:[%s20361_s7 + $0x670] ss:$8 sps:$4 sm:$0xff]  }
 0xb35   :  { %11569 = vmatpush1.bf16.msra.mxu0 %v15171_v6  ;;  %v11427_v6 = vadd.f32 %v19896_v13, %v10190_v40  ;;  %v15280_v40 = vld [vmem:[%s20361_s7 + $0x694] ss:$8 sps:$4 sm:$0xff]  }
 0xb36   :  { %11570 = vmatprep.subr.bf16.mxu0 %v15176_v43  ;;  %v11429_v43 = vadd.f32 %v19898_v41, %v10191_v22  ;;  %v15223_v41 = vld [vmem:[%s20361_s7 + $0x570] ss:$8 sps:$4 sm:$0xff]   ;;  %v15283_v22 = vld [vmem:[%s20361_s7 + $0x6a4] ss:$8 sps:$4 sm:$0xff]  }
 0xb39   :  { %11571 = vmatpush1.bf16.msra.mxu0 %v15174_v32 }
 0xb3a   :  { %11572 = vmatprep.subr.bf16.mxu0 %v15179_v60 }
 0xb3d   :  { %11573 = vmatpush1.bf16.msra.mxu0 %v15177_v55 }
 0xb3e   :  { %11574 = vmatprep.subr.bf16.mxu0 %v15182_v17 }
 0xb41   :  { %11575 = vmatpush1.bf16.msra.mxu0 %v15180_v30 }
 0xb42   :  { %11576 = vmatprep.subr.bf16.mxu0 %v15185_v12  ;;  %v15220_v12 = vld [vmem:[%s20361_s7 + $0x560] ss:$8 sps:$4 sm:$0xff]  }
 0xb45   :  { %11577 = vmatpush1.bf16.msra.mxu0 %v15183_v62  ;;  %v15225_v62 = vld [vmem:[%s20361_s7 + $0x574] ss:$8 sps:$4 sm:$0xff]  }
 0xb46   :  { %11578 = vmatprep.subr.bf16.mxu0 %v15188_v3  ;;  %v15228_v3 = vld [vmem:[%s20361_s7 + $0x584] ss:$8 sps:$4 sm:$0xff]  }
 0xb49   :  { %11579 = vmatpush1.bf16.msra.mxu0 %v15186_v15  ;;  %v15226_v15 = vld [vmem:[%s20361_s7 + $0x580] ss:$8 sps:$4 sm:$0xff]  }
 0xb4a   :  { %11580 = vmatprep.subr.bf16.mxu0 %v15191_v2  ;;  %v15231_v2 = vld [vmem:[%s20361_s7 + $0x594] ss:$8 sps:$4 sm:$0xff]  }
 0xb4d   :  { %11581 = vmatpush1.bf16.msra.mxu0 %v15189_v50  ;;  %v15229_v50 = vld [vmem:[%s20361_s7 + $0x590] ss:$8 sps:$4 sm:$0xff]  }
 0xb4e   :  { %11582 = vmatprep.subr.bf16.mxu0 %v15194_v63  ;;  %v15234_v63 = vld [vmem:[%s20361_s7 + $0x5a4] ss:$8 sps:$4 sm:$0xff]  }
 0xb51   :  { %11583 = vmatpush1.bf16.msra.mxu0 %v15192_v25  ;;  %v15232_v25 = vld [vmem:[%s20361_s7 + $0x5a0] ss:$8 sps:$4 sm:$0xff]  }
 0xb52   :  { %11584 = vmatprep.subr.bf16.mxu0 %v15197_v36  ;;  %v15237_v36 = vld [vmem:[%s20361_s7 + $0x5b4] ss:$8 sps:$4 sm:$0xff]  }
 0xb55   :  { %11585 = vmatpush1.bf16.msra.mxu0 %v15195_v11  ;;  %v15240_v11 = vld [vmem:[%s20361_s7 + $0x5c4] ss:$8 sps:$4 sm:$0xff]  }
 0xb56   :  { %11586 = vmatprep.subr.bf16.mxu0 %v15200_v31  ;;  %v15238_v31 = vld [vmem:[%s20361_s7 + $0x5c0] ss:$8 sps:$4 sm:$0xff]  }
 0xb59   :  { %11587 = vmatpush1.bf16.msra.mxu0 %v15198_v58  ;;  %v15243_v58 = vld [vmem:[%s20361_s7 + $0x5d4] ss:$8 sps:$4 sm:$0xff]  }
 0xb5a   :  { %11597 = vmatprep.subr.bf16.mxu0 %v15203_v16  ;;  %v15241_v16 = vld [vmem:[%s20361_s7 + $0x5d0] ss:$8 sps:$4 sm:$0xff]  }
 0xb5c   :  { %11589 = vmatmul.mubr.bf16.vlgmr.msra.gmra.mrb[160].mxu0 %v9884_v53  ;;  %v15244_v53 = vld [vmem:[%s20361_s7 + $0x5e0] ss:$8 sps:$4 sm:$0xff]  }
 0xb5d   :  { %11598 = vmatpush1.bf16.msra.mxu0 %v15201_v7  ;;  %11629 = vmatprep.mubr.bf16.mxu0 %v9887_v49  ;;  %v20080_v7 = vld [vmem:[#allocation3 + $0x18] sm:$0x3f]  ;;  %v15252_v49 = vld [vmem:[%s20361_s7 + $0x604] ss:$8 sps:$4 sm:$0xff]  }
 0xb5e   :  { %11599 = vmatprep.subr.bf16.mxu0 %v15207_v23  ;;  %v20090_v23 = vrot.slane %v20080_v7, %v19444_v8 }
 0xb60   :  { %v9860_v10 = vcombine.high %v20090_v23, %v20090_v23 }
 0xb61   :  { %11600 = vmatpush1.bf16.msra.mxu0 %v15205_v26  ;;  %v15250_v26 = vld [vmem:[%s20361_s7 + $0x600] ss:$8 sps:$4 sm:$0xff]  }
 0xb62   :  { %11601 = vmatprep.subr.bf16.mxu0 %v15210_v4  ;;  %v9889_v4 = vpack.c.bf16 %v9860_v10, %v9860_v10  ;;  %v15317_v10 = vld [vmem:[%s20361_s7 + $0x760] ss:$8 sps:$4 sm:$0xff]  }
 0xb65   :  { %11602 = vmatpush1.bf16.msra.mxu0 %v15208_v47  ;;  %v15265_v47 = vld [vmem:[%s20361_s7 + $0x644] ss:$8 sps:$4 sm:$0xff]  }
 0xb66   :  { %11603 = vmatprep.subr.bf16.mxu0 %v15213_v61  ;;  %v15271_v61 = vld [vmem:[%s20361_s7 + $0x664] ss:$8 sps:$4 sm:$0xff]  }
 0xb69   :  { %11604 = vmatpush1.bf16.msra.mxu0 %v15211_v48 }
 0xb6a   :  { %11605 = vmatprep.subr.bf16.mxu0 %v15216_v46  ;;  %v15274_v46 = vld [vmem:[%s20361_s7 + $0x674] ss:$8 sps:$4 sm:$0xff]  }
 0xb6d   :  { %11606 = vmatpush1.bf16.msra.mxu0 %v15214_v9  ;;  %v15275_v9 = vld [vmem:[%s20361_s7 + $0x680] ss:$8 sps:$4 sm:$0xff]  }
 0xb6e   :  { %11607 = vmatprep.subr.bf16.mxu0 %v15219_v28  ;;  %v15278_v28 = vld [vmem:[%s20361_s7 + $0x690] ss:$8 sps:$4 sm:$0xff]  }
 0xb6f   :  { %v11467_v32 = vpop.f32.mrb[148].mxu0 }
 0xb70   :  { %v20028_v60 = vadd.f32 %v11467_v32, %v11427_v6  ;;  %v11469_v55 = vpop.f32.mrb[149].mxu0  ;;  %v15286_v6 = vld [vmem:[%s20361_s7 + $0x6b4] ss:$8 sps:$4 sm:$0xff]   ;;  %v15287_v32 = vld [vmem:[%s20361_s7 + $0x6c0] ss:$8 sps:$4 sm:$0xff]  }
 0xb71   :  { %v20030_v17 = vadd.f32 %v11469_v55, %v11429_v43  ;;  %v11471_v30 = vpop.f32.mrb[150].mxu0  ;;  %11608 = vmatpush1.bf16.msra.mxu0 %v15217_v27  ;;  %v15281_v27 = vld [vmem:[%s20361_s7 + $0x6a0] ss:$8 sps:$4 sm:$0xff]   ;;  %v15289_v43 = vld [vmem:[%s20361_s7 + $0x6c4] ss:$8 sps:$4 sm:$0xff]  }
 0xb72   :  { %v11472_v13 = vpop.f32.mrb[151].mxu0  ;;  %11609 = vmatprep.subr.bf16.mxu0 %v15222_v5  ;;  %v15284_v5 = vld [vmem:[%s20361_s7 + $0x6b0] ss:$8 sps:$4 sm:$0xff]   ;;  %v15293_v30 = vld [vmem:[%s20361_s7 + $0x6e0] ss:$8 sps:$4 sm:$0xff]  }
 0xb73   :  { %v15290_v55 = vld [vmem:[%s20361_s7 + $0x6d0] ss:$8 sps:$4 sm:$0xff]  }
 0xb74   :  { %v15296_v13 = vld [vmem:[%s20361_s7 + $0x6f0] ss:$8 sps:$4 sm:$0xff]  }
 0xb75   :  { %11610 = vmatpush1.bf16.msra.mxu0 %v15220_v12  ;;  %v15298_v12 = vld [vmem:[%s20361_s7 + $0x6f4] ss:$8 sps:$4 sm:$0xff]  }
 0xb76   :  { %11611 = vmatprep.subr.bf16.mxu0 %v15225_v62  ;;  %v15301_v62 = vld [vmem:[%s20361_s7 + $0x704] ss:$8 sps:$4 sm:$0xff]  }
 0xb79   :  { %11612 = vmatpush1.bf16.msra.mxu0 %v15223_v41  ;;  %v15299_v41 = vld [vmem:[%s20361_s7 + $0x700] ss:$8 sps:$4 sm:$0xff]  }
 0xb7a   :  { %11613 = vmatprep.subr.bf16.mxu0 %v15228_v3  ;;  %v9888_v3 = vpack.c.bf16 %v20090_v23, %v20090_v23 }
 0xb7d   :  { %11614 = vmatpush1.bf16.msra.mxu0 %v15226_v15  ;;  %v15304_v15 = vld [vmem:[%s20361_s7 + $0x714] ss:$8 sps:$4 sm:$0xff]  }
 0xb7e   :  { %11615 = vmatprep.subr.bf16.mxu0 %v15231_v2  ;;  %v15302_v2 = vld [vmem:[%s20361_s7 + $0x710] ss:$8 sps:$4 sm:$0xff]  }
 0xb81   :  { %11616 = vmatpush1.bf16.msra.mxu0 %v15229_v50  ;;  %v20380_v50 = vmov 0  }
 0xb82   :  { %11617 = vmatprep.subr.bf16.mxu0 %v15234_v63  ;;  %v15307_v63 = vld [vmem:[%s20361_s7 + $0x724] ss:$8 sps:$4 sm:$0xff]  }
 0xb85   :  { %11618 = vmatpush1.bf16.msra.mxu0 %v15232_v25  ;;  %v15305_v25 = vld [vmem:[%s20361_s7 + $0x720] ss:$8 sps:$4 sm:$0xff]  }
 0xb86   :  { %11619 = vmatprep.subr.bf16.mxu0 %v15237_v36  ;;  %v15310_v36 = vld [vmem:[%s20361_s7 + $0x734] ss:$8 sps:$4 sm:$0xff]  }
 0xb89   :  { %11620 = vmatpush1.bf16.msra.mxu0 %v15235_v39  ;;  %v15308_v39 = vld [vmem:[%s20361_s7 + $0x730] ss:$8 sps:$4 sm:$0xff]  }
 0xb8a   :  { %11621 = vmatprep.subr.bf16.mxu0 %v15240_v11  ;;  %v15313_v11 = vld [vmem:[%s20361_s7 + $0x744] ss:$8 sps:$4 sm:$0xff]  }
 0xb8d   :  { %11622 = vmatpush1.bf16.msra.mxu0 %v15238_v31  ;;  %v15311_v31 = vld [vmem:[%s20361_s7 + $0x740] ss:$8 sps:$4 sm:$0xff]  }
 0xb8e   :  { %11623 = vmatprep.subr.bf16.mxu0 %v15243_v58  ;;  %v15316_v58 = vld [vmem:[%s20361_s7 + $0x754] ss:$8 sps:$4 sm:$0xff]  }
 0xb91   :  { %11624 = vmatpush1.bf16.msra.mxu0 %v15241_v16  ;;  %v15314_v16 = vld [vmem:[%s20361_s7 + $0x750] ss:$8 sps:$4 sm:$0xff]  }
 0xb92   :  { %11625 = vmatprep.subr.bf16.mxu0 %v15246_v51  ;;  %v15319_v51 = vld [vmem:[%s20361_s7 + $0x764] ss:$8 sps:$4 sm:$0xff]  }
 0xb95   :  { %11626 = vmatpush1.bf16.msra.mxu0 %v15244_v53 }
 0xb96   :  { %11627 = vmatprep.subr.bf16.mxu0 %v15249_v59 }
 0xb99   :  { %11628 = vmatpush1.bf16.msra.mxu0 %v15247_v29 }
 0xb9a   :  { %11638 = vmatprep.subr.bf16.mxu0 %v15252_v49 }
 0xb9c   :  { %11630 = vmatmul.mubr.bf16.vlgmr.msra.gmra.mrb[164].mxu0 %v9886_v37 }
 0xb9d   :  { %11639 = vmatpush1.bf16.msra.mxu0 %v15250_v26  ;;  %11670 = vmatprep.mubr.bf16.mxu0 %v9889_v4  ;;  %v9845_v26 = vcombine.high %v20080_v7, %v20080_v7  ;;  %v15320_v4 = vld [vmem:[%s20361_s7 + $0x770] ss:$8 sps:$4 sm:$0xff]  }
 0xb9e   :  { %11640 = vmatprep.subr.bf16.mxu0 %v15256_v45  ;;  %v15322_v45 = vld [vmem:[%s20361_s7 + $0x774] ss:$8 sps:$4 sm:$0xff]  }
 0xba1   :  { %11641 = vmatpush1.bf16.msra.mxu0 %v15254_v57  ;;  %v9859_v57 = vrot.slane %v9845_v26, %v19444_v8  ;;  %v15325_v8 = vld [vmem:[%s20364_s10 + $0x48] sm:$0xff]  }
 0xba2   :  { %11642 = vmatprep.subr.bf16.mxu0 %v15259_v21 }
 0xba3   :  { %v9890_v21 = vpack.c.bf16 %v9859_v57, %v9859_v57 }
 0xba5   :  { %11643 = vmatpush1.bf16.msra.mxu0 %v15257_v24 }
 0xba6   :  { %11644 = vmatprep.subr.bf16.mxu0 %v15262_v44 }
 0xba9   :  { %11645 = vmatpush1.bf16.msra.mxu0 %v15260_v34 }
 0xbaa   :  { %11646 = vmatprep.subr.bf16.mxu0 %v15265_v47 }
 0xbad   :  { %11647 = vmatpush1.bf16.msra.mxu0 %v15263_v56 }
 0xbae   :  { %11648 = vmatprep.subr.bf16.mxu0 %v15268_v19  ;;  %v15323_v19 = vld [vmem:[%s20364_s10 + $0x40] sm:$0xff]  }
 0xbaf   :  { %v11508_v18 = vpop.f32.mrb[152].mxu0 }
 0xbb0   :  { %v20139_v38 = vadd.f32 %v11508_v18, %v20028_v60  ;;  %v11510_v42 = vpop.f32.mrb[153].mxu0  ;;  %v15292_v60 = vld [vmem:[%s20361_s7 + $0x6d4] ss:$8 sps:$4 sm:$0xff]  }
 0xbb1   :  { %v20142_v35 = vadd.f32 %v11510_v42, %v20030_v17  ;;  %v11512_v48 = vpop.f32.mrb[154].mxu0  ;;  %11649 = vmatpush1.bf16.msra.mxu0 %v15266_v33  ;;  %v15295_v17 = vld [vmem:[%s20361_s7 + $0x6e4] ss:$8 sps:$4 sm:$0xff]   ;;  %v15327_v18 = vld [vmem:[%s20364_s10 + $0x50] sm:$0xff]   ;;  %v15329_v42 = vld [vmem:[%s20364_s10 + $0x58] sm:$0xff]  }
 0xbb2   :  { %v11513_v52 = vpop.f32.mrb[155].mxu0  ;;  %11650 = vmatprep.subr.bf16.mxu0 %v15271_v61  ;;  %v15324_v33 = vld [vmem:[%s20364_s10] sm:$0xff]   ;;  %v15326_v61 = vld [vmem:[%s20364_s10 + $0x8] sm:$0xff]  }
 0xbb3   :  { %v15331_v48 = vld [vmem:[%s20364_s10 + $0x60] sm:$0xff]   ;;  %v15333_v52 = vld [vmem:[%s20364_s10 + $0x68] sm:$0xff]  }
 0xbb5   :  { %11651 = vmatpush1.bf16.msra.mxu0 %v15269_v54  ;;  %v15332_v54 = vld [vmem:[%s20364_s10 + $0x20] sm:$0xff]  }
 0xbb6   :  { %11652 = vmatprep.subr.bf16.mxu0 %v15274_v46  ;;  %v15334_v46 = vld [vmem:[%s20364_s10 + $0x28] sm:$0xff]  }
 0xbb9   :  { %11653 = vmatpush1.bf16.msra.mxu0 %v15272_v14  ;;  %v15335_v14 = vld [vmem:[%s20364_s10 + $0x70] sm:$0xff]  }
 0xbba   :  { %11654 = vmatprep.subr.bf16.mxu0 %v15277_v1  ;;  %v15336_v1 = vld [vmem:[%s20364_s10 + $0x30] sm:$0xff]  }
 0xbbd   :  { %11655 = vmatpush1.bf16.msra.mxu0 %v15275_v9  ;;  %v15337_v9 = vld [vmem:[%s20364_s10 + $0x78] sm:$0xff]  }
 0xbbe   :  { %11656 = vmatprep.subr.bf16.mxu0 %v15280_v40  ;;  %v15338_v40 = vld [vmem:[%s20364_s10 + $0x38] sm:$0xff]  }
 0xbc1   :  { %11657 = vmatpush1.bf16.msra.mxu0 %v15278_v28  ;;  %v15383_v28 = vmov 0.0  }
 0xbc2   :  { %11658 = vmatprep.subr.bf16.mxu0 %v15283_v22 }
 0xbc5   :  { %11659 = vmatpush1.bf16.msra.mxu0 %v15281_v27 }
 0xbc6   :  { %11660 = vmatprep.subr.bf16.mxu0 %v15286_v6 }
 0xbc9   :  { %11661 = vmatpush1.bf16.msra.mxu0 %v15284_v5 }
 0xbca   :  { %11662 = vmatprep.subr.bf16.mxu0 %v15289_v43 }
 0xbcd   :  { %11663 = vmatpush1.bf16.msra.mxu0 %v15287_v32 }
 0xbce   :  { %11664 = vmatprep.subr.bf16.mxu0 %v15292_v60 }
 0xbd1   :  { %11665 = vmatpush1.bf16.msra.mxu0 %v15290_v55 }
 0xbd2   :  { %11666 = vmatprep.subr.bf16.mxu0 %v15295_v17 }
 0xbd5   :  { %11667 = vmatpush1.bf16.msra.mxu0 %v15293_v30 }
 0xbd6   :  { %11668 = vmatprep.subr.bf16.mxu0 %v15298_v12 }
 0xbd9   :  { %11669 = vmatpush1.bf16.msra.mxu0 %v15296_v13 }
 0xbda   :  { %11679 = vmatprep.subr.bf16.mxu0 %v15301_v62  ;;  %v11720_v62 = vld [vmem:[%s20363_s9] sm:$0x3] }
 0xbdc   :  { %11671 = vmatmul.mubr.bf16.vlgmr.msra.gmra.mrb[168].mxu0 %v9888_v3 }
 0xbdd   :  { %11680 = vmatpush1.bf16.msra.mxu0 %v15299_v41  ;;  %11711 = vmatprep.mubr.bf16.mxu0 %v20380_v50  ;;  %v11725_v41 = vrot.slane %v11720_v62, %v19976_v20  ;;  %v15340_v20 = vld [vmem:[%s20366_s12 + $0x8] sm:$0xff]  }
 0xbde   :  { %11681 = vmatprep.subr.bf16.mxu0 %v15304_v15  ;;  %v11729_v15 = vrot.slane %v11720_v62, %v19982_v0  ;;  %v15341_v0 = vld [vmem:[%s20366_s12 + $0x10] sm:$0xff]  }
 0xbe1   :  { %11682 = vmatpush1.bf16.msra.mxu0 %v15302_v2 }
 0xbe2   :  { %11683 = vmatprep.subr.bf16.mxu0 %v15307_v63 }
 0xbe5   :  { %11684 = vmatpush1.bf16.msra.mxu0 %v15305_v25 }
 0xbe6   :  { %11685 = vmatprep.subr.bf16.mxu0 %v15310_v36 }
 0xbe9   :  { %11686 = vmatpush1.bf16.msra.mxu0 %v15308_v39 }
 0xbea   :  { %11687 = vmatprep.subr.bf16.mxu0 %v15313_v11 }
 0xbed   :  { %11688 = vmatpush1.bf16.msra.mxu0 %v15311_v31 }
 0xbee   :  { %11689 = vmatprep.subr.bf16.mxu0 %v15316_v58 }
 0xbef   :  { %v11549_v53 = vpop.f32.mrb[156].mxu0 }
 0xbf0   :  { %v11550_v59 = vadd.f32 %v11549_v53, %v20139_v38  ;;  %v11551_v23 = vpop.f32.mrb[157].mxu0  ;;  %v15328_v38 = vld [vmem:[%s20364_s10 + $0x10] sm:$0xff]  }
 0xbf1   :  { %v11552_v29 = vadd.f32 %v11551_v23, %v20142_v35  ;;  %v11553_v49 = vpop.f32.mrb[158].mxu0  ;;  %11690 = vmatpush1.bf16.msra.mxu0 %v15314_v16  ;;  %v15330_v35 = vld [vmem:[%s20364_s10 + $0x18] sm:$0xff]   ;;  %v15343_v23 = vld [vmem:[%s20366_s12 + $0x20] sm:$0xff]  }
 0xbf2   :  { %v11554_v37 = vpop.f32.mrb[159].mxu0  ;;  %11691 = vmatprep.subr.bf16.mxu0 %v15319_v51  ;;  %v15339_v51 = vld [vmem:[%s20366_s12] sm:$0xff]   ;;  %v15345_v49 = vld [vmem:[%s20366_s12 + $0x30] sm:$0xff]  }
 0xbf3   :  { %v13206_v37 = vld [vmem:[%s20365_s11] ss:$0 sm:$0xff]  ;;  %s15386_s11 = smov [#allocation4]  }
 0xbf4   :  { %s12046_s2 = sshll.u32 %s15386_s11, 4  ;;  %s12047_s2 = int_to_ptr.vmem [resolvable:$true] %s12046_s2 }
 0xbf5   :  { %11692 = vmatpush1.bf16.msra.mxu0 %v15317_v10  ;;  %v15346_v10 = vld [vmem:[%s20366_s12 + $0x38] sm:$0xff]   ;;  %p15353_p1 = scmp.lt.s32.totalorder %s12047_s2, %s12047_s2 }
 0xbf6   :  { %11693 = vmatprep.subr.bf16.mxu0 %v15322_v45 }
 0xbf9   :  { %11694 = vmatpush1.bf16.msra.mxu0 %v15320_v4 }
 0xbfa   :  { %13354 = vmatprep.subr.bf16.mxu0 %v15323_v19 }
 0xbfc   :  { %11712 = vmatmul.mubr.bf16.vlgmr.msra.gmra.mrb[172].mxu0 %v9890_v21 }
 0xbfd   :  { %13355 = vmatpush3.bf16.msra.mxu0 %v15324_v33 }
 0xbfe   :  { %13356 = vmatprep.subr.bf16.mxu0 %v15325_v8 }
 0xc01   :  { %13357 = vmatpush3.bf16.msra.mxu0 %v15326_v61 }
 0xc02   :  { %13358 = vmatprep.subr.bf16.mxu0 %v15327_v18 }
 0xc05   :  { %13359 = vmatpush3.bf16.msra.mxu0 %v15328_v38 }
 0xc06   :  { %13360 = vmatprep.subr.bf16.mxu0 %v15329_v42 }
 0xc09   :  { %13361 = vmatpush3.bf16.msra.mxu0 %v15330_v35 }
 0xc0a   :  { %13362 = vmatprep.subr.bf16.mxu0 %v15331_v48 }
 0xc0d   :  { %13363 = vmatpush3.bf16.msra.mxu0 %v15332_v54 }
 0xc0e   :  { %13364 = vmatprep.subr.bf16.mxu0 %v15333_v52 }
 0xc11   :  { %13365 = vmatpush3.bf16.msra.mxu0 %v15334_v46 }
 0xc12   :  { %13366 = vmatprep.subr.bf16.mxu0 %v15335_v14 }
 0xc15   :  { %13367 = vmatpush3.bf16.msra.mxu0 %v15336_v1 }
 0xc16   :  { %13368 = vmatprep.subr.bf16.mxu0 %v15337_v9 }
 0xc19   :  { %13369 = vmatpush3.bf16.msra.mxu0 %v15338_v40 }
 0xc1a   :  { %13469 = vmatprep.subr.bf16.mxu0 %v15383_v28 }
 0xc2f   :  { %v11590_v24 = vpop.f32.mrb[160].mxu0 }
 0xc30   :  { %v11591_v44 = vadd.f32 %v11590_v24, %v11550_v59  ;;  %v11592_v7 = vpop.f32.mrb[161].mxu0  ;;  %v15342_v59 = vld [vmem:[%s20366_s12 + $0x18] sm:$0xff]  }
 0xc31   :  { %v11593_v34 = vadd.f32 %v11592_v7, %v11552_v29  ;;  %v11594_v47 = vpop.f32.mrb[162].mxu0  ;;  %v15344_v29 = vld [vmem:[%s20366_s12 + $0x28] sm:$0xff]  }
 0xc32   :  { %v11595_v56 = vpop.f32.mrb[163].mxu0  ;;  %v13223_v47 = vld [vmem:[%s20367_s13] ss:$0 sm:$0xff]  ;;  %s15348_s13 = scalar_lea.vmem %s12047_s2, 32 }
 0xc33   :  { %p15349_p0 = scmp.ne.s32.totalorder %s12047_s2, %s15348_s13  ;;  %p15354_p2 = scmp.lt.s32.totalorder %s15348_s13, %s15348_s13 }
 0xc35   :  { %p15355_p3 = por %p15354_p2, %p15353_p1 }
 0xc37   :  { %p15356_p4 = pnand %p15355_p3, %p15349_p0 }
 0xc6f   :  { %v11631_v22 = vpop.f32.mrb[164].mxu0 }
 0xc70   :  { %v11632_v27 = vadd.f32 %v11631_v22, %v11591_v44  ;;  %v11633_v6 = vpop.f32.mrb[165].mxu0 }
 0xc71   :  { %v11634_v5 = vadd.f32 %v11633_v6, %v11593_v34  ;;  %v11635_v43 = vpop.f32.mrb[166].mxu0  ;;  %v15385_v34 = vmov 8  }
 0xc72   :  { %v11636_v32 = vpop.f32.mrb[167].mxu0  ;;  %13910 = vset.pattern.permute.xlu0 %v15385_v34 }
 0xcaf   :  { %v11672_v60 = vpop.f32.mrb[168].mxu0 }
 0xcb0   :  { %v11673_v55 = vadd.f32 %v11672_v60, %v11632_v27  ;;  %v11674_v17 = vpop.f32.mrb[169].mxu0 }
 0xcb1   :  { %v11675_v30 = vadd.f32 %v11674_v17, %v11634_v5  ;;  %v11676_v12 = vpop.f32.mrb[170].mxu0 }
 0xcb2   :  { %v11677_v13 = vpop.f32.mrb[171].mxu0 }
 0xccf   :  { %v11713_v3 = vpop.f32.mrb[172].mxu0 }
 0xcd0   :  { %v11714_v2 = vadd.f32 %v11713_v3, %v11673_v55  ;;  %v11715_v50 = vpop.f32.mrb[173].mxu0 }
 0xcd1   :  { %v11716_v63 = vadd.f32 %v11715_v50, %v11675_v30  ;;  %v11717_v25 = vpop.f32.mrb[174].mxu0 }
 0xcd2   :  { %v11732_v36 = vadd.f32 %v11725_v41, %v11714_v2  ;;  %v11718_v39 = vpop.f32.mrb[175].mxu0 }
 0xcd3   :  { %v11733_v11 = vadd.f32 %v11729_v15, %v11716_v63 }
 0xcd4   :  { %v11734_v31 = vmax.f32 %v11732_v36, 0.0 }
 0xcd5   :  { %v11735_v58 = vmax.f32 %v11733_v11, 0.0 }
 0xcd6   :  { %v11736_v53 = vpack.c.bf16 %v11734_v31, %v11734_v31 }
 0xcd7   :  { %v11737_v16 = vpack.c.bf16 %v11735_v58, %v11735_v58 }
 0xcd9   :  { %11905 = vmatprep.mubr.bf16.mxu0 %v11737_v16 }
 0xcda   :  { %11906 = vmatmul.mubr.bf16.vlgmr.msra.gmra.mrb[176].mxu0 %v11736_v53 }
 0xcdb   :  { %13470 = vmatpush3.bf16.msra.mxu0 %v15339_v51  ;;  %13485 = vmatprep.mubr.msk.bf16.mxu0 %vm15384_vm14, %v15383_v28 }
 0xcdc   :  { %13471 = vmatprep.subr.bf16.mxu0 %v15383_v28 }
 0xcdf   :  { %13472 = vmatpush3.bf16.msra.mxu0 %v15340_v20 }
 0xce0   :  { %13473 = vmatprep.subr.bf16.mxu0 %v15383_v28 }
 0xce3   :  { %13474 = vmatpush3.bf16.msra.mxu0 %v15341_v0 }
 0xce4   :  { %13475 = vmatprep.subr.bf16.mxu0 %v15383_v28 }
 0xce7   :  { %13476 = vmatpush3.bf16.msra.mxu0 %v15342_v59 }
 0xce8   :  { %13477 = vmatprep.subr.bf16.mxu0 %v15383_v28 }
 0xceb   :  { %13478 = vmatpush3.bf16.msra.mxu0 %v15343_v23 }
 0xcec   :  { %13479 = vmatprep.subr.bf16.mxu0 %v15383_v28 }
 0xcef   :  { %13480 = vmatpush3.bf16.msra.mxu0 %v15344_v29 }
 0xcf0   :  { %13481 = vmatprep.subr.bf16.mxu0 %v15383_v28 }
 0xcf3   :  { %13482 = vmatpush3.bf16.msra.mxu0 %v15345_v49 }
 0xcf4   :  { %13483 = vmatprep.subr.bf16.mxu0 %v15383_v28 }
 0xcf7   :  { %13484 = vmatpush3.bf16.msra.mxu0 %v15346_v10 }
 0xdad   :  { %v13370_v26 = vpop.f32.mrb[176].mxu0 }
 0xdae   :  { %v13371_v45 = vpop.f32.mrb[177].mxu0 }
 0xdaf   :  { %v13372_v4 = vadd.f32 %v13371_v45, %v13370_v26  ;;  %v13373_v57 = vpop.f32.mrb[178].mxu0 }
 0xdb0   :  { %v13374_v21 = vpop.f32.mrb[179].mxu0 }
 0xdb1   :  { %v11908_v24 = vadd.f32 %v13372_v4, %v13206_v37 }
 0xdb3   :  { %v11913_v44 = vmax.f32 %v11908_v24, 0.0 }
 0xdb5   :  { %v11914_v7 = vpack.c.bf16 %v11913_v44, %v11913_v44 }
 0xdb7   :  { %13486 = vmatmul.mubr.bf16.vlgmr.msra.gmra.mrb[180].mxu0 %v11914_v7 }
 0xe8a   :  { %v12020_v56 = vpop.f32.mrb[180].mxu0 }
 0xe8b   :  { %v12021_v19 = vadd.f32 %v13223_v47, %v12020_v56  ;;  %v13487_v33 = vpop.f32.mrb[181].mxu0 }
 0xe8c   :  { %v12023_v8 = vpop.f32.mrb[182].mxu0 }
 0xe8d   :  { %12028 = vperm.xlu0 %13910, %v12021_v19   ;;  %v13488_v61 = vpop.f32.mrb[183].mxu0  ;;  %v12033_v18 = vsel %vm12032_vm15, %v12021_v19, 0.0 }
 0xe8e   :  { %12034 = vadd.xlane.f32.xlu1 %v12033_v18 }
 0xf0c   :  { %v12029_v38 = vpop.permute.xlu0 %12028 }
 0xf0d   :  { %v12031_v35 = vadd.f32 %v12029_v38, %v12021_v19 }
 0xf1b   :  { %v12035_v42 = vpop.xlane.xlu1 %12034 }
 0xf1c   :  { %v12037_v48 = vmul.f32 0.125, %v12035_v42 }
 0xf1e   :  { %v12038_v54 = vsub.f32 %v12031_v35, %v12037_v48 }
 0xf20   :  { %12039 = vst.msk [vmem:[#allocation4] sm:$0x3] %vm12032_vm15, %v12038_v54 }
 0xf21   :  { %15359 = shalt.err (!%p15356_p4)
}
 0xf22   :  { %s15360_s7 = scalar_lea.hbm %s20368_s14, 32 }
 0xf23   :  { %p15361_p5 = scmp.ne.s32.totalorder %s20368_s14, %s15360_s7  ;;  %p15364_p6 = scmp.lt.u32.totalorder %s15360_s7, %s20368_s14 }
 0xf25   :  { %p15366_p7 = pnand %p15364_p6, %p15361_p5 }
 0xf27   :  { %15369 = shalt.err (!%p15366_p7)
}
 0xf28   :  { %12049 = dma.vmem_to_hbm [thread:$0]  %s12047_s2, 32, %s20368_s14, [#allocation5]  }
 0xf29   :  { %15370 = dma.done.wait [#allocation5], 32  }
 0xf2a   :  { %15371 = vsyncadd [#allocation5], 4294967264 }
 0xf2b   :  { %12053 = vsyncpa [#allocation5], 1 }

</bundles_post_ra>
